<compile_context>
chip_gen: v7x
topology: tpu7x:2x2x1
jax: 0.10.0
libtpu: 0.0.40
codegen_flags: <defaults>
</compile_context>

<pallas_src>
import functools

import jax
import jax.numpy as jnp
from jax.experimental import pallas as pl
from jax.experimental.pallas import tpu as pltpu

EPS = 1e-5


def _round_up(x, m):
    return ((x + m - 1) // m) * m


# ----------------------------------------------------------------------------
# Fused Bottleneck kernel (block_batch images per grid step)
# ----------------------------------------------------------------------------
def make_bottleneck_kernel(H, W, block_batch, matmul_dtype):
    HW = H * W
    M = block_batch * HW                 # rows processed per grid step
    TOP = _round_up(W + 1, 8)            # top/bottom halo rows of the scratch

    def kernel(x_ref, w1_ref, s1_ref, b1_ref,
               w2_ref, s2_ref, b2_ref,
               w3_ref, s3_ref, b3_ref,
               o_ref, t1_ref, acc_ref):
        planes = w1_ref.shape[1]

        # Zero the small halos (all halo / cross-image tap reads are masked
        # below, so this is belt-and-braces only; it is 2 tiny stores).
        halo = jnp.zeros((TOP, planes), t1_ref.dtype)
        t1_ref[pl.ds(0, TOP), :] = halo
        t1_ref[pl.ds(TOP + M, TOP), :] = halo

        # ---- conv1 (1x1) + bn1 + relu -> haloed VMEM scratch ---------------
        y1 = jnp.dot(x_ref[...], w1_ref[...], preferred_element_type=jnp.float32)
        y1 = jnp.maximum(y1 * s1_ref[...] + b1_ref[...], 0.0)
        t1_ref[pl.ds(TOP, M), :] = y1.astype(t1_ref.dtype)

        # ---- conv2 (3x3, stride=1, pad=1) + bn2 + relu ---------------------
        # Per-output-row validity of the shifted taps, computed once per grid
        # step on an (M, 1) column.  Images are stored back-to-back, so these
        # masks also kill cross-image reads (no per-image gaps needed).
        r = jax.lax.broadcasted_iota(jnp.int32, (M, 1), 0)
        w_in_row = r % W
        hw_in_img = r % HW
        mask_l = w_in_row > 0            # reading w-1 invalid at w == 0
        mask_r = w_in_row < (W - 1)      # reading w+1 invalid at w == W-1
        mask_t = hw_in_img >= W          # reading h-1 invalid at h == 0
        mask_b = hw_in_img < (HW - W)    # reading h+1 invalid at h == H-1

        for t in range(9):               # static unroll: 9 MXU matmuls
            dy, dx = t // 3, t % 3
            shift = (dy - 1) * W + (dx - 1)          # static row offset
            patch = t1_ref[pl.ds(TOP + shift, M), :]
            m = None
            if dy == 0:
                m = mask_t
            elif dy == 2:
                m = mask_b
            if dx == 0:
                m = mask_l if m is None else (m & mask_l)
            elif dx == 2:
                m = mask_r if m is None else (m & mask_r)
            if m is not None:
                patch = jnp.where(m, patch, 0).astype(t1_ref.dtype)
            tap = jnp.dot(patch, w2_ref[pl.ds(t * planes, planes), :],
                          preferred_element_type=jnp.float32)
            if t == 0:
                acc_ref[...] = tap        # first tap writes (no zero-init pass)
            else:
                acc_ref[...] += tap       # v7x: MRB in-place accumulate path
        y2 = jnp.maximum(acc_ref[...] * s2_ref[...] + b2_ref[...], 0.0)

        # ---- conv3 (1x1) + bn3 + relu, residual add, final relu ------------
        y3 = jnp.dot(y2.astype(matmul_dtype), w3_ref[...],
                     preferred_element_type=jnp.float32)
        y3 = jnp.maximum(y3 * s3_ref[...] + b3_ref[...], 0.0)
        # Re-read the identity from the resident input block (keeps vreg
        # pressure low versus holding an f32 copy across all the matmuls).
        y3 = jnp.maximum(y3 + x_ref[...].astype(jnp.float32), 0.0)
        o_ref[...] = y3.astype(o_ref.dtype)

    return kernel, TOP


# ----------------------------------------------------------------------------
# Wrapper
# ----------------------------------------------------------------------------
def fold_bn(gamma, beta, mean, var):
    scale = gamma / jnp.sqrt(var + EPS)
    bias = beta - mean * scale
    return scale.astype(jnp.float32), bias.astype(jnp.float32)


def _padded_vmem_bytes(shape, dtype):
    """Rough VMEM footprint of a 2-D array (sublane pad to 8, lane pad to 128)."""
    item = jnp.dtype(dtype).itemsize
    s, l = shape[-2], shape[-1]
    lead = 1
    for d in shape[:-2]:
        lead *= d
    return lead * _round_up(s, 8) * _round_up(l, 128) * item


def bottleneck_forward(x_nchw, params, *, compute_dtype=jnp.bfloat16,
                       block_batch=None):
    """x_nchw: (N, Cin, H, W) f32 -> (N, 4*planes, H, W) in compute_dtype."""
    N, Cin, H, W = x_nchw.shape
    w1, w2, w3 = params["w1"], params["w2"], params["w3"]
    planes = w1.shape[1]
    Cout = w3.shape[1]
    assert Cout == Cin, "identity residual requires Cin == planes * expansion"

    if block_batch is None:
        # Batch images per step, but keep >= 2 grid steps for the 2nd v7x TC.
        block_batch = 2 if (N % 2 == 0 and N >= 4) else 1
    assert N % block_batch == 0
    B = block_batch
    HW = H * W
    M = B * HW

    s1, b1 = fold_bn(*params["bn1"])
    s2, b2 = fold_bn(*params["bn2"])
    s3, b3 = fold_bn(*params["bn3"])

    # NCHW -> (N*H*W, C): channels on the lane axis, flattened pixels on the
    # sublane axis.  One f32 -> bf16 cast happens here (activation I/O dtype).
    x_rows = (jnp.transpose(x_nchw, (0, 2, 3, 1))
              .reshape(N * HW, Cin).astype(compute_dtype))

    # conv2 weights as a 2-D (9*planes, planes) slab: rows [t*P, (t+1)*P) are
    # the (in, out) matrix of tap t = ky*3 + kx.
    w2_2d = w2.reshape(9 * planes, planes)

    kernel, TOP = make_bottleneck_kernel(H, W, B, compute_dtype)
    cd = compute_dtype

    def inv(shape):   # grid-invariant 2-D block (loaded once)
        return pl.BlockSpec(shape, lambda n: (0, 0))

    # Explicit scoped-VMEM budget (v5e's 16 MiB default is too small at real
    # ResNet shapes): double-buffered activation I/O + weights + scratch +
    # generous temp headroom, x1.5, floored at 32 MiB.
    est = (
        2 * (_padded_vmem_bytes((M, Cin), cd) + _padded_vmem_bytes((M, Cout), cd))
        + 2 * (_padded_vmem_bytes((Cin, planes), cd)
               + _padded_vmem_bytes((9 * planes, planes), cd)
               + _padded_vmem_bytes((planes, Cout), cd)
               + 6 * _padded_vmem_bytes((1, max(planes, Cout)), jnp.float32))
        + _padded_vmem_bytes((2 * TOP + M, planes), cd)          # conv1 scratch
        + _padded_vmem_bytes((M, planes), jnp.float32)           # conv2 accumulator
        + 6 * _padded_vmem_bytes((M, max(Cin, Cout, planes)), jnp.float32)
    )
    vmem_limit = min(max(int(1.5 * est), 32 * 1024 * 1024), 100 * 1024 * 1024)

    out = pl.pallas_call(
        kernel,
        out_shape=jax.ShapeDtypeStruct((N * HW, Cout), compute_dtype),
        grid=(N // B,),
        in_specs=[
            pl.BlockSpec((M, Cin), lambda n: (n, 0)),            # x / identity
            inv((Cin, planes)), inv((1, planes)), inv((1, planes)),
            inv((9 * planes, planes)), inv((1, planes)), inv((1, planes)),
            inv((planes, Cout)), inv((1, Cout)), inv((1, Cout)),
        ],
        out_specs=pl.BlockSpec((M, Cout), lambda n: (n, 0)),
        scratch_shapes=[
            pltpu.VMEM((2 * TOP + M, planes), compute_dtype),    # haloed conv1 out
            pltpu.VMEM((M, planes), jnp.float32),                # conv2 accumulator
        ],
        compiler_params=pltpu.CompilerParams(
            dimension_semantics=("parallel",),
            vmem_limit_bytes=vmem_limit),
    )(
        x_rows,
        w1.astype(cd), s1.reshape(1, planes), b1.reshape(1, planes),
        w2_2d.astype(cd), s2.reshape(1, planes), b2.reshape(1, planes),
        w3.astype(cd), s3.reshape(1, Cout), b3.reshape(1, Cout),
    )
    # (N*H*W, Cout) -> NCHW; stays in compute_dtype (bf16 on the perf path).
    return jnp.transpose(out.reshape(N, H, W, Cout), (0, 3, 1, 2))


# ----------------------------------------------------------------------------
# Pure-JAX reference (the provided module's semantics, eval-mode BN)
# ----------------------------------------------------------------------------
def ref_bottleneck(x_nchw, pt_params, stride=1):
    conv = functools.partial(
        jax.lax.conv_general_dilated, dimension_numbers=("NCHW", "OIHW", "NCHW")
    )

    def bn(y, bn_p):
        gamma, beta, mean, var = bn_p
        s = gamma / jnp.sqrt(var + EPS)
        return y * s[None, :, None, None] + (beta - mean * s)[None, :, None, None]

    relu = lambda y: jnp.maximum(y, 0.0)
    identity = x_nchw
    out = relu(bn(conv(x_nchw, pt_params["w1_pt"], (1, 1), "VALID"), pt_params["bn1"]))
    out = relu(bn(conv(out, pt_params["w2_pt"], (stride, stride), [(1, 1), (1, 1)]),
                  pt_params["bn2"]))
    out = relu(bn(conv(out, pt_params["w3_pt"], (1, 1), "VALID"), pt_params["bn3"]))
    out = out + identity     # NB: spec module relu's bn3 output before this add
    return relu(out)


# ----------------------------------------------------------------------------
if __name__ == "__main__":
    # Small shapes: batch=4 (2 images per grid step, grid of 2), inplanes=64,
    # planes=16 (expansion 4 -> out 64), 16x16 spatial.
    N, inplanes, planes, H, W = 4, 64, 16, 16, 16
    expansion = 4

    key = jax.random.PRNGKey(0)
    ks = jax.random.split(key, 8)

    # PyTorch-layout conv weights (OIHW), no bias.
    w1_pt = 0.1 * jax.random.normal(ks[0], (planes, inplanes, 1, 1), jnp.float32)
    w2_pt = 0.1 * jax.random.normal(ks[1], (planes, planes, 3, 3), jnp.float32)
    w3_pt = 0.1 * jax.random.normal(ks[2], (planes * expansion, planes, 1, 1), jnp.float32)

    def bn_params(k, c):
        k1, k2, k3, k4 = jax.random.split(k, 4)
        gamma = 1.0 + 0.1 * jax.random.normal(k1, (c,), jnp.float32)
        beta = 0.1 * jax.random.normal(k2, (c,), jnp.float32)
        mean = 0.1 * jax.random.normal(k3, (c,), jnp.float32)
        var = 1.0 + 0.1 * jnp.abs(jax.random.normal(k4, (c,), jnp.float32))
        return (gamma, beta, mean, var)

    bn1 = bn_params(ks[3], planes)
    bn2 = bn_params(ks[4], planes)
    bn3 = bn_params(ks[5], planes * expansion)

    params = {
        "w1": jnp.transpose(w1_pt[:, :, 0, 0], (1, 0)),    # (Cin, planes)
        "w2": jnp.transpose(w2_pt, (2, 3, 1, 0)),           # (3, 3, in, out)
        "w3": jnp.transpose(w3_pt[:, :, 0, 0], (1, 0)),     # (planes, 4*planes)
        "bn1": bn1, "bn2": bn2, "bn3": bn3,
    }
    pt_params = {"w1_pt": w1_pt, "w2_pt": w2_pt, "w3_pt": w3_pt,
                 "bn1": bn1, "bn2": bn2, "bn3": bn3}

    x = jax.random.normal(ks[6], (N, inplanes, H, W), jnp.float32)

    ref = jax.block_until_ready(ref_bottleneck(x, pt_params))

    # f32 I/O + f32 matmuls: tight validation of the fused structure.
    out_f32 = jax.block_until_ready(
        bottleneck_forward(x, params, compute_dtype=jnp.float32))
    assert out_f32.shape == ref.shape == (N, planes * expansion, H, W)
    err_f32 = float(jnp.max(jnp.abs(out_f32 - ref)))
    assert jnp.allclose(out_f32, ref, rtol=1e-2, atol=1e-2), err_f32

    # bf16 I/O + bf16 matmuls (the performance path).  Compare against the
    # reference evaluated on the bf16-rounded input so only the kernel's own
    # bf16 error is measured.
    x_rounded = x.astype(jnp.bfloat16).astype(jnp.float32)
    ref_bf16 = jax.block_until_ready(ref_bottleneck(x_rounded, pt_params))
    out_bf16 = jax.block_until_ready(
        bottleneck_forward(x, params, compute_dtype=jnp.bfloat16))
    err_bf16 = float(jnp.max(jnp.abs(out_bf16.astype(jnp.float32) - ref_bf16)))
    assert err_bf16 < 1e-1, err_bf16

    print("KERNEL_OK")
</pallas_src>

<mosaic_0001>
module attributes {stable_mosaic.version = 11 : i64} {
  func.func @kernel(%arg0: i32, %arg1: memref<512x64xf32, #tpu.memory_space<vmem>>, %arg2: memref<64x16xf32, #tpu.memory_space<vmem>>, %arg3: memref<1x16xf32, #tpu.memory_space<vmem>>, %arg4: memref<1x16xf32, #tpu.memory_space<vmem>>, %arg5: memref<144x16xf32, #tpu.memory_space<vmem>>, %arg6: memref<1x16xf32, #tpu.memory_space<vmem>>, %arg7: memref<1x16xf32, #tpu.memory_space<vmem>>, %arg8: memref<16x64xf32, #tpu.memory_space<vmem>>, %arg9: memref<1x64xf32, #tpu.memory_space<vmem>>, %arg10: memref<1x64xf32, #tpu.memory_space<vmem>>, %arg11: memref<512x64xf32, #tpu.memory_space<vmem>>, %arg12: memref<560x16xf32, #tpu.memory_space<vmem>>, %arg13: memref<512x16xf32, #tpu.memory_space<vmem>>) attributes {dimension_semantics = [#tpu.dimension_semantics<parallel>], iteration_bounds = array<i64: 2>, scalar_prefetch = 0 : i64, scratch_operands = 2 : i64, tpu.core_type = #tpu.core_type<tc>, window_params = [{transform_indices = @transform_0, window_bounds = array<i64: 512, 64>}, {pipeline_mode = #tpu.pipeline_mode<synchronous>, transform_indices = @transform_1, window_bounds = array<i64: 64, 16>}, {pipeline_mode = #tpu.pipeline_mode<synchronous>, transform_indices = @transform_2, window_bounds = array<i64: 1, 16>}, {pipeline_mode = #tpu.pipeline_mode<synchronous>, transform_indices = @transform_3, window_bounds = array<i64: 1, 16>}, {pipeline_mode = #tpu.pipeline_mode<synchronous>, transform_indices = @transform_4, window_bounds = array<i64: 144, 16>}, {pipeline_mode = #tpu.pipeline_mode<synchronous>, transform_indices = @transform_5, window_bounds = array<i64: 1, 16>}, {pipeline_mode = #tpu.pipeline_mode<synchronous>, transform_indices = @transform_6, window_bounds = array<i64: 1, 16>}, {pipeline_mode = #tpu.pipeline_mode<synchronous>, transform_indices = @transform_7, window_bounds = array<i64: 16, 64>}, {pipeline_mode = #tpu.pipeline_mode<synchronous>, transform_indices = @transform_8, window_bounds = array<i64: 1, 64>}, {pipeline_mode = #tpu.pipeline_mode<synchronous>, transform_indices = @transform_9, window_bounds = array<i64: 1, 64>}, {transform_indices = @transform_10, window_bounds = array<i64: 512, 64>}]} {
    %cst = arith.constant 0.000000e+00 : f32
    %0 = vector.broadcast %cst : f32 to vector<24x16xf32>
    %c0 = arith.constant 0 : index
    %c0_0 = arith.constant 0 : index
    %1 = vector.load %arg12[%c0, %c0_0] : memref<560x16xf32, #tpu.memory_space<vmem>>, vector<24x16xf32>
    tpu.vector_store %arg12[%c0, %c0_0], %0 {strides = array<i32>} : memref<560x16xf32, #tpu.memory_space<vmem>>, vector<24x16xf32>,
    %c536 = arith.constant 536 : index
    %c0_1 = arith.constant 0 : index
    %2 = vector.load %arg12[%c536, %c0_1] : memref<560x16xf32, #tpu.memory_space<vmem>>, vector<24x16xf32>
    tpu.vector_store %arg12[%c536, %c0_1], %0 {strides = array<i32>} : memref<560x16xf32, #tpu.memory_space<vmem>>, vector<24x16xf32>,
    %c0_2 = arith.constant 0 : index
    %c0_3 = arith.constant 0 : index
    %3 = vector.load %arg1[%c0_2, %c0_3] : memref<512x64xf32, #tpu.memory_space<vmem>>, vector<512x64xf32>
    %c0_4 = arith.constant 0 : index
    %c0_5 = arith.constant 0 : index
    %4 = vector.load %arg2[%c0_4, %c0_5] : memref<64x16xf32, #tpu.memory_space<vmem>>, vector<64x16xf32>
    %cst_6 = arith.constant dense<0.000000e+00> : vector<512x16xf32>
    %5 = tpu.matmul %3, %4, %cst_6 {dimension_numbers = #tpu.dot_dimension_numbers<[1], [0], [0], [1], [0, 0, 1, 1], [], []>} : vector<512x64xf32>, vector<64x16xf32>, vector<512x16xf32> -> vector<512x16xf32>
    %c0_7 = arith.constant 0 : index
    %c0_8 = arith.constant 0 : index
    %6 = vector.load %arg3[%c0_7, %c0_8] : memref<1x16xf32, #tpu.memory_space<vmem>>, vector<1x16xf32>
    %7 = vector.broadcast %6 : vector<1x16xf32> to vector<512x16xf32>
    %8 = arith.mulf %5, %7 : vector<512x16xf32>
    %c0_9 = arith.constant 0 : index
    %c0_10 = arith.constant 0 : index
    %9 = vector.load %arg4[%c0_9, %c0_10] : memref<1x16xf32, #tpu.memory_space<vmem>>, vector<1x16xf32>
    %10 = vector.broadcast %9 : vector<1x16xf32> to vector<512x16xf32>
    %11 = arith.addf %8, %10 : vector<512x16xf32>
    %cst_11 = arith.constant 0.000000e+00 : f32
    %12 = vector.broadcast %cst_11 : f32 to vector<512x16xf32>
    %13 = arith.maximumf %11, %12 : vector<512x16xf32>
    %c24 = arith.constant 24 : index
    %c0_12 = arith.constant 0 : index
    %14 = vector.load %arg12[%c24, %c0_12] : memref<560x16xf32, #tpu.memory_space<vmem>>, vector<512x16xf32>
    tpu.vector_store %arg12[%c24, %c0_12], %13 {strides = array<i32>} : memref<560x16xf32, #tpu.memory_space<vmem>>, vector<512x16xf32>,
    %15 = tpu.iota {dimensions = array<i32: 0>} : vector<512x1xi32>
    %c16_i32 = arith.constant 16 : i32
    %c0_i32 = arith.constant 0 : i32
    %16 = arith.cmpi eq, %c16_i32, %c0_i32 : i32
    %c1_i32 = arith.constant 1 : i32
    %17 = arith.select %16, %c1_i32, %c16_i32 : i32
    %18 = vector.broadcast %17 : i32 to vector<512x1xi32>
    %19 = arith.remsi %15, %18 : vector<512x1xi32>
    %c0_i32_13 = arith.constant 0 : i32
    %20 = vector.broadcast %c0_i32_13 : i32 to vector<512x1xi32>
    %21 = arith.cmpi ne, %19, %20 : vector<512x1xi32>
    %c0_i32_14 = arith.constant 0 : i32
    %22 = vector.broadcast %c0_i32_14 : i32 to vector<512x1xi32>
    %23 = arith.cmpi slt, %19, %22 : vector<512x1xi32>
    %c0_i32_15 = arith.constant 0 : i32
    %24 = arith.cmpi slt, %17, %c0_i32_15 : i32
    %25 = vector.broadcast %24 : i1 to vector<512x1xi1>
    %26 = vector.broadcast %25 : vector<512x1xi1> to vector<512x1xi1>
    %27 = arith.xori %23, %26 : vector<512x1xi1>
    %28 = arith.andi %27, %21 : vector<512x1xi1>
    %29 = vector.broadcast %17 : i32 to vector<512x1xi32>
    %30 = arith.addi %19, %29 : vector<512x1xi32>
    %31 = arith.select %28, %30, %19 : vector<512x1xi1>, vector<512x1xi32>
    %c256_i32 = arith.constant 256 : i32
    %c0_i32_16 = arith.constant 0 : i32
    %32 = arith.cmpi eq, %c256_i32, %c0_i32_16 : i32
    %c1_i32_17 = arith.constant 1 : i32
    %33 = arith.select %32, %c1_i32_17, %c256_i32 : i32
    %34 = vector.broadcast %33 : i32 to vector<512x1xi32>
    %35 = arith.remsi %15, %34 : vector<512x1xi32>
    %c0_i32_18 = arith.constant 0 : i32
    %36 = vector.broadcast %c0_i32_18 : i32 to vector<512x1xi32>
    %37 = arith.cmpi ne, %35, %36 : vector<512x1xi32>
    %c0_i32_19 = arith.constant 0 : i32
    %38 = vector.broadcast %c0_i32_19 : i32 to vector<512x1xi32>
    %39 = arith.cmpi slt, %35, %38 : vector<512x1xi32>
    %c0_i32_20 = arith.constant 0 : i32
    %40 = arith.cmpi slt, %33, %c0_i32_20 : i32
    %41 = vector.broadcast %40 : i1 to vector<512x1xi1>
    %42 = vector.broadcast %41 : vector<512x1xi1> to vector<512x1xi1>
    %43 = arith.xori %39, %42 : vector<512x1xi1>
    %44 = arith.andi %43, %37 : vector<512x1xi1>
    %45 = vector.broadcast %33 : i32 to vector<512x1xi32>
    %46 = arith.addi %35, %45 : vector<512x1xi32>
    %47 = arith.select %44, %46, %35 : vector<512x1xi1>, vector<512x1xi32>
    %c0_i32_21 = arith.constant 0 : i32
    %48 = vector.broadcast %c0_i32_21 : i32 to vector<512x1xi32>
    %49 = arith.cmpi sgt, %31, %48 : vector<512x1xi32>
    %c15_i32 = arith.constant 15 : i32
    %50 = vector.broadcast %c15_i32 : i32 to vector<512x1xi32>
    %51 = arith.cmpi slt, %31, %50 : vector<512x1xi32>
    %c16_i32_22 = arith.constant 16 : i32
    %52 = vector.broadcast %c16_i32_22 : i32 to vector<512x1xi32>
    %53 = arith.cmpi sge, %47, %52 : vector<512x1xi32>
    %c240_i32 = arith.constant 240 : i32
    %54 = vector.broadcast %c240_i32 : i32 to vector<512x1xi32>
    %55 = arith.cmpi slt, %47, %54 : vector<512x1xi32>
    %c7 = arith.constant 7 : index
    %c0_23 = arith.constant 0 : index
    %56 = vector.load %arg12[%c7, %c0_23] : memref<560x16xf32, #tpu.memory_space<vmem>>, vector<512x16xf32>
    %57 = arith.andi %53, %49 : vector<512x1xi1>
    %c0_i32_24 = arith.constant 0 : i32
    %58 = arith.sitofp %c0_i32_24 : i32 to f32
    %59 = vector.shape_cast %57 : vector<512x1xi1> to vector<512x1xi1>
    %60 = vector.broadcast %59 : vector<512x1xi1> to vector<512x16xi1>
    %61 = vector.broadcast %58 : f32 to vector<512x16xf32>
    %62 = arith.select %60, %56, %61 : vector<512x16xi1>, vector<512x16xf32>
    %c0_25 = arith.constant 0 : index
    %c0_26 = arith.constant 0 : index
    %63 = vector.load %arg5[%c0_25, %c0_26] : memref<144x16xf32, #tpu.memory_space<vmem>>, vector<16x16xf32>
    %cst_27 = arith.constant dense<0.000000e+00> : vector<512x16xf32>
    %64 = tpu.matmul %62, %63, %cst_27 {dimension_numbers = #tpu.dot_dimension_numbers<[1], [0], [0], [1], [0, 0, 1, 1], [], []>} : vector<512x16xf32>, vector<16x16xf32>, vector<512x16xf32> -> vector<512x16xf32>
    %c0_28 = arith.constant 0 : index
    %c0_29 = arith.constant 0 : index
    %65 = vector.load %arg13[%c0_28, %c0_29] : memref<512x16xf32, #tpu.memory_space<vmem>>, vector<512x16xf32>
    tpu.vector_store %arg13[%c0_28, %c0_29], %64 {strides = array<i32>} : memref<512x16xf32, #tpu.memory_space<vmem>>, vector<512x16xf32>,
    %c8 = arith.constant 8 : index
    %c0_30 = arith.constant 0 : index
    %66 = vector.load %arg12[%c8, %c0_30] : memref<560x16xf32, #tpu.memory_space<vmem>>, vector<512x16xf32>
    %c0_i32_31 = arith.constant 0 : i32
    %67 = arith.sitofp %c0_i32_31 : i32 to f32
    %68 = vector.shape_cast %53 : vector<512x1xi1> to vector<512x1xi1>
    %69 = vector.broadcast %68 : vector<512x1xi1> to vector<512x16xi1>
    %70 = vector.broadcast %67 : f32 to vector<512x16xf32>
    %71 = arith.select %69, %66, %70 : vector<512x16xi1>, vector<512x16xf32>
    %c16 = arith.constant 16 : index
    %c0_32 = arith.constant 0 : index
    %72 = vector.load %arg5[%c16, %c0_32] : memref<144x16xf32, #tpu.memory_space<vmem>>, vector<16x16xf32>
    %cst_33 = arith.constant dense<0.000000e+00> : vector<512x16xf32>
    %73 = tpu.matmul %71, %72, %cst_33 {dimension_numbers = #tpu.dot_dimension_numbers<[1], [0], [0], [1], [0, 0, 1, 1], [], []>} : vector<512x16xf32>, vector<16x16xf32>, vector<512x16xf32> -> vector<512x16xf32>
    %c0_34 = arith.constant 0 : index
    %c0_35 = arith.constant 0 : index
    %74 = vector.load %arg13[%c0_34, %c0_35] : memref<512x16xf32, #tpu.memory_space<vmem>>, vector<512x16xf32>
    %75 = arith.addf %74, %73 : vector<512x16xf32>
    %c0_36 = arith.constant 0 : index
    %c0_37 = arith.constant 0 : index
    %76 = vector.load %arg13[%c0_36, %c0_37] : memref<512x16xf32, #tpu.memory_space<vmem>>, vector<512x16xf32>
    tpu.vector_store %arg13[%c0_36, %c0_37], %75 {strides = array<i32>} : memref<512x16xf32, #tpu.memory_space<vmem>>, vector<512x16xf32>,
    %c9 = arith.constant 9 : index
    %c0_38 = arith.constant 0 : index
    %77 = vector.load %arg12[%c9, %c0_38] : memref<560x16xf32, #tpu.memory_space<vmem>>, vector<512x16xf32>
    %78 = arith.andi %53, %51 : vector<512x1xi1>
    %c0_i32_39 = arith.constant 0 : i32
    %79 = arith.sitofp %c0_i32_39 : i32 to f32
    %80 = vector.shape_cast %78 : vector<512x1xi1> to vector<512x1xi1>
    %81 = vector.broadcast %80 : vector<512x1xi1> to vector<512x16xi1>
    %82 = vector.broadcast %79 : f32 to vector<512x16xf32>
    %83 = arith.select %81, %77, %82 : vector<512x16xi1>, vector<512x16xf32>
    %c32 = arith.constant 32 : index
    %c0_40 = arith.constant 0 : index
    %84 = vector.load %arg5[%c32, %c0_40] : memref<144x16xf32, #tpu.memory_space<vmem>>, vector<16x16xf32>
    %cst_41 = arith.constant dense<0.000000e+00> : vector<512x16xf32>
    %85 = tpu.matmul %83, %84, %cst_41 {dimension_numbers = #tpu.dot_dimension_numbers<[1], [0], [0], [1], [0, 0, 1, 1], [], []>} : vector<512x16xf32>, vector<16x16xf32>, vector<512x16xf32> -> vector<512x16xf32>
    %c0_42 = arith.constant 0 : index
    %c0_43 = arith.constant 0 : index
    %86 = vector.load %arg13[%c0_42, %c0_43] : memref<512x16xf32, #tpu.memory_space<vmem>>, vector<512x16xf32>
    %87 = arith.addf %86, %85 : vector<512x16xf32>
    %c0_44 = arith.constant 0 : index
    %c0_45 = arith.constant 0 : index
    %88 = vector.load %arg13[%c0_44, %c0_45] : memref<512x16xf32, #tpu.memory_space<vmem>>, vector<512x16xf32>
    tpu.vector_store %arg13[%c0_44, %c0_45], %87 {strides = array<i32>} : memref<512x16xf32, #tpu.memory_space<vmem>>, vector<512x16xf32>,
    %c23 = arith.constant 23 : index
    %c0_46 = arith.constant 0 : index
    %89 = vector.load %arg12[%c23, %c0_46] : memref<560x16xf32, #tpu.memory_space<vmem>>, vector<512x16xf32>
    %c0_i32_47 = arith.constant 0 : i32
    %90 = arith.sitofp %c0_i32_47 : i32 to f32
    %91 = vector.shape_cast %49 : vector<512x1xi1> to vector<512x1xi1>
    %92 = vector.broadcast %91 : vector<512x1xi1> to vector<512x16xi1>
    %93 = vector.broadcast %90 : f32 to vector<512x16xf32>
    %94 = arith.select %92, %89, %93 : vector<512x16xi1>, vector<512x16xf32>
    %c48 = arith.constant 48 : index
    %c0_48 = arith.constant 0 : index
    %95 = vector.load %arg5[%c48, %c0_48] : memref<144x16xf32, #tpu.memory_space<vmem>>, vector<16x16xf32>
    %cst_49 = arith.constant dense<0.000000e+00> : vector<512x16xf32>
    %96 = tpu.matmul %94, %95, %cst_49 {dimension_numbers = #tpu.dot_dimension_numbers<[1], [0], [0], [1], [0, 0, 1, 1], [], []>} : vector<512x16xf32>, vector<16x16xf32>, vector<512x16xf32> -> vector<512x16xf32>
    %c0_50 = arith.constant 0 : index
    %c0_51 = arith.constant 0 : index
    %97 = vector.load %arg13[%c0_50, %c0_51] : memref<512x16xf32, #tpu.memory_space<vmem>>, vector<512x16xf32>
    %98 = arith.addf %97, %96 : vector<512x16xf32>
    %c0_52 = arith.constant 0 : index
    %c0_53 = arith.constant 0 : index
    %99 = vector.load %arg13[%c0_52, %c0_53] : memref<512x16xf32, #tpu.memory_space<vmem>>, vector<512x16xf32>
    tpu.vector_store %arg13[%c0_52, %c0_53], %98 {strides = array<i32>} : memref<512x16xf32, #tpu.memory_space<vmem>>, vector<512x16xf32>,
    %c24_54 = arith.constant 24 : index
    %c0_55 = arith.constant 0 : index
    %100 = vector.load %arg12[%c24_54, %c0_55] : memref<560x16xf32, #tpu.memory_space<vmem>>, vector<512x16xf32>
    %c64 = arith.constant 64 : index
    %c0_56 = arith.constant 0 : index
    %101 = vector.load %arg5[%c64, %c0_56] : memref<144x16xf32, #tpu.memory_space<vmem>>, vector<16x16xf32>
    %cst_57 = arith.constant dense<0.000000e+00> : vector<512x16xf32>
    %102 = tpu.matmul %100, %101, %cst_57 {dimension_numbers = #tpu.dot_dimension_numbers<[1], [0], [0], [1], [0, 0, 1, 1], [], []>} : vector<512x16xf32>, vector<16x16xf32>, vector<512x16xf32> -> vector<512x16xf32>
    %c0_58 = arith.constant 0 : index
    %c0_59 = arith.constant 0 : index
    %103 = vector.load %arg13[%c0_58, %c0_59] : memref<512x16xf32, #tpu.memory_space<vmem>>, vector<512x16xf32>
    %104 = arith.addf %103, %102 : vector<512x16xf32>
    %c0_60 = arith.constant 0 : index
    %c0_61 = arith.constant 0 : index
    %105 = vector.load %arg13[%c0_60, %c0_61] : memref<512x16xf32, #tpu.memory_space<vmem>>, vector<512x16xf32>
    tpu.vector_store %arg13[%c0_60, %c0_61], %104 {strides = array<i32>} : memref<512x16xf32, #tpu.memory_space<vmem>>, vector<512x16xf32>,
    %c25 = arith.constant 25 : index
    %c0_62 = arith.constant 0 : index
    %106 = vector.load %arg12[%c25, %c0_62] : memref<560x16xf32, #tpu.memory_space<vmem>>, vector<512x16xf32>
    %c0_i32_63 = arith.constant 0 : i32
    %107 = arith.sitofp %c0_i32_63 : i32 to f32
    %108 = vector.shape_cast %51 : vector<512x1xi1> to vector<512x1xi1>
    %109 = vector.broadcast %108 : vector<512x1xi1> to vector<512x16xi1>
    %110 = vector.broadcast %107 : f32 to vector<512x16xf32>
    %111 = arith.select %109, %106, %110 : vector<512x16xi1>, vector<512x16xf32>
    %c80 = arith.constant 80 : index
    %c0_64 = arith.constant 0 : index
    %112 = vector.load %arg5[%c80, %c0_64] : memref<144x16xf32, #tpu.memory_space<vmem>>, vector<16x16xf32>
    %cst_65 = arith.constant dense<0.000000e+00> : vector<512x16xf32>
    %113 = tpu.matmul %111, %112, %cst_65 {dimension_numbers = #tpu.dot_dimension_numbers<[1], [0], [0], [1], [0, 0, 1, 1], [], []>} : vector<512x16xf32>, vector<16x16xf32>, vector<512x16xf32> -> vector<512x16xf32>
    %c0_66 = arith.constant 0 : index
    %c0_67 = arith.constant 0 : index
    %114 = vector.load %arg13[%c0_66, %c0_67] : memref<512x16xf32, #tpu.memory_space<vmem>>, vector<512x16xf32>
    %115 = arith.addf %114, %113 : vector<512x16xf32>
    %c0_68 = arith.constant 0 : index
    %c0_69 = arith.constant 0 : index
    %116 = vector.load %arg13[%c0_68, %c0_69] : memref<512x16xf32, #tpu.memory_space<vmem>>, vector<512x16xf32>
    tpu.vector_store %arg13[%c0_68, %c0_69], %115 {strides = array<i32>} : memref<512x16xf32, #tpu.memory_space<vmem>>, vector<512x16xf32>,
    %c39 = arith.constant 39 : index
    %c0_70 = arith.constant 0 : index
    %117 = vector.load %arg12[%c39, %c0_70] : memref<560x16xf32, #tpu.memory_space<vmem>>, vector<512x16xf32>
    %118 = arith.andi %55, %49 : vector<512x1xi1>
    %c0_i32_71 = arith.constant 0 : i32
    %119 = arith.sitofp %c0_i32_71 : i32 to f32
    %120 = vector.shape_cast %118 : vector<512x1xi1> to vector<512x1xi1>
    %121 = vector.broadcast %120 : vector<512x1xi1> to vector<512x16xi1>
    %122 = vector.broadcast %119 : f32 to vector<512x16xf32>
    %123 = arith.select %121, %117, %122 : vector<512x16xi1>, vector<512x16xf32>
    %c96 = arith.constant 96 : index
    %c0_72 = arith.constant 0 : index
    %124 = vector.load %arg5[%c96, %c0_72] : memref<144x16xf32, #tpu.memory_space<vmem>>, vector<16x16xf32>
    %cst_73 = arith.constant dense<0.000000e+00> : vector<512x16xf32>
    %125 = tpu.matmul %123, %124, %cst_73 {dimension_numbers = #tpu.dot_dimension_numbers<[1], [0], [0], [1], [0, 0, 1, 1], [], []>} : vector<512x16xf32>, vector<16x16xf32>, vector<512x16xf32> -> vector<512x16xf32>
    %c0_74 = arith.constant 0 : index
    %c0_75 = arith.constant 0 : index
    %126 = vector.load %arg13[%c0_74, %c0_75] : memref<512x16xf32, #tpu.memory_space<vmem>>, vector<512x16xf32>
    %127 = arith.addf %126, %125 : vector<512x16xf32>
    %c0_76 = arith.constant 0 : index
    %c0_77 = arith.constant 0 : index
    %128 = vector.load %arg13[%c0_76, %c0_77] : memref<512x16xf32, #tpu.memory_space<vmem>>, vector<512x16xf32>
    tpu.vector_store %arg13[%c0_76, %c0_77], %127 {strides = array<i32>} : memref<512x16xf32, #tpu.memory_space<vmem>>, vector<512x16xf32>,
    %c40 = arith.constant 40 : index
    %c0_78 = arith.constant 0 : index
    %129 = vector.load %arg12[%c40, %c0_78] : memref<560x16xf32, #tpu.memory_space<vmem>>, vector<512x16xf32>
    %c0_i32_79 = arith.constant 0 : i32
    %130 = arith.sitofp %c0_i32_79 : i32 to f32
    %131 = vector.shape_cast %55 : vector<512x1xi1> to vector<512x1xi1>
    %132 = vector.broadcast %131 : vector<512x1xi1> to vector<512x16xi1>
    %133 = vector.broadcast %130 : f32 to vector<512x16xf32>
    %134 = arith.select %132, %129, %133 : vector<512x16xi1>, vector<512x16xf32>
    %c112 = arith.constant 112 : index
    %c0_80 = arith.constant 0 : index
    %135 = vector.load %arg5[%c112, %c0_80] : memref<144x16xf32, #tpu.memory_space<vmem>>, vector<16x16xf32>
    %cst_81 = arith.constant dense<0.000000e+00> : vector<512x16xf32>
    %136 = tpu.matmul %134, %135, %cst_81 {dimension_numbers = #tpu.dot_dimension_numbers<[1], [0], [0], [1], [0, 0, 1, 1], [], []>} : vector<512x16xf32>, vector<16x16xf32>, vector<512x16xf32> -> vector<512x16xf32>
    %c0_82 = arith.constant 0 : index
    %c0_83 = arith.constant 0 : index
    %137 = vector.load %arg13[%c0_82, %c0_83] : memref<512x16xf32, #tpu.memory_space<vmem>>, vector<512x16xf32>
    %138 = arith.addf %137, %136 : vector<512x16xf32>
    %c0_84 = arith.constant 0 : index
    %c0_85 = arith.constant 0 : index
    %139 = vector.load %arg13[%c0_84, %c0_85] : memref<512x16xf32, #tpu.memory_space<vmem>>, vector<512x16xf32>
    tpu.vector_store %arg13[%c0_84, %c0_85], %138 {strides = array<i32>} : memref<512x16xf32, #tpu.memory_space<vmem>>, vector<512x16xf32>,
    %c41 = arith.constant 41 : index
    %c0_86 = arith.constant 0 : index
    %140 = vector.load %arg12[%c41, %c0_86] : memref<560x16xf32, #tpu.memory_space<vmem>>, vector<512x16xf32>
    %141 = arith.andi %55, %51 : vector<512x1xi1>
    %c0_i32_87 = arith.constant 0 : i32
    %142 = arith.sitofp %c0_i32_87 : i32 to f32
    %143 = vector.shape_cast %141 : vector<512x1xi1> to vector<512x1xi1>
    %144 = vector.broadcast %143 : vector<512x1xi1> to vector<512x16xi1>
    %145 = vector.broadcast %142 : f32 to vector<512x16xf32>
    %146 = arith.select %144, %140, %145 : vector<512x16xi1>, vector<512x16xf32>
    %c128 = arith.constant 128 : index
    %c0_88 = arith.constant 0 : index
    %147 = vector.load %arg5[%c128, %c0_88] : memref<144x16xf32, #tpu.memory_space<vmem>>, vector<16x16xf32>
    %cst_89 = arith.constant dense<0.000000e+00> : vector<512x16xf32>
    %148 = tpu.matmul %146, %147, %cst_89 {dimension_numbers = #tpu.dot_dimension_numbers<[1], [0], [0], [1], [0, 0, 1, 1], [], []>} : vector<512x16xf32>, vector<16x16xf32>, vector<512x16xf32> -> vector<512x16xf32>
    %c0_90 = arith.constant 0 : index
    %c0_91 = arith.constant 0 : index
    %149 = vector.load %arg13[%c0_90, %c0_91] : memref<512x16xf32, #tpu.memory_space<vmem>>, vector<512x16xf32>
    %150 = arith.addf %149, %148 : vector<512x16xf32>
    %c0_92 = arith.constant 0 : index
    %c0_93 = arith.constant 0 : index
    %151 = vector.load %arg13[%c0_92, %c0_93] : memref<512x16xf32, #tpu.memory_space<vmem>>, vector<512x16xf32>
    tpu.vector_store %arg13[%c0_92, %c0_93], %150 {strides = array<i32>} : memref<512x16xf32, #tpu.memory_space<vmem>>, vector<512x16xf32>,
    %c0_94 = arith.constant 0 : index
    %c0_95 = arith.constant 0 : index
    %152 = vector.load %arg13[%c0_94, %c0_95] : memref<512x16xf32, #tpu.memory_space<vmem>>, vector<512x16xf32>
    %c0_96 = arith.constant 0 : index
    %c0_97 = arith.constant 0 : index
    %153 = vector.load %arg6[%c0_96, %c0_97] : memref<1x16xf32, #tpu.memory_space<vmem>>, vector<1x16xf32>
    %154 = vector.broadcast %153 : vector<1x16xf32> to vector<512x16xf32>
    %155 = arith.mulf %152, %154 : vector<512x16xf32>
    %c0_98 = arith.constant 0 : index
    %c0_99 = arith.constant 0 : index
    %156 = vector.load %arg7[%c0_98, %c0_99] : memref<1x16xf32, #tpu.memory_space<vmem>>, vector<1x16xf32>
    %157 = vector.broadcast %156 : vector<1x16xf32> to vector<512x16xf32>
    %158 = arith.addf %155, %157 : vector<512x16xf32>
    %cst_100 = arith.constant 0.000000e+00 : f32
    %159 = vector.broadcast %cst_100 : f32 to vector<512x16xf32>
    %160 = arith.maximumf %158, %159 : vector<512x16xf32>
    %c0_101 = arith.constant 0 : index
    %c0_102 = arith.constant 0 : index
    %161 = vector.load %arg8[%c0_101, %c0_102] : memref<16x64xf32, #tpu.memory_space<vmem>>, vector<16x64xf32>
    %cst_103 = arith.constant dense<0.000000e+00> : vector<512x64xf32>
    %162 = tpu.matmul %160, %161, %cst_103 {dimension_numbers = #tpu.dot_dimension_numbers<[1], [0], [0], [1], [0, 0, 1, 1], [], []>} : vector<512x16xf32>, vector<16x64xf32>, vector<512x64xf32> -> vector<512x64xf32>
    %c0_104 = arith.constant 0 : index
    %c0_105 = arith.constant 0 : index
    %163 = vector.load %arg9[%c0_104, %c0_105] : memref<1x64xf32, #tpu.memory_space<vmem>>, vector<1x64xf32>
    %164 = vector.broadcast %163 : vector<1x64xf32> to vector<512x64xf32>
    %165 = arith.mulf %162, %164 : vector<512x64xf32>
    %c0_106 = arith.constant 0 : index
    %c0_107 = arith.constant 0 : index
    %166 = vector.load %arg10[%c0_106, %c0_107] : memref<1x64xf32, #tpu.memory_space<vmem>>, vector<1x64xf32>
    %167 = vector.broadcast %166 : vector<1x64xf32> to vector<512x64xf32>
    %168 = arith.addf %165, %167 : vector<512x64xf32>
    %cst_108 = arith.constant 0.000000e+00 : f32
    %169 = vector.broadcast %cst_108 : f32 to vector<512x64xf32>
    %170 = arith.maximumf %168, %169 : vector<512x64xf32>
    %c0_109 = arith.constant 0 : index
    %c0_110 = arith.constant 0 : index
    %171 = vector.load %arg1[%c0_109, %c0_110] : memref<512x64xf32, #tpu.memory_space<vmem>>, vector<512x64xf32>
    %172 = arith.addf %170, %171 : vector<512x64xf32>
    %cst_111 = arith.constant 0.000000e+00 : f32
    %173 = vector.broadcast %cst_111 : f32 to vector<512x64xf32>
    %174 = arith.maximumf %172, %173 : vector<512x64xf32>
    %c0_112 = arith.constant 0 : index
    %c0_113 = arith.constant 0 : index
    %175 = vector.load %arg11[%c0_112, %c0_113] : memref<512x64xf32, #tpu.memory_space<vmem>>, vector<512x64xf32>
    tpu.vector_store %arg11[%c0_112, %c0_113], %174 {strides = array<i32>} : memref<512x64xf32, #tpu.memory_space<vmem>>, vector<512x64xf32>,
    return
  }
  func.func @transform_0(%arg0: i32) -> (i32, i32) {
    %c0_i32 = arith.constant 0 : i32
    %c0_i32_0 = arith.constant 0 : i32
    return %arg0, %c0_i32 : i32, i32
  }
  func.func @transform_1(%arg0: i32) -> (i32, i32) {
    %c0_i32 = arith.constant 0 : i32
    %c0_i32_0 = arith.constant 0 : i32
    %c0_i32_1 = arith.constant 0 : i32
    return %c0_i32, %c0_i32_0 : i32, i32
  }
  func.func @transform_2(%arg0: i32) -> (i32, i32) {
    %c0_i32 = arith.constant 0 : i32
    %c0_i32_0 = arith.constant 0 : i32
    %c0_i32_1 = arith.constant 0 : i32
    return %c0_i32, %c0_i32_0 : i32, i32
  }
  func.func @transform_3(%arg0: i32) -> (i32, i32) {
    %c0_i32 = arith.constant 0 : i32
    %c0_i32_0 = arith.constant 0 : i32
    %c0_i32_1 = arith.constant 0 : i32
    return %c0_i32, %c0_i32_0 : i32, i32
  }
  func.func @transform_4(%arg0: i32) -> (i32, i32) {
    %c0_i32 = arith.constant 0 : i32
    %c0_i32_0 = arith.constant 0 : i32
    %c0_i32_1 = arith.constant 0 : i32
    return %c0_i32, %c0_i32_0 : i32, i32
  }
  func.func @transform_5(%arg0: i32) -> (i32, i32) {
    %c0_i32 = arith.constant 0 : i32
    %c0_i32_0 = arith.constant 0 : i32
    %c0_i32_1 = arith.constant 0 : i32
    return %c0_i32, %c0_i32_0 : i32, i32
  }
  func.func @transform_6(%arg0: i32) -> (i32, i32) {
    %c0_i32 = arith.constant 0 : i32
    %c0_i32_0 = arith.constant 0 : i32
    %c0_i32_1 = arith.constant 0 : i32
    return %c0_i32, %c0_i32_0 : i32, i32
  }
  func.func @transform_7(%arg0: i32) -> (i32, i32) {
    %c0_i32 = arith.constant 0 : i32
    %c0_i32_0 = arith.constant 0 : i32
    %c0_i32_1 = arith.constant 0 : i32
    return %c0_i32, %c0_i32_0 : i32, i32
  }
  func.func @transform_8(%arg0: i32) -> (i32, i32) {
    %c0_i32 = arith.constant 0 : i32
    %c0_i32_0 = arith.constant 0 : i32
    %c0_i32_1 = arith.constant 0 : i32
    return %c0_i32, %c0_i32_0 : i32, i32
  }
  func.func @transform_9(%arg0: i32) -> (i32, i32) {
    %c0_i32 = arith.constant 0 : i32
    %c0_i32_0 = arith.constant 0 : i32
    %c0_i32_1 = arith.constant 0 : i32
    return %c0_i32, %c0_i32_0 : i32, i32
  }
  func.func @transform_10(%arg0: i32) -> (i32, i32) {
    %c0_i32 = arith.constant 0 : i32
    %c0_i32_0 = arith.constant 0 : i32
    return %arg0, %c0_i32 : i32, i32
  }
}

</mosaic_0001>

<bundles_post_ra>
// kernel: tpu_custom_call.1
= control target key start
LH: loop header
LB: loop body
LE: loop exit
PB: predicated region body
PF: predicated region fallthrough
CT: control target
= control target key end

     0   :  { %s16369_s13 = smov 0   ;;  %s20825_s0 = inlined_call_operand.vmem [shape: f32[1024,64], index: 0, kind: input, shape index: {}]   ;;  %s20826_s1 = inlined_call_operand.vmem [shape: f32[64,16], index: 1, kind: input, shape index: {}]   ;;  %s20827_s2 = inlined_call_operand.vmem [shape: f32[1,16], index: 2, kind: input, shape index: {}]   ;;  %s20828_s3 = inlined_call_operand.vmem [shape: f32[1,16], index: 3, kind: input, shape index: {}]   ;;  %s20829_s4 = inlined_call_operand.vmem [shape: f32[144,16], index: 4, kind: input, shape index: {}]   ;;  %s20830_s5 = inlined_call_operand.vmem [shape: f32[1,16], index: 5, kind: input, shape index: {}]   ;;  %s20831_s6 = inlined_call_operand.vmem [shape: f32[1,16], index: 6, kind: input, shape index: {}]   ;;  %s20832_s7 = inlined_call_operand.vmem [shape: f32[16,64], index: 7, kind: input, shape index: {}]   ;;  %s20833_s8 = inlined_call_operand.vmem [shape: f32[1,64], index: 8, kind: input, shape index: {}]   ;;  %s20834_s9 = inlined_call_operand.vmem [shape: f32[1,64], index: 9, kind: input, shape index: {}]   ;;  %s20835_s10 = inlined_call_operand.vmem [shape: f32[1024,64], index: 10, kind: output, shape index: {}]  }
   0x1 LB: > { %s13693_s14 = sadd.s32 4294967295, %s16311_s13   ;;  %p13697_p0 = scmp.ge.s32.totalorder %s16311_s13, 1  ;;  %s16311_s13 = sphi %s16369_s13, %s20_s13  }
   0x2   : > { %p313_p1 = scmp.lt.s32.totalorder %s16311_s13, 3 }
   0x4   : > { %p314_p2 = pnand %p13697_p0, %p313_p1 }
   0x6   : > { %317 = sbr.rel (%p314_p2) target bundleno = 1367 (0x557), region = 60 }
   0xd   : > { %v434_v0 = vld [vmem:[%s20826_s1] sm:$0xff]  ;;  %v435_v1 = vld [vmem:[%s20826_s1 + $0x8] sm:$0xff]  ;;  %v436_v2 = vld [vmem:[%s20826_s1 + $0x10] sm:$0xff]  ;;  %s13698_s21 = sshll.u32 %s13693_s14, 6  ;;  %vm20836_vm0 = vcmask 523264   ;;  %vm363_vm1 = vcmask 130048  }
   0xe   : > { %v16234_v3 = vpack.c.bf16 %v435_v1, %v434_v0  ;;  %v437_v4 = vld [vmem:[%s20826_s1 + $0x18] sm:$0xff]  ;;  %p352_p3 = scmp.lt.s32.totalorder %s13698_s21, 127  ;;  %v438_v6 = vld [vmem:[%s20826_s1 + $0x20] sm:$0xff]  ;;  %v439_v7 = vld [vmem:[%s20826_s1 + $0x28] sm:$0xff]  ;;  %v20868_v0 = vmov 0.0  }
   0xf   : > { %v16238_v5 = vpack.c.bf16 %v437_v4, %v436_v2  ;;  %v16242_v8 = vpack.c.bf16 %v439_v7, %v438_v6  ;;  %v440_v9 = vld [vmem:[%s20826_s1 + $0x30] sm:$0xff]  ;;  %v441_v10 = vld [vmem:[%s20826_s1 + $0x38] sm:$0xff]  ;;  %v3467_v20 = vld [vmem:[%s20829_s4] sm:$0xff]  ;;  %366 = vst.msk [vmem:[#allocation2 + $0x10] sm:$0xff] %vm363_vm1, %v20868_v0 }
  0x10   : > { %16235 = vmatprep.subr.bf16.mxu0 %v16234_v3  ;;  %s21630_s21 = smov (!%p352_p3, %s13698_s21), 127  ;;  %v16246_v12 = vpack.c.bf16 %v441_v10, %v440_v9  ;;  %v3468_v21 = vld [vmem:[%s20829_s4 + $0x8] sm:$0xff]  ;;  %367 = vst.msk [vmem:[#allocation2 + $0x218] sm:$0xff] %vm363_vm1, %v20868_v0 }
  0x11   : > { %16237 = vmatpush3.bf16.msra.mxu0 %v16234_v3  ;;  %s13699_s28 = sshll.u32 %s21630_s21, 3  ;;  %v16250_v23 = vpack.c.bf16 %v3468_v21, %v3467_v20  ;;  %v4367_v20 = vld [vmem:[%s20829_s4 + $0x18] sm:$0xff] }
  0x12   : > { %16239 = vmatprep.subr.bf16.mxu0 %v16238_v5  ;;  %s16409_s16 = scalar_lea.vmem %s20825_s0, %s13699_s28  ;;  %s20509_s14 = scalar_lea.vmem %s20835_s10, %s13699_s28 }
  0x13   : > { %v370_v11 = vld [vmem:[%s16409_s16] sm:$0xff]  ;;  %v371_v13 = vld [vmem:[%s16409_s16 + $0x8] sm:$0xff]  ;;  %v372_v14 = vld [vmem:[%s16409_s16 + $0x10] sm:$0xff]  ;;  %16290 = vmatprep.subr.bf16.mxu1 %v16250_v23 }
  0x14   : > { %15138 = vmatprep.mubr.msk.f32.mxu0 %vm20836_vm0, %v370_v11  ;;  %v373_v15 = vld [vmem:[%s16409_s16 + $0x18] sm:$0xff]  ;;  %v374_v16 = vld [vmem:[%s16409_s16 + $0x20] sm:$0xff]  ;;  %v375_v17 = vld [vmem:[%s16409_s16 + $0x28] sm:$0xff]  ;;  %16291 = vmatpush3.bf16.msra.mxu1 %v16250_v23 }
  0x15   : > { %16241 = vmatpush3.bf16.msra.mxu0 %v16238_v5  ;;  %v376_v18 = vld [vmem:[%s16409_s16 + $0x30] sm:$0xff]  ;;  %v377_v19 = vld [vmem:[%s16409_s16 + $0x38] sm:$0xff]  ;;  %v378_v22 = vld [vmem:[%s16409_s16 + $0x40] sm:$0xff] }
  0x16   : > { %16243 = vmatprep.subr.bf16.mxu0 %v16242_v8  ;;  %v379_v24 = vld [vmem:[%s16409_s16 + $0x48] sm:$0xff]  ;;  %v380_v25 = vld [vmem:[%s16409_s16 + $0x50] sm:$0xff]  ;;  %v381_v26 = vld [vmem:[%s16409_s16 + $0x58] sm:$0xff] }
  0x17   : > { %v382_v27 = vld [vmem:[%s16409_s16 + $0x60] sm:$0xff]  ;;  %v383_v28 = vld [vmem:[%s16409_s16 + $0x68] sm:$0xff]  ;;  %v384_v29 = vld [vmem:[%s16409_s16 + $0x70] sm:$0xff] }
  0x18   : > { %v385_v30 = vld [vmem:[%s16409_s16 + $0x78] sm:$0xff]  ;;  %v386_v31 = vld [vmem:[%s16409_s16 + $0x80] sm:$0xff]  ;;  %v387_v32 = vld [vmem:[%s16409_s16 + $0x88] sm:$0xff] }
  0x19   : > { %16245 = vmatpush3.bf16.msra.mxu0 %v16242_v8  ;;  %v388_v33 = vld [vmem:[%s16409_s16 + $0x90] sm:$0xff]  ;;  %v389_v34 = vld [vmem:[%s16409_s16 + $0x98] sm:$0xff]  ;;  %v390_v35 = vld [vmem:[%s16409_s16 + $0xa0] sm:$0xff] }
  0x1a   : > { %16247 = vmatprep.subr.bf16.mxu0 %v16246_v12  ;;  %v391_v36 = vld [vmem:[%s16409_s16 + $0xa8] sm:$0xff]  ;;  %v392_v37 = vld [vmem:[%s16409_s16 + $0xb0] sm:$0xff]  ;;  %v393_v38 = vld [vmem:[%s16409_s16 + $0xb8] sm:$0xff] }
  0x1b   : > { %v394_v39 = vld [vmem:[%s16409_s16 + $0xc0] sm:$0xff]  ;;  %v395_v40 = vld [vmem:[%s16409_s16 + $0xc8] sm:$0xff]  ;;  %v396_v41 = vld [vmem:[%s16409_s16 + $0xd0] sm:$0xff] }
  0x1c   : > { %v397_v42 = vld [vmem:[%s16409_s16 + $0xd8] sm:$0xff]  ;;  %v398_v43 = vld [vmem:[%s16409_s16 + $0xe0] sm:$0xff]  ;;  %v399_v44 = vld [vmem:[%s16409_s16 + $0xe8] sm:$0xff] }
  0x1d   : > { %16249 = vmatpush3.bf16.msra.mxu0 %v16246_v12  ;;  %v400_v45 = vld [vmem:[%s16409_s16 + $0xf0] sm:$0xff]  ;;  %v401_v46 = vld [vmem:[%s16409_s16 + $0xf8] sm:$0xff]  ;;  %v402_v47 = vld [vmem:[%s16409_s16 + $0x100] sm:$0xff] }
  0x1e   : > { %16251 = vmatprep.subr.bf16.mxu0 %v16250_v23  ;;  %v403_v48 = vld [vmem:[%s16409_s16 + $0x108] sm:$0xff]  ;;  %v404_v49 = vld [vmem:[%s16409_s16 + $0x110] sm:$0xff]  ;;  %v405_v50 = vld [vmem:[%s16409_s16 + $0x118] sm:$0xff] }
  0x1f   : > { %v406_v51 = vld [vmem:[%s16409_s16 + $0x120] sm:$0xff]  ;;  %v407_v52 = vld [vmem:[%s16409_s16 + $0x128] sm:$0xff]  ;;  %v408_v53 = vld [vmem:[%s16409_s16 + $0x130] sm:$0xff] }
  0x20   : > { %15139 = vmatmul.mubr.msk.f32.vlgmr.msra.gmra.mrb[0].mxu0 %vm20836_vm0, %v371_v13  ;;  %v409_v54 = vld [vmem:[%s16409_s16 + $0x138] sm:$0xff]  ;;  %v410_v55 = vld [vmem:[%s16409_s16 + $0x140] sm:$0xff]  ;;  %v411_v56 = vld [vmem:[%s16409_s16 + $0x148] sm:$0xff] }
  0x21   : > { %15141 = vmatprep.mubr.msk.f32.mxu0 %vm20836_vm0, %v372_v14  ;;  %16253 = vmatpush3.bf16.msra.mxu0 %v16250_v23  ;;  %v412_v57 = vld [vmem:[%s16409_s16 + $0x150] sm:$0xff]  ;;  %v413_v58 = vld [vmem:[%s16409_s16 + $0x158] sm:$0xff]  ;;  %v414_v59 = vld [vmem:[%s16409_s16 + $0x160] sm:$0xff] }
  0x22   : > { %v415_v60 = vld [vmem:[%s16409_s16 + $0x168] sm:$0xff]  ;;  %v416_v61 = vld [vmem:[%s16409_s16 + $0x170] sm:$0xff]  ;;  %v417_v62 = vld [vmem:[%s16409_s16 + $0x178] sm:$0xff] }
  0x23   : > { %v418_v63 = vld [vmem:[%s16409_s16 + $0x180] sm:$0xff]  ;;  %v419_v1 = vld [vmem:[%s16409_s16 + $0x188] sm:$0xff]  ;;  %v420_v2 = vld [vmem:[%s16409_s16 + $0x190] sm:$0xff] }
  0x24   : > { %15142 = vmatmul.mubr.msk.f32.gmra.mrb[2].mxu0 %vm20836_vm0, %v373_v15  ;;  %v421_v3 = vld [vmem:[%s16409_s16 + $0x198] sm:$0xff]  ;;  %v422_v4 = vld [vmem:[%s16409_s16 + $0x1a0] sm:$0xff]  ;;  %v423_v5 = vld [vmem:[%s16409_s16 + $0x1a8] sm:$0xff] }
  0x25   : > { %15144 = vmatprep.mubr.msk.f32.mxu0 %vm20836_vm0, %v374_v16  ;;  %v424_v6 = vld [vmem:[%s16409_s16 + $0x1b0] sm:$0xff]  ;;  %v425_v7 = vld [vmem:[%s16409_s16 + $0x1b8] sm:$0xff]  ;;  %v426_v8 = vld [vmem:[%s16409_s16 + $0x1c0] sm:$0xff] }
  0x26   : > { %v427_v9 = vld [vmem:[%s16409_s16 + $0x1c8] sm:$0xff]  ;;  %v428_v10 = vld [vmem:[%s16409_s16 + $0x1d0] sm:$0xff]  ;;  %v429_v11 = vld [vmem:[%s16409_s16 + $0x1d8] sm:$0xff] }
  0x27   : > { %v430_v12 = vld [vmem:[%s16409_s16 + $0x1e0] sm:$0xff]  ;;  %v431_v13 = vld [vmem:[%s16409_s16 + $0x1e8] sm:$0xff]  ;;  %v432_v14 = vld [vmem:[%s16409_s16 + $0x1f0] sm:$0xff] }
  0x28   : > { %15145 = vmatmul.mubr.msk.f32.gmra.mrb[4].mxu0 %vm20836_vm0, %v375_v17  ;;  %v433_v15 = vld [vmem:[%s16409_s16 + $0x1f8] sm:$0xff]  ;;  %v5457_v16 = vld [vmem:[%s20829_s4 + $0x20] sm:$0xff]  ;;  %v5458_v17 = vld [vmem:[%s20829_s4 + $0x28] sm:$0xff] }
  0x29   : > { %15147 = vmatprep.mubr.msk.f32.mxu0 %vm20836_vm0, %v376_v18  ;;  %v16258_v18 = vpack.c.bf16 %v5458_v17, %v5457_v16  ;;  %v16569_v23 = vld [vmem:[%s20827_s2] ss:$0 sm:$0xff] }
  0x2b   : > { %16259 = vmatprep.subr.bf16.mxu0 %v16258_v18 }
  0x2c   : > { %15148 = vmatmul.mubr.msk.f32.gmra.mrb[6].mxu0 %vm20836_vm0, %v377_v19  ;;  %v4366_v19 = vld [vmem:[%s20829_s4 + $0x10] sm:$0xff] }
  0x2d   : > { %15150 = vmatprep.mubr.msk.f32.mxu0 %vm20836_vm0, %v378_v22  ;;  %v16563_v21 = vpack.c.bf16 %v4367_v20, %v4366_v19  ;;  %v1290_v22 = vlaneseq }
  0x2f   : > { %16255 = vmatprep.subr.bf16.mxu1 %v16563_v21 }
  0x30   : > { %15151 = vmatmul.mubr.msk.f32.gmra.mrb[8].mxu0 %vm20836_vm0, %v379_v24 }
  0x31   : > { %15153 = vmatprep.mubr.msk.f32.mxu0 %vm20836_vm0, %v380_v25  ;;  %v16574_v25 = vld [vmem:[%s20828_s3] ss:$0 sm:$0xff] }
  0x34   : > { %15154 = vmatmul.mubr.msk.f32.gmra.mrb[10].mxu0 %vm20836_vm0, %v381_v26 }
  0x35   : > { %15156 = vmatprep.mubr.msk.f32.mxu0 %vm20836_vm0, %v382_v27 }
  0x38   : > { %15157 = vmatmul.mubr.msk.f32.gmra.mrb[12].mxu0 %vm20836_vm0, %v383_v28  ;;  %v16577_v28 = vshrl.u32 %v1290_v22, 7 }
  0x39   : > { %15159 = vmatprep.mubr.msk.f32.mxu0 %vm20836_vm0, %v384_v29 }
  0x3a   : > { %21062 = vst [vmem:[#allocation4_spill] sm:$0xff] %v16577_v28  ;;  %v1301_v17 = vadd.s32 80, %v16577_v28 }
  0x3c   : > { %15160 = vmatmul.mubr.msk.f32.gmra.mrb[14].mxu0 %vm20836_vm0, %v385_v30 }
  0x3d   : > { %15162 = vmatprep.mubr.msk.f32.mxu0 %vm20836_vm0, %v386_v31 }
  0x40   : > { %15163 = vmatmul.mubr.msk.f32.gmra.mrb[16].mxu0 %vm20836_vm0, %v387_v32 }
  0x41   : > { %15165 = vmatprep.mubr.msk.f32.mxu0 %vm20836_vm0, %v388_v33 }
  0x44   : > { %15166 = vmatmul.mubr.msk.f32.gmra.mrb[18].mxu0 %vm20836_vm0, %v389_v34 }
  0x45   : > { %15168 = vmatprep.mubr.msk.f32.mxu0 %vm20836_vm0, %v390_v35 }
  0x48   : > { %15169 = vmatmul.mubr.msk.f32.gmra.mrb[20].mxu0 %vm20836_vm0, %v391_v36  ;;  %v1293_v36 = vadd.s32 16, %v16577_v28 }
  0x49   : > { %15171 = vmatprep.mubr.msk.f32.mxu0 %vm20836_vm0, %v392_v37 }
  0x4c   : > { %15172 = vmatmul.mubr.msk.f32.gmra.mrb[22].mxu0 %vm20836_vm0, %v393_v38 }
  0x4d   : > { %15174 = vmatprep.mubr.msk.f32.mxu0 %vm20836_vm0, %v394_v39 }
  0x50   : > { %15175 = vmatmul.mubr.msk.f32.gmra.mrb[24].mxu0 %vm20836_vm0, %v395_v40 }
  0x51   : > { %15177 = vmatprep.mubr.msk.f32.mxu0 %vm20836_vm0, %v396_v41 }
  0x54   : > { %15178 = vmatmul.mubr.msk.f32.gmra.mrb[26].mxu0 %vm20836_vm0, %v397_v42  ;;  %v1295_v42 = vadd.s32 32, %v16577_v28 }
  0x55   : > { %15180 = vmatprep.mubr.msk.f32.mxu0 %vm20836_vm0, %v398_v43 }
  0x58   : > { %15181 = vmatmul.mubr.msk.f32.gmra.mrb[28].mxu0 %vm20836_vm0, %v399_v44 }
  0x59   : > { %15183 = vmatprep.mubr.msk.f32.mxu0 %vm20836_vm0, %v400_v45 }
  0x5c   : > { %15184 = vmatmul.mubr.msk.f32.gmra.mrb[30].mxu0 %vm20836_vm0, %v401_v46  ;;  %v1373_v46 = vand.u32 15, %v1293_v36 }
  0x5d   : > { %15186 = vmatprep.mubr.msk.f32.mxu0 %vm20836_vm0, %v402_v47 }
  0x5e   : > { %vm16597_vm2 = vcmp.gt.s32.totalorder %v1373_v46, 0 }
  0x60   : > { %15187 = vmatmul.mubr.msk.f32.gmra.mrb[32].mxu0 %vm20836_vm0, %v403_v48 }
  0x61   : > { %15189 = vmatprep.mubr.msk.f32.mxu0 %vm20836_vm0, %v404_v49 }
  0x64   : > { %15190 = vmatmul.mubr.msk.f32.gmra.mrb[34].mxu0 %vm20836_vm0, %v405_v50 }
  0x65   : > { %15192 = vmatprep.mubr.msk.f32.mxu0 %vm20836_vm0, %v406_v51 }
  0x68   : > { %15193 = vmatmul.mubr.msk.f32.gmra.mrb[36].mxu0 %vm20836_vm0, %v407_v52  ;;  %v1387_v52 = vand.u32 15, %v1295_v42 }
  0x69   : > { %15195 = vmatprep.mubr.msk.f32.mxu0 %vm20836_vm0, %v408_v53 }
  0x6a   : > { %vm16609_vm3 = vcmp.gt.s32.totalorder %v1387_v52, 0 }
  0x6c   : > { %15196 = vmatmul.mubr.msk.f32.gmra.mrb[38].mxu0 %vm20836_vm0, %v409_v54 }
  0x6d   : > { %15198 = vmatprep.mubr.msk.f32.mxu0 %vm20836_vm0, %v410_v55 }
  0x70   : > { %15199 = vmatmul.mubr.msk.f32.gmra.mrb[40].mxu0 %vm20836_vm0, %v411_v56 }
  0x71   : > { %15201 = vmatprep.mubr.msk.f32.mxu0 %vm20836_vm0, %v412_v57  ;;  %v1297_v57 = vadd.s32 48, %v16577_v28 }
  0x74   : > { %15202 = vmatmul.mubr.msk.f32.gmra.mrb[42].mxu0 %vm20836_vm0, %v413_v58 }
  0x75   : > { %15204 = vmatprep.mubr.msk.f32.mxu0 %vm20836_vm0, %v414_v59 }
  0x78   : > { %15205 = vmatmul.mubr.msk.f32.gmra.mrb[44].mxu0 %vm20836_vm0, %v415_v60 }
  0x79   : > { %15207 = vmatprep.mubr.msk.f32.mxu0 %vm20836_vm0, %v416_v61 }
  0x7c   : > { %15208 = vmatmul.mubr.msk.f32.gmra.mrb[46].mxu0 %vm20836_vm0, %v417_v62 }
  0x7d   : > { %15210 = vmatprep.mubr.msk.f32.mxu0 %vm20836_vm0, %v418_v63 }
  0x80   : > { %15211 = vmatmul.mubr.msk.f32.gmra.mrb[48].mxu0 %vm20836_vm0, %v419_v1 }
  0x81   : > { %15213 = vmatprep.mubr.msk.f32.mxu0 %vm20836_vm0, %v420_v2 }
  0x84   : > { %15214 = vmatmul.mubr.msk.f32.gmra.mrb[50].mxu0 %vm20836_vm0, %v421_v3 }
  0x85   : > { %15216 = vmatprep.mubr.msk.f32.mxu0 %vm20836_vm0, %v422_v4 }
  0x88   : > { %15217 = vmatmul.mubr.msk.f32.gmra.mrb[52].mxu0 %vm20836_vm0, %v423_v5 }
  0x89   : > { %15219 = vmatprep.mubr.msk.f32.mxu0 %vm20836_vm0, %v424_v6 }
  0x8c   : > { %15220 = vmatmul.mubr.msk.f32.gmra.mrb[54].mxu0 %vm20836_vm0, %v425_v7  ;;  %v1401_v7 = vand.u32 15, %v1297_v57 }
  0x8d   : > { %15222 = vmatprep.mubr.msk.f32.mxu0 %vm20836_vm0, %v426_v8  ;;  %v1299_v8 = vadd.s32 64, %v16577_v28 }
  0x8e   : > { %vm16628_vm4 = vcmp.gt.s32.totalorder %v1401_v7, 0 }
  0x90   : > { %15223 = vmatmul.mubr.msk.f32.gmra.mrb[56].mxu0 %vm20836_vm0, %v427_v9 }
  0x91   : > { %15225 = vmatprep.mubr.msk.f32.mxu0 %vm20836_vm0, %v428_v10 }
  0x94   : > { %15226 = vmatmul.mubr.msk.f32.gmra.mrb[58].mxu0 %vm20836_vm0, %v429_v11 }
  0x95   : > { %15228 = vmatprep.mubr.msk.f32.mxu0 %vm20836_vm0, %v430_v12 }
  0x98   : > { %15229 = vmatmul.mubr.msk.f32.gmra.mrb[60].mxu0 %vm20836_vm0, %v431_v13  ;;  %v1294_v13 = vadd.s32 24, %v16577_v28 }
  0x99   : > { %15231 = vmatprep.mubr.msk.f32.mxu0 %vm20836_vm0, %v432_v14 }
  0x9c   : > { %15232 = vmatmul.mubr.msk.f32.gmra.mrb[62].mxu0 %vm20836_vm0, %v433_v15 }
  0x9d   : > { %15238 = vmatprep.mubr.f32.mxu0 %v20868_v0 }
  0xa0   : > { %15239 = vmatmul.mubr.f32.vlgmr.msra.gmra.mrb[64].mxu0 %v20868_v0 }
  0xa1   : > { %16261 = vmatpush3.bf16.msra.mxu0 %v16258_v18 }
  0xf3   : > { %v15140_v24 = vpop.f32.mrb[0].mxu0 }
  0xf4   : > { %v1028_v26 = vmul.f32 %v15140_v24, %v16569_v23  ;;  %v701_v27 = vpop.f32.mrb[1].mxu0  ;;  %v21067_v24 = vmov 0 }
  0xf5   : > { %v1027_v29 = vmul.f32 %v16569_v23, %v701_v27  ;;  %v21068_v24 = vsel %vm16628_vm4, 4294967295, %v21067_v24 }
  0xf6   : > { %v1099_v30 = vadd.f32 %v16574_v25, %v1028_v26  ;;  %v1415_v26 = vand.u32 15, %v1299_v8 }
  0xf7   : > { %v1098_v31 = vadd.f32 %v16574_v25, %v1027_v29  ;;  %v15143_v32 = vpop.f32.mrb[2].mxu0 }
  0xf8   : > { %v1163_v33 = vmax.f32 %v1099_v30, 0.0  ;;  %v1030_v34 = vmul.f32 %v15143_v32, %v16569_v23  ;;  %v711_v35 = vpop.f32.mrb[3].mxu0  ;;  %v1380_v32 = vand.u32 15, %v1294_v13  ;;  %vm16646_vm5 = vcmp.gt.s32.totalorder %v1415_v26, 0 }
  0xf9   : > { %v1162_v37 = vmax.f32 %v1098_v31, 0.0  ;;  %v1029_v38 = vmul.f32 %v16569_v23, %v711_v35  ;;  %v21081_v26 = vmov 0 }
  0xfa   : > { %1227 = vst.msk [vmem:[#allocation2 + $0x20] sm:$0xff] %vm363_vm1, %v1163_v33  ;;  %v1101_v39 = vadd.f32 %v16574_v25, %v1030_v34  ;;  %v1296_v33 = vadd.s32 40, %v16577_v28  ;;  %vm16660_vm6 = vcmp.lt.s32.totalorder %v1380_v32, 15 }
  0xfb   : > { %1226 = vst.msk [vmem:[#allocation2 + $0x18] sm:$0xff] %vm363_vm1, %v1162_v37  ;;  %v1100_v40 = vadd.f32 %v16574_v25, %v1029_v38  ;;  %v15146_v41 = vpop.f32.mrb[4].mxu0  ;;  %v1429_v37 = vand.u32 15, %v1301_v17  ;;  %v7319_v38 = vld [vmem:[%s20829_s4 + $0x40] sm:$0xff] }
  0xfc   : > { %v1165_v43 = vmax.f32 %v1101_v39, 0.0  ;;  %v1032_v44 = vmul.f32 %v15146_v41, %v16569_v23  ;;  %v721_v45 = vpop.f32.mrb[5].mxu0 }
  0xfd   : > { %v1164_v47 = vmax.f32 %v1100_v40, 0.0  ;;  %v1031_v48 = vmul.f32 %v16569_v23, %v721_v45  ;;  %v7320_v45 = vld [vmem:[%s20829_s4 + $0x48] sm:$0xff]  ;;  %vm16671_vm7 = vcmp.gt.s32.totalorder %v1429_v37, 0 }
  0xfe   : > { %1229 = vst.msk [vmem:[#allocation2 + $0x30] sm:$0xff] %vm363_vm1, %v1165_v43  ;;  %v1103_v49 = vadd.f32 %v16574_v25, %v1032_v44  ;;  %v21069_v43 = vmov 0  ;;  %v1303_v44 = vadd.s32 96, %v16577_v28 }
  0xff   : > { %1228 = vst.msk [vmem:[#allocation2 + $0x28] sm:$0xff] %vm363_vm1, %v1164_v47  ;;  %v1102_v50 = vadd.f32 %v16574_v25, %v1031_v48  ;;  %v15149_v51 = vpop.f32.mrb[6].mxu0  ;;  %v21070_v43 = vsel %vm16646_vm5, 4294967295, %v21069_v43  ;;  %v16656_v48 = vpack.c.bf16 %v7320_v45, %v7319_v38 }
 0x100   : > { %v1167_v53 = vmax.f32 %v1103_v49, 0.0  ;;  %v1034_v54 = vmul.f32 %v15149_v51, %v16569_v23  ;;  %v731_v55 = vpop.f32.mrb[7].mxu0  ;;  %v21071_v51 = vmov 0 }
 0x101   : > { %v1166_v58 = vmax.f32 %v1102_v50, 0.0  ;;  %v1033_v59 = vmul.f32 %v16569_v23, %v731_v55  ;;  %v21072_v51 = vsel %vm16660_vm6, 4294967295, %v21071_v51  ;;  %16267 = vmatprep.subr.bf16.mxu0 %v16656_v48 }
 0x102   : > { %1231 = vst.msk [vmem:[#allocation2 + $0x40] sm:$0xff] %vm363_vm1, %v1167_v53  ;;  %v1105_v60 = vadd.f32 %v16574_v25, %v1034_v54  ;;  %v3149_v61 = vld [vmem:[#allocation2 + $0x17] sm:$0xff]  ;;  %v3150_v6 = vld [vmem:[#allocation2 + $0x1f] sm:$0xff]  ;;  %21073 = vst [vmem:[#allocation5_spill] sm:$0xff] %v21072_v51  ;;  %v1394_v53 = vand.u32 15, %v1296_v33  ;;  %v1298_v54 = vadd.s32 56, %v16577_v28 }
 0x103   : > { %1230 = vst.msk [vmem:[#allocation2 + $0x38] sm:$0xff] %vm363_vm1, %v1166_v58  ;;  %v1104_v62 = vadd.f32 %v16574_v25, %v1033_v59  ;;  %v15152_v63 = vpop.f32.mrb[8].mxu0  ;;  %v3405_v1 = vsel %vm16597_vm2, %v3149_v61, 0.0  ;;  %v21075_v59 = vmov 0  ;;  %v21083_v33 = vmov 0 }
 0x104   : > { %v1169_v3 = vmax.f32 %v1105_v60, 0.0  ;;  %v1036_v4 = vmul.f32 %v15152_v63, %v16569_v23  ;;  %v741_v5 = vpop.f32.mrb[9].mxu0  ;;  %15241 = vmatprep.mubr.msk.f32.mxu0 %vm363_vm1, %v3405_v1  ;;  %v21076_v59 = vsel %vm16671_vm7, 4294967295, %v21075_v59  ;;  %vm16686_vm8 = vcmp.lt.s32.totalorder %v1394_v53, 15 }
 0x105   : > { %v1168_v9 = vmax.f32 %v1104_v62, 0.0  ;;  %v1035_v10 = vmul.f32 %v16569_v23, %v741_v5  ;;  %15242 = vmatmul.mubr.msk.f32.gmra.mrb[66].mxu0 %vm363_vm1, %v3150_v6 }
 0x106   : > { %1233 = vst.msk [vmem:[#allocation2 + $0x50] sm:$0xff] %vm363_vm1, %v1169_v3  ;;  %v1107_v11 = vadd.f32 %v16574_v25, %v1036_v4  ;;  %v3151_v12 = vld [vmem:[#allocation2 + $0x27] sm:$0xff]  ;;  %v3152_v22 = vld [vmem:[#allocation2 + $0x2f] sm:$0xff]  ;;  %v1443_v3 = vand.u32 15, %v1303_v44  ;;  %v1305_v4 = vadd.s32 112, %v16577_v28 }
 0x107   : > { %1232 = vst.msk [vmem:[#allocation2 + $0x48] sm:$0xff] %vm363_vm1, %v1168_v9  ;;  %v1106_v14 = vadd.f32 %v16574_v25, %v1035_v10  ;;  %v15155_v15 = vpop.f32.mrb[10].mxu0  ;;  %v3407_v16 = vsel %vm16609_vm3, %v3151_v12, 0.0  ;;  %v21077_v9 = vmov 0  ;;  %v1300_v12 = vadd.s32 72, %v16577_v28 }
 0x108   : > { %v1171_v18 = vmax.f32 %v1107_v11, 0.0  ;;  %v1038_v19 = vmul.f32 %v15155_v15, %v16569_v23  ;;  %v751_v20 = vpop.f32.mrb[11].mxu0  ;;  %15244 = vmatprep.mubr.msk.f32.mxu0 %vm363_vm1, %v3407_v16  ;;  %v21078_v9 = vsel %vm16686_vm8, 4294967295, %v21077_v9  ;;  %v1408_v11 = vand.u32 15, %v1298_v54 }
 0x109   : > { %v1170_v27 = vmax.f32 %v1106_v14, 0.0  ;;  %v1037_v29 = vmul.f32 %v16569_v23, %v751_v20  ;;  %15245 = vmatmul.mubr.msk.f32.gmra.mrb[68].mxu0 %vm363_vm1, %v3152_v22  ;;  %21079 = vst [vmem:[#allocation7_spill] sm:$0xff] %v21078_v9  ;;  %v1307_v16 = vadd.s32 128, %v16577_v28  ;;  %vm16703_vm9 = vcmp.gt.s32.totalorder %v1443_v3, 0 }
 0x10a   : > { %1235 = vst.msk [vmem:[#allocation2 + $0x60] sm:$0xff] %vm363_vm1, %v1171_v18  ;;  %v1109_v30 = vadd.f32 %v16574_v25, %v1038_v19  ;;  %v3153_v31 = vld [vmem:[#allocation2 + $0x37] sm:$0xff]  ;;  %v3154_v42 = vld [vmem:[#allocation2 + $0x3f] sm:$0xff]  ;;  %v21082_v26 = vsel %vm16703_vm9, 4294967295, %v21081_v26  ;;  %vm16711_vm10 = vcmp.lt.s32.totalorder %v1408_v11, 15 }
 0x10b   : > { %1234 = vst.msk [vmem:[#allocation2 + $0x58] sm:$0xff] %vm363_vm1, %v1170_v27  ;;  %v1108_v34 = vadd.f32 %v16574_v25, %v1037_v29  ;;  %v15158_v35 = vpop.f32.mrb[12].mxu0  ;;  %v3409_v36 = vsel %vm16628_vm4, %v3153_v31, 0.0  ;;  %v1457_v27 = vand.u32 15, %v1305_v4  ;;  %v21084_v33 = vsel %vm16711_vm10, 4294967295, %v21083_v33 }
 0x10c   : > { %v1173_v39 = vmax.f32 %v1109_v30, 0.0  ;;  %v1040_v40 = vmul.f32 %v15158_v35, %v16569_v23  ;;  %v761_v41 = vpop.f32.mrb[13].mxu0  ;;  %15247 = vmatprep.mubr.msk.f32.mxu0 %vm363_vm1, %v3409_v36  ;;  %21085 = vst [vmem:[#allocation9_spill] sm:$0xff] %v21084_v33  ;;  %v1422_v35 = vand.u32 15, %v1300_v12  ;;  %v1302_v36 = vadd.s32 88, %v16577_v28 }
 0x10d   : > { %v1172_v46 = vmax.f32 %v1108_v34, 0.0  ;;  %v1039_v47 = vmul.f32 %v16569_v23, %v761_v41  ;;  %15248 = vmatmul.mubr.msk.f32.gmra.mrb[70].mxu0 %vm363_vm1, %v3154_v42  ;;  %vm16727_vm11 = vcmp.gt.s32.totalorder %v1457_v27, 0  ;;  %v21093_v4 = vmov 0  ;;  %v5142_v41 = vld [vmem:[#allocation2 + $0x31] sm:$0xff] }
 0x10e   : > { %1237 = vst.msk [vmem:[#allocation2 + $0x70] sm:$0xff] %vm363_vm1, %v1173_v39  ;;  %v1111_v49 = vadd.f32 %v16574_v25, %v1040_v40  ;;  %v3155_v50 = vld [vmem:[#allocation2 + $0x47] sm:$0xff]  ;;  %v3156_v1 = vld [vmem:[#allocation2 + $0x4f] sm:$0xff]  ;;  %v1471_v40 = vand.u32 15, %v1307_v16  ;;  %vm16736_vm12 = vcmp.lt.s32.totalorder %v1422_v35, 15  ;;  %v1306_v27 = vadd.s32 120, %v16577_v28 }
 0x10f   : > { %v16664_v52 = vld [vmem:[#allocation2 + $0x41] sm:$0xff]  ;;  %1236 = vst.msk [vmem:[#allocation2 + $0x68] sm:$0xff] %vm363_vm1, %v1172_v46  ;;  %v1110_v55 = vadd.f32 %v16574_v25, %v1039_v47  ;;  %v15161_v57 = vpop.f32.mrb[14].mxu0  ;;  %v3411_v58 = vsel %vm16646_vm5, %v3155_v50, 0.0  ;;  %v21087_v47 = vmov 0 }
 0x110   : > { %21074 = vst [vmem:[#allocation6_spill] sm:$0xff] %v16664_v52  ;;  %v1175_v61 = vmax.f32 %v1111_v49, 0.0  ;;  %v1042_v62 = vmul.f32 %v15161_v57, %v16569_v23  ;;  %v771_v63 = vpop.f32.mrb[15].mxu0  ;;  %15250 = vmatprep.mubr.msk.f32.mxu0 %vm363_vm1, %v3411_v58  ;;  %v21088_v47 = vsel %vm16727_vm11, 4294967295, %v21087_v47  ;;  %v1309_v49 = vadd.s32 144, %v16577_v28 }
 0x111   : > { %v1174_v5 = vmax.f32 %v1110_v55, 0.0  ;;  %v1041_v6 = vmul.f32 %v16569_v23, %v771_v63  ;;  %15251 = vmatmul.mubr.msk.f32.gmra.mrb[72].mxu0 %vm363_vm1, %v3156_v1  ;;  %v21089_v57 = vmov 0  ;;  %vm16747_vm13 = vcmp.gt.s32.totalorder %v1471_v40, 0 }
 0x112   : > { %1239 = vst.msk [vmem:[#allocation2 + $0x80] sm:$0xff] %vm363_vm1, %v1175_v61  ;;  %v1113_v7 = vadd.f32 %v16574_v25, %v1042_v62  ;;  %v3157_v8 = vld [vmem:[#allocation2 + $0x57] sm:$0xff]  ;;  %v3158_v22 = vld [vmem:[#allocation2 + $0x5f] sm:$0xff]  ;;  %v21090_v57 = vsel %vm16736_vm12, 4294967295, %v21089_v57  ;;  %v1436_v61 = vand.u32 15, %v1302_v36  ;;  %v1304_v62 = vadd.s32 104, %v16577_v28 }
 0x113   : > { %v16690_v10 = vld [vmem:[#allocation2 + $0x51] sm:$0xff]  ;;  %1238 = vst.msk [vmem:[#allocation2 + $0x78] sm:$0xff] %vm363_vm1, %v1174_v5  ;;  %v1112_v13 = vadd.f32 %v16574_v25, %v1041_v6  ;;  %v15164_v14 = vpop.f32.mrb[16].mxu0  ;;  %v3413_v15 = vsel %vm16671_vm7, %v3157_v8, 0.0  ;;  %21091 = vst [vmem:[#allocation11_spill] sm:$0xff] %v21090_v57  ;;  %v21094_v4 = vsel %vm16747_vm13, 4294967295, %v21093_v4 }
 0x114   : > { %21080 = vst [vmem:[#allocation8_spill] sm:$0xff] %v16690_v10  ;;  %v1177_v18 = vmax.f32 %v1113_v7, 0.0  ;;  %v1044_v19 = vmul.f32 %v15164_v14, %v16569_v23  ;;  %v781_v20 = vpop.f32.mrb[17].mxu0  ;;  %15253 = vmatprep.mubr.msk.f32.mxu0 %vm363_vm1, %v3413_v15  ;;  %v1485_v12 = vand.u32 15, %v1309_v49  ;;  %vm16761_vm14 = vcmp.lt.s32.totalorder %v1436_v61, 15 }
 0x115   : > { %v1176_v29 = vmax.f32 %v1112_v13, 0.0  ;;  %v1043_v30 = vmul.f32 %v16569_v23, %v781_v20  ;;  %15254 = vmatmul.mubr.msk.f32.gmra.mrb[74].mxu0 %vm363_vm1, %v3158_v22  ;;  %v1311_v13 = vadd.s32 160, %v16577_v28  ;;  %v1450_v22 = vand.u32 15, %v1304_v62 }
 0x116   : > { %1241 = vst.msk [vmem:[#allocation2 + $0x90] sm:$0xff] %vm363_vm1, %v1177_v18  ;;  %v1115_v31 = vadd.f32 %v16574_v25, %v1044_v19  ;;  %v3159_v32 = vld [vmem:[#allocation2 + $0x67] sm:$0xff]  ;;  %v3160_v46 = vld [vmem:[#allocation2 + $0x6f] sm:$0xff]  ;;  %v21095_v19 = vmov 0  ;;  %vm16778_vm15 = vcmp.gt.s32.totalorder %v1485_v12, 0  ;;  %v21099_v40 = vmov 0 }
 0x117   : > { %v16715_v34 = vld [vmem:[#allocation2 + $0x61] sm:$0xff]  ;;  %1240 = vst.msk [vmem:[#allocation2 + $0x88] sm:$0xff] %vm363_vm1, %v1176_v29  ;;  %v1114_v37 = vadd.f32 %v16574_v25, %v1043_v30  ;;  %v15167_v38 = vpop.f32.mrb[18].mxu0  ;;  %v3415_v39 = vsel %vm16703_vm9, %v3159_v32, 0.0  ;;  %v21096_v19 = vsel %vm16761_vm14, 4294967295, %v21095_v19  ;;  %v1313_v32 = vadd.s32 176, %v16577_v28 }
 0x118   : > { %21086 = vst [vmem:[#allocation10_spill] sm:$0xff] %v16715_v34  ;;  %v1179_v42 = vmax.f32 %v1115_v31, 0.0  ;;  %v1046_v44 = vmul.f32 %v15167_v38, %v16569_v23  ;;  %v791_v45 = vpop.f32.mrb[19].mxu0  ;;  %15256 = vmatprep.mubr.msk.f32.mxu0 %vm363_vm1, %v3415_v39  ;;  %21097 = vst [vmem:[#allocation13_spill] sm:$0xff] %v21096_v19  ;;  %v21100_v40 = vsel %vm16778_vm15, 4294967295, %v21099_v40  ;;  %vm16786_vm0 = vcmp.lt.s32.totalorder %v1450_v22, 15 }
 0x119   : > { %v1178_v50 = vmax.f32 %v1114_v37, 0.0  ;;  %v1045_v53 = vmul.f32 %v16569_v23, %v791_v45  ;;  %15257 = vmatmul.mubr.msk.f32.gmra.mrb[76].mxu0 %vm363_vm1, %v3160_v46  ;;  %v21105_v12 = vmov 0  ;;  %v21107_v22 = vmov 0 }
 0x11a   : > { %1243 = vst.msk [vmem:[#allocation2 + $0xa0] sm:$0xff] %vm363_vm1, %v1179_v42  ;;  %v1117_v54 = vadd.f32 %v16574_v25, %v1046_v44  ;;  %v3161_v55 = vld [vmem:[#allocation2 + $0x77] sm:$0xff]  ;;  %v3162_v11 = vld [vmem:[#allocation2 + $0x7f] sm:$0xff]  ;;  %v1499_v42 = vand.u32 15, %v1311_v13  ;;  %v1315_v13 = vadd.s32 192, %v16577_v28 }
 0x11b   : > { %v16740_v58 = vld [vmem:[#allocation2 + $0x71] sm:$0xff]  ;;  %1242 = vst.msk [vmem:[#allocation2 + $0x98] sm:$0xff] %vm363_vm1, %v1178_v50  ;;  %v1116_v63 = vadd.f32 %v16574_v25, %v1045_v53  ;;  %v15170_v1 = vpop.f32.mrb[20].mxu0  ;;  %v3417_v3 = vsel %vm16727_vm11, %v3161_v55, 0.0  ;;  %v21101_v50 = vmov 0  ;;  %v1308_v55 = vadd.s32 136, %v16577_v28 }
 0x11c   : > { %21092 = vst [vmem:[#allocation12_spill] sm:$0xff] %v16740_v58  ;;  %v1181_v6 = vmax.f32 %v1117_v54, 0.0  ;;  %v1048_v7 = vmul.f32 %v15170_v1, %v16569_v23  ;;  %v801_v8 = vpop.f32.mrb[21].mxu0  ;;  %15259 = vmatprep.mubr.msk.f32.mxu0 %vm363_vm1, %v3417_v3  ;;  %v21102_v50 = vsel %vm16786_vm0, 4294967295, %v21101_v50  ;;  %v1464_v54 = vand.u32 15, %v1306_v27 }
 0x11d   : > { %v1180_v14 = vmax.f32 %v1116_v63, 0.0  ;;  %v1047_v15 = vmul.f32 %v16569_v23, %v801_v8  ;;  %15260 = vmatmul.mubr.msk.f32.gmra.mrb[78].mxu0 %vm363_vm1, %v3162_v11  ;;  %21103 = vst [vmem:[#allocation15_spill] sm:$0xff] %v21102_v50  ;;  %v1513_v1 = vand.u32 15, %v1313_v32 }
 0x11e   : > { %1245 = vst.msk [vmem:[#allocation2 + $0xb0] sm:$0xff] %vm363_vm1, %v1181_v6  ;;  %v1119_v16 = vadd.f32 %v16574_v25, %v1048_v7  ;;  %v3163_v18 = vld [vmem:[#allocation2 + $0x87] sm:$0xff]  ;;  %v3164_v39 = vld [vmem:[#allocation2 + $0x8f] sm:$0xff] }
 0x11f   : > { %v16765_v20 = vld [vmem:[#allocation2 + $0x81] sm:$0xff]  ;;  %1244 = vst.msk [vmem:[#allocation2 + $0xa8] sm:$0xff] %vm363_vm1, %v1180_v14  ;;  %v1118_v29 = vadd.f32 %v16574_v25, %v1047_v15  ;;  %v15173_v30 = vpop.f32.mrb[22].mxu0  ;;  %v3419_v31 = vsel %vm16747_vm13, %v3163_v18, 0.0  ;;  %vm16802_vm13 = vcmp.gt.s32.totalorder %v1499_v42, 0  ;;  %vm16822_vm11 = vcmp.gt.s32.totalorder %v1513_v1, 0 }
 0x120   : > { %21098 = vst [vmem:[#allocation14_spill] sm:$0xff] %v16765_v20  ;;  %v1183_v36 = vmax.f32 %v1119_v16, 0.0  ;;  %v1050_v37 = vmul.f32 %v15173_v30, %v16569_v23  ;;  %v811_v38 = vpop.f32.mrb[23].mxu0  ;;  %15262 = vmatprep.mubr.msk.f32.mxu0 %vm363_vm1, %v3419_v31  ;;  %v21106_v12 = vsel %vm16802_vm13, 4294967295, %v21105_v12  ;;  %v1310_v30 = vadd.s32 152, %v16577_v28 }
 0x121   : > { %v1182_v44 = vmax.f32 %v1118_v29, 0.0  ;;  %v1049_v45 = vmul.f32 %v16569_v23, %v811_v38  ;;  %15263 = vmatmul.mubr.msk.f32.gmra.mrb[80].mxu0 %vm363_vm1, %v3164_v39  ;;  %v1478_v29 = vand.u32 15, %v1308_v55 }
 0x122   : > { %1247 = vst.msk [vmem:[#allocation2 + $0xc0] sm:$0xff] %vm363_vm1, %v1183_v36  ;;  %v1121_v46 = vadd.f32 %v16574_v25, %v1050_v37  ;;  %v3165_v49 = vld [vmem:[#allocation2 + $0x97] sm:$0xff]  ;;  %v3166_v11 = vld [vmem:[#allocation2 + $0x9f] sm:$0xff]  ;;  %v21111_v37 = vmov 0 }
 0x123   : > { %v16790_v53 = vld [vmem:[#allocation2 + $0x91] sm:$0xff]  ;;  %1246 = vst.msk [vmem:[#allocation2 + $0xb8] sm:$0xff] %vm363_vm1, %v1182_v44  ;;  %v1120_v61 = vadd.f32 %v16574_v25, %v1049_v45  ;;  %v15176_v62 = vpop.f32.mrb[24].mxu0  ;;  %v3421_v63 = vsel %vm16778_vm15, %v3165_v49, 0.0  ;;  %vm16811_vm15 = vcmp.lt.s32.totalorder %v1464_v54, 15  ;;  %v21112_v37 = vsel %vm16822_vm11, 4294967295, %v21111_v37 }
 0x124   : > { %21104 = vst [vmem:[#allocation16_spill] sm:$0xff] %v16790_v53  ;;  %v1185_v6 = vmax.f32 %v1121_v46, 0.0  ;;  %v1052_v7 = vmul.f32 %v15176_v62, %v16569_v23  ;;  %v821_v8 = vpop.f32.mrb[25].mxu0  ;;  %15265 = vmatprep.mubr.msk.f32.mxu0 %vm363_vm1, %v3421_v63  ;;  %v21108_v22 = vsel %vm16811_vm15, 4294967295, %v21107_v22  ;;  %v1527_v46 = vand.u32 15, %v1315_v13 }
 0x125   : > { %v1184_v14 = vmax.f32 %v1120_v61, 0.0  ;;  %v1051_v15 = vmul.f32 %v16569_v23, %v821_v8  ;;  %15266 = vmatmul.mubr.msk.f32.gmra.mrb[82].mxu0 %vm363_vm1, %v3166_v11  ;;  %21109 = vst [vmem:[#allocation17_spill] sm:$0xff] %v21108_v22  ;;  %v1317_v49 = vadd.s32 208, %v16577_v28  ;;  %v21113_v63 = vmov 0 }
 0x126   : > { %1249 = vst.msk [vmem:[#allocation2 + $0xd0] sm:$0xff] %vm363_vm1, %v1185_v6  ;;  %v1123_v16 = vadd.f32 %v16574_v25, %v1052_v7  ;;  %v3167_v18 = vld [vmem:[#allocation2 + $0xa7] sm:$0xff]  ;;  %v3168_v45 = vld [vmem:[#allocation2 + $0xaf] sm:$0xff]  ;;  %v1492_v6 = vand.u32 15, %v1310_v30  ;;  %v1312_v7 = vadd.s32 168, %v16577_v28  ;;  %vm16853_vm9 = vcmp.gt.s32.totalorder %v1527_v46, 0 }
 0x127   : > { %v16815_v27 = vld [vmem:[#allocation2 + $0xa1] sm:$0xff]  ;;  %1248 = vst.msk [vmem:[#allocation2 + $0xc8] sm:$0xff] %vm363_vm1, %v1184_v14  ;;  %v1122_v31 = vadd.f32 %v16574_v25, %v1051_v15  ;;  %v15179_v32 = vpop.f32.mrb[26].mxu0  ;;  %v3423_v36 = vsel %vm16802_vm13, %v3167_v18, 0.0  ;;  %vm16836_vm13 = vcmp.lt.s32.totalorder %v1478_v29, 15  ;;  %v1319_v14 = vadd.s32 224, %v16577_v28 }
 0x128   : > { %21110 = vst [vmem:[#allocation18_spill] sm:$0xff] %v16815_v27  ;;  %v1187_v39 = vmax.f32 %v1123_v16, 0.0  ;;  %v1054_v42 = vmul.f32 %v15179_v32, %v16569_v23  ;;  %v831_v44 = vpop.f32.mrb[27].mxu0  ;;  %15268 = vmatprep.mubr.msk.f32.mxu0 %vm363_vm1, %v3423_v36  ;;  %v21114_v63 = vsel %vm16836_vm13, 4294967295, %v21113_v63  ;;  %v1541_v32 = vand.u32 15, %v1317_v49 }
 0x129   : > { %v1186_v54 = vmax.f32 %v1122_v31, 0.0  ;;  %v1053_v55 = vmul.f32 %v16569_v23, %v831_v44  ;;  %15269 = vmatmul.mubr.msk.f32.gmra.mrb[84].mxu0 %vm363_vm1, %v3168_v45  ;;  %21115 = vst [vmem:[#allocation19_spill] sm:$0xff] %v21114_v63  ;;  %v21117_v31 = vmov 0 }
 0x12a   : > { %1251 = vst.msk [vmem:[#allocation2 + $0xe0] sm:$0xff] %vm363_vm1, %v1187_v39  ;;  %v1125_v61 = vadd.f32 %v16574_v25, %v1054_v42  ;;  %v3169_v62 = vld [vmem:[#allocation2 + $0xb7] sm:$0xff]  ;;  %v3170_v30 = vld [vmem:[#allocation2 + $0xbf] sm:$0xff]  ;;  %v21118_v31 = vsel %vm16853_vm9, 4294967295, %v21117_v31  ;;  %v1314_v42 = vadd.s32 184, %v16577_v28  ;;  %vm16877_vm7 = vcmp.gt.s32.totalorder %v1541_v32, 0 }
 0x12b   : > { %v16840_v1 = vld [vmem:[#allocation2 + $0xb1] sm:$0xff]  ;;  %1250 = vst.msk [vmem:[#allocation2 + $0xd8] sm:$0xff] %vm363_vm1, %v1186_v54  ;;  %v1124_v8 = vadd.f32 %v16574_v25, %v1053_v55  ;;  %v15182_v11 = vpop.f32.mrb[28].mxu0  ;;  %v3425_v13 = vsel %vm16822_vm11, %v3169_v62, 0.0  ;;  %vm16862_vm11 = vcmp.lt.s32.totalorder %v1492_v6, 15  ;;  %v21119_v54 = vmov 0 }
 0x12c   : > { %21116 = vst [vmem:[#allocation20_spill] sm:$0xff] %v16840_v1  ;;  %v1189_v16 = vmax.f32 %v1125_v61, 0.0  ;;  %v1056_v18 = vmul.f32 %v15182_v11, %v16569_v23  ;;  %v841_v29 = vpop.f32.mrb[29].mxu0  ;;  %15271 = vmatprep.mubr.msk.f32.mxu0 %vm363_vm1, %v3425_v13  ;;  %v21120_v54 = vsel %vm16862_vm11, 4294967295, %v21119_v54  ;;  %v1506_v55 = vand.u32 15, %v1312_v7 }
 0x12d   : > { %v1188_v36 = vmax.f32 %v1124_v8, 0.0  ;;  %v1055_v39 = vmul.f32 %v16569_v23, %v841_v29  ;;  %15272 = vmatmul.mubr.msk.f32.gmra.mrb[86].mxu0 %vm363_vm1, %v3170_v30  ;;  %21121 = vst [vmem:[#allocation21_spill] sm:$0xff] %v21120_v54  ;;  %v1555_v8 = vand.u32 15, %v1319_v14  ;;  %v1321_v29 = vadd.s32 240, %v16577_v28 }
 0x12e   : > { %1253 = vst.msk [vmem:[#allocation2 + $0xf0] sm:$0xff] %vm363_vm1, %v1189_v16  ;;  %v1127_v44 = vadd.f32 %v16574_v25, %v1056_v18  ;;  %v3171_v45 = vld [vmem:[#allocation2 + $0xc7] sm:$0xff]  ;;  %v3172_v7 = vld [vmem:[#allocation2 + $0xcf] sm:$0xff]  ;;  %v21123_v18 = vmov 0 }
 0x12f   : > { %v16866_v46 = vld [vmem:[#allocation2 + $0xc1] sm:$0xff]  ;;  %1252 = vst.msk [vmem:[#allocation2 + $0xe8] sm:$0xff] %vm363_vm1, %v1188_v36  ;;  %v1126_v49 = vadd.f32 %v16574_v25, %v1055_v39  ;;  %v15185_v61 = vpop.f32.mrb[30].mxu0  ;;  %v3427_v62 = vsel %vm16853_vm9, %v3171_v45, 0.0  ;;  %v21124_v18 = vsel %vm16877_vm7, 4294967295, %v21123_v18  ;;  %v1520_v36 = vand.u32 15, %v1314_v42 }
 0x130   : > { %21122 = vst [vmem:[#allocation22_spill] sm:$0xff] %v16866_v46  ;;  %v1191_v6 = vmax.f32 %v1127_v44, 0.0  ;;  %v1058_v13 = vmul.f32 %v15185_v61, %v16569_v23  ;;  %v851_v16 = vpop.f32.mrb[31].mxu0  ;;  %15274 = vmatprep.mubr.msk.f32.mxu0 %vm363_vm1, %v3427_v62  ;;  %21125 = vst [vmem:[#allocation23_spill] sm:$0xff] %v21124_v18  ;;  %vm16886_vm9 = vcmp.lt.s32.totalorder %v1506_v55, 15  ;;  %v21126_v45 = vmov 0 }
 0x131   : > { %v1190_v30 = vmax.f32 %v1126_v49, 0.0  ;;  %v1057_v14 = vmul.f32 %v16569_v23, %v851_v16  ;;  %15275 = vmatmul.mubr.msk.f32.gmra.mrb[88].mxu0 %vm363_vm1, %v3172_v7  ;;  %v21127_v45 = vsel %vm16886_vm9, 4294967295, %v21126_v45  ;;  %v1316_v61 = vadd.s32 200, %v16577_v28 }
 0x132   : > { %1255 = vst.msk [vmem:[#allocation2 + $0x100] sm:$0xff] %vm363_vm1, %v1191_v6  ;;  %v1129_v39 = vadd.f32 %v16574_v25, %v1058_v13  ;;  %v3173_v44 = vld [vmem:[#allocation2 + $0xd7] sm:$0xff]  ;;  %21128 = vst [vmem:[#allocation24_spill] sm:$0xff] %v21127_v45  ;;  %vm16897_vm5 = vcmp.gt.s32.totalorder %v1555_v8, 0  ;;  %v21130_v6 = vmov 0 }
 0x133   : > { %v16890_v32 = vld [vmem:[#allocation2 + $0xd1] sm:$0xff]  ;;  %1254 = vst.msk [vmem:[#allocation2 + $0xf8] sm:$0xff] %vm363_vm1, %v1190_v30  ;;  %v1128_v49 = vadd.f32 %v16574_v25, %v1057_v14  ;;  %v15188_v62 = vpop.f32.mrb[32].mxu0  ;;  %v3429_v42 = vsel %vm16877_vm7, %v3173_v44, 0.0  ;;  %v21131_v6 = vsel %vm16897_vm5, 4294967295, %v21130_v6  ;;  %v3174_v30 = vld [vmem:[#allocation2 + $0xdf] sm:$0xff] }
 0x134   : > { %21129 = vst [vmem:[#allocation25_spill] sm:$0xff] %v16890_v32  ;;  %21132 = vst [vmem:[#allocation26_spill] sm:$0xff] %v21131_v6  ;;  %v1193_v13 = vmax.f32 %v1129_v39, 0.0  ;;  %v1060_v16 = vmul.f32 %v15188_v62, %v16569_v23  ;;  %v861_v7 = vpop.f32.mrb[33].mxu0  ;;  %15277 = vmatprep.mubr.msk.f32.mxu0 %vm363_vm1, %v3429_v42  ;;  %v1569_v14 = vand.u32 15, %v1321_v29  ;;  %v6484_v44 = vld [vmem:[%s20829_s4 + $0x30] sm:$0xff] }
 0x135   : > { %v6485_v8 = vld [vmem:[%s20829_s4 + $0x38] sm:$0xff]  ;;  %v1192_v11 = vmax.f32 %v1128_v49, 0.0  ;;  %v1059_v15 = vmul.f32 %v16569_v23, %v861_v7  ;;  %15278 = vmatmul.mubr.msk.f32.gmra.mrb[90].mxu0 %vm363_vm1, %v3174_v30  ;;  %vm16914_vm7 = vcmp.lt.s32.totalorder %v1520_v36, 15  ;;  %v21133_v39 = vmov 0 }
 0x136   : > { %v21134_v39 = vsel %vm16914_vm7, 4294967295, %v21133_v39  ;;  %1257 = vst.msk [vmem:[#allocation2 + $0x110] sm:$0xff] %vm363_vm1, %v1193_v13  ;;  %v1131_v29 = vadd.f32 %v16574_v25, %v1060_v16  ;;  %v3175_v62 = vld [vmem:[#allocation2 + $0xe7] sm:$0xff]  ;;  %15438 = vmatprep.mubr.f32.mxu0 %v20868_v0  ;;  %v1325_v42 = vadd.s32 272, %v16577_v28  ;;  %v1534_v49 = vand.u32 15, %v1316_v61  ;;  %v3176_v5 = vld [vmem:[#allocation2 + $0xef] sm:$0xff] }
 0x137   : > { %21135 = vst [vmem:[#allocation27_spill] sm:$0xff] %v21134_v39  ;;  %v16922_v55 = vld [vmem:[#allocation2 + $0xe1] sm:$0xff]  ;;  %v1318_v7 = vadd.s32 216, %v16577_v28  ;;  %1256 = vst.msk [vmem:[#allocation2 + $0x108] sm:$0xff] %vm363_vm1, %v1192_v11  ;;  %v1130_v36 = vadd.f32 %v16574_v25, %v1059_v15  ;;  %v15191_v30 = vpop.f32.mrb[34].mxu0  ;;  %v3431_v13 = vsel %vm16897_vm5, %v3175_v62, 0.0  ;;  %v16932_v38 = vpack.c.bf16 %v6485_v8, %v6484_v44 }
 0x138   : > { %21136 = vst [vmem:[#allocation28_spill] sm:$0xff] %v16922_v55  ;;  %v1195_v3 = vmax.f32 %v1131_v29, 0.0  ;;  %v1062_v35 = vmul.f32 %v15191_v30, %v16569_v23  ;;  %v871_v61 = vpop.f32.mrb[35].mxu0  ;;  %15280 = vmatprep.mubr.msk.f32.mxu1 %vm363_vm1, %v3431_v13  ;;  %vm16936_vm4 = vcmp.gt.s32.totalorder %v1569_v14, 0  ;;  %v21137_v11 = vmov 0  ;;  %v5139_v44 = vld [vmem:[#allocation2 + $0x19] sm:$0xff] }
 0x139   : > { %v21138_v11 = vsel %vm16936_vm4, 4294967295, %v21137_v11  ;;  %v1194_v15 = vmax.f32 %v1130_v36, 0.0  ;;  %v1061_v62 = vmul.f32 %v16569_v23, %v871_v61  ;;  %15281 = vmatmul.mubr.msk.f32.vlgmr.msra.gmra.mrb[0].mxu1 %vm363_vm1, %v3176_v5  ;;  %15439 = vmatmul.mubr.f32.vlgmr.msra.gmra.mrb[92].mxu0 %v20868_v0  ;;  %v5140_v8 = vld [vmem:[#allocation2 + $0x21] sm:$0xff]  ;;  %v1597_v30 = vand.u32 15, %v1325_v42  ;;  %v5141_v42 = vld [vmem:[#allocation2 + $0x29] sm:$0xff] }
 0x13a   : > { %1259 = vst.msk [vmem:[#allocation2 + $0x120] sm:$0xff] %vm363_vm1, %v1195_v3  ;;  %v1133_v29 = vadd.f32 %v16574_v25, %v1062_v35  ;;  %16257 = vmatpush3.bf16.msra.mxu1 %v16563_v21  ;;  %15441 = vmatprep.mubr.msk.f32.mxu0 %vm363_vm1, %v5139_v44  ;;  %v3177_v14 = vld [vmem:[#allocation2 + $0xf7] sm:$0xff]  ;;  %vm16947_vm5 = vcmp.lt.s32.totalorder %v1534_v49, 15  ;;  %v21139_v36 = vmov 0  ;;  %v1548_v5 = vand.u32 15, %v1318_v7 }
 0x13b   : > { %v21140_v36 = vsel %vm16947_vm5, 4294967295, %v21139_v36  ;;  %v16951_v13 = vld [vmem:[#allocation2 + $0xf1] sm:$0xff]  ;;  %1258 = vst.msk [vmem:[#allocation2 + $0x118] sm:$0xff] %vm363_vm1, %v1194_v15  ;;  %v1132_v61 = vadd.f32 %v16574_v25, %v1061_v62  ;;  %v15194_v3 = vpop.f32.mrb[36].mxu0  ;;  %v3433_v35 = vsel %vm16936_vm4, %v3177_v14, 0.0  ;;  %v1327_v21 = vadd.s32 288, %v16577_v28  ;;  %16263 = vmatprep.subr.bf16.mxu1 %v16932_v38  ;;  %16269 = vmatpush3.bf16.msra.mxu0 %v16656_v48 }
 0x13c   : > { %21141 = vst [vmem:[#allocation29_spill] sm:$0xff] %v21140_v36  ;;  %21142 = vst [vmem:[#allocation30_spill] sm:$0xff] %v16951_v13  ;;  %v1197_v49 = vmax.f32 %v1133_v29, 0.0  ;;  %v1064_v7 = vmul.f32 %v15194_v3, %v16569_v23  ;;  %v881_v15 = vpop.f32.mrb[37].mxu0  ;;  %15283 = vmatprep.mubr.msk.f32.mxu1 %vm363_vm1, %v3433_v35  ;;  %v3178_v62 = vld [vmem:[#allocation2 + $0xff] sm:$0xff]  ;;  %v5396_v44 = vsel %vm16660_vm6, %v5140_v8, 0.0 }
 0x13d   : > { %v1196_v14 = vmax.f32 %v1132_v61, 0.0  ;;  %v1063_v16 = vmul.f32 %v16569_v23, %v881_v15  ;;  %15284 = vmatmul.mubr.msk.f32.gmra.mrb[2].mxu1 %vm363_vm1, %v3178_v62  ;;  %15442 = vmatmul.mubr.msk.f32.gmra.mrb[94].mxu0 %vm363_vm1, %v5396_v44  ;;  %vm16974_vm4 = vcmp.lt.s32.totalorder %v1548_v5, 15  ;;  %v21143_v29 = vmov 0 }
 0x13e   : > { %1261 = vst.msk [vmem:[#allocation2 + $0x130] sm:$0xff] %vm363_vm1, %v1197_v49  ;;  %v1135_v48 = vadd.f32 %v16574_v25, %v1064_v7  ;;  %15444 = vmatprep.mubr.msk.f32.mxu0 %vm363_vm1, %v5141_v42  ;;  %15286 = vmatprep.mubr.f32.mxu1 %v20868_v0  ;;  %v21144_v29 = vsel %vm16974_vm4, 4294967295, %v21143_v29  ;;  %v16978_v8 = vld [vmem:[#allocation2 + $0x101] sm:$0xff]  ;;  %vm16982_vm6 = vcmp.gt.s32.totalorder %v1597_v30, 0  ;;  %v21147_v35 = vmov 0 }
 0x13f   : > { %21145 = vst [vmem:[#allocation31_spill] sm:$0xff] %v21144_v29  ;;  %21146 = vst [vmem:[#allocation32_spill] sm:$0xff] %v16978_v8  ;;  %v1134_v61 = vadd.f32 %v16574_v25, %v1063_v16  ;;  %v15197_v3 = vpop.f32.mrb[38].mxu0  ;;  %v21148_v35 = vsel %vm16982_vm6, 4294967295, %v21147_v35  ;;  %v1611_v49 = vand.u32 15, %v1327_v21  ;;  %v5398_v62 = vsel %vm16686_vm8, %v5142_v41, 0.0 }
 0x140   : > { %1260 = vst.msk [vmem:[#allocation2 + $0x128] sm:$0xff] %vm363_vm1, %v1196_v14  ;;  %v1199_v5 = vmax.f32 %v1135_v48, 0.0  ;;  %v1066_v7 = vmul.f32 %v15197_v3, %v16569_v23  ;;  %v891_v15 = vpop.f32.mrb[39].mxu0  ;;  %v1329_v44 = vadd.s32 304, %v16577_v28  ;;  %v5143_v21 = vld [vmem:[#allocation2 + $0x39] sm:$0xff] }
 0x141   : > { %v1198_v16 = vmax.f32 %v1134_v61, 0.0  ;;  %v1065_v30 = vmul.f32 %v16569_v23, %v891_v15  ;;  %15287 = vmatmul.mubr.f32.gmra.mrb[4].mxu1 %v20868_v0  ;;  %15445 = vmatmul.mubr.msk.f32.gmra.mrb[96].mxu0 %vm363_vm1, %v5398_v62  ;;  %vm17003_vm8 = vcmp.gt.s32.totalorder %v1611_v49, 0  ;;  %v21149_v15 = vmov 0 }
 0x142   : > { %1263 = vst.msk [vmem:[#allocation2 + $0x140] sm:$0xff] %vm363_vm1, %v1199_v5  ;;  %v1137_v14 = vadd.f32 %v16574_v25, %v1066_v7  ;;  %15447 = vmatprep.mubr.msk.f32.mxu0 %vm363_vm1, %v5143_v21  ;;  %v3181_v48 = vld [vmem:[#allocation2 + $0x117] sm:$0xff]  ;;  %v21150_v15 = vsel %vm17003_vm8, 4294967295, %v21149_v15  ;;  %v1331_v62 = vadd.s32 320, %v16577_v28  ;;  %v3182_v21 = vld [vmem:[#allocation2 + $0x11f] sm:$0xff] }
 0x143   : > { %1262 = vst.msk [vmem:[#allocation2 + $0x138] sm:$0xff] %vm363_vm1, %v1198_v16  ;;  %v1136_v41 = vadd.f32 %v16574_v25, %v1065_v30  ;;  %v15200_v3 = vpop.f32.mrb[40].mxu0  ;;  %v3437_v61 = vsel %vm16982_vm6, %v3181_v48, 0.0  ;;  %v5400_v16 = vsel %vm16711_vm10, %v16664_v52, 0.0  ;;  %v1625_v30 = vand.u32 15, %v1329_v44  ;;  %v5145_v48 = vld [vmem:[#allocation2 + $0x49] sm:$0xff] }
 0x144   : > { %v1201_v5 = vmax.f32 %v1137_v14, 0.0  ;;  %v1068_v7 = vmul.f32 %v15200_v3, %v16569_v23  ;;  %v901_v42 = vpop.f32.mrb[41].mxu0  ;;  %15289 = vmatprep.mubr.msk.f32.mxu1 %vm363_vm1, %v3437_v61  ;;  %v1326_v61 = vadd.s32 280, %v16577_v28 }
 0x145   : > { %v1200_v17 = vmax.f32 %v1136_v41, 0.0  ;;  %v1067_v49 = vmul.f32 %v16569_v23, %v901_v42  ;;  %15290 = vmatmul.mubr.msk.f32.gmra.mrb[6].mxu1 %vm363_vm1, %v3182_v21  ;;  %15448 = vmatmul.mubr.msk.f32.gmra.mrb[98].mxu0 %vm363_vm1, %v5400_v16  ;;  %v1639_v21 = vand.u32 15, %v1331_v62  ;;  %v1333_v16 = vadd.s32 336, %v16577_v28 }
 0x146   : > { %1265 = vst.msk [vmem:[#allocation2 + $0x150] sm:$0xff] %vm363_vm1, %v1201_v5  ;;  %v1139_v14 = vadd.f32 %v16574_v25, %v1068_v7  ;;  %15450 = vmatprep.mubr.msk.f32.mxu0 %vm363_vm1, %v5145_v48  ;;  %vm17030_vm10 = vcmp.gt.s32.totalorder %v1625_v30, 0  ;;  %v1328_v30 = vadd.s32 296, %v16577_v28 }
 0x147   : > { %v3183_v3 = vld [vmem:[#allocation2 + $0x127] sm:$0xff]  ;;  %1264 = vst.msk [vmem:[#allocation2 + $0x148] sm:$0xff] %vm363_vm1, %v1200_v17  ;;  %v1138_v44 = vadd.f32 %v16574_v25, %v1067_v49  ;;  %v15203_v41 = vpop.f32.mrb[42].mxu0  ;;  %v3184_v48 = vld [vmem:[#allocation2 + $0x12f] sm:$0xff]  ;;  %v5402_v17 = vsel %vm16736_vm12, %v16690_v10, 0.0  ;;  %v21151_v49 = vmov 0 }
 0x148   : > { %v3439_v42 = vsel %vm17003_vm8, %v3183_v3, 0.0  ;;  %v1203_v60 = vmax.f32 %v1139_v14, 0.0  ;;  %v1070_v5 = vmul.f32 %v15203_v41, %v16569_v23  ;;  %v911_v7 = vpop.f32.mrb[43].mxu0  ;;  %v21152_v49 = vsel %vm17030_vm10, 4294967295, %v21151_v49  ;;  %v5147_v14 = vld [vmem:[#allocation2 + $0x59] sm:$0xff] }
 0x149   : > { %15292 = vmatprep.mubr.msk.f32.mxu1 %vm363_vm1, %v3439_v42  ;;  %v1202_v0 = vmax.f32 %v1138_v44, 0.0  ;;  %v1069_v62 = vmul.f32 %v16569_v23, %v911_v7  ;;  %15451 = vmatmul.mubr.msk.f32.gmra.mrb[100].mxu0 %vm363_vm1, %v5402_v17  ;;  %v1604_v42 = vand.u32 15, %v1326_v61  ;;  %vm17045_vm12 = vcmp.gt.s32.totalorder %v1639_v21, 0 }
 0x14a   : > { %15293 = vmatmul.mubr.msk.f32.gmra.mrb[8].mxu1 %vm363_vm1, %v3184_v48  ;;  %1267 = vst.msk [vmem:[#allocation2 + $0x160] sm:$0xff] %vm363_vm1, %v1203_v60  ;;  %v1141_v3 = vadd.f32 %v16574_v25, %v1070_v5  ;;  %15453 = vmatprep.mubr.msk.f32.mxu0 %vm363_vm1, %v5147_v14  ;;  %v3185_v41 = vld [vmem:[#allocation2 + $0x137] sm:$0xff]  ;;  %v21153_v17 = vmov 0  ;;  %v1653_v60 = vand.u32 15, %v1333_v16  ;;  %v3186_v61 = vld [vmem:[#allocation2 + $0x13f] sm:$0xff]  ;;  %v5149_v16 = vld [vmem:[#allocation2 + $0x69] sm:$0xff] }
 0x14b   : > { %1266 = vst.msk [vmem:[#allocation2 + $0x158] sm:$0xff] %vm363_vm1, %v1202_v0  ;;  %v1140_v44 = vadd.f32 %v16574_v25, %v1069_v62  ;;  %v15206_v7 = vpop.f32.mrb[44].mxu0  ;;  %v3441_v48 = vsel %vm17030_vm10, %v3185_v41, 0.0  ;;  %v21154_v17 = vsel %vm17045_vm12, 4294967295, %v21153_v17  ;;  %v5404_v0 = vsel %vm16761_vm14, %v16715_v34, 0.0 }
 0x14c   : > { %v1205_v5 = vmax.f32 %v1141_v3, 0.0  ;;  %v1072_v14 = vmul.f32 %v15206_v7, %v16569_v23  ;;  %v921_v10 = vpop.f32.mrb[45].mxu0  ;;  %15295 = vmatprep.mubr.msk.f32.mxu1 %vm363_vm1, %v3441_v48  ;;  %v1335_v62 = vadd.s32 352, %v16577_v28  ;;  %v1330_v3 = vadd.s32 312, %v16577_v28 }
 0x14d   : > { %v1204_v52 = vmax.f32 %v1140_v44, 0.0  ;;  %v1071_v21 = vmul.f32 %v16569_v23, %v921_v10  ;;  %15454 = vmatmul.mubr.msk.f32.gmra.mrb[102].mxu0 %vm363_vm1, %v5404_v0  ;;  %v1337_v48 = vadd.s32 368, %v16577_v28  ;;  %vm17063_vm14 = vcmp.lt.s32.totalorder %v1604_v42, 15  ;;  %v5151_v42 = vld [vmem:[#allocation2 + $0x79] sm:$0xff] }
 0x14e   : > { %15296 = vmatmul.mubr.msk.f32.gmra.mrb[10].mxu1 %vm363_vm1, %v3186_v61  ;;  %1269 = vst.msk [vmem:[#allocation2 + $0x170] sm:$0xff] %vm363_vm1, %v1205_v5  ;;  %v1143_v41 = vadd.f32 %v16574_v25, %v1072_v14  ;;  %15456 = vmatprep.mubr.msk.f32.mxu0 %vm363_vm1, %v5149_v16  ;;  %v3187_v7 = vld [vmem:[#allocation2 + $0x147] sm:$0xff]  ;;  %v21155_v44 = vmov 0  ;;  %v1618_v61 = vand.u32 15, %v1328_v30  ;;  %vm17073_vm10 = vcmp.gt.s32.totalorder %v1653_v60, 0 }
 0x14f   : > { %v21156_v44 = vsel %vm17063_vm14, 4294967295, %v21155_v44  ;;  %v17067_v10 = vld [vmem:[#allocation2 + $0x141] sm:$0xff]  ;;  %1268 = vst.msk [vmem:[#allocation2 + $0x168] sm:$0xff] %vm363_vm1, %v1204_v52  ;;  %v1142_v0 = vadd.f32 %v16574_v25, %v1071_v21  ;;  %v15209_v34 = vpop.f32.mrb[46].mxu0  ;;  %v3443_v5 = vsel %vm17045_vm12, %v3187_v7, 0.0  ;;  %v21159_v14 = vmov 0 }
 0x150   : > { %21157 = vst [vmem:[#allocation33_spill] sm:$0xff] %v21156_v44  ;;  %21158 = vst [vmem:[#allocation34_spill] sm:$0xff] %v17067_v10  ;;  %v21160_v14 = vsel %vm17073_vm10, 4294967295, %v21159_v14  ;;  %v1207_v16 = vmax.f32 %v1143_v41, 0.0  ;;  %v1074_v19 = vmul.f32 %v15209_v34, %v16569_v23  ;;  %v931_v30 = vpop.f32.mrb[47].mxu0  ;;  %15298 = vmatprep.mubr.msk.f32.mxu1 %vm363_vm1, %v3443_v5  ;;  %v3188_v52 = vld [vmem:[#allocation2 + $0x14f] sm:$0xff] }
 0x151   : > { %v5406_v21 = vsel %vm16786_vm0, %v16740_v58, 0.0  ;;  %v1667_v7 = vand.u32 15, %v1335_v62  ;;  %v1206_v60 = vmax.f32 %v1142_v0, 0.0  ;;  %v1073_v57 = vmul.f32 %v16569_v23, %v931_v30 }
 0x152   : > { %15299 = vmatmul.mubr.msk.f32.gmra.mrb[12].mxu1 %vm363_vm1, %v3188_v52  ;;  %15457 = vmatmul.mubr.msk.f32.gmra.mrb[104].mxu0 %vm363_vm1, %v5406_v21  ;;  %v1632_v41 = vand.u32 15, %v1330_v3  ;;  %1271 = vst.msk [vmem:[#allocation2 + $0x180] sm:$0xff] %vm363_vm1, %v1207_v16  ;;  %v1145_v34 = vadd.f32 %v16574_v25, %v1074_v19  ;;  %v3189_v5 = vld [vmem:[#allocation2 + $0x157] sm:$0xff]  ;;  %v1681_v33 = vand.u32 15, %v1337_v48  ;;  %vm17091_vm12 = vcmp.lt.s32.totalorder %v1618_v61, 15 }
 0x153   : > { %15459 = vmatprep.mubr.msk.f32.mxu0 %vm363_vm1, %v5151_v42  ;;  %v21161_v58 = vmov 0  ;;  %v17095_v62 = vld [vmem:[#allocation2 + $0x151] sm:$0xff]  ;;  %v1332_v23 = vadd.s32 328, %v16577_v28  ;;  %1270 = vst.msk [vmem:[#allocation2 + $0x178] sm:$0xff] %vm363_vm1, %v1206_v60  ;;  %v17102_v3 = vld [vmem:[%s20828_s3] ss:$0 sm:$0xff] }
 0x154   : > { %v21162_v58 = vsel %vm17091_vm12, 4294967295, %v21161_v58  ;;  %21164 = vst [vmem:[#allocation36_spill] sm:$0xff] %v17095_v62  ;;  %v1144_v25 = vadd.f32 %v17102_v3, %v1073_v57  ;;  %v15212_v19 = vpop.f32.mrb[48].mxu0  ;;  %v3445_v48 = vsel %vm17073_vm10, %v3189_v5, 0.0  ;;  %v1339_v61 = vadd.s32 384, %v16577_v28  ;;  %v3190_v57 = vld [vmem:[#allocation2 + $0x15f] sm:$0xff] }
 0x155   : > { %21163 = vst [vmem:[#allocation35_spill] sm:$0xff] %v21162_v58  ;;  %v1209_v42 = vmax.f32 %v1145_v34, 0.0  ;;  %v17114_v16 = vld [vmem:[%s20827_s2] ss:$0 sm:$0xff]  ;;  %v941_v52 = vpop.f32.mrb[49].mxu0  ;;  %15301 = vmatprep.mubr.msk.f32.mxu1 %vm363_vm1, %v3445_v48  ;;  %v5408_v21 = vsel %vm16811_vm15, %v16765_v20, 0.0 }
 0x156   : > { %v1076_v30 = vmul.f32 %v17114_v16, %v15212_v19  ;;  %vm17121_vm0 = vcmp.gt.s32.totalorder %v1667_v7, 0  ;;  %v21165_v60 = vmov 0  ;;  %v1208_v34 = vmax.f32 %v1144_v25, 0.0  ;;  %15302 = vmatmul.mubr.msk.f32.gmra.mrb[14].mxu1 %vm363_vm1, %v3190_v57  ;;  %15460 = vmatmul.mubr.msk.f32.gmra.mrb[106].mxu0 %vm363_vm1, %v5408_v21  ;;  %v5153_v19 = vld [vmem:[#allocation2 + $0x89] sm:$0xff] }
 0x157   : > { %v21166_v60 = vsel %vm17121_vm0, 4294967295, %v21165_v60  ;;  %v1075_v5 = vmul.f32 %v17114_v16, %v941_v52  ;;  %vm17128_vm10 = vcmp.lt.s32.totalorder %v1632_v41, 15  ;;  %v21168_v0 = vmov 0  ;;  %1273 = vst.msk [vmem:[#allocation2 + $0x190] sm:$0xff] %vm363_vm1, %v1209_v42  ;;  %15462 = vmatprep.mubr.msk.f32.mxu0 %vm363_vm1, %v5153_v19  ;;  %v3191_v7 = vld [vmem:[#allocation2 + $0x167] sm:$0xff]  ;;  %v15215_v20 = vpop.f32.mrb[50].mxu0 }
 0x158   : > { %21167 = vst [vmem:[#allocation37_spill] sm:$0xff] %v21166_v60  ;;  %v21169_v0 = vsel %vm17128_vm10, 4294967295, %v21168_v0  ;;  %v1147_v48 = vadd.f32 %v17102_v3, %v1076_v30  ;;  %vm17135_vm15 = vcmp.gt.s32.totalorder %v1681_v33, 0  ;;  %v21171_v25 = vmov 0  ;;  %v17139_v52 = vld [vmem:[#allocation2 + $0x161] sm:$0xff]  ;;  %1272 = vst.msk [vmem:[#allocation2 + $0x188] sm:$0xff] %vm363_vm1, %v1208_v34 }
 0x159   : > { %21170 = vst [vmem:[#allocation38_spill] sm:$0xff] %v21169_v0  ;;  %v21172_v25 = vsel %vm17135_vm15, 4294967295, %v21171_v25  ;;  %21174 = vst [vmem:[#allocation40_spill] sm:$0xff] %v17139_v52  ;;  %v1646_v57 = vand.u32 15, %v1332_v23  ;;  %v1334_v21 = vadd.s32 344, %v16577_v28  ;;  %v1146_v41 = vadd.f32 %v17102_v3, %v1075_v5  ;;  %v951_v50 = vpop.f32.mrb[51].mxu0 }
 0x15a   : > { %21173 = vst [vmem:[#allocation39_spill] sm:$0xff] %v21172_v25  ;;  %v3447_v42 = vsel %vm17121_vm0, %v3191_v7, 0.0  ;;  %v1695_v30 = vand.u32 15, %v1339_v61  ;;  %v1211_v19 = vmax.f32 %v1147_v48, 0.0  ;;  %v1078_v22 = vmul.f32 %v17114_v16, %v15215_v20  ;;  %v3192_v23 = vld [vmem:[#allocation2 + $0x16f] sm:$0xff]  ;;  %v5155_v48 = vld [vmem:[#allocation2 + $0x99] sm:$0xff] }
 0x15b   : > { %15304 = vmatprep.mubr.msk.f32.mxu1 %vm363_vm1, %v3447_v42  ;;  %v5410_v34 = vsel %vm16836_vm13, %v16790_v53, 0.0  ;;  %v1341_v5 = vadd.s32 400, %v16577_v28  ;;  %v1210_v9 = vmax.f32 %v1146_v41, 0.0  ;;  %v1077_v61 = vmul.f32 %v17114_v16, %v951_v50  ;;  %v3193_v42 = vld [vmem:[#allocation2 + $0x177] sm:$0xff]  ;;  %v15218_v53 = vpop.f32.mrb[52].mxu0 }
 0x15c   : > { %15305 = vmatmul.mubr.msk.f32.gmra.mrb[16].mxu1 %vm363_vm1, %v3192_v23  ;;  %15463 = vmatmul.mubr.msk.f32.gmra.mrb[108].mxu0 %vm363_vm1, %v5410_v34  ;;  %v1336_v20 = vadd.s32 360, %v16577_v28  ;;  %1275 = vst.msk [vmem:[#allocation2 + $0x1a0] sm:$0xff] %vm363_vm1, %v1211_v19  ;;  %v1149_v7 = vadd.f32 %v17102_v3, %v1078_v22  ;;  %v1343_v33 = vadd.s32 416, %v16577_v28  ;;  %vm17163_vm13 = vcmp.lt.s32.totalorder %v1646_v57, 15  ;;  %v17167_v50 = vld [vmem:[#allocation2 + $0x171] sm:$0xff]  ;;  %v5157_v57 = vld [vmem:[#allocation2 + $0xa9] sm:$0xff] }
 0x15d   : > { %15465 = vmatprep.mubr.msk.f32.mxu0 %vm363_vm1, %v5155_v48  ;;  %v21175_v41 = vmov 0  ;;  %21178 = vst [vmem:[#allocation42_spill] sm:$0xff] %v17167_v50  ;;  %v1660_v23 = vand.u32 15, %v1334_v21  ;;  %1274 = vst.msk [vmem:[#allocation2 + $0x198] sm:$0xff] %vm363_vm1, %v1210_v9  ;;  %v1148_v34 = vadd.f32 %v17102_v3, %v1077_v61  ;;  %v3449_v22 = vsel %vm17135_vm15, %v3193_v42, 0.0  ;;  %v961_v21 = vpop.f32.mrb[53].mxu0 }
 0x15e   : > { %v21176_v41 = vsel %vm17163_vm13, 4294967295, %v21175_v41  ;;  %vm17173_vm0 = vcmp.gt.s32.totalorder %v1695_v30, 0  ;;  %v21179_v19 = vmov 0  ;;  %v1213_v48 = vmax.f32 %v1149_v7, 0.0  ;;  %15307 = vmatprep.mubr.msk.f32.mxu1 %vm363_vm1, %v3449_v22  ;;  %v3194_v9 = vld [vmem:[#allocation2 + $0x17f] sm:$0xff] }
 0x15f   : > { %21177 = vst [vmem:[#allocation41_spill] sm:$0xff] %v21176_v41  ;;  %v21180_v19 = vsel %vm17173_vm0, 4294967295, %v21179_v19  ;;  %v1080_v63 = vmul.f32 %v17114_v16, %v15218_v53  ;;  %v5412_v61 = vsel %vm16862_vm11, %v16815_v27, 0.0  ;;  %v1709_v42 = vand.u32 15, %v1341_v5  ;;  %v3195_v54 = vld [vmem:[#allocation2 + $0x187] sm:$0xff]  ;;  %v3196_v25 = vld [vmem:[#allocation2 + $0x18f] sm:$0xff] }
 0x160   : > { %21181 = vst [vmem:[#allocation43_spill] sm:$0xff] %v21180_v19  ;;  %v1212_v30 = vmax.f32 %v1148_v34, 0.0  ;;  %v1079_v51 = vmul.f32 %v17114_v16, %v961_v21  ;;  %15308 = vmatmul.mubr.msk.f32.gmra.mrb[18].mxu1 %vm363_vm1, %v3194_v9  ;;  %15466 = vmatmul.mubr.msk.f32.gmra.mrb[110].mxu0 %vm363_vm1, %v5412_v61  ;;  %v1320_v7 = vadd.s32 232, %v16577_v28  ;;  %v1674_v53 = vand.u32 15, %v1336_v20  ;;  %1277 = vst.msk [vmem:[#allocation2 + $0x1b0] sm:$0xff] %vm363_vm1, %v1213_v48  ;;  %v17196_v34 = vld [vmem:[#allocation2 + $0x181] sm:$0xff] }
 0x161   : > { %v1151_v22 = vadd.f32 %v17102_v3, %v1080_v63  ;;  %15468 = vmatprep.mubr.msk.f32.mxu0 %vm363_vm1, %v5157_v57  ;;  %v1723_v27 = vand.u32 15, %v1343_v33  ;;  %vm17192_vm11 = vcmp.lt.s32.totalorder %v1660_v23, 15  ;;  %v21182_v5 = vmov 0  ;;  %21185 = vst [vmem:[#allocation45_spill] sm:$0xff] %v17196_v34  ;;  %v15221_v9 = vpop.f32.mrb[54].mxu0 }
 0x162   : > { %v21183_v5 = vsel %vm17192_vm11, 4294967295, %v21182_v5  ;;  %v1338_v21 = vadd.s32 376, %v16577_v28  ;;  %1276 = vst.msk [vmem:[#allocation2 + $0x1a8] sm:$0xff] %vm363_vm1, %v1212_v30  ;;  %v1150_v20 = vadd.f32 %v17102_v3, %v1079_v51  ;;  %v3451_v63 = vsel %vm17173_vm0, %v3195_v54, 0.0  ;;  %v971_v61 = vpop.f32.mrb[55].mxu0 }
 0x163   : > { %21184 = vst [vmem:[#allocation44_spill] sm:$0xff] %v21183_v5  ;;  %v1345_v57 = vadd.s32 432, %v16577_v28  ;;  %v1215_v23 = vmax.f32 %v1151_v22, 0.0  ;;  %v1082_v48 = vmul.f32 %v17114_v16, %v15221_v9  ;;  %15310 = vmatprep.mubr.msk.f32.mxu1 %vm363_vm1, %v3451_v63  ;;  %v5414_v51 = vsel %vm16886_vm9, %v16840_v1, 0.0  ;;  %v5159_v22 = vld [vmem:[#allocation2 + $0xb9] sm:$0xff] }
 0x164   : > { %vm17212_vm15 = vcmp.gt.s32.totalorder %v1709_v42, 0  ;;  %v21186_v30 = vmov 0  ;;  %v1214_v54 = vmax.f32 %v1150_v20, 0.0  ;;  %v1081_v19 = vmul.f32 %v17114_v16, %v971_v61  ;;  %15311 = vmatmul.mubr.msk.f32.gmra.mrb[20].mxu1 %vm363_vm1, %v3196_v25  ;;  %15469 = vmatmul.mubr.msk.f32.gmra.mrb[112].mxu0 %vm363_vm1, %v5414_v51  ;;  %v3197_v33 = vld [vmem:[#allocation2 + $0x197] sm:$0xff]  ;;  %v15224_v51 = vpop.f32.mrb[56].mxu0 }
 0x165   : > { %v21187_v30 = vsel %vm17212_vm15, 4294967295, %v21186_v30  ;;  %v1562_v9 = vand.u32 15, %v1320_v7  ;;  %vm17219_vm0 = vcmp.lt.s32.totalorder %v1674_v53, 15  ;;  %v21189_v63 = vmov 0  ;;  %1279 = vst.msk [vmem:[#allocation2 + $0x1c0] sm:$0xff] %vm363_vm1, %v1215_v23  ;;  %15471 = vmatprep.mubr.msk.f32.mxu0 %vm363_vm1, %v5159_v22  ;;  %v17230_v25 = vld [vmem:[#allocation2 + $0x191] sm:$0xff] }
 0x166   : > { %21188 = vst [vmem:[#allocation46_spill] sm:$0xff] %v21187_v30  ;;  %v21190_v63 = vsel %vm17219_vm0, 4294967295, %v21189_v63  ;;  %v1153_v42 = vadd.f32 %v17102_v3, %v1082_v48  ;;  %vm17226_vm9 = vcmp.gt.s32.totalorder %v1723_v27, 0  ;;  %v21192_v20 = vmov 0  ;;  %21195 = vst [vmem:[#allocation49_spill] sm:$0xff] %v17230_v25  ;;  %v981_v45 = vpop.f32.mrb[57].mxu0 }
 0x167   : > { %21191 = vst [vmem:[#allocation47_spill] sm:$0xff] %v21190_v63  ;;  %v21193_v20 = vsel %vm17226_vm9, 4294967295, %v21192_v20  ;;  %v1688_v61 = vand.u32 15, %v1338_v21  ;;  %v1340_v7 = vadd.s32 392, %v16577_v28  ;;  %1278 = vst.msk [vmem:[#allocation2 + $0x1b8] sm:$0xff] %vm363_vm1, %v1214_v54  ;;  %v1152_v53 = vadd.f32 %v17102_v3, %v1081_v19  ;;  %v3198_v21 = vld [vmem:[#allocation2 + $0x19f] sm:$0xff] }
 0x168   : > { %21194 = vst [vmem:[#allocation48_spill] sm:$0xff] %v21193_v20  ;;  %v3453_v23 = vsel %vm17212_vm15, %v3197_v33, 0.0  ;;  %v1737_v48 = vand.u32 15, %v1345_v57  ;;  %v1217_v22 = vmax.f32 %v1153_v42, 0.0  ;;  %v1084_v1 = vmul.f32 %v17114_v16, %v15224_v51  ;;  %v5161_v33 = vld [vmem:[#allocation2 + $0xc9] sm:$0xff] }
 0x169   : > { %15313 = vmatprep.mubr.msk.f32.mxu1 %vm363_vm1, %v3453_v23  ;;  %v5416_v19 = vsel %vm16914_vm7, %v16866_v46, 0.0  ;;  %v1347_v54 = vadd.s32 448, %v16577_v28  ;;  %v1216_v30 = vmax.f32 %v1152_v53, 0.0  ;;  %v1083_v57 = vmul.f32 %v17114_v16, %v981_v45  ;;  %v3199_v53 = vld [vmem:[#allocation2 + $0x1a7] sm:$0xff]  ;;  %v15227_v46 = vpop.f32.mrb[58].mxu0 }
 0x16a   : > { %15314 = vmatmul.mubr.msk.f32.gmra.mrb[22].mxu1 %vm363_vm1, %v3198_v21  ;;  %15472 = vmatmul.mubr.msk.f32.gmra.mrb[114].mxu0 %vm363_vm1, %v5416_v19  ;;  %vm17249_vm15 = vcmp.lt.s32.totalorder %v1562_v9, 15  ;;  %v21196_v42 = vmov 0  ;;  %v1342_v51 = vadd.s32 408, %v16577_v28  ;;  %1281 = vst.msk [vmem:[#allocation2 + $0x1d0] sm:$0xff] %vm363_vm1, %v1217_v22  ;;  %v1155_v23 = vadd.f32 %v17102_v3, %v1084_v1  ;;  %v17262_v19 = vld [vmem:[#allocation2 + $0x1a1] sm:$0xff] }
 0x16b   : > { %v21197_v42 = vsel %vm17249_vm15, 4294967295, %v21196_v42  ;;  %15474 = vmatprep.mubr.msk.f32.mxu0 %vm363_vm1, %v5161_v33  ;;  %v1349_v45 = vadd.s32 464, %v16577_v28  ;;  %vm17258_vm7 = vcmp.lt.s32.totalorder %v1688_v61, 15  ;;  %v21199_v21 = vmov 0  ;;  %21202 = vst [vmem:[#allocation52_spill] sm:$0xff] %v17262_v19  ;;  %1280 = vst.msk [vmem:[#allocation2 + $0x1c8] sm:$0xff] %vm363_vm1, %v1216_v30 }
 0x16c   : > { %21198 = vst [vmem:[#allocation50_spill] sm:$0xff] %v21197_v42  ;;  %v21200_v21 = vsel %vm17258_vm7, 4294967295, %v21199_v21  ;;  %v1702_v9 = vand.u32 15, %v1340_v7  ;;  %v1154_v27 = vadd.f32 %v17102_v3, %v1083_v57  ;;  %v3455_v1 = vsel %vm17226_vm9, %v3199_v53, 0.0  ;;  %v991_v7 = vpop.f32.mrb[59].mxu0  ;;  %v3200_v30 = vld [vmem:[#allocation2 + $0x1af] sm:$0xff] }
 0x16d   : > { %21201 = vst [vmem:[#allocation51_spill] sm:$0xff] %v21200_v21  ;;  %vm17268_vm8 = vcmp.gt.s32.totalorder %v1737_v48, 0  ;;  %v21203_v22 = vmov 0  ;;  %v1219_v33 = vmax.f32 %v1155_v23, 0.0  ;;  %v1086_v39 = vmul.f32 %v17114_v16, %v15227_v46  ;;  %15316 = vmatprep.mubr.msk.f32.mxu1 %vm363_vm1, %v3455_v1  ;;  %v5163_v61 = vld [vmem:[#allocation2 + $0xd9] sm:$0xff]  ;;  %v17976_v42 = vld [vmem:[#allocation2 + $0x6f] sm:$0xff] }
 0x16e   : > { %v21204_v22 = vsel %vm17268_vm8, 4294967295, %v21203_v22  ;;  %v5418_v57 = vsel %vm16947_vm5, %v16890_v32, 0.0  ;;  %v1751_v53 = vand.u32 15, %v1347_v54  ;;  %v1218_v48 = vmax.f32 %v1154_v27, 0.0  ;;  %15317 = vmatmul.mubr.msk.f32.gmra.mrb[24].mxu1 %vm363_vm1, %v3200_v30  ;;  %v3201_v36 = vld [vmem:[#allocation2 + $0x1b7] sm:$0xff]  ;;  %v15230_v30 = vpop.f32.mrb[60].mxu0 }
 0x16f   : > { %21205 = vst [vmem:[#allocation53_spill] sm:$0xff] %v21204_v22  ;;  %v1085_v20 = vmul.f32 %v17114_v16, %v991_v7  ;;  %15475 = vmatmul.mubr.msk.f32.gmra.mrb[116].mxu0 %vm363_vm1, %v5418_v57  ;;  %v1322_v23 = vadd.s32 248, %v16577_v28  ;;  %v1716_v46 = vand.u32 15, %v1342_v51  ;;  %1283 = vst.msk [vmem:[#allocation2 + $0x1e0] sm:$0xff] %vm363_vm1, %v1219_v33  ;;  %v1157_v1 = vadd.f32 %v17102_v3, %v1086_v39  ;;  %v17291_v54 = vld [vmem:[#allocation2 + $0x1b1] sm:$0xff]  ;;  %v1001_v57 = vpop.f32.mrb[61].mxu0 }
 0x170   : > { %15477 = vmatprep.mubr.msk.f32.mxu0 %vm363_vm1, %v5163_v61  ;;  %v1765_v32 = vand.u32 15, %v1349_v45  ;;  %vm17287_vm5 = vcmp.lt.s32.totalorder %v1702_v9, 15  ;;  %v21206_v27 = vmov 0  ;;  %21209 = vst [vmem:[#allocation55_spill] sm:$0xff] %v17291_v54  ;;  %v1344_v7 = vadd.s32 424, %v16577_v28  ;;  %1282 = vst.msk [vmem:[#allocation2 + $0x1d8] sm:$0xff] %vm363_vm1, %v1218_v48 }
 0x171   : > { %v21207_v27 = vsel %vm17287_vm5, 4294967295, %v21206_v27  ;;  %v1156_v51 = vadd.f32 %v17102_v3, %v1085_v20  ;;  %v3457_v39 = vsel %vm17268_vm8, %v3201_v36, 0.0  ;;  %v1351_v61 = vadd.s32 480, %v16577_v28  ;;  %v3202_v60 = vld [vmem:[#allocation2 + $0x1bf] sm:$0xff] }
 0x172   : > { %21208 = vst [vmem:[#allocation54_spill] sm:$0xff] %v21207_v27  ;;  %v1221_v9 = vmax.f32 %v1157_v1, 0.0  ;;  %v1088_v33 = vmul.f32 %v17114_v16, %v15230_v30  ;;  %15319 = vmatprep.mubr.msk.f32.mxu1 %vm363_vm1, %v3457_v39  ;;  %v5420_v20 = vsel %vm16974_vm4, %v16922_v55, 0.0  ;;  %vm17307_vm9 = vcmp.gt.s32.totalorder %v1751_v53, 0  ;;  %v5165_v1 = vld [vmem:[#allocation2 + $0xe9] sm:$0xff] }
 0x173   : > { %v21210_v48 = vmov 0  ;;  %v1220_v36 = vmax.f32 %v1156_v51, 0.0  ;;  %v1087_v22 = vmul.f32 %v17114_v16, %v1001_v57  ;;  %15320 = vmatmul.mubr.msk.f32.gmra.mrb[26].mxu1 %vm363_vm1, %v3202_v60  ;;  %15478 = vmatmul.mubr.msk.f32.gmra.mrb[118].mxu0 %vm363_vm1, %v5420_v20  ;;  %v1576_v30 = vand.u32 15, %v1322_v23  ;;  %v3203_v45 = vld [vmem:[#allocation2 + $0x1c7] sm:$0xff]  ;;  %v15233_v20 = vpop.f32.mrb[62].mxu0 }
 0x174   : > { %v21211_v48 = vsel %vm17307_vm9, 4294967295, %v21210_v48  ;;  %vm17314_vm8 = vcmp.lt.s32.totalorder %v1716_v46, 15  ;;  %v21213_v39 = vmov 0  ;;  %1285 = vst.msk [vmem:[#allocation2 + $0x1f0] sm:$0xff] %vm363_vm1, %v1221_v9  ;;  %v1159_v53 = vadd.f32 %v17102_v3, %v1088_v33  ;;  %15480 = vmatprep.mubr.msk.f32.mxu0 %vm363_vm1, %v5165_v1  ;;  %v17325_v60 = vld [vmem:[#allocation2 + $0x1c1] sm:$0xff]  ;;  %v1011_v29 = vpop.f32.mrb[63].mxu0 }
 0x175   : > { %21212 = vst [vmem:[#allocation56_spill] sm:$0xff] %v21211_v48  ;;  %v21214_v39 = vsel %vm17314_vm8, 4294967295, %v21213_v39  ;;  %vm17321_vm4 = vcmp.gt.s32.totalorder %v1765_v32, 0  ;;  %v21216_v51 = vmov 0  ;;  %21219 = vst [vmem:[#allocation59_spill] sm:$0xff] %v17325_v60  ;;  %v1730_v57 = vand.u32 15, %v1344_v7 }
 0x176   : > { %21215 = vst [vmem:[#allocation57_spill] sm:$0xff] %v21214_v39  ;;  %v21217_v51 = vsel %vm17321_vm4, 4294967295, %v21216_v51  ;;  %v1346_v23 = vadd.s32 440, %v16577_v28  ;;  %1284 = vst.msk [vmem:[#allocation2 + $0x1e8] sm:$0xff] %vm363_vm1, %v1220_v36  ;;  %v1158_v46 = vadd.f32 %v17102_v3, %v1087_v22  ;;  %v3459_v9 = vsel %vm17307_vm9, %v3203_v45, 0.0  ;;  %v3204_v7 = vld [vmem:[#allocation2 + $0x1cf] sm:$0xff] }
 0x177   : > { %21218 = vst [vmem:[#allocation58_spill] sm:$0xff] %v21217_v51  ;;  %v1779_v33 = vand.u32 15, %v1351_v61  ;;  %v1223_v1 = vmax.f32 %v1159_v53, 0.0  ;;  %v1090_v55 = vmul.f32 %v17114_v16, %v15233_v20  ;;  %15322 = vmatprep.mubr.msk.f32.mxu1 %vm363_vm1, %v3459_v9  ;;  %v5422_v22 = vsel %vm17249_vm15, %v16951_v13, 0.0  ;;  %v5167_v45 = vld [vmem:[#allocation2 + $0xf9] sm:$0xff]  ;;  %v5174_v32 = vld [vmem:[#allocation2 + $0x131] sm:$0xff] }
 0x178   : > { %v1353_v36 = vadd.s32 496, %v16577_v28  ;;  %v1222_v48 = vmax.f32 %v1158_v46, 0.0  ;;  %v1089_v61 = vmul.f32 %v17114_v16, %v1011_v29  ;;  %15323 = vmatmul.mubr.msk.f32.gmra.mrb[28].mxu1 %vm363_vm1, %v3204_v7  ;;  %15481 = vmatmul.mubr.msk.f32.gmra.mrb[120].mxu0 %vm363_vm1, %v5422_v22  ;;  %vm17344_vm9 = vcmp.lt.s32.totalorder %v1576_v30, 15  ;;  %v3205_v9 = vld [vmem:[#allocation2 + $0x1d7] sm:$0xff]  ;;  %v5181_v13 = vld [vmem:[#allocation2 + $0x169] sm:$0xff] }
 0x179   : > { %v21220_v53 = vmov 0  ;;  %1287 = vst.msk [vmem:[#allocation2 + $0x200] sm:$0xff] %vm363_vm1, %v1223_v1  ;;  %v1161_v20 = vadd.f32 %v17102_v3, %v1090_v55  ;;  %15483 = vmatprep.mubr.msk.f32.mxu0 %vm363_vm1, %v5167_v45  ;;  %vm17351_vm15 = vcmp.lt.s32.totalorder %v1730_v57, 15  ;;  %v21223_v46 = vmov 0  ;;  %v17355_v29 = vld [vmem:[#allocation2 + $0x1d1] sm:$0xff]  ;;  %v15240_v57 = vpop.f32.mrb[64].mxu0 }
 0x17a   : > { %v21221_v53 = vsel %vm17344_vm9, 4294967295, %v21220_v53  ;;  %v21224_v46 = vsel %vm17351_vm15, 4294967295, %v21223_v46  ;;  %21226 = vst [vmem:[#allocation62_spill] sm:$0xff] %v17355_v29  ;;  %v1744_v16 = vand.u32 15, %v1346_v23  ;;  %v1348_v7 = vadd.s32 456, %v16577_v28  ;;  %1286 = vst.msk [vmem:[#allocation2 + $0x1f8] sm:$0xff] %vm363_vm1, %v1222_v48 }
 0x17b   : > { %21222 = vst [vmem:[#allocation60_spill] sm:$0xff] %v21221_v53  ;;  %21225 = vst [vmem:[#allocation61_spill] sm:$0xff] %v21224_v46  ;;  %v1160_v30 = vadd.f32 %v17102_v3, %v1089_v61  ;;  %v3461_v1 = vsel %vm17321_vm4, %v3205_v9, 0.0  ;;  %v1225_v22 = vmax.f32 %v1161_v20, 0.0  ;;  %v3206_v45 = vld [vmem:[#allocation2 + $0x1df] sm:$0xff]  ;;  %v5424_v23 = vsel %vm17344_vm9, %v16978_v8, 0.0 }
 0x17c   : > { %15325 = vmatprep.mubr.msk.f32.mxu1 %vm363_vm1, %v3461_v1  ;;  %vm17369_vm6 = vcmp.gt.s32.totalorder %v1779_v33, 0  ;;  %v21227_v48 = vmov 0  ;;  %v1793_v3 = vand.u32 15, %v1353_v36  ;;  %4047 = vst.msk [vmem:[#allocation3 + $0x8] sm:$0xff] %vm363_vm1, %v15240_v57  ;;  %v3727_v61 = vpop.f32.mrb[65].mxu0  ;;  %15484 = vmatmul.mubr.msk.f32.gmra.mrb[122].mxu0 %vm363_vm1, %v5424_v23  ;;  %v21230_v1 = vmov 0.0  }
 0x17d   : > { %v21228_v48 = vsel %vm17369_vm6, 4294967295, %v21227_v48  ;;  %v1224_v9 = vmax.f32 %v1160_v30, 0.0  ;;  %15326 = vmatmul.mubr.msk.f32.gmra.mrb[30].mxu1 %vm363_vm1, %v3206_v45  ;;  %4046 = vst.msk [vmem:[#allocation3] sm:$0xff] %vm363_vm1, %v3727_v61  ;;  %1289 = vst.msk [vmem:[#allocation2 + $0x210] sm:$0xff] %vm363_vm1, %v1225_v22  ;;  %v3207_v20 = vld [vmem:[#allocation2 + $0x1e7] sm:$0xff]  ;;  %15486 = vmatprep.mubr.f32.mxu0 %v21230_v1  ;;  %vm17379_vm9 = vcmp.lt.s32.totalorder %v1744_v16, 15 }
 0x17e   : > { %21229 = vst [vmem:[#allocation63_spill] sm:$0xff] %v21228_v48  ;;  %v21231_v33 = vmov 0  ;;  %v17383_v36 = vld [vmem:[#allocation2 + $0x1e1] sm:$0xff]  ;;  %v1758_v57 = vand.u32 15, %v1348_v7  ;;  %v1350_v30 = vadd.s32 472, %v16577_v28  ;;  %v3463_v45 = vsel %vm17369_vm6, %v3207_v20, 0.0 }
 0x17f   : > { %v21232_v33 = vsel %vm17379_vm9, 4294967295, %v21231_v33  ;;  %21234 = vst [vmem:[#allocation65_spill] sm:$0xff] %v17383_v36  ;;  %1288 = vst.msk [vmem:[#allocation2 + $0x208] sm:$0xff] %vm363_vm1, %v1224_v9  ;;  %15328 = vmatprep.mubr.msk.f32.mxu1 %vm363_vm1, %v3463_v45  ;;  %v3208_v16 = vld [vmem:[#allocation2 + $0x1ef] sm:$0xff]  ;;  %vm17393_vm4 = vcmp.gt.s32.totalorder %v1793_v3, 0  ;;  %v21235_v23 = vmov 0 }
 0x180   : > { %21233 = vst [vmem:[#allocation64_spill] sm:$0xff] %v21232_v33  ;;  %v21236_v23 = vsel %vm17393_vm4, 4294967295, %v21235_v23  ;;  %15487 = vmatmul.mubr.f32.gmra.mrb[124].mxu0 %v21230_v1  ;;  %v5171_v7 = vld [vmem:[#allocation2 + $0x119] sm:$0xff]  ;;  %v5172_v61 = vld [vmem:[#allocation2 + $0x121] sm:$0xff]  ;;  %vm17400_vm6 = vcmp.lt.s32.totalorder %v1758_v57, 15  ;;  %v21238_v20 = vmov 0 }
 0x181   : > { %21237 = vst [vmem:[#allocation66_spill] sm:$0xff] %v21236_v23  ;;  %15329 = vmatmul.mubr.msk.f32.gmra.mrb[32].mxu1 %vm363_vm1, %v3208_v16  ;;  %15489 = vmatprep.mubr.msk.f32.mxu0 %vm363_vm1, %v5171_v7  ;;  %v3209_v9 = vld [vmem:[#allocation2 + $0x1f7] sm:$0xff]  ;;  %v21239_v20 = vsel %vm17400_vm6, 4294967295, %v21238_v20  ;;  %v1772_v45 = vand.u32 15, %v1350_v30  ;;  %v3210_v55 = vld [vmem:[#allocation2 + $0x1ff] sm:$0xff]  ;;  %v5428_v7 = vsel %vm17063_vm14, %v5172_v61, 0.0  ;;  %vm21282_vm14 = vnez %v21131_v6 }
 0x182   : > { %21240 = vst [vmem:[#allocation67_spill] sm:$0xff] %v21239_v20  ;;  %v17404_v22 = vld [vmem:[#allocation2 + $0x1f1] sm:$0xff]  ;;  %v3465_v3 = vsel %vm17393_vm4, %v3209_v9, 0.0  ;;  %v5173_v57 = vld [vmem:[#allocation2 + $0x129] sm:$0xff]  ;;  %v21242_v30 = vmov 0  ;;  %v5432_v61 = vsel %vm17128_vm10, %v17067_v10, 0.0  ;;  %vm21276_vm10 = vnez %v21118_v31 }
 0x183   : > { %21241 = vst [vmem:[#allocation68_spill] sm:$0xff] %v17404_v22  ;;  %15331 = vmatprep.mubr.msk.f32.mxu1 %vm363_vm1, %v3465_v3  ;;  %vm17418_vm4 = vcmp.lt.s32.totalorder %v1772_v45, 15  ;;  %v17431_v3 = vld [vmem:[#allocation2 + $0x18] sm:$0xff]  ;;  %v8346_v45 = vld [vmem:[%s20829_s4 + $0x50] sm:$0xff]  ;;  %v17480_v8 = vld [vmem:[#allocation2 + $0x40] sm:$0xff]  ;;  %v5440_v63 = vsel %vm17258_vm7, %v17196_v34, 0.0  ;;  %vm21264_vm7 = vnez %v21094_v4 }
 0x184   : > { %15490 = vmatmul.mubr.msk.f32.gmra.mrb[126].mxu0 %vm363_vm1, %v5428_v7  ;;  %v21243_v30 = vsel %vm17418_vm4, 4294967295, %v21242_v30  ;;  %v8347_v7 = vld [vmem:[%s20829_s4 + $0x58] sm:$0xff]  ;;  %v5177_v16 = vld [vmem:[#allocation2 + $0x149] sm:$0xff]  ;;  %v5442_v21 = vsel %vm17287_vm5, %v17230_v25, 0.0  ;;  %v5444_v27 = vsel %vm17314_vm8, %v17262_v19, 0.0  ;;  %v5446_v39 = vsel %vm17351_vm15, %v17291_v54, 0.0 }
 0x185   : > { %15332 = vmatmul.mubr.msk.f32.gmra.mrb[34].mxu1 %vm363_vm1, %v3210_v55  ;;  %15492 = vmatprep.mubr.msk.f32.mxu0 %vm363_vm1, %v5173_v57  ;;  %21244 = vst [vmem:[#allocation69_spill] sm:$0xff] %v21243_v30  ;;  %v5430_v55 = vsel %vm17091_vm12, %v5174_v32, 0.0  ;;  %v5175_v32 = vld [vmem:[#allocation2 + $0x139] sm:$0xff]  ;;  %v17442_v57 = vpack.c.bf16 %v8347_v7, %v8346_v45  ;;  %v17459_v45 = vld [vmem:[#allocation2 + $0x30] sm:$0xff]  ;;  %v5434_v7 = vsel %vm17163_vm13, %v17095_v62, 0.0  ;;  %v9438_v62 = vld [vmem:[%s20829_s4 + $0x68] sm:$0xff]  ;;  %vm21257_vm15 = vnez %v21076_v59 }
 0x186   : > { %15338 = vmatprep.mubr.f32.mxu1 %v21230_v1  ;;  %v17422_v9 = vld [vmem:[#allocation2 + $0x201] sm:$0xff]  ;;  %v5187_v34 = vld [vmem:[#allocation2 + $0x199] sm:$0xff]  ;;  %v5189_v25 = vld [vmem:[#allocation2 + $0x1a9] sm:$0xff]  ;;  %v5448_v46 = vsel %vm17379_vm9, %v17325_v60, 0.0  ;;  %v1352_v5 = vadd.s32 488, %v16577_v28  ;;  %v5450_v60 = vsel %vm17400_vm6, %v17355_v29, 0.0  ;;  %vm21256_vm9 = vnez %v21070_v43 }
 0x187   : > { %21245 = vst [vmem:[#allocation70_spill] sm:$0xff] %v17422_v9  ;;  %v5191_v19 = vld [vmem:[#allocation2 + $0x1b9] sm:$0xff]  ;;  %v5193_v54 = vld [vmem:[#allocation2 + $0x1c9] sm:$0xff]  ;;  %v1354_v0 = vadd.s32 504, %v16577_v28  ;;  %v5452_v29 = vsel %vm17418_vm4, %v17383_v36, 0.0  ;;  %v21246_v20 = vmov 0  ;;  %vm21258_vm8 = vnez %v21082_v26 }
 0x188   : > { %15493 = vmatmul.mubr.msk.f32.gmra.mrb[128].mxu0 %vm363_vm1, %v5430_v55  ;;  %v17445_v55 = vld [vmem:[#allocation2 + $0x20] sm:$0xff]  ;;  %v1786_v41 = vand.u32 15, %v1352_v5  ;;  %v5197_v5 = vld [vmem:[#allocation2 + $0x1e9] sm:$0xff]  ;;  %vm21261_vm5 = vnez %v21088_v47  ;;  %vm21273_vm13 = vnez %v21112_v37  ;;  %vm21279_vm12 = vnez %v21124_v18  ;;  %v21299_v47 = vld [vmem:[#allocation37_spill] sm:$0xff] }
 0x189   : > { %15339 = vmatmul.mubr.f32.vlgmr.msra.gmra.mrb[36].mxu1 %v21230_v1  ;;  %15495 = vmatprep.mubr.msk.f32.mxu0 %vm363_vm1, %v5175_v32  ;;  %v5179_v32 = vld [vmem:[#allocation2 + $0x159] sm:$0xff]  ;;  %v1800_v58 = vand.u32 15, %v1354_v0  ;;  %v21249_v0 = vmov 0 }
 0x18a   : > { %16265 = vmatpush3.bf16.msra.mxu1 %v16932_v38  ;;  %15341 = vmatprep.mubr.msk.f32.mxu1 %vm363_vm1, %v17431_v3  ;;  %v17454_v38 = vld [vmem:[#allocation2 + $0x28] sm:$0xff]  ;;  %v5195_v33 = vld [vmem:[#allocation2 + $0x1d9] sm:$0xff]  ;;  %vm17597_vm6 = vcmp.lt.s32.totalorder %v1786_v41, 15 }
 0x18b   : > { %16271 = vmatprep.subr.bf16.mxu1 %v17442_v57  ;;  %v21247_v20 = vsel %vm17597_vm6, 4294967295, %v21246_v20  ;;  %v5454_v36 = vsel %vm17597_vm6, %v17404_v22, 0.0  ;;  %v17612_v41 = vld [vmem:[#allocation2 + $0xd8] sm:$0xff]  ;;  %vm17614_vm4 = vcmp.lt.s32.totalorder %v1800_v58, 15  ;;  %v17629_v58 = vld [vmem:[#allocation2 + $0xe8] sm:$0xff]  ;;  %vm21255_vm6 = vnez %v21068_v24 }
 0x18c   : > { %15496 = vmatmul.mubr.msk.f32.gmra.mrb[130].mxu0 %vm363_vm1, %v5432_v61  ;;  %v17467_v61 = vld [vmem:[#allocation2 + $0x38] sm:$0xff]  ;;  %21248 = vst [vmem:[#allocation71_spill] sm:$0xff] %v21247_v20  ;;  %v21250_v0 = vsel %vm17614_vm4, 4294967295, %v21249_v0  ;;  %v5456_v22 = vsel %vm17614_vm4, %v17422_v9, 0.0  ;;  %v17855_v20 = vld [vmem:[#allocation2 + $0x200] sm:$0xff] }
 0x18d   : > { %15342 = vmatmul.mubr.msk.f32.gmra.mrb[38].mxu1 %vm363_vm1, %v17445_v55  ;;  %15498 = vmatprep.mubr.msk.f32.mxu0 %vm363_vm1, %v5177_v16  ;;  %v9437_v16 = vld [vmem:[%s20829_s4 + $0x60] sm:$0xff]  ;;  %21251 = vst [vmem:[#allocation72_spill] sm:$0xff] %v21250_v0 }
 0x18e   : > { %15344 = vmatprep.mubr.msk.f32.mxu1 %vm363_vm1, %v17454_v38  ;;  %v17478_v10 = vpack.c.bf16 %v9438_v62, %v9437_v16  ;;  %v17494_v62 = vld [vmem:[#allocation2 + $0x50] sm:$0xff]  ;;  %v5438_v16 = vsel %vm17219_vm0, %v17167_v50, 0.0  ;;  %v17956_v53 = vld [vmem:[#allocation2 + $0x5f] sm:$0xff]  ;;  %vm21267_vm0 = vnez %v21100_v40 }
 0x18f   : > { %v5185_v50 = vld [vmem:[#allocation2 + $0x189] sm:$0xff]  ;;  %v17996_v23 = vld [vmem:[#allocation2 + $0x7f] sm:$0xff] }
 0x190   : > { %15499 = vmatmul.mubr.msk.f32.gmra.mrb[132].mxu0 %vm363_vm1, %v5434_v7  ;;  %v5436_v7 = vsel %vm17192_vm11, %v17139_v52, 0.0  ;;  %16275 = vmatprep.subr.bf16.mxu0 %v17478_v10  ;;  %v5183_v52 = vld [vmem:[#allocation2 + $0x179] sm:$0xff]  ;;  %vm21270_vm11 = vnez %v21106_v12 }
 0x191   : > { %15345 = vmatmul.mubr.msk.f32.gmra.mrb[40].mxu1 %vm363_vm1, %v17459_v45  ;;  %15501 = vmatprep.mubr.msk.f32.mxu0 %vm363_vm1, %v5179_v32  ;;  %v17488_v32 = vld [vmem:[#allocation2 + $0x48] sm:$0xff]  ;;  %v18377_v12 = vld [vmem:[#allocation2 + $0x19f] sm:$0xff] }
 0x192   : > { %15347 = vmatprep.mubr.msk.f32.mxu1 %vm363_vm1, %v17467_v61 }
 0x194   : > { %15502 = vmatmul.mubr.msk.f32.gmra.mrb[134].mxu0 %vm363_vm1, %v5436_v7  ;;  %v17502_v7 = vld [vmem:[#allocation2 + $0x58] sm:$0xff] }
 0x195   : > { %15348 = vmatmul.mubr.msk.f32.gmra.mrb[42].mxu1 %vm363_vm1, %v17480_v8  ;;  %15504 = vmatprep.mubr.msk.f32.mxu0 %vm363_vm1, %v5181_v13  ;;  %v17507_v13 = vld [vmem:[#allocation2 + $0x60] sm:$0xff] }
 0x196   : > { %15350 = vmatprep.mubr.msk.f32.mxu1 %vm363_vm1, %v17488_v32 }
 0x198   : > { %15505 = vmatmul.mubr.msk.f32.gmra.mrb[136].mxu0 %vm363_vm1, %v5438_v16  ;;  %v17515_v16 = vld [vmem:[#allocation2 + $0x68] sm:$0xff] }
 0x199   : > { %15351 = vmatmul.mubr.msk.f32.gmra.mrb[44].mxu1 %vm363_vm1, %v17494_v62  ;;  %15507 = vmatprep.mubr.msk.f32.mxu0 %vm363_vm1, %v5183_v52  ;;  %v17520_v52 = vld [vmem:[#allocation2 + $0x70] sm:$0xff] }
 0x19a   : > { %15353 = vmatprep.mubr.msk.f32.mxu1 %vm363_vm1, %v17502_v7 }
 0x19c   : > { %15508 = vmatmul.mubr.msk.f32.gmra.mrb[138].mxu0 %vm363_vm1, %v5440_v63  ;;  %v17528_v63 = vld [vmem:[#allocation2 + $0x78] sm:$0xff] }
 0x19d   : > { %15354 = vmatmul.mubr.msk.f32.gmra.mrb[46].mxu1 %vm363_vm1, %v17507_v13  ;;  %15510 = vmatprep.mubr.msk.f32.mxu0 %vm363_vm1, %v5185_v50  ;;  %v17533_v50 = vld [vmem:[#allocation2 + $0x80] sm:$0xff] }
 0x19e   : > { %15356 = vmatprep.mubr.msk.f32.mxu1 %vm363_vm1, %v17515_v16 }
 0x1a0   : > { %15511 = vmatmul.mubr.msk.f32.gmra.mrb[140].mxu0 %vm363_vm1, %v5442_v21  ;;  %v17541_v21 = vld [vmem:[#allocation2 + $0x88] sm:$0xff] }
 0x1a1   : > { %15357 = vmatmul.mubr.msk.f32.gmra.mrb[48].mxu1 %vm363_vm1, %v17520_v52  ;;  %15513 = vmatprep.mubr.msk.f32.mxu0 %vm363_vm1, %v5187_v34  ;;  %v17546_v34 = vld [vmem:[#allocation2 + $0x90] sm:$0xff] }
 0x1a2   : > { %15359 = vmatprep.mubr.msk.f32.mxu1 %vm363_vm1, %v17528_v63 }
 0x1a4   : > { %15514 = vmatmul.mubr.msk.f32.gmra.mrb[142].mxu0 %vm363_vm1, %v5444_v27  ;;  %v17554_v27 = vld [vmem:[#allocation2 + $0x98] sm:$0xff] }
 0x1a5   : > { %15360 = vmatmul.mubr.msk.f32.gmra.mrb[50].mxu1 %vm363_vm1, %v17533_v50  ;;  %15516 = vmatprep.mubr.msk.f32.mxu0 %vm363_vm1, %v5189_v25  ;;  %v17559_v25 = vld [vmem:[#allocation2 + $0xa0] sm:$0xff] }
 0x1a6   : > { %15362 = vmatprep.mubr.msk.f32.mxu1 %vm363_vm1, %v17541_v21 }
 0x1a8   : > { %15517 = vmatmul.mubr.msk.f32.gmra.mrb[144].mxu0 %vm363_vm1, %v5446_v39  ;;  %v17567_v39 = vld [vmem:[#allocation2 + $0xa8] sm:$0xff] }
 0x1a9   : > { %15363 = vmatmul.mubr.msk.f32.gmra.mrb[52].mxu1 %vm363_vm1, %v17546_v34  ;;  %15519 = vmatprep.mubr.msk.f32.mxu0 %vm363_vm1, %v5191_v19  ;;  %v17573_v19 = vld [vmem:[#allocation2 + $0xb0] sm:$0xff] }
 0x1aa   : > { %15365 = vmatprep.mubr.msk.f32.mxu1 %vm363_vm1, %v17554_v27 }
 0x1ac   : > { %15520 = vmatmul.mubr.msk.f32.gmra.mrb[146].mxu0 %vm363_vm1, %v5448_v46  ;;  %v17581_v46 = vld [vmem:[#allocation2 + $0xb8] sm:$0xff] }
 0x1ad   : > { %15366 = vmatmul.mubr.msk.f32.gmra.mrb[54].mxu1 %vm363_vm1, %v17559_v25  ;;  %15522 = vmatprep.mubr.msk.f32.mxu0 %vm363_vm1, %v5193_v54  ;;  %v17587_v54 = vld [vmem:[#allocation2 + $0xc0] sm:$0xff] }
 0x1ae   : > { %15368 = vmatprep.mubr.msk.f32.mxu1 %vm363_vm1, %v17567_v39 }
 0x1b0   : > { %15523 = vmatmul.mubr.msk.f32.gmra.mrb[148].mxu0 %vm363_vm1, %v5450_v60  ;;  %v17595_v60 = vld [vmem:[#allocation2 + $0xc8] sm:$0xff] }
 0x1b1   : > { %15369 = vmatmul.mubr.msk.f32.gmra.mrb[56].mxu1 %vm363_vm1, %v17573_v19  ;;  %15525 = vmatprep.mubr.msk.f32.mxu0 %vm363_vm1, %v5195_v33  ;;  %v17604_v33 = vld [vmem:[#allocation2 + $0xd0] sm:$0xff] }
 0x1b2   : > { %15371 = vmatprep.mubr.msk.f32.mxu1 %vm363_vm1, %v17581_v46 }
 0x1b4   : > { %15526 = vmatmul.mubr.msk.f32.gmra.mrb[150].mxu0 %vm363_vm1, %v5452_v29  ;;  %v5199_v29 = vld [vmem:[#allocation2 + $0x1f9] sm:$0xff] }
 0x1b5   : > { %15372 = vmatmul.mubr.msk.f32.gmra.mrb[58].mxu1 %vm363_vm1, %v17587_v54  ;;  %15528 = vmatprep.mubr.msk.f32.mxu0 %vm363_vm1, %v5197_v5  ;;  %v17621_v5 = vld [vmem:[#allocation2 + $0xe0] sm:$0xff] }
 0x1b6   : > { %15374 = vmatprep.mubr.msk.f32.mxu1 %vm363_vm1, %v17595_v60 }
 0x1b8   : > { %15529 = vmatmul.mubr.msk.f32.gmra.mrb[152].mxu0 %vm363_vm1, %v5454_v36  ;;  %v17635_v36 = vld [vmem:[#allocation2 + $0xf0] sm:$0xff] }
 0x1b9   : > { %15375 = vmatmul.mubr.msk.f32.gmra.mrb[60].mxu1 %vm363_vm1, %v17604_v33  ;;  %15531 = vmatprep.mubr.msk.f32.mxu0 %vm363_vm1, %v5199_v29  ;;  %v17641_v29 = vld [vmem:[#allocation2 + $0xf8] sm:$0xff] }
 0x1ba   : > { %15377 = vmatprep.mubr.msk.f32.mxu1 %vm363_vm1, %v17612_v41 }
 0x1bc   : > { %15532 = vmatmul.mubr.msk.f32.gmra.mrb[154].mxu0 %vm363_vm1, %v5456_v22  ;;  %v17648_v22 = vld [vmem:[#allocation2 + $0x100] sm:$0xff] }
 0x1bd   : > { %15378 = vmatmul.mubr.msk.f32.gmra.mrb[62].mxu1 %vm363_vm1, %v17621_v5  ;;  %15638 = vmatprep.mubr.msk.f32.mxu0 %vm363_vm1, %v17431_v3  ;;  %v17660_v3 = vld [vmem:[#allocation2 + $0x118] sm:$0xff] }
 0x1be   : > { %15380 = vmatprep.mubr.msk.f32.mxu1 %vm363_vm1, %v17629_v58 }
 0x1c0   : > { %15639 = vmatmul.mubr.msk.f32.vlgmr.msra.gmra.mrb[156].mxu0 %vm363_vm1, %v17445_v55  ;;  %v17672_v55 = vld [vmem:[#allocation2 + $0x128] sm:$0xff] }
 0x1c1   : > { %15381 = vmatmul.mubr.msk.f32.gmra.mrb[64].mxu1 %vm363_vm1, %v17635_v36  ;;  %15641 = vmatprep.mubr.msk.f32.mxu0 %vm363_vm1, %v17454_v38  ;;  %v17684_v38 = vld [vmem:[#allocation2 + $0x138] sm:$0xff] }
 0x1c2   : > { %15383 = vmatprep.mubr.msk.f32.mxu1 %vm363_vm1, %v17641_v29  ;;  %16277 = vmatpush3.bf16.msra.mxu0 %v17478_v10  ;;  %v17666_v10 = vld [vmem:[#allocation2 + $0x120] sm:$0xff] }
 0x1c4   : > { %15642 = vmatmul.mubr.msk.f32.gmra.mrb[158].mxu0 %vm363_vm1, %v17459_v45  ;;  %v17690_v45 = vld [vmem:[#allocation2 + $0x140] sm:$0xff] }
 0x1c5   : > { %15384 = vmatmul.mubr.msk.f32.gmra.mrb[66].mxu1 %vm363_vm1, %v17648_v22  ;;  %15644 = vmatprep.mubr.msk.f32.mxu0 %vm363_vm1, %v17467_v61  ;;  %v17696_v61 = vld [vmem:[#allocation2 + $0x148] sm:$0xff] }
 0x1c6   : > { %15386 = vmatprep.mubr.f32.mxu1 %v21230_v1 }
 0x1c8   : > { %15645 = vmatmul.mubr.msk.f32.gmra.mrb[160].mxu0 %vm363_vm1, %v17480_v8  ;;  %v17678_v8 = vld [vmem:[#allocation2 + $0x130] sm:$0xff] }
 0x1c9   : > { %15387 = vmatmul.mubr.f32.gmra.mrb[68].mxu1 %v21230_v1  ;;  %15647 = vmatprep.mubr.msk.f32.mxu0 %vm363_vm1, %v17488_v32  ;;  %v17702_v32 = vld [vmem:[#allocation2 + $0x150] sm:$0xff] }
 0x1ca   : > { %15389 = vmatprep.mubr.msk.f32.mxu1 %vm363_vm1, %v17660_v3  ;;  %v18016_v1 = vld [vmem:[#allocation2 + $0x8f] sm:$0xff] }
 0x1cc   : > { %15648 = vmatmul.mubr.msk.f32.gmra.mrb[162].mxu0 %vm363_vm1, %v17494_v62  ;;  %v17708_v62 = vld [vmem:[#allocation2 + $0x158] sm:$0xff] }
 0x1cd   : > { %15390 = vmatmul.mubr.msk.f32.gmra.mrb[70].mxu1 %vm363_vm1, %v17666_v10  ;;  %15650 = vmatprep.mubr.msk.f32.mxu0 %vm363_vm1, %v17502_v7  ;;  %v17714_v7 = vld [vmem:[#allocation2 + $0x160] sm:$0xff] }
 0x1ce   : > { %15392 = vmatprep.mubr.msk.f32.mxu1 %vm363_vm1, %v17672_v55 }
 0x1d0   : > { %15651 = vmatmul.mubr.msk.f32.gmra.mrb[164].mxu0 %vm363_vm1, %v17507_v13  ;;  %v17720_v13 = vld [vmem:[#allocation2 + $0x168] sm:$0xff] }
 0x1d1   : > { %15393 = vmatmul.mubr.msk.f32.gmra.mrb[72].mxu1 %vm363_vm1, %v17678_v8  ;;  %15653 = vmatprep.mubr.msk.f32.mxu0 %vm363_vm1, %v17515_v16 }
 0x1d2   : > { %15395 = vmatprep.mubr.msk.f32.mxu1 %vm363_vm1, %v17684_v38 }
 0x1d4   : > { %15654 = vmatmul.mubr.msk.f32.gmra.mrb[166].mxu0 %vm363_vm1, %v17520_v52  ;;  %v17726_v52 = vld [vmem:[#allocation2 + $0x170] sm:$0xff] }
 0x1d5   : > { %15396 = vmatmul.mubr.msk.f32.gmra.mrb[74].mxu1 %vm363_vm1, %v17690_v45  ;;  %15656 = vmatprep.mubr.msk.f32.mxu0 %vm363_vm1, %v17528_v63 }
 0x1d6   : > { %15398 = vmatprep.mubr.msk.f32.mxu1 %vm363_vm1, %v17696_v61 }
 0x1d8   : > { %15657 = vmatmul.mubr.msk.f32.gmra.mrb[168].mxu0 %vm363_vm1, %v17533_v50  ;;  %v15243_v16 = vpop.f32.mrb[66].mxu0  ;;  %v17733_v50 = vld [vmem:[#allocation2 + $0x178] sm:$0xff] }
 0x1d9   : > { %15399 = vmatmul.mubr.msk.f32.gmra.mrb[76].mxu1 %vm363_vm1, %v17702_v32  ;;  %15659 = vmatprep.mubr.msk.f32.mxu0 %vm363_vm1, %v17541_v21  ;;  %4049 = vst.msk [vmem:[#allocation3 + $0x18] sm:$0xff] %vm363_vm1, %v15243_v16  ;;  %v3737_v63 = vpop.f32.mrb[67].mxu0  ;;  %v17754_v16 = vld [vmem:[#allocation2 + $0x190] sm:$0xff] }
 0x1da   : > { %15401 = vmatprep.mubr.msk.f32.mxu1 %vm363_vm1, %v17708_v62  ;;  %4048 = vst.msk [vmem:[#allocation3 + $0x10] sm:$0xff] %vm363_vm1, %v3737_v63 }
 0x1dc   : > { %15660 = vmatmul.mubr.msk.f32.gmra.mrb[170].mxu0 %vm363_vm1, %v17546_v34  ;;  %v15246_v21 = vpop.f32.mrb[68].mxu0  ;;  %v17740_v34 = vld [vmem:[#allocation2 + $0x180] sm:$0xff] }
 0x1dd   : > { %15402 = vmatmul.mubr.msk.f32.gmra.mrb[78].mxu1 %vm363_vm1, %v17714_v7  ;;  %15662 = vmatprep.mubr.msk.f32.mxu0 %vm363_vm1, %v17554_v27  ;;  %4051 = vst.msk [vmem:[#allocation3 + $0x28] sm:$0xff] %vm363_vm1, %v15246_v21  ;;  %v3747_v27 = vpop.f32.mrb[69].mxu0  ;;  %v17768_v21 = vld [vmem:[#allocation2 + $0x1a0] sm:$0xff] }
 0x1de   : > { %15404 = vmatprep.mubr.msk.f32.mxu1 %vm363_vm1, %v17720_v13  ;;  %4050 = vst.msk [vmem:[#allocation3 + $0x20] sm:$0xff] %vm363_vm1, %v3747_v27 }
 0x1e0   : > { %15663 = vmatmul.mubr.msk.f32.gmra.mrb[172].mxu0 %vm363_vm1, %v17559_v25  ;;  %v17747_v25 = vld [vmem:[#allocation2 + $0x188] sm:$0xff] }
 0x1e1   : > { %15405 = vmatmul.mubr.msk.f32.gmra.mrb[80].mxu1 %vm363_vm1, %v17726_v52  ;;  %15665 = vmatprep.mubr.msk.f32.mxu0 %vm363_vm1, %v17567_v39  ;;  %v15249_v39 = vpop.f32.mrb[70].mxu0 }
 0x1e2   : > { %15407 = vmatprep.mubr.msk.f32.mxu1 %vm363_vm1, %v17733_v50  ;;  %4053 = vst.msk [vmem:[#allocation3 + $0x38] sm:$0xff] %vm363_vm1, %v15249_v39  ;;  %v3757_v63 = vpop.f32.mrb[71].mxu0  ;;  %v17782_v39 = vld [vmem:[#allocation2 + $0x1b0] sm:$0xff] }
 0x1e3   : > { %4052 = vst.msk [vmem:[#allocation3 + $0x30] sm:$0xff] %vm363_vm1, %v3757_v63 }
 0x1e4   : > { %15666 = vmatmul.mubr.msk.f32.gmra.mrb[174].mxu0 %vm363_vm1, %v17573_v19  ;;  %v17761_v19 = vld [vmem:[#allocation2 + $0x198] sm:$0xff] }
 0x1e5   : > { %15408 = vmatmul.mubr.msk.f32.gmra.mrb[82].mxu1 %vm363_vm1, %v17740_v34  ;;  %15668 = vmatprep.mubr.msk.f32.mxu0 %vm363_vm1, %v17581_v46  ;;  %v15252_v46 = vpop.f32.mrb[72].mxu0 }
 0x1e6   : > { %15410 = vmatprep.mubr.msk.f32.mxu1 %vm363_vm1, %v17747_v25  ;;  %4055 = vst.msk [vmem:[#allocation3 + $0x48] sm:$0xff] %vm363_vm1, %v15252_v46  ;;  %v3767_v27 = vpop.f32.mrb[73].mxu0  ;;  %v17796_v46 = vld [vmem:[#allocation2 + $0x1c0] sm:$0xff] }
 0x1e7   : > { %4054 = vst.msk [vmem:[#allocation3 + $0x40] sm:$0xff] %vm363_vm1, %v3767_v27 }
 0x1e8   : > { %15669 = vmatmul.mubr.msk.f32.gmra.mrb[176].mxu0 %vm363_vm1, %v17587_v54  ;;  %v17775_v54 = vld [vmem:[#allocation2 + $0x1a8] sm:$0xff] }
 0x1e9   : > { %15411 = vmatmul.mubr.msk.f32.gmra.mrb[84].mxu1 %vm363_vm1, %v17754_v16  ;;  %15671 = vmatprep.mubr.msk.f32.mxu0 %vm363_vm1, %v17595_v60  ;;  %v15255_v60 = vpop.f32.mrb[74].mxu0 }
 0x1ea   : > { %15413 = vmatprep.mubr.msk.f32.mxu1 %vm363_vm1, %v17761_v19  ;;  %4057 = vst.msk [vmem:[#allocation3 + $0x58] sm:$0xff] %vm363_vm1, %v15255_v60  ;;  %v3777_v63 = vpop.f32.mrb[75].mxu0  ;;  %v17810_v60 = vld [vmem:[#allocation2 + $0x1d0] sm:$0xff] }
 0x1eb   : > { %4056 = vst.msk [vmem:[#allocation3 + $0x50] sm:$0xff] %vm363_vm1, %v3777_v63 }
 0x1ec   : > { %15672 = vmatmul.mubr.msk.f32.gmra.mrb[178].mxu0 %vm363_vm1, %v17604_v33  ;;  %v17789_v33 = vld [vmem:[#allocation2 + $0x1b8] sm:$0xff] }
 0x1ed   : > { %15414 = vmatmul.mubr.msk.f32.gmra.mrb[86].mxu1 %vm363_vm1, %v17768_v21  ;;  %15674 = vmatprep.mubr.msk.f32.mxu0 %vm363_vm1, %v17612_v41  ;;  %v15258_v41 = vpop.f32.mrb[76].mxu0 }
 0x1ee   : > { %15416 = vmatprep.mubr.msk.f32.mxu1 %vm363_vm1, %v17775_v54  ;;  %4059 = vst.msk [vmem:[#allocation3 + $0x68] sm:$0xff] %vm363_vm1, %v15258_v41  ;;  %v3787_v27 = vpop.f32.mrb[77].mxu0  ;;  %v7285_v41 = vld [vmem:[#allocation2 + $0x108] sm:$0xff] }
 0x1ef   : > { %4058 = vst.msk [vmem:[#allocation3 + $0x60] sm:$0xff] %vm363_vm1, %v3787_v27  ;;  %v17823_v27 = vld [vmem:[#allocation2 + $0x1e0] sm:$0xff] }
 0x1f0   : > { %15675 = vmatmul.mubr.msk.f32.gmra.mrb[180].mxu0 %vm363_vm1, %v17621_v5  ;;  %v17803_v5 = vld [vmem:[#allocation2 + $0x1c8] sm:$0xff] }
 0x1f1   : > { %15417 = vmatmul.mubr.msk.f32.gmra.mrb[88].mxu1 %vm363_vm1, %v17782_v39  ;;  %15677 = vmatprep.mubr.msk.f32.mxu0 %vm363_vm1, %v17629_v58  ;;  %v15261_v58 = vpop.f32.mrb[78].mxu0 }
 0x1f2   : > { %15419 = vmatprep.mubr.msk.f32.mxu1 %vm363_vm1, %v17789_v33  ;;  %4061 = vst.msk [vmem:[#allocation3 + $0x78] sm:$0xff] %vm363_vm1, %v15261_v58  ;;  %v3797_v63 = vpop.f32.mrb[79].mxu0  ;;  %v7286_v58 = vld [vmem:[#allocation2 + $0x110] sm:$0xff] }
 0x1f3   : > { %4060 = vst.msk [vmem:[#allocation3 + $0x70] sm:$0xff] %vm363_vm1, %v3797_v63  ;;  %v1359_v63 = vand.u32 15, %v16577_v28 }
 0x1f4   : > { %15678 = vmatmul.mubr.msk.f32.gmra.mrb[182].mxu0 %vm363_vm1, %v17635_v36  ;;  %v17817_v36 = vld [vmem:[#allocation2 + $0x1d8] sm:$0xff] }
 0x1f5   : > { %15420 = vmatmul.mubr.msk.f32.gmra.mrb[90].mxu1 %vm363_vm1, %v17796_v46  ;;  %15680 = vmatprep.mubr.msk.f32.mxu0 %vm363_vm1, %v17641_v29  ;;  %v15264_v29 = vpop.f32.mrb[80].mxu0  ;;  %vm17851_vm4 = vcmp.gt.s32.totalorder %v1359_v63, 0 }
 0x1f6   : > { %15422 = vmatprep.mubr.msk.f32.mxu1 %vm363_vm1, %v17803_v5  ;;  %4063 = vst.msk [vmem:[#allocation3 + $0x88] sm:$0xff] %vm363_vm1, %v15264_v29  ;;  %v3807_v9 = vpop.f32.mrb[81].mxu0  ;;  %v17837_v29 = vld [vmem:[#allocation2 + $0x1f0] sm:$0xff] }
 0x1f7   : > { %4062 = vst.msk [vmem:[#allocation3 + $0x80] sm:$0xff] %vm363_vm1, %v3807_v9  ;;  %v17844_v9 = vld [vmem:[#allocation2 + $0x1f8] sm:$0xff] }
 0x1f8   : > { %15681 = vmatmul.mubr.msk.f32.gmra.mrb[184].mxu0 %vm363_vm1, %v17648_v22  ;;  %v17829_v22 = vld [vmem:[#allocation2 + $0x1e8] sm:$0xff] }
 0x1f9   : > { %15423 = vmatmul.mubr.msk.f32.gmra.mrb[92].mxu1 %vm363_vm1, %v17810_v60  ;;  %15683 = vmatprep.mubr.msk.f32.mxu0 %vm363_vm1, %v7285_v41  ;;  %v15267_v41 = vpop.f32.mrb[82].mxu0 }
 0x1fa   : > { %15425 = vmatprep.mubr.msk.f32.mxu1 %vm363_vm1, %v17817_v36  ;;  %4065 = vst.msk [vmem:[#allocation3 + $0x98] sm:$0xff] %vm363_vm1, %v15267_v41  ;;  %v3817_v0 = vpop.f32.mrb[83].mxu0 }
 0x1fb   : > { %4064 = vst.msk [vmem:[#allocation3 + $0x90] sm:$0xff] %vm363_vm1, %v3817_v0 }
 0x1fc   : > { %15684 = vmatmul.mubr.msk.f32.gmra.mrb[186].mxu0 %vm363_vm1, %v7286_v58  ;;  %v6228_v58 = vld [vmem:[#allocation2 + $0x17] sm:$0xff]  ;;  %v15270_v41 = vpop.f32.mrb[84].mxu0 }
 0x1fd   : > { %15426 = vmatmul.mubr.msk.f32.gmra.mrb[94].mxu1 %vm363_vm1, %v17823_v27  ;;  %15686 = vmatprep.mubr.msk.f32.mxu0 %vm363_vm1, %v17660_v3  ;;  %4067 = vst.msk [vmem:[#allocation3 + $0xa8] sm:$0xff] %vm363_vm1, %v15270_v41  ;;  %v6420_v0 = vsel %vm17851_vm4, %v6228_v58, 0.0  ;;  %v6229_v41 = vld [vmem:[#allocation2 + $0x1f] sm:$0xff]  ;;  %v10464_v58 = vld [vmem:[%s20829_s4 + $0x70] sm:$0xff] }
 0x1fe   : > { %15428 = vmatprep.mubr.msk.f32.mxu1 %vm363_vm1, %v17829_v22 }
 0x200   : > { %15687 = vmatmul.mubr.msk.f32.gmra.mrb[188].mxu0 %vm363_vm1, %v17666_v10  ;;  %v3827_v10 = vpop.f32.mrb[85].mxu0 }
 0x201   : > { %15429 = vmatmul.mubr.msk.f32.gmra.mrb[96].mxu1 %vm363_vm1, %v17837_v29  ;;  %15689 = vmatprep.mubr.msk.f32.mxu0 %vm363_vm1, %v17672_v55  ;;  %4066 = vst.msk [vmem:[#allocation3 + $0xa0] sm:$0xff] %vm363_vm1, %v3827_v10  ;;  %v17868_v55 = vld [vmem:[#allocation2 + $0x27] sm:$0xff]  ;;  %v15273_v63 = vpop.f32.mrb[86].mxu0 }
 0x202   : > { %15431 = vmatprep.mubr.msk.f32.mxu1 %vm363_vm1, %v17844_v9  ;;  %4069 = vst.msk [vmem:[#allocation3 + $0xb8] sm:$0xff] %vm363_vm1, %v15273_v63  ;;  %v3837_v30 = vpop.f32.mrb[87].mxu0  ;;  %v17906_v63 = vld [vmem:[#allocation2 + $0x47] sm:$0xff] }
 0x203   : > { %4068 = vst.msk [vmem:[#allocation3 + $0xb0] sm:$0xff] %vm363_vm1, %v3837_v30 }
 0x204   : > { %15690 = vmatmul.mubr.msk.f32.gmra.mrb[190].mxu0 %vm363_vm1, %v17678_v8  ;;  %v6422_v8 = vsel %vm16597_vm2, %v17868_v55, 0.0  ;;  %v15276_v10 = vpop.f32.mrb[88].mxu0 }
 0x205   : > { %15432 = vmatmul.mubr.msk.f32.gmra.mrb[98].mxu1 %vm363_vm1, %v17855_v20  ;;  %15692 = vmatprep.mubr.msk.f32.mxu0 %vm363_vm1, %v17684_v38  ;;  %v17880_v38 = vld [vmem:[#allocation2 + $0x37] sm:$0xff]  ;;  %4071 = vst.msk [vmem:[#allocation3 + $0xc8] sm:$0xff] %vm363_vm1, %v15276_v10  ;;  %v17925_v10 = vld [vmem:[#allocation2 + $0x4f] sm:$0xff] }
 0x206   : > { %15538 = vmatprep.mubr.msk.f32.mxu1 %vm363_vm1, %v6420_v0  ;;  %v17890_v0 = vld [vmem:[#allocation2 + $0x2f] sm:$0xff] }
 0x208   : > { %15693 = vmatmul.mubr.msk.f32.gmra.mrb[192].mxu0 %vm363_vm1, %v17690_v45  ;;  %v10465_v45 = vld [vmem:[%s20829_s4 + $0x78] sm:$0xff] }
 0x209   : > { %15539 = vmatmul.mubr.msk.f32.vlgmr.msra.gmra.mrb[100].mxu1 %vm363_vm1, %v6229_v41  ;;  %15695 = vmatprep.mubr.msk.f32.mxu0 %vm363_vm1, %v17696_v61  ;;  %v17892_v30 = vpack.c.bf16 %v10465_v45, %v10464_v58  ;;  %v6424_v61 = vsel %vm16609_vm3, %v17880_v38, 0.0  ;;  %v17923_v58 = vld [vmem:[#allocation2 + $0x57] sm:$0xff] }
 0x20a   : > { %16273 = vmatpush3.bf16.msra.mxu1 %v17442_v57  ;;  %15541 = vmatprep.mubr.msk.f32.mxu1 %vm363_vm1, %v6422_v8  ;;  %v3847_v57 = vpop.f32.mrb[89].mxu0  ;;  %v17909_v8 = vld [vmem:[#allocation2 + $0x3f] sm:$0xff] }
 0x20b   : > { %21254 = vst [vmem:[#allocation73_spill] sm:$0xff] %v17892_v30  ;;  %4070 = vst.msk [vmem:[#allocation3 + $0xc0] sm:$0xff] %vm363_vm1, %v3847_v57  ;;  %16279 = vmatprep.subr.bf16.mxu1 %v17892_v30  ;;  %v15279_v41 = vpop.f32.mrb[90].mxu0 }
 0x20c   : > { %15696 = vmatmul.mubr.msk.f32.gmra.mrb[194].mxu0 %vm363_vm1, %v17702_v32  ;;  %4073 = vst.msk [vmem:[#allocation3 + $0xd8] sm:$0xff] %vm363_vm1, %v15279_v41  ;;  %v3857_v32 = vpop.f32.mrb[91].mxu0  ;;  %v15282_v45 = vpop.f32.mrb[0].mxu1 }
 0x20d   : > { %15542 = vmatmul.mubr.msk.f32.gmra.mrb[102].mxu1 %vm363_vm1, %v17890_v0  ;;  %15698 = vmatprep.mubr.msk.f32.mxu0 %vm363_vm1, %v17708_v62  ;;  %v6426_v62 = vsel %vm21255_vm6, %v17906_v63, 0.0  ;;  %4072 = vst.msk [vmem:[#allocation3 + $0xd0] sm:$0xff] %vm363_vm1, %v3857_v32  ;;  %v17927_v57 = vpop.f32.mrb[92].mxu0  ;;  %4075 = vst.msk [vmem:[#allocation3 + $0xe8] sm:$0xff] %vm363_vm1, %v15282_v45  ;;  %v3867_v41 = vpop.f32.mrb[1].mxu1  ;;  %v17951_v45 = vld [vmem:[#allocation2 + $0x67] sm:$0xff] }
 0x20e   : > { %15544 = vmatprep.mubr.msk.f32.mxu1 %vm363_vm1, %v6424_v61  ;;  %v11556_v61 = vld [vmem:[%s20829_s4 + $0x88] sm:$0xff]  ;;  %v17943_v32 = vpop.f32.mrb[93].mxu0  ;;  %4074 = vst.msk [vmem:[#allocation3 + $0xe0] sm:$0xff] %vm363_vm1, %v3867_v41  ;;  %v17972_v41 = vld [vmem:[#allocation2 + $0x77] sm:$0xff] }
 0x210   : > { %15699 = vmatmul.mubr.msk.f32.gmra.mrb[196].mxu0 %vm363_vm1, %v17714_v7  ;;  %v11555_v7 = vld [vmem:[%s20829_s4 + $0x80] sm:$0xff]  ;;  %v17954_v44 = vpop.f32.mrb[94].mxu0 }
 0x211   : > { %15545 = vmatmul.mubr.msk.f32.gmra.mrb[104].mxu1 %vm363_vm1, %v17909_v8  ;;  %15701 = vmatprep.mubr.msk.f32.mxu0 %vm363_vm1, %v17720_v13  ;;  %v6428_v13 = vsel %vm21256_vm9, %v17923_v58, 0.0 }
 0x212   : > { %15547 = vmatprep.mubr.msk.f32.mxu1 %vm363_vm1, %v6426_v62  ;;  %v17945_v62 = vpack.c.bf16 %v11556_v61, %v11555_v7  ;;  %v17959_v61 = vpop.f32.mrb[95].mxu0 }
 0x214   : > { %15702 = vmatmul.mubr.msk.f32.gmra.mrb[198].mxu0 %vm363_vm1, %v17726_v52  ;;  %16283 = vmatprep.subr.bf16.mxu0 %v17945_v62  ;;  %v15285_v52 = vpop.f32.mrb[2].mxu1 }
 0x215   : > { %15548 = vmatmul.mubr.msk.f32.gmra.mrb[106].mxu1 %vm363_vm1, %v17925_v10  ;;  %15704 = vmatprep.mubr.msk.f32.mxu0 %vm363_vm1, %v17733_v50  ;;  %4077 = vst.msk [vmem:[#allocation3 + $0xf8] sm:$0xff] %vm363_vm1, %v15285_v52  ;;  %v3877_v7 = vpop.f32.mrb[3].mxu1  ;;  %v6430_v50 = vsel %vm21257_vm15, %v17951_v45, 0.0  ;;  %v17974_v52 = vpop.f32.mrb[96].mxu0 }
 0x216   : > { %15550 = vmatprep.mubr.msk.f32.mxu1 %vm363_vm1, %v6428_v13  ;;  %4076 = vst.msk [vmem:[#allocation3 + $0xf0] sm:$0xff] %vm363_vm1, %v3877_v7  ;;  %v15288_v13 = vpop.f32.mrb[4].mxu1  ;;  %v17979_v30 = vpop.f32.mrb[97].mxu0  ;;  %v17992_v7 = vld [vmem:[#allocation2 + $0x87] sm:$0xff] }
 0x217   : > { %4079 = vst.msk [vmem:[#allocation3 + $0x108] sm:$0xff] %vm363_vm1, %v15288_v13 }
 0x218   : > { %15705 = vmatmul.mubr.msk.f32.gmra.mrb[200].mxu0 %vm363_vm1, %v17740_v34  ;;  %v3887_v34 = vpop.f32.mrb[5].mxu1  ;;  %v17994_v13 = vpop.f32.mrb[98].mxu0 }
 0x219   : > { %15551 = vmatmul.mubr.msk.f32.gmra.mrb[108].mxu1 %vm363_vm1, %v17956_v53  ;;  %15707 = vmatprep.mubr.msk.f32.mxu0 %vm363_vm1, %v17747_v25  ;;  %v6432_v25 = vsel %vm21258_vm8, %v17972_v41, 0.0  ;;  %4078 = vst.msk [vmem:[#allocation3 + $0x100] sm:$0xff] %vm363_vm1, %v3887_v34  ;;  %21259 = vst [vmem:[#allocation74_spill] sm:$0xff] %v17994_v13  ;;  %v17999_v48 = vpop.f32.mrb[99].mxu0  ;;  %v18012_v34 = vld [vmem:[#allocation2 + $0x97] sm:$0xff] }
 0x21a   : > { %15553 = vmatprep.mubr.msk.f32.mxu1 %vm363_vm1, %v6430_v50  ;;  %v15291_v50 = vpop.f32.mrb[6].mxu1  ;;  %21260 = vst [vmem:[#allocation75_spill] sm:$0xff] %v17999_v48  ;;  %v18136_v48 = vld [vmem:[#allocation2 + $0xef] sm:$0xff] }
 0x21b   : > { %4081 = vst.msk [vmem:[#allocation3 + $0x118] sm:$0xff] %vm363_vm1, %v15291_v50 }
 0x21c   : > { %15708 = vmatmul.mubr.msk.f32.gmra.mrb[202].mxu0 %vm363_vm1, %v17754_v16  ;;  %v3897_v16 = vpop.f32.mrb[7].mxu1  ;;  %v18014_v50 = vpop.f32.mrb[100].mxu0 }
 0x21d   : > { %15554 = vmatmul.mubr.msk.f32.gmra.mrb[110].mxu1 %vm363_vm1, %v17976_v42  ;;  %15710 = vmatprep.mubr.msk.f32.mxu0 %vm363_vm1, %v17761_v19  ;;  %v6434_v19 = vsel %vm21261_vm5, %v17992_v7, 0.0  ;;  %4080 = vst.msk [vmem:[#allocation3 + $0x110] sm:$0xff] %vm363_vm1, %v3897_v16  ;;  %21262 = vst [vmem:[#allocation76_spill] sm:$0xff] %v18014_v50  ;;  %v18019_v51 = vpop.f32.mrb[101].mxu0  ;;  %v18032_v16 = vld [vmem:[#allocation2 + $0xa7] sm:$0xff] }
 0x21e   : > { %15556 = vmatprep.mubr.msk.f32.mxu1 %vm363_vm1, %v6432_v25  ;;  %v15294_v25 = vpop.f32.mrb[8].mxu1  ;;  %21263 = vst [vmem:[#allocation77_spill] sm:$0xff] %v18019_v51  ;;  %v18036_v51 = vld [vmem:[#allocation2 + $0x9f] sm:$0xff] }
 0x21f   : > { %4083 = vst.msk [vmem:[#allocation3 + $0x128] sm:$0xff] %vm363_vm1, %v15294_v25 }
 0x220   : > { %15711 = vmatmul.mubr.msk.f32.gmra.mrb[204].mxu0 %vm363_vm1, %v17768_v21  ;;  %v3907_v21 = vpop.f32.mrb[9].mxu1  ;;  %v18034_v25 = vpop.f32.mrb[102].mxu0 }
 0x221   : > { %15557 = vmatmul.mubr.msk.f32.gmra.mrb[112].mxu1 %vm363_vm1, %v17996_v23  ;;  %15713 = vmatprep.mubr.msk.f32.mxu0 %vm363_vm1, %v17775_v54  ;;  %v6436_v54 = vsel %vm21264_vm7, %v18012_v34, 0.0  ;;  %4082 = vst.msk [vmem:[#allocation3 + $0x120] sm:$0xff] %vm363_vm1, %v3907_v21  ;;  %21265 = vst [vmem:[#allocation78_spill] sm:$0xff] %v18034_v25  ;;  %v18039_v50 = vpop.f32.mrb[103].mxu0  ;;  %v18052_v21 = vld [vmem:[#allocation2 + $0xb7] sm:$0xff] }
 0x222   : > { %15559 = vmatprep.mubr.msk.f32.mxu1 %vm363_vm1, %v6434_v19  ;;  %v15297_v19 = vpop.f32.mrb[10].mxu1  ;;  %21266 = vst [vmem:[#allocation79_spill] sm:$0xff] %v18039_v50  ;;  %v18056_v50 = vld [vmem:[#allocation2 + $0xaf] sm:$0xff] }
 0x223   : > { %4085 = vst.msk [vmem:[#allocation3 + $0x138] sm:$0xff] %vm363_vm1, %v15297_v19 }
 0x224   : > { %15714 = vmatmul.mubr.msk.f32.gmra.mrb[206].mxu0 %vm363_vm1, %v17782_v39  ;;  %v3917_v39 = vpop.f32.mrb[11].mxu1 }
 0x225   : > { %15560 = vmatmul.mubr.msk.f32.gmra.mrb[114].mxu1 %vm363_vm1, %v18016_v1  ;;  %15716 = vmatprep.mubr.msk.f32.mxu0 %vm363_vm1, %v17789_v33  ;;  %v6438_v33 = vsel %vm21267_vm0, %v18032_v16, 0.0  ;;  %4084 = vst.msk [vmem:[#allocation3 + $0x130] sm:$0xff] %vm363_vm1, %v3917_v39  ;;  %v18054_v19 = vpop.f32.mrb[104].mxu0  ;;  %v18072_v39 = vld [vmem:[#allocation2 + $0xc7] sm:$0xff] }
 0x226   : > { %15562 = vmatprep.mubr.msk.f32.mxu1 %vm363_vm1, %v6436_v54  ;;  %v15300_v54 = vpop.f32.mrb[12].mxu1  ;;  %21268 = vst [vmem:[#allocation80_spill] sm:$0xff] %v18054_v19  ;;  %v18059_v25 = vpop.f32.mrb[105].mxu0 }
 0x227   : > { %4087 = vst.msk [vmem:[#allocation3 + $0x148] sm:$0xff] %vm363_vm1, %v15300_v54  ;;  %21269 = vst [vmem:[#allocation81_spill] sm:$0xff] %v18059_v25  ;;  %v18076_v25 = vld [vmem:[#allocation2 + $0xbf] sm:$0xff] }
 0x228   : > { %15717 = vmatmul.mubr.msk.f32.gmra.mrb[208].mxu0 %vm363_vm1, %v17796_v46  ;;  %v3927_v46 = vpop.f32.mrb[13].mxu1 }
 0x229   : > { %15563 = vmatmul.mubr.msk.f32.gmra.mrb[116].mxu1 %vm363_vm1, %v18036_v51  ;;  %15719 = vmatprep.mubr.msk.f32.mxu0 %vm363_vm1, %v17803_v5  ;;  %v6440_v5 = vsel %vm21270_vm11, %v18052_v21, 0.0  ;;  %4086 = vst.msk [vmem:[#allocation3 + $0x140] sm:$0xff] %vm363_vm1, %v3927_v46  ;;  %v18074_v54 = vpop.f32.mrb[106].mxu0  ;;  %v18092_v46 = vld [vmem:[#allocation2 + $0xd7] sm:$0xff] }
 0x22a   : > { %15565 = vmatprep.mubr.msk.f32.mxu1 %vm363_vm1, %v6438_v33  ;;  %v15303_v33 = vpop.f32.mrb[14].mxu1  ;;  %21271 = vst [vmem:[#allocation82_spill] sm:$0xff] %v18074_v54  ;;  %v18079_v19 = vpop.f32.mrb[107].mxu0 }
 0x22b   : > { %4089 = vst.msk [vmem:[#allocation3 + $0x158] sm:$0xff] %vm363_vm1, %v15303_v33  ;;  %21272 = vst [vmem:[#allocation83_spill] sm:$0xff] %v18079_v19  ;;  %v18096_v19 = vld [vmem:[#allocation2 + $0xcf] sm:$0xff] }
 0x22c   : > { %15720 = vmatmul.mubr.msk.f32.gmra.mrb[210].mxu0 %vm363_vm1, %v17810_v60  ;;  %v3937_v60 = vpop.f32.mrb[15].mxu1 }
 0x22d   : > { %15566 = vmatmul.mubr.msk.f32.gmra.mrb[118].mxu1 %vm363_vm1, %v18056_v50  ;;  %15722 = vmatprep.mubr.msk.f32.mxu0 %vm363_vm1, %v17817_v36  ;;  %v6442_v36 = vsel %vm21273_vm13, %v18072_v39, 0.0  ;;  %4088 = vst.msk [vmem:[#allocation3 + $0x150] sm:$0xff] %vm363_vm1, %v3937_v60  ;;  %v18112_v60 = vld [vmem:[#allocation2 + $0xe7] sm:$0xff] }
 0x22e   : > { %15568 = vmatprep.mubr.msk.f32.mxu1 %vm363_vm1, %v6440_v5 }
 0x22f   : > { %v15306_v5 = vpop.f32.mrb[16].mxu1  ;;  %v18094_v33 = vpop.f32.mrb[108].mxu0 }
 0x230   : > { %15723 = vmatmul.mubr.msk.f32.gmra.mrb[212].mxu0 %vm363_vm1, %v17823_v27  ;;  %21274 = vst [vmem:[#allocation84_spill] sm:$0xff] %v18094_v33  ;;  %4091 = vst.msk [vmem:[#allocation3 + $0x168] sm:$0xff] %vm363_vm1, %v15306_v5  ;;  %v3947_v27 = vpop.f32.mrb[17].mxu1  ;;  %v18099_v54 = vpop.f32.mrb[109].mxu0 }
 0x231   : > { %15569 = vmatmul.mubr.msk.f32.gmra.mrb[120].mxu1 %vm363_vm1, %v18076_v25  ;;  %15725 = vmatprep.mubr.msk.f32.mxu0 %vm363_vm1, %v17829_v22  ;;  %21275 = vst [vmem:[#allocation85_spill] sm:$0xff] %v18099_v54  ;;  %v6444_v22 = vsel %vm21276_vm10, %v18092_v46, 0.0  ;;  %4090 = vst.msk [vmem:[#allocation3 + $0x160] sm:$0xff] %vm363_vm1, %v3947_v27  ;;  %v18116_v54 = vld [vmem:[#allocation2 + $0xdf] sm:$0xff]  ;;  %v7317_v27 = vld [vmem:[#allocation2 + $0x208] sm:$0xff] }
 0x232   : > { %15571 = vmatprep.mubr.msk.f32.mxu1 %vm363_vm1, %v6442_v36 }
 0x233   : > { %v15309_v36 = vpop.f32.mrb[18].mxu1  ;;  %v18114_v5 = vpop.f32.mrb[110].mxu0 }
 0x234   : > { %15726 = vmatmul.mubr.msk.f32.gmra.mrb[214].mxu0 %vm363_vm1, %v17837_v29  ;;  %21277 = vst [vmem:[#allocation86_spill] sm:$0xff] %v18114_v5  ;;  %4093 = vst.msk [vmem:[#allocation3 + $0x178] sm:$0xff] %vm363_vm1, %v15309_v36  ;;  %v3957_v29 = vpop.f32.mrb[19].mxu1  ;;  %v18119_v33 = vpop.f32.mrb[111].mxu0  ;;  %v1323_v36 = vadd.s32 256, %v16577_v28 }
 0x235   : > { %15572 = vmatmul.mubr.msk.f32.gmra.mrb[122].mxu1 %vm363_vm1, %v18096_v19  ;;  %15728 = vmatprep.mubr.msk.f32.mxu0 %vm363_vm1, %v17844_v9  ;;  %21278 = vst [vmem:[#allocation87_spill] sm:$0xff] %v18119_v33  ;;  %v6446_v9 = vsel %vm21279_vm12, %v18112_v60, 0.0  ;;  %4092 = vst.msk [vmem:[#allocation3 + $0x170] sm:$0xff] %vm363_vm1, %v3957_v29 }
 0x236   : > { %15574 = vmatprep.mubr.msk.f32.mxu1 %vm363_vm1, %v6444_v22  ;;  %v18131_v22 = vld [vmem:[#allocation2 + $0xf7] sm:$0xff] }
 0x237   : > { %v15312_v33 = vpop.f32.mrb[20].mxu1  ;;  %v18134_v5 = vpop.f32.mrb[112].mxu0  ;;  %v6448_v29 = vsel %vm21282_vm14, %v18131_v22, 0.0 }
 0x238   : > { %15729 = vmatmul.mubr.msk.f32.gmra.mrb[216].mxu0 %vm363_vm1, %v17855_v20  ;;  %21280 = vst [vmem:[#allocation88_spill] sm:$0xff] %v18134_v5  ;;  %v7318_v20 = vld [vmem:[#allocation2 + $0x210] sm:$0xff]  ;;  %4095 = vst.msk [vmem:[#allocation3 + $0x188] sm:$0xff] %vm363_vm1, %v15312_v33  ;;  %v3967_v13 = vpop.f32.mrb[21].mxu1  ;;  %v18139_v18 = vpop.f32.mrb[113].mxu0  ;;  %v18153_v33 = vld [vmem:[#allocation2 + $0x107] sm:$0xff] }
 0x239   : > { %15575 = vmatmul.mubr.msk.f32.gmra.mrb[124].mxu1 %vm363_vm1, %v18116_v54  ;;  %15731 = vmatprep.mubr.msk.f32.mxu0 %vm363_vm1, %v7317_v27  ;;  %21281 = vst [vmem:[#allocation89_spill] sm:$0xff] %v18139_v18  ;;  %4094 = vst.msk [vmem:[#allocation3 + $0x180] sm:$0xff] %vm363_vm1, %v3967_v13  ;;  %v1583_v27 = vand.u32 15, %v1323_v36  ;;  %v6260_v13 = vld [vmem:[#allocation2 + $0x117] sm:$0xff]  ;;  %v18182_v36 = vld [vmem:[#allocation2 + $0x10f] sm:$0xff] }
 0x23a   : > { %15577 = vmatprep.mubr.msk.f32.mxu1 %vm363_vm1, %v6446_v9  ;;  %v9373_v9 = vsel %vm17851_vm4, %v17868_v55, 0.0  ;;  %vm21283_vm4 = vnez %v21138_v11  ;;  %v9375_v55 = vsel %vm16597_vm2, %v17880_v38, 0.0  ;;  %vm21286_vm2 = vnez %v21148_v35  ;;  %v4966_v35 = vld [vmem:[#allocation3 + $0xa8] sm:$0xff] }
 0x23b   : > { %v6450_v3 = vsel %vm21283_vm4, %v18153_v33, 0.0  ;;  %vm18175_vm14 = vcmp.gt.s32.totalorder %v1583_v27, 0 }
 0x23c   : > { %15732 = vmatmul.mubr.msk.f32.gmra.mrb[218].mxu0 %vm363_vm1, %v7318_v20  ;;  %v18157_v20 = vld [vmem:[#allocation2 + $0xff] sm:$0xff]  ;;  %v6452_v38 = vsel %vm18175_vm14, %v6260_v13, 0.0  ;;  %v18218_v13 = vld [vmem:[#allocation2 + $0x137] sm:$0xff] }
 0x23d   : > { %15578 = vmatmul.mubr.msk.f32.gmra.mrb[126].mxu1 %vm363_vm1, %v18136_v48  ;;  %15838 = vmatprep.mubr.msk.f32.mxu0 %vm363_vm1, %v9373_v9  ;;  %v15315_v18 = vpop.f32.mrb[22].mxu1  ;;  %v18155_v5 = vpop.f32.mrb[114].mxu0 }
 0x23e   : > { %15580 = vmatprep.mubr.msk.f32.mxu1 %vm363_vm1, %v6448_v29  ;;  %4097 = vst.msk [vmem:[#allocation3 + $0x198] sm:$0xff] %vm363_vm1, %v15315_v18  ;;  %v3977_v28 = vpop.f32.mrb[23].mxu1  ;;  %v18160_v6 = vpop.f32.mrb[115].mxu0  ;;  %v18199_v29 = vld [vmem:[#allocation2 + $0x127] sm:$0xff] }
 0x23f   : > { %4096 = vst.msk [vmem:[#allocation3 + $0x190] sm:$0xff] %vm363_vm1, %v3977_v28  ;;  %v6454_v2 = vsel %vm21286_vm2, %v18199_v29, 0.0 }
 0x240   : > { %15839 = vmatmul.mubr.msk.f32.vlgmr.msra.gmra.mrb[220].mxu0 %vm363_vm1, %v17890_v0 }
 0x241   : > { %15581 = vmatmul.mubr.msk.f32.gmra.mrb[128].mxu1 %vm363_vm1, %v18157_v20  ;;  %15841 = vmatprep.mubr.msk.f32.mxu0 %vm363_vm1, %v9375_v55  ;;  %v15318_v0 = vpop.f32.mrb[24].mxu1 }
 0x242   : > { %15583 = vmatprep.mubr.msk.f32.mxu1 %vm363_vm1, %v6450_v3  ;;  %16285 = vmatpush3.bf16.msra.mxu0 %v17945_v62  ;;  %v18180_v11 = vpop.f32.mrb[116].mxu0  ;;  %4099 = vst.msk [vmem:[#allocation3 + $0x1a8] sm:$0xff] %vm363_vm1, %v15318_v0  ;;  %v3987_v56 = vpop.f32.mrb[25].mxu1  ;;  %v9377_v62 = vsel %vm16609_vm3, %v17906_v63, 0.0  ;;  %v6261_v3 = vld [vmem:[#allocation2 + $0x11f] sm:$0xff]  ;;  %v9379_v63 = vsel %vm21255_vm6, %v17923_v58, 0.0  ;;  %vm21287_vm3 = vnez %v21150_v15  ;;  %vm21290_vm6 = vnez %v21152_v49 }
 0x243   : > { %v18185_v28 = vpop.f32.mrb[117].mxu0  ;;  %4098 = vst.msk [vmem:[#allocation3 + $0x1a0] sm:$0xff] %vm363_vm1, %v3987_v56  ;;  %v6456_v24 = vsel %vm21287_vm3, %v18218_v13, 0.0  ;;  %v9381_v58 = vsel %vm21256_vm9, %v17951_v45, 0.0  ;;  %v9383_v45 = vsel %vm21257_vm15, %v17972_v41, 0.0  ;;  %vm21292_vm9 = vnez %v21154_v17 }
 0x244   : > { %15842 = vmatmul.mubr.msk.f32.gmra.mrb[222].mxu0 %vm363_vm1, %v17909_v8  ;;  %v9385_v41 = vsel %vm21258_vm8, %v17992_v7, 0.0  ;;  %vm21296_vm8 = vnez %v21160_v14 }
 0x245   : > { %15584 = vmatmul.mubr.msk.f32.gmra.mrb[130].mxu1 %vm363_vm1, %v18182_v36  ;;  %15844 = vmatprep.mubr.msk.f32.mxu0 %vm363_vm1, %v9377_v62 }
 0x246   : > { %15586 = vmatprep.mubr.msk.f32.mxu1 %vm363_vm1, %v6452_v38  ;;  %v15321_v9 = vpop.f32.mrb[26].mxu1  ;;  %v18201_v27 = vpop.f32.mrb[118].mxu0 }
 0x247   : > { %4101 = vst.msk [vmem:[#allocation3 + $0x1b8] sm:$0xff] %vm363_vm1, %v15321_v9  ;;  %v3997_v8 = vpop.f32.mrb[27].mxu1  ;;  %v18204_v55 = vpop.f32.mrb[119].mxu0  ;;  %v18240_v9 = vld [vmem:[#allocation2 + $0x147] sm:$0xff] }
 0x248   : > { %15845 = vmatmul.mubr.msk.f32.gmra.mrb[224].mxu0 %vm363_vm1, %v17925_v10  ;;  %4100 = vst.msk [vmem:[#allocation3 + $0x1b0] sm:$0xff] %vm363_vm1, %v3997_v8  ;;  %v18222_v10 = vld [vmem:[#allocation2 + $0x12f] sm:$0xff]  ;;  %v6458_v43 = vsel %vm21290_vm6, %v18240_v9, 0.0 }
 0x249   : > { %15587 = vmatmul.mubr.msk.f32.gmra.mrb[132].mxu1 %vm363_vm1, %v6261_v3  ;;  %15847 = vmatprep.mubr.msk.f32.mxu0 %vm363_vm1, %v9379_v63 }
 0x24a   : > { %15589 = vmatprep.mubr.msk.f32.mxu1 %vm363_vm1, %v6454_v2 }
 0x24b   : > { %v15324_v0 = vpop.f32.mrb[28].mxu1  ;;  %v18220_v56 = vpop.f32.mrb[120].mxu0 }
 0x24c   : > { %4103 = vst.msk [vmem:[#allocation3 + $0x1c8] sm:$0xff] %vm363_vm1, %v15324_v0  ;;  %v4007_v38 = vpop.f32.mrb[29].mxu1  ;;  %v18225_v62 = vpop.f32.mrb[121].mxu0  ;;  %15848 = vmatmul.mubr.msk.f32.gmra.mrb[226].mxu0 %vm363_vm1, %v17956_v53  ;;  %v18244_v53 = vld [vmem:[#allocation2 + $0x13f] sm:$0xff]  ;;  %v18262_v0 = vld [vmem:[#allocation2 + $0x157] sm:$0xff] }
 0x24d   : > { %15590 = vmatmul.mubr.msk.f32.gmra.mrb[134].mxu1 %vm363_vm1, %v18222_v10  ;;  %4102 = vst.msk [vmem:[#allocation3 + $0x1c0] sm:$0xff] %vm363_vm1, %v4007_v38  ;;  %15850 = vmatprep.mubr.msk.f32.mxu0 %vm363_vm1, %v9381_v58  ;;  %v6460_v59 = vsel %vm21292_vm9, %v18262_v0, 0.0 }
 0x24e   : > { %15592 = vmatprep.mubr.msk.f32.mxu1 %vm363_vm1, %v6456_v24  ;;  %v18264_v24 = vld [vmem:[#allocation2 + $0x14f] sm:$0xff] }
 0x24f   : > { %v18242_v8 = vpop.f32.mrb[122].mxu0 }
 0x250   : > { %v15327_v3 = vpop.f32.mrb[30].mxu1  ;;  %21288 = vst [vmem:[#allocation90_spill] sm:$0xff] %v18242_v8  ;;  %v18247_v63 = vpop.f32.mrb[123].mxu0  ;;  %15851 = vmatmul.mubr.msk.f32.gmra.mrb[228].mxu0 %vm363_vm1, %v17976_v42 }
 0x251   : > { %4105 = vst.msk [vmem:[#allocation3 + $0x1d8] sm:$0xff] %vm363_vm1, %v15327_v3  ;;  %v4017_v2 = vpop.f32.mrb[31].mxu1  ;;  %21289 = vst [vmem:[#allocation91_spill] sm:$0xff] %v18247_v63  ;;  %15593 = vmatmul.mubr.msk.f32.gmra.mrb[136].mxu1 %vm363_vm1, %v18244_v53  ;;  %15853 = vmatprep.mubr.msk.f32.mxu0 %vm363_vm1, %v9383_v45  ;;  %v18288_v45 = vld [vmem:[#allocation2 + $0x15f] sm:$0xff] }
 0x252   : > { %4104 = vst.msk [vmem:[#allocation3 + $0x1d0] sm:$0xff] %vm363_vm1, %v4017_v2  ;;  %15595 = vmatprep.mubr.msk.f32.mxu1 %vm363_vm1, %v6458_v43  ;;  %v18284_v2 = vld [vmem:[#allocation2 + $0x167] sm:$0xff] }
 0x253   : > { %v18266_v42 = vpop.f32.mrb[124].mxu0  ;;  %v6462_v7 = vsel %vm21296_vm8, %v18284_v2, 0.0 }
 0x254   : > { %v15330_v38 = vpop.f32.mrb[32].mxu1  ;;  %21291 = vst [vmem:[#allocation92_spill] sm:$0xff] %v18266_v42  ;;  %15854 = vmatmul.mubr.msk.f32.gmra.mrb[230].mxu0 %vm363_vm1, %v17996_v23  ;;  %v18279_v3 = vpop.f32.mrb[125].mxu0  ;;  %v4945_v42 = vld [vmem:[#allocation3] sm:$0xff] }
 0x255   : > { %4107 = vst.msk [vmem:[#allocation3 + $0x1e8] sm:$0xff] %vm363_vm1, %v15330_v38  ;;  %v4027_v58 = vpop.f32.mrb[33].mxu1  ;;  %15596 = vmatmul.mubr.msk.f32.gmra.mrb[138].mxu1 %vm363_vm1, %v18264_v24  ;;  %21293 = vst [vmem:[#allocation93_spill] sm:$0xff] %v18279_v3  ;;  %15856 = vmatprep.mubr.msk.f32.mxu0 %vm363_vm1, %v9385_v41 }
 0x256   : > { %4106 = vst.msk [vmem:[#allocation3 + $0x1e0] sm:$0xff] %vm363_vm1, %v4027_v58  ;;  %15598 = vmatprep.mubr.msk.f32.mxu1 %vm363_vm1, %v6460_v59  ;;  %v9387_v58 = vsel %vm21261_vm5, %v18012_v34, 0.0  ;;  %v18306_v59 = vld [vmem:[#allocation2 + $0x177] sm:$0xff]  ;;  %vm21300_vm5 = vnez %v21299_v47 }
 0x257   : > { %v18286_v23 = vpop.f32.mrb[126].mxu0  ;;  %v6464_v34 = vsel %vm21300_vm5, %v18306_v59, 0.0 }
 0x258   : > { %v15333_v43 = vpop.f32.mrb[34].mxu1  ;;  %21294 = vst [vmem:[#allocation94_spill] sm:$0xff] %v18286_v23  ;;  %v18291_v26 = vpop.f32.mrb[127].mxu0  ;;  %15857 = vmatmul.mubr.msk.f32.gmra.mrb[232].mxu0 %vm363_vm1, %v18016_v1  ;;  %v18310_v1 = vld [vmem:[#allocation2 + $0x16f] sm:$0xff] }
 0x259   : > { %4109 = vst.msk [vmem:[#allocation3 + $0x1f8] sm:$0xff] %vm363_vm1, %v15333_v43  ;;  %v4037_v38 = vpop.f32.mrb[35].mxu1  ;;  %21295 = vst [vmem:[#allocation95_spill] sm:$0xff] %v18291_v26  ;;  %15599 = vmatmul.mubr.msk.f32.gmra.mrb[140].mxu1 %vm363_vm1, %v18288_v45  ;;  %15859 = vmatprep.mubr.msk.f32.mxu0 %vm363_vm1, %v9387_v58  ;;  %v4946_v43 = vld [vmem:[#allocation3 + $0x8] sm:$0xff]  ;;  %v18326_v58 = vld [vmem:[#allocation2 + $0x187] sm:$0xff] }
 0x25a   : > { %4108 = vst.msk [vmem:[#allocation3 + $0x1f0] sm:$0xff] %vm363_vm1, %v4037_v38  ;;  %15601 = vmatprep.mubr.msk.f32.mxu1 %vm363_vm1, %v6462_v7  ;;  %v9389_v38 = vsel %vm21264_vm7, %v18032_v16, 0.0  ;;  %v4947_v16 = vld [vmem:[#allocation3 + $0x10] sm:$0xff] }
 0x25b   : > { %v18308_v26 = vpop.f32.mrb[128].mxu0 }
 0x25c   : > { %v15340_v41 = vpop.f32.mrb[36].mxu1  ;;  %21297 = vst [vmem:[#allocation96_spill] sm:$0xff] %v18308_v26  ;;  %v18312_v63 = vpop.f32.mrb[129].mxu0  ;;  %15860 = vmatmul.mubr.msk.f32.gmra.mrb[234].mxu0 %vm363_vm1, %v18036_v51 }
 0x25d   : > { %v5010_v23 = vadd.f32 %v15340_v41, %v4946_v43  ;;  %v4626_v3 = vpop.f32.mrb[37].mxu1  ;;  %21298 = vst [vmem:[#allocation97_spill] sm:$0xff] %v18312_v63  ;;  %15602 = vmatmul.mubr.msk.f32.gmra.mrb[142].mxu1 %vm363_vm1, %v18310_v1  ;;  %15862 = vmatprep.mubr.msk.f32.mxu0 %vm363_vm1, %v9389_v38  ;;  %v4948_v41 = vld [vmem:[#allocation3 + $0x18] sm:$0xff]  ;;  %v18332_v63 = vld [vmem:[#allocation2 + $0x17f] sm:$0xff] }
 0x25e   : > { %v5009_v7 = vadd.f32 %v4945_v42, %v4626_v3  ;;  %15604 = vmatprep.mubr.msk.f32.mxu1 %vm363_vm1, %v6464_v34  ;;  %v21303_v3 = vld [vmem:[#allocation39_spill] sm:$0xff]  ;;  %v9391_v34 = vsel %vm21267_vm0, %v18052_v21, 0.0  ;;  %v4949_v21 = vld [vmem:[#allocation3 + $0x20] sm:$0xff] }
 0x25f   : > { %5074 = vst.msk [vmem:[#allocation3 + $0x8] sm:$0xff] %vm363_vm1, %v5010_v23  ;;  %v18330_v43 = vpop.f32.mrb[130].mxu0  ;;  %vm21304_vm7 = vnez %v21303_v3 }
 0x260   : > { %5073 = vst.msk [vmem:[#allocation3] sm:$0xff] %vm363_vm1, %v5009_v7  ;;  %v15343_v51 = vpop.f32.mrb[38].mxu1  ;;  %21301 = vst [vmem:[#allocation37_spill] sm:$0xff] %v18330_v43  ;;  %v18334_v42 = vpop.f32.mrb[131].mxu0  ;;  %15863 = vmatmul.mubr.msk.f32.gmra.mrb[236].mxu0 %vm363_vm1, %v18056_v50  ;;  %v6466_v23 = vsel %vm21304_vm7, %v18326_v58, 0.0  ;;  %v18348_v7 = vld [vmem:[#allocation2 + $0x197] sm:$0xff] }
 0x261   : > { %v5012_v26 = vadd.f32 %v15343_v51, %v4948_v41  ;;  %v4636_v4 = vpop.f32.mrb[39].mxu1  ;;  %21302 = vst [vmem:[#allocation98_spill] sm:$0xff] %v18334_v42  ;;  %15605 = vmatmul.mubr.msk.f32.gmra.mrb[144].mxu1 %vm363_vm1, %v18332_v63  ;;  %15865 = vmatprep.mubr.msk.f32.mxu0 %vm363_vm1, %v9391_v34  ;;  %v4950_v51 = vld [vmem:[#allocation3 + $0x28] sm:$0xff]  ;;  %v18354_v42 = vld [vmem:[#allocation2 + $0x18f] sm:$0xff] }
 0x262   : > { %v5011_v38 = vadd.f32 %v4947_v16, %v4636_v4  ;;  %15607 = vmatprep.mubr.msk.f32.mxu1 %vm363_vm1, %v6466_v23  ;;  %v9393_v23 = vsel %vm21270_vm11, %v18072_v39, 0.0 }
 0x263   : > { %5076 = vst.msk [vmem:[#allocation3 + $0x18] sm:$0xff] %vm363_vm1, %v5012_v26  ;;  %v18352_v41 = vpop.f32.mrb[132].mxu0  ;;  %v21307_v26 = vld [vmem:[#allocation43_spill] sm:$0xff] }
 0x264   : > { %5075 = vst.msk [vmem:[#allocation3 + $0x10] sm:$0xff] %vm363_vm1, %v5011_v38  ;;  %v15346_v50 = vpop.f32.mrb[40].mxu1  ;;  %21305 = vst [vmem:[#allocation39_spill] sm:$0xff] %v18352_v41  ;;  %v18356_v4 = vpop.f32.mrb[133].mxu0  ;;  %15866 = vmatmul.mubr.msk.f32.gmra.mrb[238].mxu0 %vm363_vm1, %v18076_v25  ;;  %vm21308_vm0 = vnez %v21307_v26  ;;  %v18370_v38 = vld [vmem:[#allocation2 + $0x1a7] sm:$0xff] }
 0x265   : > { %v5014_v43 = vadd.f32 %v15346_v50, %v4950_v51  ;;  %v4646_v40 = vpop.f32.mrb[41].mxu1  ;;  %21306 = vst [vmem:[#allocation99_spill] sm:$0xff] %v18356_v4  ;;  %15608 = vmatmul.mubr.msk.f32.gmra.mrb[146].mxu1 %vm363_vm1, %v18354_v42  ;;  %v6468_v16 = vsel %vm21308_vm0, %v18348_v7, 0.0  ;;  %15868 = vmatprep.mubr.msk.f32.mxu0 %vm363_vm1, %v9393_v23  ;;  %v4952_v41 = vld [vmem:[#allocation3 + $0x38] sm:$0xff] }
 0x266   : > { %v5013_v34 = vadd.f32 %v4949_v21, %v4646_v40  ;;  %15610 = vmatprep.mubr.msk.f32.mxu1 %vm363_vm1, %v6468_v16  ;;  %v6037_v50 = vld [vmem:[#allocation3 + $0x8] sm:$0xff]  ;;  %v4951_v16 = vld [vmem:[#allocation3 + $0x30] sm:$0xff] }
 0x267   : > { %5078 = vst.msk [vmem:[#allocation3 + $0x28] sm:$0xff] %vm363_vm1, %v5014_v43  ;;  %v6101_v25 = vadd.f32 %v17927_v57, %v6037_v50  ;;  %v6036_v51 = vld [vmem:[#allocation3] sm:$0xff]  ;;  %v18375_v8 = vpop.f32.mrb[134].mxu0  ;;  %v21311_v57 = vld [vmem:[#allocation46_spill] sm:$0xff] }
 0x268   : > { %5077 = vst.msk [vmem:[#allocation3 + $0x20] sm:$0xff] %vm363_vm1, %v5013_v34  ;;  %v15349_v4 = vpop.f32.mrb[42].mxu1  ;;  %21309 = vst [vmem:[#allocation43_spill] sm:$0xff] %v18375_v8  ;;  %v6100_v39 = vadd.f32 %v6036_v51, %v17943_v32  ;;  %v18380_v23 = vpop.f32.mrb[135].mxu0  ;;  %15869 = vmatmul.mubr.msk.f32.gmra.mrb[240].mxu0 %vm363_vm1, %v18096_v19  ;;  %vm21312_vm11 = vnez %v21311_v57  ;;  %v9395_v34 = vsel %vm21273_vm13, %v18092_v46, 0.0  ;;  %v4954_v46 = vld [vmem:[#allocation3 + $0x48] sm:$0xff] }
 0x269   : > { %v5016_v40 = vadd.f32 %v15349_v4, %v4952_v41  ;;  %v4656_v21 = vpop.f32.mrb[43].mxu1  ;;  %21310 = vst [vmem:[#allocation100_spill] sm:$0xff] %v18380_v23  ;;  %15611 = vmatmul.mubr.msk.f32.gmra.mrb[148].mxu1 %vm363_vm1, %v18377_v12  ;;  %v6470_v43 = vsel %vm21312_vm11, %v18370_v38, 0.0  ;;  %6165 = vst.msk [vmem:[#allocation3 + $0x8] sm:$0xff] %vm363_vm1, %v6101_v25  ;;  %15871 = vmatprep.mubr.msk.f32.mxu0 %vm363_vm1, %v9395_v34  ;;  %v18395_v41 = vld [vmem:[#allocation2 + $0x1b7] sm:$0xff]  ;;  %v18403_v51 = vld [vmem:[#allocation2 + $0x1af] sm:$0xff] }
 0x26a   : > { %v5015_v32 = vadd.f32 %v4951_v16, %v4656_v21  ;;  %15613 = vmatprep.mubr.msk.f32.mxu1 %vm363_vm1, %v6470_v43  ;;  %6164 = vst.msk [vmem:[#allocation3] sm:$0xff] %vm363_vm1, %v6100_v39  ;;  %v6039_v19 = vld [vmem:[#allocation3 + $0x18] sm:$0xff]  ;;  %v4953_v34 = vld [vmem:[#allocation3 + $0x40] sm:$0xff] }
 0x26b   : > { %5080 = vst.msk [vmem:[#allocation3 + $0x38] sm:$0xff] %vm363_vm1, %v5016_v40  ;;  %v6103_v4 = vadd.f32 %v17954_v44, %v6039_v19  ;;  %v6038_v50 = vld [vmem:[#allocation3 + $0x10] sm:$0xff]  ;;  %v18401_v25 = vpop.f32.mrb[136].mxu0  ;;  %v21315_v44 = vld [vmem:[#allocation48_spill] sm:$0xff]  ;;  %v21341_v23 = vld [vmem:[#allocation79_spill] sm:$0xff] }
 0x26c   : > { %5079 = vst.msk [vmem:[#allocation3 + $0x30] sm:$0xff] %vm363_vm1, %v5015_v32  ;;  %v15352_v37 = vpop.f32.mrb[44].mxu1  ;;  %21313 = vst [vmem:[#allocation46_spill] sm:$0xff] %v18401_v25  ;;  %v6102_v21 = vadd.f32 %v6038_v50, %v17959_v61  ;;  %v18406_v39 = vpop.f32.mrb[137].mxu0  ;;  %15872 = vmatmul.mubr.msk.f32.gmra.mrb[242].mxu0 %vm363_vm1, %v18116_v54  ;;  %vm21316_vm13 = vnez %v21315_v44  ;;  %v9397_v32 = vsel %vm21276_vm10, %v18112_v60, 0.0  ;;  %v18421_v19 = vld [vmem:[#allocation2 + $0x1c7] sm:$0xff] }
 0x26d   : > { %v5018_v16 = vadd.f32 %v15352_v37, %v4954_v46  ;;  %v4666_v43 = vpop.f32.mrb[45].mxu1  ;;  %21314 = vst [vmem:[#allocation101_spill] sm:$0xff] %v18406_v39  ;;  %15614 = vmatmul.mubr.msk.f32.gmra.mrb[150].mxu1 %vm363_vm1, %v18403_v51  ;;  %v6472_v40 = vsel %vm21316_vm13, %v18395_v41, 0.0  ;;  %6167 = vst.msk [vmem:[#allocation3 + $0x18] sm:$0xff] %vm363_vm1, %v6103_v4  ;;  %15874 = vmatprep.mubr.msk.f32.mxu0 %vm363_vm1, %v9397_v32  ;;  %v4956_v60 = vld [vmem:[#allocation3 + $0x58] sm:$0xff]  ;;  %v18429_v46 = vld [vmem:[#allocation2 + $0x1bf] sm:$0xff] }
 0x26e   : > { %v5017_v61 = vadd.f32 %v4953_v34, %v4666_v43  ;;  %15616 = vmatprep.mubr.msk.f32.mxu1 %vm363_vm1, %v6472_v40  ;;  %6166 = vst.msk [vmem:[#allocation3 + $0x10] sm:$0xff] %vm363_vm1, %v6102_v21  ;;  %v6041_v54 = vld [vmem:[#allocation3 + $0x28] sm:$0xff]  ;;  %v4955_v32 = vld [vmem:[#allocation3 + $0x50] sm:$0xff]  ;;  %v4957_v39 = vld [vmem:[#allocation3 + $0x60] sm:$0xff] }
 0x26f   : > { %5082 = vst.msk [vmem:[#allocation3 + $0x48] sm:$0xff] %vm363_vm1, %v5018_v16  ;;  %v6105_v50 = vadd.f32 %v17974_v52, %v6041_v54  ;;  %v6040_v37 = vld [vmem:[#allocation3 + $0x20] sm:$0xff]  ;;  %v18427_v4 = vpop.f32.mrb[138].mxu0  ;;  %v21319_v52 = vld [vmem:[#allocation53_spill] sm:$0xff]  ;;  %v9399_v54 = vsel %vm21279_vm12, %v18131_v22, 0.0  ;;  %v4959_v25 = vld [vmem:[#allocation3 + $0x70] sm:$0xff] }
 0x270   : > { %5081 = vst.msk [vmem:[#allocation3 + $0x40] sm:$0xff] %vm363_vm1, %v5017_v61  ;;  %v15355_v31 = vpop.f32.mrb[46].mxu1  ;;  %21317 = vst [vmem:[#allocation48_spill] sm:$0xff] %v18427_v4  ;;  %v6104_v43 = vadd.f32 %v6040_v37, %v17979_v30  ;;  %v18432_v21 = vpop.f32.mrb[139].mxu0  ;;  %15875 = vmatmul.mubr.msk.f32.gmra.mrb[244].mxu0 %vm363_vm1, %v18136_v48  ;;  %vm21320_vm10 = vnez %v21319_v52  ;;  %v18447_v37 = vld [vmem:[#allocation2 + $0x1d7] sm:$0xff] }
 0x271   : > { %v5020_v34 = vadd.f32 %v15355_v31, %v4956_v60  ;;  %v4676_v40 = vpop.f32.mrb[47].mxu1  ;;  %21318 = vst [vmem:[#allocation102_spill] sm:$0xff] %v18432_v21  ;;  %15617 = vmatmul.mubr.msk.f32.gmra.mrb[152].mxu1 %vm363_vm1, %v18429_v46  ;;  %v6474_v16 = vsel %vm21320_vm10, %v18421_v19, 0.0  ;;  %6169 = vst.msk [vmem:[#allocation3 + $0x28] sm:$0xff] %vm363_vm1, %v6105_v50  ;;  %15877 = vmatprep.mubr.msk.f32.mxu0 %vm363_vm1, %v9399_v54  ;;  %v21322_v31 = vld [vmem:[#allocation74_spill] sm:$0xff]  ;;  %v4958_v61 = vld [vmem:[#allocation3 + $0x68] sm:$0xff] }
 0x272   : > { %v5019_v30 = vadd.f32 %v4955_v32, %v4676_v40  ;;  %15619 = vmatprep.mubr.msk.f32.mxu1 %vm363_vm1, %v6474_v16  ;;  %6168 = vst.msk [vmem:[#allocation3 + $0x20] sm:$0xff] %vm363_vm1, %v6104_v43  ;;  %v6043_v48 = vld [vmem:[#allocation3 + $0x38] sm:$0xff] }
 0x273   : > { %5084 = vst.msk [vmem:[#allocation3 + $0x58] sm:$0xff] %vm363_vm1, %v5020_v34  ;;  %v6107_v60 = vadd.f32 %v21322_v31, %v6043_v48  ;;  %v6042_v21 = vld [vmem:[#allocation3 + $0x30] sm:$0xff]  ;;  %v18453_v50 = vpop.f32.mrb[140].mxu0  ;;  %v18455_v40 = vld [vmem:[#allocation2 + $0x1cf] sm:$0xff] }
 0x274   : > { %5083 = vst.msk [vmem:[#allocation3 + $0x50] sm:$0xff] %vm363_vm1, %v5019_v30  ;;  %v15358_v22 = vpop.f32.mrb[48].mxu1  ;;  %21323 = vst [vmem:[#allocation53_spill] sm:$0xff] %v18453_v50  ;;  %v21324_v32 = vld [vmem:[#allocation75_spill] sm:$0xff]  ;;  %v18458_v43 = vpop.f32.mrb[141].mxu0  ;;  %15878 = vmatmul.mubr.msk.f32.gmra.mrb[246].mxu0 %vm363_vm1, %v18157_v20  ;;  %v21326_v34 = vld [vmem:[#allocation56_spill] sm:$0xff] }
 0x275   : > { %v6106_v16 = vadd.f32 %v6042_v21, %v21324_v32  ;;  %v5022_v54 = vadd.f32 %v15358_v22, %v4958_v61  ;;  %v4686_v4 = vpop.f32.mrb[49].mxu1  ;;  %21325 = vst [vmem:[#allocation23_spill] sm:$0xff] %v18458_v43  ;;  %15620 = vmatmul.mubr.msk.f32.gmra.mrb[154].mxu1 %vm363_vm1, %v18455_v40  ;;  %vm21327_vm12 = vnez %v21326_v34  ;;  %v21328_v48 = vld [vmem:[#allocation26_spill] sm:$0xff]  ;;  %6171 = vst.msk [vmem:[#allocation3 + $0x38] sm:$0xff] %vm363_vm1, %v6107_v60  ;;  %v21331_v61 = vld [vmem:[#allocation76_spill] sm:$0xff] }
 0x276   : > { %v6476_v30 = vsel %vm21327_vm12, %v18447_v37, 0.0  ;;  %vm21329_vm15 = vnez %v21328_v48  ;;  %v5021_v21 = vadd.f32 %v4957_v39, %v4686_v4  ;;  %v18473_v22 = vld [vmem:[#allocation2 + $0x1e7] sm:$0xff]  ;;  %v6045_v20 = vld [vmem:[#allocation3 + $0x48] sm:$0xff]  ;;  %v4961_v34 = vld [vmem:[#allocation3 + $0x80] sm:$0xff] }
 0x277   : > { %v9401_v31 = vsel %vm21329_vm15, %v18153_v33, 0.0  ;;  %15622 = vmatprep.mubr.msk.f32.mxu1 %vm363_vm1, %v6476_v30  ;;  %21330 = vst [vmem:[#allocation74_spill] sm:$0xff] %v18473_v22  ;;  %6170 = vst.msk [vmem:[#allocation3 + $0x30] sm:$0xff] %vm363_vm1, %v6106_v16  ;;  %v6109_v32 = vadd.f32 %v21331_v61, %v6045_v20  ;;  %v6044_v43 = vld [vmem:[#allocation3 + $0x40] sm:$0xff]  ;;  %v4960_v48 = vld [vmem:[#allocation3 + $0x78] sm:$0xff]  ;;  %v18479_v60 = vpop.f32.mrb[142].mxu0 }
 0x278   : > { %15880 = vmatprep.mubr.msk.f32.mxu0 %vm363_vm1, %v9401_v31  ;;  %5086 = vst.msk [vmem:[#allocation3 + $0x68] sm:$0xff] %vm363_vm1, %v5022_v54  ;;  %5085 = vst.msk [vmem:[#allocation3 + $0x60] sm:$0xff] %vm363_vm1, %v5021_v21  ;;  %v15361_v33 = vpop.f32.mrb[50].mxu1  ;;  %v18481_v39 = vld [vmem:[#allocation2 + $0x1df] sm:$0xff]  ;;  %v18484_v16 = vpop.f32.mrb[143].mxu0  ;;  %v18496_v61 = vld [vmem:[#allocation2 + $0x1f7] sm:$0xff] }
 0x279   : > { %21332 = vst [vmem:[#allocation75_spill] sm:$0xff] %v18479_v60  ;;  %v21333_v4 = vld [vmem:[#allocation77_spill] sm:$0xff]  ;;  %v5024_v31 = vadd.f32 %v15361_v33, %v4960_v48  ;;  %v4696_v50 = vpop.f32.mrb[51].mxu1  ;;  %21334 = vst [vmem:[#allocation26_spill] sm:$0xff] %v18484_v16  ;;  %15623 = vmatmul.mubr.msk.f32.gmra.mrb[156].mxu1 %vm363_vm1, %v18481_v39  ;;  %15881 = vmatmul.mubr.msk.f32.gmra.mrb[248].mxu0 %vm363_vm1, %v18182_v36  ;;  %v21335_v54 = vld [vmem:[#allocation58_spill] sm:$0xff] }
 0x27a   : > { %v6108_v30 = vadd.f32 %v6044_v43, %v21333_v4  ;;  %vm21336_vm4 = vnez %v21335_v54  ;;  %6173 = vst.msk [vmem:[#allocation3 + $0x48] sm:$0xff] %vm363_vm1, %v6109_v32  ;;  %v5023_v20 = vadd.f32 %v4959_v25, %v4696_v50  ;;  %v21337_v43 = vmov 0.0   ;;  %v6047_v33 = vld [vmem:[#allocation3 + $0x58] sm:$0xff]  ;;  %v21338_v48 = vld [vmem:[#allocation78_spill] sm:$0xff]  ;;  %v4962_v60 = vld [vmem:[#allocation3 + $0x88] sm:$0xff] }
 0x27b   : > { %v6478_v21 = vsel %vm21336_vm4, %v18473_v22, 0.0  ;;  %15883 = vmatprep.mubr.f32.mxu0 %v21337_v43  ;;  %5088 = vst.msk [vmem:[#allocation3 + $0x78] sm:$0xff] %vm363_vm1, %v5024_v31  ;;  %v6111_v36 = vadd.f32 %v21338_v48, %v6047_v33  ;;  %v6046_v4 = vld [vmem:[#allocation3 + $0x50] sm:$0xff]  ;;  %v18502_v32 = vpop.f32.mrb[144].mxu0  ;;  %v18504_v25 = vld [vmem:[#allocation2 + $0x1ef] sm:$0xff]  ;;  %v9405_v33 = vsel %vm18175_vm14, %v18199_v29, 0.0 }
 0x27c   : > { %15625 = vmatprep.mubr.msk.f32.mxu1 %vm363_vm1, %v6478_v21  ;;  %6172 = vst.msk [vmem:[#allocation3 + $0x40] sm:$0xff] %vm363_vm1, %v6108_v30  ;;  %5087 = vst.msk [vmem:[#allocation3 + $0x70] sm:$0xff] %vm363_vm1, %v5023_v20  ;;  %v15364_v16 = vpop.f32.mrb[52].mxu1  ;;  %v21340_v50 = vld [vmem:[#allocation4_spill] sm:$0xff]  ;;  %v6110_v8 = vadd.f32 %v6046_v4, %v21341_v23  ;;  %v18508_v22 = vpop.f32.mrb[145].mxu0  ;;  %v21343_v31 = vld [vmem:[#allocation63_spill] sm:$0xff] }
 0x27d   : > { %21339 = vst [vmem:[#allocation76_spill] sm:$0xff] %v18502_v32  ;;  %v1292_v21 = vadd.s32 8, %v21340_v50  ;;  %v5026_v54 = vadd.f32 %v15364_v16, %v4962_v60  ;;  %v4706_v30 = vpop.f32.mrb[53].mxu1  ;;  %21342 = vst [vmem:[#allocation77_spill] sm:$0xff] %v18508_v22  ;;  %15626 = vmatmul.mubr.msk.f32.gmra.mrb[158].mxu1 %vm363_vm1, %v18504_v25  ;;  %15884 = vmatmul.mubr.f32.gmra.mrb[250].mxu0 %v21337_v43  ;;  %vm21344_vm15 = vnez %v21343_v31  ;;  %v18522_v60 = vld [vmem:[#allocation2 + $0x207] sm:$0xff]  ;;  %v21345_v48 = vld [vmem:[#allocation80_spill] sm:$0xff] }
 0x27e   : > { %v6480_v20 = vsel %vm21344_vm15, %v18496_v61, 0.0  ;;  %6175 = vst.msk [vmem:[#allocation3 + $0x58] sm:$0xff] %vm363_vm1, %v6111_v36  ;;  %v5025_v23 = vadd.f32 %v4961_v34, %v4706_v30  ;;  %15886 = vmatprep.mubr.msk.f32.mxu0 %vm363_vm1, %v9405_v33  ;;  %6174 = vst.msk [vmem:[#allocation3 + $0x50] sm:$0xff] %vm363_vm1, %v6110_v8  ;;  %v4964_v29 = vld [vmem:[#allocation3 + $0x98] sm:$0xff]  ;;  %v18530_v34 = vld [vmem:[#allocation2 + $0x1ff] sm:$0xff] }
 0x27f   : > { %15628 = vmatprep.mubr.msk.f32.mxu1 %vm363_vm1, %v6480_v20  ;;  %v6049_v16 = vld [vmem:[#allocation3 + $0x68] sm:$0xff]  ;;  %5090 = vst.msk [vmem:[#allocation3 + $0x88] sm:$0xff] %vm363_vm1, %v5026_v54  ;;  %v6048_v22 = vld [vmem:[#allocation3 + $0x60] sm:$0xff]  ;;  %v18528_v36 = vpop.f32.mrb[146].mxu0  ;;  %v1366_v30 = vand.u32 15, %v1292_v21  ;;  %v4963_v8 = vld [vmem:[#allocation3 + $0x90] sm:$0xff] }
 0x280   : > { %v6113_v4 = vadd.f32 %v21345_v48, %v6049_v16  ;;  %5089 = vst.msk [vmem:[#allocation3 + $0x80] sm:$0xff] %vm363_vm1, %v5025_v23  ;;  %v15367_v18 = vpop.f32.mrb[54].mxu1  ;;  %v21346_v20 = vld [vmem:[#allocation81_spill] sm:$0xff]  ;;  %v18533_v43 = vpop.f32.mrb[147].mxu0  ;;  %v21347_v54 = vld [vmem:[#allocation66_spill] sm:$0xff]  ;;  %v9407_v21 = vsel %vm21286_vm2, %v18218_v13, 0.0 }
 0x281   : > { %v6112_v33 = vadd.f32 %v6048_v22, %v21346_v20  ;;  %v5028_v32 = vadd.f32 %v15367_v18, %v4964_v29  ;;  %v4716_v50 = vpop.f32.mrb[55].mxu1  ;;  %15629 = vmatmul.mubr.msk.f32.gmra.mrb[160].mxu1 %vm363_vm1, %v18530_v34  ;;  %15887 = vmatmul.mubr.msk.f32.gmra.mrb[252].mxu0 %vm363_vm1, %v18222_v10  ;;  %vm21348_vm14 = vnez %v21347_v54  ;;  %v21349_v10 = vld [vmem:[#allocation82_spill] sm:$0xff]  ;;  %vm18556_vm2 = vcmp.lt.s32.totalorder %v1366_v30, 15  ;;  %v21352_v20 = vld [vmem:[#allocation83_spill] sm:$0xff] }
 0x282   : > { %v6482_v23 = vsel %vm21348_vm14, %v18522_v60, 0.0  ;;  %6177 = vst.msk [vmem:[#allocation3 + $0x68] sm:$0xff] %vm363_vm1, %v6113_v4  ;;  %v5027_v22 = vadd.f32 %v4963_v8, %v4716_v50  ;;  %15889 = vmatprep.mubr.msk.f32.mxu0 %vm363_vm1, %v9407_v21  ;;  %v6051_v16 = vld [vmem:[#allocation3 + $0x78] sm:$0xff]  ;;  %v8090_v21 = vld [vmem:[#allocation2 + $0x19] sm:$0xff]  ;;  %v9409_v30 = vsel %vm21287_vm3, %v18240_v9, 0.0 }
 0x283   : > { %15631 = vmatprep.mubr.msk.f32.mxu1 %vm363_vm1, %v6482_v23  ;;  %6176 = vst.msk [vmem:[#allocation3 + $0x60] sm:$0xff] %vm363_vm1, %v6112_v33  ;;  %5092 = vst.msk [vmem:[#allocation3 + $0x98] sm:$0xff] %vm363_vm1, %v5028_v32  ;;  %v6115_v48 = vadd.f32 %v21349_v10, %v6051_v16  ;;  %v6050_v18 = vld [vmem:[#allocation3 + $0x70] sm:$0xff]  ;;  %v18552_v13 = vpop.f32.mrb[148].mxu0  ;;  %v18554_v4 = vld [vmem:[#allocation2 + $0x20f] sm:$0xff] }
 0x284   : > { %5091 = vst.msk [vmem:[#allocation3 + $0x90] sm:$0xff] %vm363_vm1, %v5027_v22  ;;  %v15370_v29 = vpop.f32.mrb[56].mxu1  ;;  %v6114_v33 = vadd.f32 %v6050_v18, %v21352_v20  ;;  %v4965_v32 = vld [vmem:[#allocation3 + $0xa0] sm:$0xff]  ;;  %v18561_v23 = vpop.f32.mrb[149].mxu0  ;;  %v8091_v22 = vld [vmem:[#allocation2 + $0x21] sm:$0xff]  ;;  %v21354_v20 = vld [vmem:[#allocation85_spill] sm:$0xff] }
 0x285   : > { %v5030_v8 = vadd.f32 %v15370_v29, %v4966_v35  ;;  %v4726_v54 = vpop.f32.mrb[57].mxu1  ;;  %15632 = vmatmul.mubr.msk.f32.gmra.mrb[162].mxu1 %vm363_vm1, %v18554_v4  ;;  %15890 = vmatmul.mubr.msk.f32.gmra.mrb[254].mxu0 %vm363_vm1, %v18244_v53  ;;  %6179 = vst.msk [vmem:[#allocation3 + $0x78] sm:$0xff] %vm363_vm1, %v6115_v48  ;;  %v21353_v18 = vld [vmem:[#allocation84_spill] sm:$0xff]  ;;  %v4968_v9 = vld [vmem:[#allocation3 + $0xb8] sm:$0xff]  ;;  %v8283_v48 = vsel %vm18556_vm2, %v8091_v22, 0.0  ;;  %v21356_v22 = vld [vmem:[#allocation73_spill] sm:$0xff] }
 0x286   : > { %v5029_v16 = vadd.f32 %v4965_v32, %v4726_v54  ;;  %15738 = vmatprep.mubr.msk.f32.mxu1 %vm363_vm1, %v8090_v21  ;;  %15892 = vmatprep.mubr.msk.f32.mxu0 %vm363_vm1, %v9409_v30  ;;  %6178 = vst.msk [vmem:[#allocation3 + $0x70] sm:$0xff] %vm363_vm1, %v6114_v33  ;;  %v6053_v10 = vld [vmem:[#allocation3 + $0x88] sm:$0xff]  ;;  %v4967_v33 = vld [vmem:[#allocation3 + $0xb0] sm:$0xff]  ;;  %v18910_v50 = vld [vmem:[#allocation2 + $0x109] sm:$0xff] }
 0x287   : > { %5094 = vst.msk [vmem:[#allocation3 + $0xa8] sm:$0xff] %vm363_vm1, %v5030_v8  ;;  %v6117_v53 = vadd.f32 %v21353_v18, %v6053_v10  ;;  %v6052_v29 = vld [vmem:[#allocation3 + $0x80] sm:$0xff]  ;;  %v18577_v35 = vpop.f32.mrb[150].mxu0  ;;  %v9411_v18 = vsel %vm21290_vm6, %v18262_v0, 0.0  ;;  %v21361_v0 = vld [vmem:[#allocation87_spill] sm:$0xff] }
 0x288   : > { %5093 = vst.msk [vmem:[#allocation3 + $0xa0] sm:$0xff] %vm363_vm1, %v5029_v16  ;;  %v15373_v15 = vpop.f32.mrb[58].mxu1  ;;  %v6116_v54 = vadd.f32 %v6052_v29, %v21354_v20  ;;  %v18582_v30 = vpop.f32.mrb[151].mxu0  ;;  %v18585_v8 = vld [vmem:[#allocation2 + $0x31] sm:$0xff]  ;;  %v18589_v16 = vld [vmem:[#allocation2 + $0x29] sm:$0xff] }
 0x289   : > { %v5032_v32 = vadd.f32 %v15373_v15, %v4968_v9  ;;  %v4736_v21 = vpop.f32.mrb[59].mxu1  ;;  %21355 = vst [vmem:[#allocation78_spill] sm:$0xff] %v18582_v30  ;;  %15739 = vmatmul.mubr.msk.f32.vlgmr.msra.gmra.mrb[164].mxu1 %vm363_vm1, %v8283_v48  ;;  %15893 = vmatmul.mubr.msk.f32.gmra.mrb[0].mxu0 %vm363_vm1, %v18264_v24  ;;  %6181 = vst.msk [vmem:[#allocation3 + $0x88] sm:$0xff] %vm363_vm1, %v6117_v53  ;;  %v21357_v24 = vld [vmem:[#allocation86_spill] sm:$0xff]  ;;  %v4970_v48 = vld [vmem:[#allocation3 + $0xc8] sm:$0xff] }
 0x28a   : > { %v5031_v10 = vadd.f32 %v4967_v33, %v4736_v21  ;;  %16281 = vmatpush3.bf16.msra.mxu1 %v21356_v22  ;;  %15741 = vmatprep.mubr.msk.f32.mxu1 %vm363_vm1, %v18589_v16  ;;  %6180 = vst.msk [vmem:[#allocation3 + $0x80] sm:$0xff] %vm363_vm1, %v6116_v54  ;;  %v6055_v29 = vld [vmem:[#allocation3 + $0x98] sm:$0xff]  ;;  %v21359_v21 = vld [vmem:[#allocation5_spill] sm:$0xff] }
 0x28b   : > { %5096 = vst.msk [vmem:[#allocation3 + $0xb8] sm:$0xff] %vm363_vm1, %v5032_v32  ;;  %15895 = vmatprep.mubr.msk.f32.mxu0 %vm363_vm1, %v9411_v18  ;;  %v6119_v15 = vadd.f32 %v21357_v24, %v6055_v29  ;;  %v6054_v53 = vld [vmem:[#allocation3 + $0x90] sm:$0xff]  ;;  %v18603_v20 = vpop.f32.mrb[152].mxu0  ;;  %vm21360_vm3 = vnez %v21359_v21  ;;  %v4969_v32 = vld [vmem:[#allocation3 + $0xc0] sm:$0xff]  ;;  %v9413_v18 = vsel %vm21292_vm9, %v18284_v2, 0.0  ;;  %v4972_v2 = vld [vmem:[#allocation3 + $0xd8] sm:$0xff] }
 0x28c   : > { %5095 = vst.msk [vmem:[#allocation3 + $0xb0] sm:$0xff] %vm363_vm1, %v5031_v10  ;;  %v15376_v9 = vpop.f32.mrb[60].mxu1  ;;  %21358 = vst [vmem:[#allocation79_spill] sm:$0xff] %v18603_v20  ;;  %v8285_v49 = vsel %vm21360_vm3, %v18585_v8, 0.0  ;;  %v6118_v54 = vadd.f32 %v6054_v53, %v21361_v0  ;;  %v18609_v30 = vpop.f32.mrb[153].mxu0  ;;  %v18614_v10 = vld [vmem:[#allocation2 + $0x39] sm:$0xff] }
 0x28d   : > { %v5034_v33 = vadd.f32 %v15376_v9, %v4970_v48  ;;  %v4746_v22 = vpop.f32.mrb[61].mxu1  ;;  %21362 = vst [vmem:[#allocation63_spill] sm:$0xff] %v18609_v30  ;;  %15742 = vmatmul.mubr.msk.f32.gmra.mrb[166].mxu1 %vm363_vm1, %v8285_v49  ;;  %15896 = vmatmul.mubr.msk.f32.gmra.mrb[2].mxu0 %vm363_vm1, %v18288_v45  ;;  %v8095_v29 = vld [vmem:[#allocation2 + $0x41] sm:$0xff]  ;;  %6183 = vst.msk [vmem:[#allocation3 + $0x98] sm:$0xff] %vm363_vm1, %v6119_v15  ;;  %v21363_v45 = vld [vmem:[#allocation88_spill] sm:$0xff] }
 0x28e   : > { %v5033_v24 = vadd.f32 %v4969_v32, %v4746_v22  ;;  %15744 = vmatprep.mubr.msk.f32.mxu1 %vm363_vm1, %v18614_v10  ;;  %15898 = vmatprep.mubr.msk.f32.mxu0 %vm363_vm1, %v9413_v18  ;;  %6182 = vst.msk [vmem:[#allocation3 + $0x90] sm:$0xff] %vm363_vm1, %v6118_v54  ;;  %v6057_v53 = vld [vmem:[#allocation3 + $0xa8] sm:$0xff]  ;;  %v21364_v15 = vld [vmem:[#allocation7_spill] sm:$0xff]  ;;  %v4971_v54 = vld [vmem:[#allocation3 + $0xd0] sm:$0xff] }
 0x28f   : > { %5098 = vst.msk [vmem:[#allocation3 + $0xc8] sm:$0xff] %vm363_vm1, %v5034_v33  ;;  %v6121_v9 = vadd.f32 %v21363_v45, %v6057_v53  ;;  %v6056_v48 = vld [vmem:[#allocation3 + $0xa0] sm:$0xff]  ;;  %v18627_v49 = vpop.f32.mrb[154].mxu0  ;;  %vm21365_vm6 = vnez %v21364_v15  ;;  %v21366_v22 = vld [vmem:[#allocation89_spill] sm:$0xff]  ;;  %v21440_v15 = vld [vmem:[#allocation75_spill] sm:$0xff] }
 0x290   : > { %5097 = vst.msk [vmem:[#allocation3 + $0xc0] sm:$0xff] %vm363_vm1, %v5033_v24  ;;  %v15379_v17 = vpop.f32.mrb[62].mxu1  ;;  %v8287_v0 = vsel %vm21365_vm6, %v8095_v29, 0.0  ;;  %v6120_v32 = vadd.f32 %v6056_v48, %v21366_v22  ;;  %v18632_v20 = vpop.f32.mrb[155].mxu0  ;;  %v18637_v33 = vld [vmem:[#allocation2 + $0x49] sm:$0xff]  ;;  %v9415_v24 = vsel %vm21296_vm8, %v18306_v59, 0.0 }
 0x291   : > { %v5036_v18 = vadd.f32 %v15379_v17, %v4972_v2  ;;  %v4756_v30 = vpop.f32.mrb[63].mxu1  ;;  %15745 = vmatmul.mubr.msk.f32.gmra.mrb[168].mxu1 %vm363_vm1, %v8287_v0  ;;  %15899 = vmatmul.mubr.msk.f32.gmra.mrb[4].mxu0 %vm363_vm1, %v18310_v1  ;;  %v8097_v53 = vld [vmem:[#allocation2 + $0x51] sm:$0xff]  ;;  %6185 = vst.msk [vmem:[#allocation3 + $0xa8] sm:$0xff] %vm363_vm1, %v6121_v9 }
 0x292   : > { %v5035_v29 = vadd.f32 %v4971_v54, %v4756_v30  ;;  %15747 = vmatprep.mubr.msk.f32.mxu1 %vm363_vm1, %v18637_v33  ;;  %15901 = vmatprep.mubr.msk.f32.mxu0 %vm363_vm1, %v9415_v24  ;;  %6184 = vst.msk [vmem:[#allocation3 + $0xa0] sm:$0xff] %vm363_vm1, %v6120_v32  ;;  %v6059_v45 = vld [vmem:[#allocation3 + $0xb8] sm:$0xff]  ;;  %v4974_v59 = vld [vmem:[#allocation3 + $0xe8] sm:$0xff]  ;;  %v4973_v32 = vld [vmem:[#allocation3 + $0xe0] sm:$0xff] }
 0x293   : > { %5100 = vst.msk [vmem:[#allocation3 + $0xd8] sm:$0xff] %vm363_vm1, %v5036_v18  ;;  %v6123_v1 = vadd.f32 %v18155_v5, %v6059_v45  ;;  %v6058_v48 = vld [vmem:[#allocation3 + $0xb0] sm:$0xff]  ;;  %v18650_v17 = vpop.f32.mrb[156].mxu0  ;;  %v21367_v30 = vld [vmem:[#allocation9_spill] sm:$0xff]  ;;  %v9417_v18 = vsel %vm21300_vm5, %v18326_v58, 0.0  ;;  %v4976_v58 = vld [vmem:[#allocation3 + $0xf8] sm:$0xff] }
 0x294   : > { %5099 = vst.msk [vmem:[#allocation3 + $0xd0] sm:$0xff] %vm363_vm1, %v5035_v29  ;;  %v15382_v14 = vpop.f32.mrb[64].mxu1  ;;  %vm21368_vm9 = vnez %v21367_v30  ;;  %v6122_v2 = vadd.f32 %v6058_v48, %v18160_v6  ;;  %v18655_v54 = vpop.f32.mrb[157].mxu0  ;;  %v18660_v5 = vld [vmem:[#allocation2 + $0x59] sm:$0xff]  ;;  %v8099_v24 = vld [vmem:[#allocation2 + $0x61] sm:$0xff]  ;;  %v21448_v30 = vld [vmem:[#allocation76_spill] sm:$0xff] }
 0x295   : > { %v8289_v9 = vsel %vm21368_vm9, %v8097_v53, 0.0  ;;  %v5038_v0 = vadd.f32 %v15382_v14, %v4974_v59  ;;  %v4766_v22 = vpop.f32.mrb[65].mxu1  ;;  %15902 = vmatmul.mubr.msk.f32.gmra.mrb[6].mxu0 %vm363_vm1, %v18332_v63  ;;  %6187 = vst.msk [vmem:[#allocation3 + $0xb8] sm:$0xff] %vm363_vm1, %v6123_v1  ;;  %v21369_v1 = vld [vmem:[#allocation11_spill] sm:$0xff] }
 0x296   : > { %15748 = vmatmul.mubr.msk.f32.gmra.mrb[170].mxu1 %vm363_vm1, %v8289_v9  ;;  %v5037_v6 = vadd.f32 %v4973_v32, %v4766_v22  ;;  %15904 = vmatprep.mubr.msk.f32.mxu0 %vm363_vm1, %v9417_v18  ;;  %6186 = vst.msk [vmem:[#allocation3 + $0xb0] sm:$0xff] %vm363_vm1, %v6122_v2  ;;  %v6061_v53 = vld [vmem:[#allocation3 + $0xc8] sm:$0xff]  ;;  %vm21370_vm8 = vnez %v21369_v1  ;;  %v4975_v2 = vld [vmem:[#allocation3 + $0xf0] sm:$0xff] }
 0x297   : > { %15750 = vmatprep.mubr.msk.f32.mxu1 %vm363_vm1, %v18660_v5  ;;  %5102 = vst.msk [vmem:[#allocation3 + $0xe8] sm:$0xff] %vm363_vm1, %v5038_v0  ;;  %v6125_v63 = vadd.f32 %v18180_v11, %v6061_v53  ;;  %v6060_v29 = vld [vmem:[#allocation3 + $0xc0] sm:$0xff]  ;;  %v18673_v45 = vpop.f32.mrb[158].mxu0  ;;  %v8291_v48 = vsel %vm21370_vm8, %v8099_v24, 0.0  ;;  %v9419_v0 = vsel %vm21304_vm7, %v18348_v7, 0.0  ;;  %v4978_v7 = vld [vmem:[#allocation3 + $0x108] sm:$0xff] }
 0x298   : > { %5101 = vst.msk [vmem:[#allocation3 + $0xe0] sm:$0xff] %vm363_vm1, %v5037_v6  ;;  %v15385_v47 = vpop.f32.mrb[66].mxu1  ;;  %v6124_v14 = vadd.f32 %v6060_v29, %v18185_v28  ;;  %v18678_v22 = vpop.f32.mrb[159].mxu0  ;;  %v18683_v11 = vld [vmem:[#allocation2 + $0x69] sm:$0xff]  ;;  %v8101_v32 = vld [vmem:[#allocation2 + $0x71] sm:$0xff] }
 0x299   : > { %v5040_v59 = vadd.f32 %v15385_v47, %v4976_v58  ;;  %v4776_v9 = vpop.f32.mrb[67].mxu1  ;;  %15905 = vmatmul.mubr.msk.f32.gmra.mrb[8].mxu0 %vm363_vm1, %v18354_v42  ;;  %6189 = vst.msk [vmem:[#allocation3 + $0xc8] sm:$0xff] %vm363_vm1, %v6125_v63  ;;  %v21371_v53 = vld [vmem:[#allocation13_spill] sm:$0xff] }
 0x29a   : > { %15751 = vmatmul.mubr.msk.f32.gmra.mrb[172].mxu1 %vm363_vm1, %v8291_v48  ;;  %v5039_v28 = vadd.f32 %v4975_v2, %v4776_v9  ;;  %15907 = vmatprep.mubr.msk.f32.mxu0 %vm363_vm1, %v9419_v0  ;;  %6188 = vst.msk [vmem:[#allocation3 + $0xc0] sm:$0xff] %vm363_vm1, %v6124_v14  ;;  %v6063_v18 = vld [vmem:[#allocation3 + $0xd8] sm:$0xff]  ;;  %vm21372_vm5 = vnez %v21371_v53  ;;  %v4977_v48 = vld [vmem:[#allocation3 + $0x100] sm:$0xff] }
 0x29b   : > { %15753 = vmatprep.mubr.msk.f32.mxu1 %vm363_vm1, %v18683_v11  ;;  %5104 = vst.msk [vmem:[#allocation3 + $0xf8] sm:$0xff] %vm363_vm1, %v5040_v59  ;;  %v6127_v42 = vadd.f32 %v18201_v27, %v6063_v18  ;;  %v6062_v24 = vld [vmem:[#allocation3 + $0xd0] sm:$0xff]  ;;  %v18696_v6 = vpop.f32.mrb[160].mxu0  ;;  %v8293_v63 = vsel %vm21372_vm5, %v8101_v32, 0.0  ;;  %v9421_v59 = vsel %vm21308_vm0, %v18370_v38, 0.0  ;;  %v4980_v38 = vld [vmem:[#allocation3 + $0x118] sm:$0xff] }
 0x29c   : > { %5103 = vst.msk [vmem:[#allocation3 + $0xf0] sm:$0xff] %vm363_vm1, %v5039_v28  ;;  %v15388_v3 = vpop.f32.mrb[68].mxu1  ;;  %v6126_v29 = vadd.f32 %v6062_v24, %v18204_v55  ;;  %v18701_v14 = vpop.f32.mrb[161].mxu0  ;;  %v18706_v27 = vld [vmem:[#allocation2 + $0x79] sm:$0xff]  ;;  %v8103_v9 = vld [vmem:[#allocation2 + $0x81] sm:$0xff] }
 0x29d   : > { %v5042_v47 = vadd.f32 %v15388_v3, %v4978_v7  ;;  %v4786_v58 = vpop.f32.mrb[69].mxu1  ;;  %15908 = vmatmul.mubr.msk.f32.gmra.mrb[10].mxu0 %vm363_vm1, %v18377_v12  ;;  %6191 = vst.msk [vmem:[#allocation3 + $0xd8] sm:$0xff] %vm363_vm1, %v6127_v42  ;;  %v21373_v28 = vld [vmem:[#allocation15_spill] sm:$0xff]  ;;  %v4979_v7 = vld [vmem:[#allocation3 + $0x110] sm:$0xff] }
 0x29e   : > { %15754 = vmatmul.mubr.msk.f32.gmra.mrb[174].mxu1 %vm363_vm1, %v8293_v63  ;;  %v5041_v55 = vadd.f32 %v4977_v48, %v4786_v58  ;;  %15910 = vmatprep.mubr.msk.f32.mxu0 %vm363_vm1, %v9421_v59  ;;  %6190 = vst.msk [vmem:[#allocation3 + $0xd0] sm:$0xff] %vm363_vm1, %v6126_v29  ;;  %v6065_v2 = vld [vmem:[#allocation3 + $0xe8] sm:$0xff]  ;;  %vm21374_vm7 = vnez %v21373_v28  ;;  %v9423_v29 = vsel %vm21312_vm11, %v18395_v41, 0.0 }
 0x29f   : > { %15756 = vmatprep.mubr.msk.f32.mxu1 %vm363_vm1, %v18706_v27  ;;  %5106 = vst.msk [vmem:[#allocation3 + $0x108] sm:$0xff] %vm363_vm1, %v5042_v47  ;;  %v6129_v12 = vadd.f32 %v18220_v56, %v6065_v2  ;;  %v6064_v0 = vld [vmem:[#allocation3 + $0xe0] sm:$0xff]  ;;  %v18719_v32 = vpop.f32.mrb[162].mxu0  ;;  %v8295_v18 = vsel %vm21374_vm7, %v8103_v9, 0.0  ;;  %v4982_v41 = vld [vmem:[#allocation3 + $0x128] sm:$0xff] }
 0x2a0   : > { %5105 = vst.msk [vmem:[#allocation3 + $0x100] sm:$0xff] %vm363_vm1, %v5041_v55  ;;  %v15391_v26 = vpop.f32.mrb[70].mxu1  ;;  %v6128_v42 = vadd.f32 %v6064_v0, %v18225_v62  ;;  %v18724_v63 = vpop.f32.mrb[163].mxu0  ;;  %v18729_v56 = vld [vmem:[#allocation2 + $0x89] sm:$0xff]  ;;  %v8105_v47 = vld [vmem:[#allocation2 + $0x91] sm:$0xff] }
 0x2a1   : > { %v5044_v24 = vadd.f32 %v15391_v26, %v4980_v38  ;;  %v4796_v3 = vpop.f32.mrb[71].mxu1  ;;  %15911 = vmatmul.mubr.msk.f32.gmra.mrb[12].mxu0 %vm363_vm1, %v18403_v51  ;;  %6193 = vst.msk [vmem:[#allocation3 + $0xe8] sm:$0xff] %vm363_vm1, %v6129_v12  ;;  %v21375_v51 = vld [vmem:[#allocation90_spill] sm:$0xff]  ;;  %v21376_v55 = vld [vmem:[#allocation17_spill] sm:$0xff]  ;;  %v21378_v12 = vld [vmem:[#allocation91_spill] sm:$0xff] }
 0x2a2   : > { %15757 = vmatmul.mubr.msk.f32.gmra.mrb[176].mxu1 %vm363_vm1, %v8295_v18  ;;  %v5043_v62 = vadd.f32 %v4979_v7, %v4796_v3  ;;  %15913 = vmatprep.mubr.msk.f32.mxu0 %vm363_vm1, %v9423_v29  ;;  %6192 = vst.msk [vmem:[#allocation3 + $0xe0] sm:$0xff] %vm363_vm1, %v6128_v42  ;;  %v6067_v58 = vld [vmem:[#allocation3 + $0xf8] sm:$0xff]  ;;  %vm21377_vm0 = vnez %v21376_v55  ;;  %v4981_v18 = vld [vmem:[#allocation3 + $0x120] sm:$0xff]  ;;  %v9425_v3 = vsel %vm21316_vm13, %v18421_v19, 0.0 }
 0x2a3   : > { %15759 = vmatprep.mubr.msk.f32.mxu1 %vm363_vm1, %v18729_v56  ;;  %5108 = vst.msk [vmem:[#allocation3 + $0x118] sm:$0xff] %vm363_vm1, %v5044_v24  ;;  %v6131_v48 = vadd.f32 %v21375_v51, %v6067_v58  ;;  %v6066_v59 = vld [vmem:[#allocation3 + $0xf0] sm:$0xff]  ;;  %v18742_v9 = vpop.f32.mrb[164].mxu0  ;;  %v8297_v2 = vsel %vm21377_vm0, %v8105_v47, 0.0  ;;  %v4984_v19 = vld [vmem:[#allocation3 + $0x138] sm:$0xff] }
 0x2a4   : > { %5107 = vst.msk [vmem:[#allocation3 + $0x110] sm:$0xff] %vm363_vm1, %v5043_v62  ;;  %v15394_v57 = vpop.f32.mrb[72].mxu1  ;;  %v6130_v0 = vadd.f32 %v6066_v59, %v21378_v12  ;;  %v18747_v42 = vpop.f32.mrb[165].mxu0  ;;  %v18752_v24 = vld [vmem:[#allocation2 + $0x99] sm:$0xff]  ;;  %v8107_v7 = vld [vmem:[#allocation2 + $0xa1] sm:$0xff] }
 0x2a5   : > { %v5046_v26 = vadd.f32 %v15394_v57, %v4982_v41  ;;  %v4806_v38 = vpop.f32.mrb[73].mxu1  ;;  %15914 = vmatmul.mubr.msk.f32.gmra.mrb[14].mxu0 %vm363_vm1, %v18429_v46  ;;  %6195 = vst.msk [vmem:[#allocation3 + $0xf8] sm:$0xff] %vm363_vm1, %v6131_v48  ;;  %v21379_v46 = vld [vmem:[#allocation92_spill] sm:$0xff]  ;;  %v21381_v48 = vld [vmem:[#allocation19_spill] sm:$0xff]  ;;  %v21383_v57 = vld [vmem:[#allocation93_spill] sm:$0xff] }
 0x2a6   : > { %15760 = vmatmul.mubr.msk.f32.gmra.mrb[178].mxu1 %vm363_vm1, %v8297_v2  ;;  %v5045_v29 = vadd.f32 %v4981_v18, %v4806_v38  ;;  %15916 = vmatprep.mubr.msk.f32.mxu0 %vm363_vm1, %v9425_v3  ;;  %6194 = vst.msk [vmem:[#allocation3 + $0xf0] sm:$0xff] %vm363_vm1, %v6130_v0  ;;  %v6069_v47 = vld [vmem:[#allocation3 + $0x108] sm:$0xff]  ;;  %vm21382_vm11 = vnez %v21381_v48  ;;  %v4983_v0 = vld [vmem:[#allocation3 + $0x130] sm:$0xff]  ;;  %v9427_v18 = vsel %vm21320_vm10, %v18447_v37, 0.0  ;;  %v21470_v55 = vld [vmem:[#allocation79_spill] sm:$0xff] }
 0x2a7   : > { %15762 = vmatprep.mubr.msk.f32.mxu1 %vm363_vm1, %v18752_v24  ;;  %5110 = vst.msk [vmem:[#allocation3 + $0x128] sm:$0xff] %vm363_vm1, %v5046_v26  ;;  %v6133_v62 = vadd.f32 %v21379_v46, %v6069_v47  ;;  %v6068_v58 = vld [vmem:[#allocation3 + $0x100] sm:$0xff]  ;;  %v18765_v51 = vpop.f32.mrb[166].mxu0  ;;  %v8299_v59 = vsel %vm21382_vm11, %v8107_v7, 0.0  ;;  %v4986_v37 = vld [vmem:[#allocation3 + $0x148] sm:$0xff] }
 0x2a8   : > { %5109 = vst.msk [vmem:[#allocation3 + $0x120] sm:$0xff] %vm363_vm1, %v5045_v29  ;;  %v15397_v44 = vpop.f32.mrb[74].mxu1  ;;  %21380 = vst [vmem:[#allocation80_spill] sm:$0xff] %v18765_v51  ;;  %v6132_v41 = vadd.f32 %v6068_v58, %v21383_v57  ;;  %v18770_v38 = vpop.f32.mrb[167].mxu0  ;;  %v18775_v26 = vld [vmem:[#allocation2 + $0xa9] sm:$0xff]  ;;  %v8109_v3 = vld [vmem:[#allocation2 + $0xb1] sm:$0xff] }
 0x2a9   : > { %v5048_v2 = vadd.f32 %v15397_v44, %v4984_v19  ;;  %v4816_v12 = vpop.f32.mrb[75].mxu1  ;;  %21384 = vst [vmem:[#allocation81_spill] sm:$0xff] %v18770_v38  ;;  %15917 = vmatmul.mubr.msk.f32.gmra.mrb[16].mxu0 %vm363_vm1, %v18455_v40  ;;  %6197 = vst.msk [vmem:[#allocation3 + $0x108] sm:$0xff] %vm363_vm1, %v6133_v62  ;;  %v21385_v40 = vld [vmem:[#allocation94_spill] sm:$0xff]  ;;  %v21387_v62 = vld [vmem:[#allocation21_spill] sm:$0xff] }
 0x2aa   : > { %15763 = vmatmul.mubr.msk.f32.gmra.mrb[180].mxu1 %vm363_vm1, %v8299_v59  ;;  %v5047_v7 = vadd.f32 %v4983_v0, %v4816_v12  ;;  %15919 = vmatprep.mubr.msk.f32.mxu0 %vm363_vm1, %v9427_v18  ;;  %6196 = vst.msk [vmem:[#allocation3 + $0x100] sm:$0xff] %vm363_vm1, %v6132_v41  ;;  %v6071_v29 = vld [vmem:[#allocation3 + $0x118] sm:$0xff]  ;;  %vm21388_vm13 = vnez %v21387_v62  ;;  %v4985_v41 = vld [vmem:[#allocation3 + $0x140] sm:$0xff]  ;;  %v21391_v18 = vld [vmem:[#allocation74_spill] sm:$0xff] }
 0x2ab   : > { %15765 = vmatprep.mubr.msk.f32.mxu1 %vm363_vm1, %v18775_v26  ;;  %5112 = vst.msk [vmem:[#allocation3 + $0x138] sm:$0xff] %vm363_vm1, %v5048_v2  ;;  %v6135_v47 = vadd.f32 %v21385_v40, %v6071_v29  ;;  %v6070_v46 = vld [vmem:[#allocation3 + $0x110] sm:$0xff]  ;;  %v18788_v58 = vpop.f32.mrb[168].mxu0  ;;  %v8301_v44 = vsel %vm21388_vm13, %v8109_v3, 0.0  ;;  %v21389_v19 = vld [vmem:[#allocation95_spill] sm:$0xff]  ;;  %v9429_v29 = vsel %vm21327_vm12, %v21391_v18, 0.0 }
 0x2ac   : > { %5111 = vst.msk [vmem:[#allocation3 + $0x130] sm:$0xff] %vm363_vm1, %v5047_v7  ;;  %v15400_v52 = vpop.f32.mrb[76].mxu1  ;;  %21386 = vst [vmem:[#allocation66_spill] sm:$0xff] %v18788_v58  ;;  %v6134_v59 = vadd.f32 %v6070_v46, %v21389_v19  ;;  %v18793_v0 = vpop.f32.mrb[169].mxu0  ;;  %v18798_v2 = vld [vmem:[#allocation2 + $0xb9] sm:$0xff]  ;;  %v8111_v40 = vld [vmem:[#allocation2 + $0xc1] sm:$0xff] }
 0x2ad   : > { %v5050_v57 = vadd.f32 %v15400_v52, %v4986_v37  ;;  %v4826_v12 = vpop.f32.mrb[77].mxu1  ;;  %21390 = vst [vmem:[#allocation82_spill] sm:$0xff] %v18793_v0  ;;  %15920 = vmatmul.mubr.msk.f32.gmra.mrb[18].mxu0 %vm363_vm1, %v18481_v39  ;;  %6199 = vst.msk [vmem:[#allocation3 + $0x118] sm:$0xff] %vm363_vm1, %v6135_v47  ;;  %v21393_v39 = vld [vmem:[#allocation96_spill] sm:$0xff]  ;;  %v4988_v19 = vld [vmem:[#allocation3 + $0x158] sm:$0xff] }
 0x2ae   : > { %15766 = vmatmul.mubr.msk.f32.gmra.mrb[182].mxu1 %vm363_vm1, %v8301_v44  ;;  %v5049_v3 = vadd.f32 %v4985_v41, %v4826_v12  ;;  %15922 = vmatprep.mubr.msk.f32.mxu0 %vm363_vm1, %v9429_v29  ;;  %6198 = vst.msk [vmem:[#allocation3 + $0x110] sm:$0xff] %vm363_vm1, %v6134_v59  ;;  %v6073_v46 = vld [vmem:[#allocation3 + $0x128] sm:$0xff]  ;;  %v21395_v47 = vld [vmem:[#allocation24_spill] sm:$0xff]  ;;  %v4987_v59 = vld [vmem:[#allocation3 + $0x150] sm:$0xff] }
 0x2af   : > { %15768 = vmatprep.mubr.msk.f32.mxu1 %vm363_vm1, %v18798_v2  ;;  %5114 = vst.msk [vmem:[#allocation3 + $0x148] sm:$0xff] %vm363_vm1, %v5050_v57  ;;  %v6137_v52 = vadd.f32 %v21393_v39, %v6073_v46  ;;  %v6072_v37 = vld [vmem:[#allocation3 + $0x120] sm:$0xff]  ;;  %v18811_v18 = vpop.f32.mrb[170].mxu0  ;;  %vm21396_vm10 = vnez %v21395_v47  ;;  %v21397_v41 = vld [vmem:[#allocation97_spill] sm:$0xff]  ;;  %v9431_v46 = vsel %vm21336_vm4, %v18496_v61, 0.0  ;;  %v4995_v51 = vld [vmem:[#allocation3 + $0x190] sm:$0xff] }
 0x2b0   : > { %5113 = vst.msk [vmem:[#allocation3 + $0x140] sm:$0xff] %vm363_vm1, %v5049_v3  ;;  %v15403_v44 = vpop.f32.mrb[78].mxu1  ;;  %21394 = vst [vmem:[#allocation83_spill] sm:$0xff] %v18811_v18  ;;  %v8303_v12 = vsel %vm21396_vm10, %v8111_v40, 0.0  ;;  %v6136_v7 = vadd.f32 %v6072_v37, %v21397_v41  ;;  %v18816_v58 = vpop.f32.mrb[171].mxu0  ;;  %v18821_v57 = vld [vmem:[#allocation2 + $0xc9] sm:$0xff] }
 0x2b1   : > { %v5052_v29 = vadd.f32 %v15403_v44, %v4988_v19  ;;  %v4836_v0 = vpop.f32.mrb[79].mxu1  ;;  %21398 = vst [vmem:[#allocation84_spill] sm:$0xff] %v18816_v58  ;;  %15923 = vmatmul.mubr.msk.f32.gmra.mrb[20].mxu0 %vm363_vm1, %v18504_v25  ;;  %v8113_v39 = vld [vmem:[#allocation2 + $0xd1] sm:$0xff]  ;;  %6201 = vst.msk [vmem:[#allocation3 + $0x128] sm:$0xff] %vm363_vm1, %v6137_v52 }
 0x2b2   : > { %15769 = vmatmul.mubr.msk.f32.gmra.mrb[184].mxu1 %vm363_vm1, %v8303_v12  ;;  %v5051_v40 = vadd.f32 %v4987_v59, %v4836_v0  ;;  %15925 = vmatprep.mubr.msk.f32.mxu0 %vm363_vm1, %v9431_v46  ;;  %6200 = vst.msk [vmem:[#allocation3 + $0x120] sm:$0xff] %vm363_vm1, %v6136_v7  ;;  %v6075_v37 = vld [vmem:[#allocation3 + $0x138] sm:$0xff]  ;;  %v21400_v25 = vld [vmem:[#allocation37_spill] sm:$0xff]  ;;  %v21404_v59 = vld [vmem:[#allocation98_spill] sm:$0xff] }
 0x2b3   : > { %15771 = vmatprep.mubr.msk.f32.mxu1 %vm363_vm1, %v18821_v57  ;;  %5116 = vst.msk [vmem:[#allocation3 + $0x158] sm:$0xff] %vm363_vm1, %v5052_v29  ;;  %v6139_v44 = vadd.f32 %v21400_v25, %v6075_v37  ;;  %v6074_v19 = vld [vmem:[#allocation3 + $0x130] sm:$0xff]  ;;  %v4990_v12 = vld [vmem:[#allocation3 + $0x168] sm:$0xff]  ;;  %v18834_v41 = vpop.f32.mrb[172].mxu0  ;;  %v21402_v0 = vld [vmem:[#allocation27_spill] sm:$0xff] }
 0x2b4   : > { %5115 = vst.msk [vmem:[#allocation3 + $0x150] sm:$0xff] %vm363_vm1, %v5051_v40  ;;  %v15406_v61 = vpop.f32.mrb[80].mxu1  ;;  %21401 = vst [vmem:[#allocation85_spill] sm:$0xff] %v18834_v41  ;;  %vm21403_vm12 = vnez %v21402_v0  ;;  %v6138_v3 = vadd.f32 %v6074_v19, %v21404_v59  ;;  %v4989_v7 = vld [vmem:[#allocation3 + $0x160] sm:$0xff]  ;;  %v18839_v18 = vpop.f32.mrb[173].mxu0  ;;  %v18844_v29 = vld [vmem:[#allocation2 + $0xd9] sm:$0xff] }
 0x2b5   : > { %v8305_v52 = vsel %vm21403_vm12, %v8113_v39, 0.0  ;;  %v5054_v46 = vadd.f32 %v15406_v61, %v4990_v12  ;;  %v4846_v58 = vpop.f32.mrb[81].mxu1  ;;  %21405 = vst [vmem:[#allocation73_spill] sm:$0xff] %v18839_v18  ;;  %15926 = vmatmul.mubr.msk.f32.gmra.mrb[22].mxu0 %vm363_vm1, %v18530_v34  ;;  %v9433_v40 = vsel %vm21344_vm15, %v18522_v60, 0.0  ;;  %v8115_v37 = vld [vmem:[#allocation2 + $0xe1] sm:$0xff]  ;;  %6203 = vst.msk [vmem:[#allocation3 + $0x138] sm:$0xff] %vm363_vm1, %v6139_v44 }
 0x2b6   : > { %15772 = vmatmul.mubr.msk.f32.gmra.mrb[186].mxu1 %vm363_vm1, %v8305_v52  ;;  %v5053_v39 = vadd.f32 %v4989_v7, %v4846_v58  ;;  %15928 = vmatprep.mubr.msk.f32.mxu0 %vm363_vm1, %v9433_v40  ;;  %6202 = vst.msk [vmem:[#allocation3 + $0x130] sm:$0xff] %vm363_vm1, %v6138_v3  ;;  %v6077_v25 = vld [vmem:[#allocation3 + $0x148] sm:$0xff]  ;;  %v21406_v34 = vld [vmem:[#allocation39_spill] sm:$0xff]  ;;  %v4991_v3 = vld [vmem:[#allocation3 + $0x170] sm:$0xff] }
 0x2b7   : > { %15774 = vmatprep.mubr.msk.f32.mxu1 %vm363_vm1, %v18844_v29  ;;  %5118 = vst.msk [vmem:[#allocation3 + $0x168] sm:$0xff] %vm363_vm1, %v5054_v46  ;;  %v6141_v19 = vadd.f32 %v21406_v34, %v6077_v25  ;;  %v6076_v61 = vld [vmem:[#allocation3 + $0x140] sm:$0xff]  ;;  %v4992_v60 = vld [vmem:[#allocation3 + $0x178] sm:$0xff]  ;;  %v18857_v12 = vpop.f32.mrb[174].mxu0  ;;  %v21408_v58 = vld [vmem:[#allocation29_spill] sm:$0xff] }
 0x2b8   : > { %5117 = vst.msk [vmem:[#allocation3 + $0x160] sm:$0xff] %vm363_vm1, %v5053_v39  ;;  %v15409_v31 = vpop.f32.mrb[82].mxu1  ;;  %21407 = vst [vmem:[#allocation86_spill] sm:$0xff] %v18857_v12  ;;  %vm21409_vm4 = vnez %v21408_v58  ;;  %v21410_v52 = vld [vmem:[#allocation99_spill] sm:$0xff]  ;;  %v18862_v18 = vpop.f32.mrb[175].mxu0  ;;  %v8117_v39 = vld [vmem:[#allocation2 + $0xf1] sm:$0xff] }
 0x2b9   : > { %v8307_v44 = vsel %vm21409_vm4, %v8115_v37, 0.0  ;;  %v6140_v59 = vadd.f32 %v6076_v61, %v21410_v52  ;;  %v5056_v7 = vadd.f32 %v15409_v31, %v4992_v60  ;;  %v4856_v40 = vpop.f32.mrb[83].mxu1  ;;  %21411 = vst [vmem:[#allocation5_spill] sm:$0xff] %v18862_v18  ;;  %15929 = vmatmul.mubr.msk.f32.gmra.mrb[24].mxu0 %vm363_vm1, %v18554_v4  ;;  %v18867_v46 = vld [vmem:[#allocation2 + $0xe9] sm:$0xff]  ;;  %6205 = vst.msk [vmem:[#allocation3 + $0x148] sm:$0xff] %vm363_vm1, %v6141_v19  ;;  %v21412_v37 = vmov 0.0  }
 0x2ba   : > { %15775 = vmatmul.mubr.msk.f32.gmra.mrb[188].mxu1 %vm363_vm1, %v8307_v44  ;;  %v5055_v25 = vadd.f32 %v4991_v3, %v4856_v40  ;;  %15931 = vmatprep.mubr.f32.mxu0 %v21412_v37  ;;  %v6079_v34 = vld [vmem:[#allocation3 + $0x158] sm:$0xff]  ;;  %v4994_v44 = vld [vmem:[#allocation3 + $0x188] sm:$0xff]  ;;  %v21417_v3 = vld [vmem:[#allocation100_spill] sm:$0xff] }
 0x2bb   : > { %15777 = vmatprep.mubr.msk.f32.mxu1 %vm363_vm1, %v18867_v46  ;;  %6204 = vst.msk [vmem:[#allocation3 + $0x140] sm:$0xff] %vm363_vm1, %v6140_v59  ;;  %5120 = vst.msk [vmem:[#allocation3 + $0x178] sm:$0xff] %vm363_vm1, %v5056_v7  ;;  %v21413_v61 = vld [vmem:[#allocation43_spill] sm:$0xff]  ;;  %v6078_v60 = vld [vmem:[#allocation3 + $0x150] sm:$0xff]  ;;  %v18877_v52 = vpop.f32.mrb[176].mxu0 }
 0x2bc   : > { %v6143_v31 = vadd.f32 %v21413_v61, %v6079_v34  ;;  %5119 = vst.msk [vmem:[#allocation3 + $0x170] sm:$0xff] %vm363_vm1, %v5055_v25  ;;  %v15412_v4 = vpop.f32.mrb[84].mxu1  ;;  %21414 = vst [vmem:[#allocation87_spill] sm:$0xff] %v18877_v52  ;;  %v21415_v19 = vld [vmem:[#allocation31_spill] sm:$0xff]  ;;  %v6142_v18 = vadd.f32 %v6078_v60, %v21417_v3  ;;  %v4993_v59 = vld [vmem:[#allocation3 + $0x180] sm:$0xff]  ;;  %v18882_v38 = vpop.f32.mrb[177].mxu0 }
 0x2bd   : > { %vm21416_vm15 = vnez %v21415_v19  ;;  %v5058_v12 = vadd.f32 %v15412_v4, %v4994_v44  ;;  %v4866_v41 = vpop.f32.mrb[85].mxu1  ;;  %21418 = vst [vmem:[#allocation88_spill] sm:$0xff] %v18882_v38  ;;  %15932 = vmatmul.mubr.f32.gmra.mrb[26].mxu0 %v21412_v37  ;;  %v18886_v7 = vld [vmem:[#allocation2 + $0xf9] sm:$0xff]  ;;  %v8119_v25 = vld [vmem:[#allocation2 + $0x101] sm:$0xff]  ;;  %v21419_v34 = vld [vmem:[#allocation4_spill] sm:$0xff] }
 0x2be   : > { %v8309_v40 = vsel %vm21416_vm15, %v8117_v39, 0.0  ;;  %v1324_v61 = vadd.s32 264, %v21419_v34  ;;  %6207 = vst.msk [vmem:[#allocation3 + $0x158] sm:$0xff] %vm363_vm1, %v6143_v31  ;;  %v5057_v52 = vadd.f32 %v4993_v59, %v4866_v41  ;;  %16038 = vmatprep.mubr.msk.f32.mxu0 %vm363_vm1, %v18589_v16  ;;  %6206 = vst.msk [vmem:[#allocation3 + $0x150] sm:$0xff] %vm363_vm1, %v6142_v18  ;;  %v6081_v39 = vld [vmem:[#allocation3 + $0x168] sm:$0xff]  ;;  %v21420_v60 = vld [vmem:[#allocation46_spill] sm:$0xff] }
 0x2bf   : > { %15778 = vmatmul.mubr.msk.f32.gmra.mrb[190].mxu1 %vm363_vm1, %v8309_v40  ;;  %5122 = vst.msk [vmem:[#allocation3 + $0x188] sm:$0xff] %vm363_vm1, %v5058_v12  ;;  %v6145_v4 = vadd.f32 %v21420_v60, %v6081_v39  ;;  %v6080_v44 = vld [vmem:[#allocation3 + $0x160] sm:$0xff]  ;;  %v11492_v40 = vsel %vm18556_vm2, %v18585_v8, 0.0  ;;  %v4996_v31 = vld [vmem:[#allocation3 + $0x198] sm:$0xff]  ;;  %v18901_v3 = vpop.f32.mrb[178].mxu0  ;;  %v21422_v59 = vld [vmem:[#allocation50_spill] sm:$0xff] }
 0x2c0   : > { %15780 = vmatprep.mubr.msk.f32.mxu1 %vm363_vm1, %v18886_v7  ;;  %5121 = vst.msk [vmem:[#allocation3 + $0x180] sm:$0xff] %vm363_vm1, %v5057_v52  ;;  %v15415_v41 = vpop.f32.mrb[86].mxu1  ;;  %21421 = vst [vmem:[#allocation7_spill] sm:$0xff] %v18901_v3  ;;  %vm21423_vm14 = vnez %v21422_v59  ;;  %v21424_v18 = vld [vmem:[#allocation101_spill] sm:$0xff]  ;;  %v18906_v39 = vpop.f32.mrb[179].mxu0  ;;  %v1590_v52 = vand.u32 15, %v1324_v61 }
 0x2c1   : > { %v8311_v16 = vsel %vm21423_vm14, %v8119_v25, 0.0  ;;  %v6144_v34 = vadd.f32 %v6080_v44, %v21424_v18  ;;  %v5060_v38 = vadd.f32 %v15415_v41, %v4996_v31  ;;  %v4876_v12 = vpop.f32.mrb[87].mxu1  ;;  %21425 = vst [vmem:[#allocation89_spill] sm:$0xff] %v18906_v39  ;;  %16039 = vmatmul.mubr.msk.f32.vlgmr.msra.gmra.mrb[28].mxu0 %vm363_vm1, %v11492_v40  ;;  %v8121_v8 = vld [vmem:[#allocation2 + $0x111] sm:$0xff]  ;;  %6209 = vst.msk [vmem:[#allocation3 + $0x168] sm:$0xff] %vm363_vm1, %v6145_v4  ;;  %v21429_v18 = vld [vmem:[#allocation102_spill] sm:$0xff] }
 0x2c2   : > { %v5059_v60 = vadd.f32 %v4995_v51, %v4876_v12  ;;  %16041 = vmatprep.mubr.msk.f32.mxu0 %vm363_vm1, %v18614_v10  ;;  %v6083_v25 = vld [vmem:[#allocation3 + $0x178] sm:$0xff]  ;;  %v21426_v44 = vld [vmem:[#allocation48_spill] sm:$0xff]  ;;  %v4998_v31 = vld [vmem:[#allocation3 + $0x1a8] sm:$0xff]  ;;  %vm18934_vm14 = vcmp.lt.s32.totalorder %v1590_v52, 15 }
 0x2c3   : > { %15781 = vmatmul.mubr.msk.f32.gmra.mrb[192].mxu1 %vm363_vm1, %v8311_v16  ;;  %6208 = vst.msk [vmem:[#allocation3 + $0x160] sm:$0xff] %vm363_vm1, %v6144_v34  ;;  %5124 = vst.msk [vmem:[#allocation3 + $0x198] sm:$0xff] %vm363_vm1, %v5060_v38  ;;  %v6147_v40 = vadd.f32 %v21426_v44, %v6083_v25  ;;  %v6082_v41 = vld [vmem:[#allocation3 + $0x170] sm:$0xff]  ;;  %v18921_v4 = vpop.f32.mrb[180].mxu0  ;;  %v21427_v51 = vld [vmem:[#allocation60_spill] sm:$0xff] }
 0x2c4   : > { %15783 = vmatprep.mubr.msk.f32.mxu1 %vm363_vm1, %v18910_v50  ;;  %5123 = vst.msk [vmem:[#allocation3 + $0x190] sm:$0xff] %vm363_vm1, %v5059_v60  ;;  %v15418_v61 = vpop.f32.mrb[88].mxu1  ;;  %vm21428_vm2 = vnez %v21427_v51  ;;  %v6146_v12 = vadd.f32 %v6082_v41, %v21429_v18  ;;  %v4997_v34 = vld [vmem:[#allocation3 + $0x1a0] sm:$0xff]  ;;  %v18926_v3 = vpop.f32.mrb[181].mxu0  ;;  %v21430_v38 = vld [vmem:[#allocation6_spill] sm:$0xff] }
 0x2c5   : > { %v8313_v16 = vsel %vm21428_vm2, %v8121_v8, 0.0  ;;  %v5062_v10 = vadd.f32 %v15418_v61, %v4998_v31  ;;  %v4886_v39 = vpop.f32.mrb[89].mxu1  ;;  %v21431_v60 = vsel %vm21360_vm3, %v21430_v38, 0.0  ;;  %v8122_v25 = vld [vmem:[#allocation2 + $0x119] sm:$0xff]  ;;  %v8123_v8 = vld [vmem:[#allocation2 + $0x121] sm:$0xff]  ;;  %6211 = vst.msk [vmem:[#allocation3 + $0x178] sm:$0xff] %vm363_vm1, %v6147_v40 }
 0x2c6   : > { %16042 = vmatmul.mubr.msk.f32.gmra.mrb[30].mxu0 %vm363_vm1, %v21431_v60  ;;  %v5061_v41 = vadd.f32 %v4997_v34, %v4886_v39  ;;  %6210 = vst.msk [vmem:[#allocation3 + $0x170] sm:$0xff] %vm363_vm1, %v6146_v12  ;;  %v6085_v21 = vld [vmem:[#allocation3 + $0x188] sm:$0xff]  ;;  %v8315_v39 = vsel %vm18934_vm14, %v8123_v8, 0.0  ;;  %v21436_v40 = vld [vmem:[#allocation23_spill] sm:$0xff]  ;;  %v4999_v12 = vld [vmem:[#allocation3 + $0x1b0] sm:$0xff] }
 0x2c7   : > { %15784 = vmatmul.mubr.msk.f32.gmra.mrb[194].mxu1 %vm363_vm1, %v8313_v16  ;;  %16044 = vmatprep.mubr.msk.f32.mxu0 %vm363_vm1, %v18637_v33  ;;  %5126 = vst.msk [vmem:[#allocation3 + $0x1a8] sm:$0xff] %vm363_vm1, %v5062_v10  ;;  %v21434_v61 = vld [vmem:[#allocation53_spill] sm:$0xff]  ;;  %v6084_v52 = vld [vmem:[#allocation3 + $0x180] sm:$0xff]  ;;  %v5000_v16 = vld [vmem:[#allocation3 + $0x1b8] sm:$0xff]  ;;  %v18946_v18 = vpop.f32.mrb[182].mxu0 }
 0x2c8   : > { %15786 = vmatprep.mubr.msk.f32.mxu1 %vm363_vm1, %v8122_v25  ;;  %v6149_v31 = vadd.f32 %v21434_v61, %v6085_v21  ;;  %5125 = vst.msk [vmem:[#allocation3 + $0x1a0] sm:$0xff] %vm363_vm1, %v5061_v41  ;;  %v15421_v51 = vpop.f32.mrb[90].mxu1  ;;  %21435 = vst [vmem:[#allocation9_spill] sm:$0xff] %v18946_v18  ;;  %v6148_v34 = vadd.f32 %v6084_v52, %v21436_v40  ;;  %v18951_v60 = vpop.f32.mrb[183].mxu0  ;;  %v18954_v10 = vld [vmem:[#allocation2 + $0x131] sm:$0xff]  ;;  %v18961_v21 = vld [vmem:[#allocation2 + $0x129] sm:$0xff] }
 0x2c9   : > { %v5064_v33 = vadd.f32 %v15421_v51, %v5000_v16  ;;  %v4896_v38 = vpop.f32.mrb[91].mxu1  ;;  %21437 = vst [vmem:[#allocation11_spill] sm:$0xff] %v18951_v60  ;;  %v21438_v25 = vld [vmem:[#allocation8_spill] sm:$0xff]  ;;  %v21442_v40 = vld [vmem:[#allocation33_spill] sm:$0xff] }
 0x2ca   : > { %v21439_v41 = vsel %vm21365_vm6, %v21438_v25, 0.0  ;;  %6213 = vst.msk [vmem:[#allocation3 + $0x188] sm:$0xff] %vm363_vm1, %v6149_v31  ;;  %v5063_v8 = vadd.f32 %v4999_v12, %v4896_v38  ;;  %6212 = vst.msk [vmem:[#allocation3 + $0x180] sm:$0xff] %vm363_vm1, %v6148_v34  ;;  %v6087_v61 = vld [vmem:[#allocation3 + $0x198] sm:$0xff]  ;;  %vm21443_vm3 = vnez %v21442_v40  ;;  %v21444_v12 = vld [vmem:[#allocation26_spill] sm:$0xff] }
 0x2cb   : > { %15787 = vmatmul.mubr.msk.f32.gmra.mrb[196].mxu1 %vm363_vm1, %v8315_v39  ;;  %16045 = vmatmul.mubr.msk.f32.gmra.mrb[32].mxu0 %vm363_vm1, %v21439_v41  ;;  %5128 = vst.msk [vmem:[#allocation3 + $0x1b8] sm:$0xff] %vm363_vm1, %v5064_v33  ;;  %v6151_v52 = vadd.f32 %v21440_v15, %v6087_v61  ;;  %v6086_v51 = vld [vmem:[#allocation3 + $0x190] sm:$0xff]  ;;  %v5002_v39 = vld [vmem:[#allocation3 + $0x1c8] sm:$0xff]  ;;  %v18972_v31 = vpop.f32.mrb[184].mxu0  ;;  %v8317_v38 = vsel %vm21443_vm3, %v18954_v10, 0.0  ;;  %v5001_v41 = vld [vmem:[#allocation3 + $0x1c0] sm:$0xff] }
 0x2cc   : > { %15789 = vmatprep.mubr.msk.f32.mxu1 %vm363_vm1, %v18961_v21  ;;  %16047 = vmatprep.mubr.msk.f32.mxu0 %vm363_vm1, %v18660_v5  ;;  %5127 = vst.msk [vmem:[#allocation3 + $0x1b0] sm:$0xff] %vm363_vm1, %v5063_v8  ;;  %v15424_v16 = vpop.f32.mrb[92].mxu1  ;;  %21441 = vst [vmem:[#allocation13_spill] sm:$0xff] %v18972_v31  ;;  %v6150_v5 = vadd.f32 %v6086_v51, %v21444_v12  ;;  %v18978_v60 = vpop.f32.mrb[185].mxu0  ;;  %v21446_v33 = vld [vmem:[#allocation10_spill] sm:$0xff]  ;;  %v5004_v12 = vld [vmem:[#allocation3 + $0x1d8] sm:$0xff] }
 0x2cd   : > { %v5066_v25 = vadd.f32 %v15424_v16, %v5002_v39  ;;  %v4906_v34 = vpop.f32.mrb[93].mxu1  ;;  %21445 = vst [vmem:[#allocation15_spill] sm:$0xff] %v18978_v60  ;;  %v21447_v8 = vsel %vm21368_vm9, %v21446_v33, 0.0  ;;  %v18986_v61 = vld [vmem:[#allocation2 + $0x139] sm:$0xff]  ;;  %v8127_v15 = vld [vmem:[#allocation2 + $0x141] sm:$0xff]  ;;  %6215 = vst.msk [vmem:[#allocation3 + $0x198] sm:$0xff] %vm363_vm1, %v6151_v52 }
 0x2ce   : > { %v5065_v31 = vadd.f32 %v5001_v41, %v4906_v34  ;;  %6214 = vst.msk [vmem:[#allocation3 + $0x190] sm:$0xff] %vm363_vm1, %v6150_v5  ;;  %v6089_v51 = vld [vmem:[#allocation3 + $0x1a8] sm:$0xff]  ;;  %v21449_v34 = vld [vmem:[#allocation35_spill] sm:$0xff]  ;;  %v5003_v5 = vld [vmem:[#allocation3 + $0x1d0] sm:$0xff] }
 0x2cf   : > { %15790 = vmatmul.mubr.msk.f32.gmra.mrb[198].mxu1 %vm363_vm1, %v8317_v38  ;;  %16048 = vmatmul.mubr.msk.f32.gmra.mrb[34].mxu0 %vm363_vm1, %v21447_v8  ;;  %5130 = vst.msk [vmem:[#allocation3 + $0x1c8] sm:$0xff] %vm363_vm1, %v5066_v25  ;;  %v6153_v16 = vadd.f32 %v21448_v30, %v6089_v51  ;;  %v6088_v39 = vld [vmem:[#allocation3 + $0x1a0] sm:$0xff]  ;;  %v18997_v52 = vpop.f32.mrb[186].mxu0  ;;  %vm21450_vm6 = vnez %v21449_v34  ;;  %v21451_v33 = vld [vmem:[#allocation77_spill] sm:$0xff]  ;;  %v21525_v34 = vld [vmem:[#allocation86_spill] sm:$0xff] }
 0x2d0   : > { %15792 = vmatprep.mubr.msk.f32.mxu1 %vm363_vm1, %v18986_v61  ;;  %16050 = vmatprep.mubr.msk.f32.mxu0 %vm363_vm1, %v18683_v11  ;;  %5129 = vst.msk [vmem:[#allocation3 + $0x1c0] sm:$0xff] %vm363_vm1, %v5065_v31  ;;  %v15427_v38 = vpop.f32.mrb[94].mxu1  ;;  %v8319_v41 = vsel %vm21450_vm6, %v8127_v15, 0.0  ;;  %v6152_v8 = vadd.f32 %v6088_v39, %v21451_v33  ;;  %v19002_v18 = vpop.f32.mrb[187].mxu0  ;;  %v21452_v25 = vld [vmem:[#allocation12_spill] sm:$0xff] }
 0x2d1   : > { %v5068_v11 = vadd.f32 %v15427_v38, %v5004_v12  ;;  %v4916_v60 = vpop.f32.mrb[95].mxu1  ;;  %v21453_v31 = vsel %vm21370_vm8, %v21452_v25, 0.0  ;;  %v19010_v51 = vld [vmem:[#allocation2 + $0x149] sm:$0xff]  ;;  %v8129_v30 = vld [vmem:[#allocation2 + $0x151] sm:$0xff]  ;;  %6217 = vst.msk [vmem:[#allocation3 + $0x1a8] sm:$0xff] %vm363_vm1, %v6153_v16 }
 0x2d2   : > { %v5067_v15 = vadd.f32 %v5003_v5, %v4916_v60  ;;  %6216 = vst.msk [vmem:[#allocation3 + $0x1a0] sm:$0xff] %vm363_vm1, %v6152_v8  ;;  %v6091_v39 = vld [vmem:[#allocation3 + $0x1b8] sm:$0xff]  ;;  %v21454_v60 = vld [vmem:[#allocation38_spill] sm:$0xff]  ;;  %v5005_v8 = vld [vmem:[#allocation3 + $0x1e0] sm:$0xff] }
 0x2d3   : > { %15793 = vmatmul.mubr.msk.f32.gmra.mrb[200].mxu1 %vm363_vm1, %v8319_v41  ;;  %16051 = vmatmul.mubr.msk.f32.gmra.mrb[36].mxu0 %vm363_vm1, %v21453_v31  ;;  %5132 = vst.msk [vmem:[#allocation3 + $0x1d8] sm:$0xff] %vm363_vm1, %v5068_v11  ;;  %v6155_v1 = vadd.f32 %v18528_v36, %v6091_v39  ;;  %v6090_v38 = vld [vmem:[#allocation3 + $0x1b0] sm:$0xff]  ;;  %v5006_v41 = vld [vmem:[#allocation3 + $0x1e8] sm:$0xff]  ;;  %v19021_v16 = vpop.f32.mrb[188].mxu0  ;;  %vm21455_vm9 = vnez %v21454_v60  ;;  %v19299_v44 = vld [vmem:[#allocation2 + $0x209] sm:$0xff] }
 0x2d4   : > { %15795 = vmatprep.mubr.msk.f32.mxu1 %vm363_vm1, %v19010_v51  ;;  %16053 = vmatprep.mubr.msk.f32.mxu0 %vm363_vm1, %v18706_v27  ;;  %5131 = vst.msk [vmem:[#allocation3 + $0x1d0] sm:$0xff] %vm363_vm1, %v5067_v15  ;;  %v15430_v12 = vpop.f32.mrb[96].mxu1  ;;  %v8321_v33 = vsel %vm21455_vm9, %v8129_v30, 0.0  ;;  %v6154_v5 = vadd.f32 %v6090_v38, %v18533_v43  ;;  %v19026_v31 = vpop.f32.mrb[189].mxu0  ;;  %v21456_v36 = vld [vmem:[#allocation14_spill] sm:$0xff] }
 0x2d5   : > { %v5070_v27 = vadd.f32 %v15430_v12, %v5006_v41  ;;  %v4926_v25 = vpop.f32.mrb[97].mxu1  ;;  %v21457_v11 = vsel %vm21372_vm5, %v21456_v36, 0.0  ;;  %v19034_v15 = vld [vmem:[#allocation2 + $0x159] sm:$0xff]  ;;  %v8131_v39 = vld [vmem:[#allocation2 + $0x161] sm:$0xff]  ;;  %6219 = vst.msk [vmem:[#allocation3 + $0x1b8] sm:$0xff] %vm363_vm1, %v6155_v1 }
 0x2d6   : > { %v5069_v30 = vadd.f32 %v5005_v8, %v4926_v25  ;;  %6218 = vst.msk [vmem:[#allocation3 + $0x1b0] sm:$0xff] %vm363_vm1, %v6154_v5  ;;  %v6093_v43 = vld [vmem:[#allocation3 + $0x1c8] sm:$0xff]  ;;  %v5008_v41 = vld [vmem:[#allocation3 + $0x1f8] sm:$0xff]  ;;  %v5007_v5 = vld [vmem:[#allocation3 + $0x1f0] sm:$0xff] }
 0x2d7   : > { %15796 = vmatmul.mubr.msk.f32.gmra.mrb[202].mxu1 %vm363_vm1, %v8321_v33  ;;  %16054 = vmatmul.mubr.msk.f32.gmra.mrb[38].mxu0 %vm363_vm1, %v21457_v11  ;;  %5134 = vst.msk [vmem:[#allocation3 + $0x1e8] sm:$0xff] %vm363_vm1, %v5070_v27  ;;  %v6157_v53 = vadd.f32 %v18552_v13, %v6093_v43  ;;  %v6092_v38 = vld [vmem:[#allocation3 + $0x1c0] sm:$0xff]  ;;  %v19045_v1 = vpop.f32.mrb[190].mxu0  ;;  %v21458_v33 = vld [vmem:[#allocation41_spill] sm:$0xff] }
 0x2d8   : > { %15798 = vmatprep.mubr.msk.f32.mxu1 %vm363_vm1, %v19034_v15  ;;  %16056 = vmatprep.mubr.msk.f32.mxu0 %vm363_vm1, %v18729_v56  ;;  %5133 = vst.msk [vmem:[#allocation3 + $0x1e0] sm:$0xff] %vm363_vm1, %v5069_v30  ;;  %v15433_v12 = vpop.f32.mrb[98].mxu1  ;;  %vm21459_vm8 = vnez %v21458_v33  ;;  %v6156_v8 = vadd.f32 %v6092_v38, %v18561_v23  ;;  %v19050_v11 = vpop.f32.mrb[191].mxu0  ;;  %v21461_v13 = vld [vmem:[#allocation16_spill] sm:$0xff] }
 0x2d9   : > { %v8323_v25 = vsel %vm21459_vm8, %v8131_v39, 0.0  ;;  %v5072_v56 = vadd.f32 %v15433_v12, %v5008_v41  ;;  %v4936_v36 = vpop.f32.mrb[99].mxu1  ;;  %21460 = vst [vmem:[#allocation90_spill] sm:$0xff] %v19050_v11  ;;  %v21462_v27 = vsel %vm21374_vm7, %v21461_v13, 0.0  ;;  %v19058_v30 = vld [vmem:[#allocation2 + $0x169] sm:$0xff]  ;;  %v8133_v43 = vld [vmem:[#allocation2 + $0x171] sm:$0xff] }
 0x2da   : > { %6221 = vst.msk [vmem:[#allocation3 + $0x1c8] sm:$0xff] %vm363_vm1, %v6157_v53  ;;  %v5071_v39 = vadd.f32 %v5007_v5, %v4936_v36  ;;  %6220 = vst.msk [vmem:[#allocation3 + $0x1c0] sm:$0xff] %vm363_vm1, %v6156_v8  ;;  %v6095_v23 = vld [vmem:[#allocation3 + $0x1d8] sm:$0xff]  ;;  %v7064_v41 = vld [vmem:[#allocation3 + $0x8] sm:$0xff] }
 0x2db   : > { %15799 = vmatmul.mubr.msk.f32.gmra.mrb[204].mxu1 %vm363_vm1, %v8323_v25  ;;  %16057 = vmatmul.mubr.msk.f32.gmra.mrb[40].mxu0 %vm363_vm1, %v21462_v27  ;;  %5136 = vst.msk [vmem:[#allocation3 + $0x1f8] sm:$0xff] %vm363_vm1, %v5072_v56  ;;  %v6159_v28 = vadd.f32 %v18577_v35, %v6095_v23  ;;  %v6094_v38 = vld [vmem:[#allocation3 + $0x1d0] sm:$0xff]  ;;  %v19069_v53 = vpop.f32.mrb[192].mxu0  ;;  %v21464_v25 = vld [vmem:[#allocation44_spill] sm:$0xff] }
 0x2dc   : > { %15801 = vmatprep.mubr.msk.f32.mxu1 %vm363_vm1, %v19058_v30  ;;  %16059 = vmatprep.mubr.msk.f32.mxu0 %vm363_vm1, %v18752_v24  ;;  %5135 = vst.msk [vmem:[#allocation3 + $0x1f0] sm:$0xff] %vm363_vm1, %v5071_v39  ;;  %v15540_v12 = vpop.f32.mrb[100].mxu1  ;;  %21463 = vst [vmem:[#allocation17_spill] sm:$0xff] %v19069_v53  ;;  %vm21465_vm5 = vnez %v21464_v25  ;;  %v21466_v5 = vld [vmem:[#allocation78_spill] sm:$0xff]  ;;  %v7063_v8 = vld [vmem:[#allocation3] sm:$0xff]  ;;  %v19074_v11 = vpop.f32.mrb[193].mxu0 }
 0x2dd   : > { %v8325_v36 = vsel %vm21465_vm5, %v8133_v43, 0.0  ;;  %v6158_v13 = vadd.f32 %v6094_v38, %v21466_v5  ;;  %v7128_v24 = vadd.f32 %v15540_v12, %v7064_v41  ;;  %v6744_v27 = vpop.f32.mrb[101].mxu1  ;;  %21467 = vst [vmem:[#allocation91_spill] sm:$0xff] %v19074_v11  ;;  %v21468_v35 = vld [vmem:[#allocation18_spill] sm:$0xff]  ;;  %6223 = vst.msk [vmem:[#allocation3 + $0x1d8] sm:$0xff] %vm363_vm1, %v6159_v28  ;;  %v7066_v5 = vld [vmem:[#allocation3 + $0x18] sm:$0xff] }
 0x2de   : > { %v21469_v56 = vsel %vm21377_vm0, %v21468_v35, 0.0  ;;  %v19082_v39 = vld [vmem:[#allocation2 + $0x179] sm:$0xff]  ;;  %v8135_v23 = vld [vmem:[#allocation2 + $0x181] sm:$0xff]  ;;  %v7127_v43 = vadd.f32 %v7063_v8, %v6744_v27 }
 0x2df   : > { %15802 = vmatmul.mubr.msk.f32.gmra.mrb[206].mxu1 %vm363_vm1, %v8325_v36  ;;  %16060 = vmatmul.mubr.msk.f32.gmra.mrb[42].mxu0 %vm363_vm1, %v21469_v56  ;;  %6222 = vst.msk [vmem:[#allocation3 + $0x1d0] sm:$0xff] %vm363_vm1, %v6158_v13  ;;  %v6097_v38 = vld [vmem:[#allocation3 + $0x1e8] sm:$0xff]  ;;  %7192 = vst.msk [vmem:[#allocation3 + $0x8] sm:$0xff] %vm363_vm1, %v7128_v24  ;;  %v6096_v41 = vld [vmem:[#allocation3 + $0x1e0] sm:$0xff]  ;;  %v19093_v28 = vpop.f32.mrb[194].mxu0 }
 0x2e0   : > { %15804 = vmatprep.mubr.msk.f32.mxu1 %vm363_vm1, %v19082_v39  ;;  %16062 = vmatprep.mubr.msk.f32.mxu0 %vm363_vm1, %v18775_v26  ;;  %v6161_v12 = vadd.f32 %v21470_v55, %v6097_v38  ;;  %7191 = vst.msk [vmem:[#allocation3] sm:$0xff] %vm363_vm1, %v7127_v43  ;;  %v15543_v36 = vpop.f32.mrb[102].mxu1  ;;  %v21471_v27 = vld [vmem:[#allocation47_spill] sm:$0xff]  ;;  %v7065_v13 = vld [vmem:[#allocation3 + $0x10] sm:$0xff]  ;;  %v19098_v53 = vpop.f32.mrb[195].mxu0  ;;  %v21474_v24 = vld [vmem:[#allocation20_spill] sm:$0xff] }
 0x2e1   : > { %vm21472_vm7 = vnez %v21471_v27  ;;  %v21473_v35 = vld [vmem:[#allocation63_spill] sm:$0xff]  ;;  %v7130_v26 = vadd.f32 %v15543_v36, %v7066_v5  ;;  %v6754_v11 = vpop.f32.mrb[103].mxu1  ;;  %v21475_v43 = vsel %vm21382_vm11, %v21474_v24, 0.0  ;;  %v8137_v55 = vld [vmem:[#allocation2 + $0x191] sm:$0xff] }
 0x2e2   : > { %v8327_v8 = vsel %vm21472_vm7, %v8135_v23, 0.0  ;;  %v6160_v56 = vadd.f32 %v6096_v41, %v21473_v35  ;;  %v19106_v38 = vld [vmem:[#allocation2 + $0x189] sm:$0xff]  ;;  %6225 = vst.msk [vmem:[#allocation3 + $0x1e8] sm:$0xff] %vm363_vm1, %v6161_v12  ;;  %v7129_v23 = vadd.f32 %v7065_v13, %v6754_v11 }
 0x2e3   : > { %15805 = vmatmul.mubr.msk.f32.gmra.mrb[208].mxu1 %vm363_vm1, %v8327_v8  ;;  %16063 = vmatmul.mubr.msk.f32.gmra.mrb[44].mxu0 %vm363_vm1, %v21475_v43  ;;  %v6099_v41 = vld [vmem:[#allocation3 + $0x1f8] sm:$0xff]  ;;  %7194 = vst.msk [vmem:[#allocation3 + $0x18] sm:$0xff] %vm363_vm1, %v7130_v26  ;;  %v6098_v36 = vld [vmem:[#allocation3 + $0x1f0] sm:$0xff]  ;;  %v7068_v8 = vld [vmem:[#allocation3 + $0x28] sm:$0xff]  ;;  %v19117_v12 = vpop.f32.mrb[196].mxu0 }
 0x2e4   : > { %15807 = vmatprep.mubr.msk.f32.mxu1 %vm363_vm1, %v19106_v38  ;;  %16065 = vmatprep.mubr.msk.f32.mxu0 %vm363_vm1, %v18798_v2  ;;  %6224 = vst.msk [vmem:[#allocation3 + $0x1e0] sm:$0xff] %vm363_vm1, %v6160_v56  ;;  %v6163_v48 = vadd.f32 %v18627_v49, %v6099_v41  ;;  %7193 = vst.msk [vmem:[#allocation3 + $0x10] sm:$0xff] %vm363_vm1, %v7129_v23  ;;  %v15546_v5 = vpop.f32.mrb[104].mxu1  ;;  %v21476_v11 = vld [vmem:[#allocation51_spill] sm:$0xff]  ;;  %v6162_v13 = vadd.f32 %v6098_v36, %v18632_v20  ;;  %v7067_v56 = vld [vmem:[#allocation3 + $0x20] sm:$0xff]  ;;  %v19122_v43 = vpop.f32.mrb[197].mxu0 }
 0x2e5   : > { %vm21477_vm0 = vnez %v21476_v11  ;;  %v7132_v2 = vadd.f32 %v15546_v5, %v7068_v8  ;;  %v6764_v24 = vpop.f32.mrb[105].mxu1  ;;  %v21478_v49 = vld [vmem:[#allocation22_spill] sm:$0xff]  ;;  %v7070_v8 = vld [vmem:[#allocation3 + $0x38] sm:$0xff] }
 0x2e6   : > { %v8329_v35 = vsel %vm21477_vm0, %v8137_v55, 0.0  ;;  %v21479_v26 = vsel %vm21388_vm13, %v21478_v49, 0.0  ;;  %v19130_v23 = vld [vmem:[#allocation2 + $0x199] sm:$0xff]  ;;  %v8139_v41 = vld [vmem:[#allocation2 + $0x1a1] sm:$0xff]  ;;  %6227 = vst.msk [vmem:[#allocation3 + $0x1f8] sm:$0xff] %vm363_vm1, %v6163_v48  ;;  %v7131_v55 = vadd.f32 %v7067_v56, %v6764_v24  ;;  %6226 = vst.msk [vmem:[#allocation3 + $0x1f0] sm:$0xff] %vm363_vm1, %v6162_v13 }
 0x2e7   : > { %15808 = vmatmul.mubr.msk.f32.gmra.mrb[210].mxu1 %vm363_vm1, %v8329_v35  ;;  %16066 = vmatmul.mubr.msk.f32.gmra.mrb[46].mxu0 %vm363_vm1, %v21479_v26  ;;  %v7899_v20 = vld [vmem:[#allocation3 + $0x8] sm:$0xff]  ;;  %7196 = vst.msk [vmem:[#allocation3 + $0x28] sm:$0xff] %vm363_vm1, %v7132_v2  ;;  %v7898_v36 = vld [vmem:[#allocation3] sm:$0xff]  ;;  %v19141_v48 = vpop.f32.mrb[198].mxu0  ;;  %v21480_v35 = vld [vmem:[#allocation54_spill] sm:$0xff] }
 0x2e8   : > { %15810 = vmatprep.mubr.msk.f32.mxu1 %vm363_vm1, %v19130_v23  ;;  %16068 = vmatprep.mubr.msk.f32.mxu0 %vm363_vm1, %v18821_v57  ;;  %v7963_v62 = vadd.f32 %v18650_v17, %v7899_v20  ;;  %7195 = vst.msk [vmem:[#allocation3 + $0x20] sm:$0xff] %vm363_vm1, %v7131_v55  ;;  %v15549_v5 = vpop.f32.mrb[106].mxu1  ;;  %vm21481_vm11 = vnez %v21480_v35  ;;  %v7962_v56 = vadd.f32 %v7898_v36, %v18655_v54  ;;  %v7069_v13 = vld [vmem:[#allocation3 + $0x30] sm:$0xff]  ;;  %v19146_v26 = vpop.f32.mrb[199].mxu0  ;;  %v21482_v17 = vld [vmem:[#allocation25_spill] sm:$0xff]  ;;  %v19154_v55 = vld [vmem:[#allocation2 + $0x1a9] sm:$0xff] }
 0x2e9   : > { %v8331_v24 = vsel %vm21481_vm11, %v8139_v41, 0.0  ;;  %v7134_v57 = vadd.f32 %v15549_v5, %v7070_v8  ;;  %v6774_v49 = vpop.f32.mrb[107].mxu1  ;;  %v21483_v2 = vsel %vm21396_vm10, %v21482_v17, 0.0  ;;  %v8141_v20 = vld [vmem:[#allocation2 + $0x1b1] sm:$0xff] }
 0x2ea   : > { %8027 = vst.msk [vmem:[#allocation3 + $0x8] sm:$0xff] %vm363_vm1, %v7963_v62  ;;  %v7133_v41 = vadd.f32 %v7069_v13, %v6774_v49  ;;  %8026 = vst.msk [vmem:[#allocation3] sm:$0xff] %vm363_vm1, %v7962_v56  ;;  %v7901_v54 = vld [vmem:[#allocation3 + $0x18] sm:$0xff]  ;;  %v7072_v8 = vld [vmem:[#allocation3 + $0x48] sm:$0xff] }
 0x2eb   : > { %15811 = vmatmul.mubr.msk.f32.gmra.mrb[212].mxu1 %vm363_vm1, %v8331_v24  ;;  %16069 = vmatmul.mubr.msk.f32.gmra.mrb[48].mxu0 %vm363_vm1, %v21483_v2  ;;  %7198 = vst.msk [vmem:[#allocation3 + $0x38] sm:$0xff] %vm363_vm1, %v7134_v57  ;;  %v7965_v47 = vadd.f32 %v18673_v45, %v7901_v54  ;;  %v7900_v36 = vld [vmem:[#allocation3 + $0x10] sm:$0xff]  ;;  %v19165_v62 = vpop.f32.mrb[200].mxu0  ;;  %v21484_v24 = vld [vmem:[#allocation57_spill] sm:$0xff]  ;;  %v7071_v56 = vld [vmem:[#allocation3 + $0x40] sm:$0xff] }
 0x2ec   : > { %15813 = vmatprep.mubr.msk.f32.mxu1 %vm363_vm1, %v19154_v55  ;;  %16071 = vmatprep.mubr.msk.f32.mxu0 %vm363_vm1, %v18844_v29  ;;  %7197 = vst.msk [vmem:[#allocation3 + $0x30] sm:$0xff] %vm363_vm1, %v7133_v41  ;;  %v15552_v5 = vpop.f32.mrb[108].mxu1  ;;  %vm21485_vm13 = vnez %v21484_v24  ;;  %v7964_v13 = vadd.f32 %v7900_v36, %v18678_v22  ;;  %v19170_v2 = vpop.f32.mrb[201].mxu0  ;;  %v21486_v45 = vld [vmem:[#allocation28_spill] sm:$0xff]  ;;  %v19178_v41 = vld [vmem:[#allocation2 + $0x1b9] sm:$0xff]  ;;  %v8143_v54 = vld [vmem:[#allocation2 + $0x1c1] sm:$0xff] }
 0x2ed   : > { %v8333_v49 = vsel %vm21485_vm13, %v8141_v20, 0.0  ;;  %v7136_v29 = vadd.f32 %v15552_v5, %v7072_v8  ;;  %v6784_v17 = vpop.f32.mrb[109].mxu1  ;;  %v21487_v57 = vsel %vm21403_vm12, %v21486_v45, 0.0  ;;  %8029 = vst.msk [vmem:[#allocation3 + $0x18] sm:$0xff] %vm363_vm1, %v7965_v47  ;;  %v7074_v8 = vld [vmem:[#allocation3 + $0x58] sm:$0xff] }
 0x2ee   : > { %v7135_v20 = vadd.f32 %v7071_v56, %v6784_v17  ;;  %8028 = vst.msk [vmem:[#allocation3 + $0x10] sm:$0xff] %vm363_vm1, %v7964_v13  ;;  %v7903_v22 = vld [vmem:[#allocation3 + $0x28] sm:$0xff]  ;;  %v7073_v13 = vld [vmem:[#allocation3 + $0x50] sm:$0xff] }
 0x2ef   : > { %15814 = vmatmul.mubr.msk.f32.gmra.mrb[214].mxu1 %vm363_vm1, %v8333_v49  ;;  %16072 = vmatmul.mubr.msk.f32.gmra.mrb[50].mxu0 %vm363_vm1, %v21487_v57  ;;  %7200 = vst.msk [vmem:[#allocation3 + $0x48] sm:$0xff] %vm363_vm1, %v7136_v29  ;;  %v7967_v0 = vadd.f32 %v18696_v6, %v7903_v22  ;;  %v7902_v36 = vld [vmem:[#allocation3 + $0x20] sm:$0xff]  ;;  %v19189_v47 = vpop.f32.mrb[202].mxu0  ;;  %v21488_v49 = vld [vmem:[#allocation61_spill] sm:$0xff]  ;;  %v21491_v6 = vld [vmem:[#allocation30_spill] sm:$0xff] }
 0x2f0   : > { %15816 = vmatprep.mubr.msk.f32.mxu1 %vm363_vm1, %v19178_v41  ;;  %16074 = vmatprep.mubr.msk.f32.mxu0 %vm363_vm1, %v18867_v46  ;;  %7199 = vst.msk [vmem:[#allocation3 + $0x40] sm:$0xff] %vm363_vm1, %v7135_v20  ;;  %v15555_v5 = vpop.f32.mrb[110].mxu1  ;;  %vm21489_vm10 = vnez %v21488_v49  ;;  %v7966_v56 = vadd.f32 %v7902_v36, %v18701_v14  ;;  %v19194_v57 = vpop.f32.mrb[203].mxu0  ;;  %v21492_v29 = vsel %vm21409_vm4, %v21491_v6, 0.0  ;;  %v19202_v20 = vld [vmem:[#allocation2 + $0x1c9] sm:$0xff]  ;;  %v8145_v22 = vld [vmem:[#allocation2 + $0x1d1] sm:$0xff]  ;;  %vm21498_vm4 = vnez %v21422_v59 }
 0x2f1   : > { %v8335_v17 = vsel %vm21489_vm10, %v8143_v54, 0.0  ;;  %v7138_v46 = vadd.f32 %v15555_v5, %v7074_v8  ;;  %v6794_v45 = vpop.f32.mrb[111].mxu1  ;;  %21490 = vst [vmem:[#allocation92_spill] sm:$0xff] %v19194_v57  ;;  %8031 = vst.msk [vmem:[#allocation3 + $0x28] sm:$0xff] %vm363_vm1, %v7967_v0  ;;  %v11264_v5 = vld [vmem:[#allocation2 + $0x111] sm:$0xff] }
 0x2f2   : > { %v7137_v54 = vadd.f32 %v7073_v13, %v6794_v45  ;;  %8030 = vst.msk [vmem:[#allocation3 + $0x20] sm:$0xff] %vm363_vm1, %v7966_v56  ;;  %v7905_v14 = vld [vmem:[#allocation3 + $0x38] sm:$0xff]  ;;  %v7076_v0 = vld [vmem:[#allocation3 + $0x68] sm:$0xff]  ;;  %v21493_v45 = vld [vmem:[#allocation64_spill] sm:$0xff] }
 0x2f3   : > { %15817 = vmatmul.mubr.msk.f32.gmra.mrb[216].mxu1 %vm363_vm1, %v8335_v17  ;;  %16075 = vmatmul.mubr.msk.f32.gmra.mrb[52].mxu0 %vm363_vm1, %v21492_v29  ;;  %7202 = vst.msk [vmem:[#allocation3 + $0x58] sm:$0xff] %vm363_vm1, %v7138_v46  ;;  %v7969_v58 = vadd.f32 %v18719_v32, %v7905_v14  ;;  %v7904_v36 = vld [vmem:[#allocation3 + $0x30] sm:$0xff]  ;;  %v19213_v17 = vpop.f32.mrb[204].mxu0  ;;  %vm21494_vm12 = vnez %v21493_v45  ;;  %v7075_v29 = vld [vmem:[#allocation3 + $0x60] sm:$0xff] }
 0x2f4   : > { %15819 = vmatprep.mubr.msk.f32.mxu1 %vm363_vm1, %v19202_v20  ;;  %16077 = vmatprep.mubr.msk.f32.mxu0 %vm363_vm1, %v18886_v7  ;;  %7201 = vst.msk [vmem:[#allocation3 + $0x50] sm:$0xff] %vm363_vm1, %v7137_v54  ;;  %v15558_v8 = vpop.f32.mrb[112].mxu1  ;;  %v8337_v13 = vsel %vm21494_vm12, %v8145_v22, 0.0  ;;  %v7968_v7 = vadd.f32 %v7904_v36, %v18724_v63  ;;  %v19218_v57 = vpop.f32.mrb[205].mxu0  ;;  %v21496_v32 = vld [vmem:[#allocation32_spill] sm:$0xff]  ;;  %v19226_v54 = vld [vmem:[#allocation2 + $0x1d9] sm:$0xff] }
 0x2f5   : > { %v7140_v6 = vadd.f32 %v15558_v8, %v7076_v0  ;;  %v6804_v56 = vpop.f32.mrb[113].mxu1  ;;  %21495 = vst [vmem:[#allocation19_spill] sm:$0xff] %v19218_v57  ;;  %v21497_v46 = vsel %vm21416_vm15, %v21496_v32, 0.0  ;;  %v8147_v14 = vld [vmem:[#allocation2 + $0x1e1] sm:$0xff]  ;;  %8033 = vst.msk [vmem:[#allocation3 + $0x38] sm:$0xff] %vm363_vm1, %v7969_v58  ;;  %v11520_v8 = vsel %vm21498_vm4, %v11264_v5, 0.0 }
 0x2f6   : > { %v7139_v22 = vadd.f32 %v7075_v29, %v6804_v56  ;;  %8032 = vst.msk [vmem:[#allocation3 + $0x30] sm:$0xff] %vm363_vm1, %v7968_v7  ;;  %v7907_v63 = vld [vmem:[#allocation3 + $0x48] sm:$0xff]  ;;  %v7078_v0 = vld [vmem:[#allocation3 + $0x78] sm:$0xff] }
 0x2f7   : > { %15820 = vmatmul.mubr.msk.f32.gmra.mrb[218].mxu1 %vm363_vm1, %v8337_v13  ;;  %16078 = vmatmul.mubr.msk.f32.gmra.mrb[54].mxu0 %vm363_vm1, %v21497_v46  ;;  %7204 = vst.msk [vmem:[#allocation3 + $0x68] sm:$0xff] %vm363_vm1, %v7140_v6  ;;  %v7971_v19 = vadd.f32 %v18742_v9, %v7907_v63  ;;  %v7906_v36 = vld [vmem:[#allocation3 + $0x40] sm:$0xff]  ;;  %v19239_v13 = vpop.f32.mrb[206].mxu0  ;;  %v21500_v56 = vld [vmem:[#allocation67_spill] sm:$0xff]  ;;  %v7077_v6 = vld [vmem:[#allocation3 + $0x70] sm:$0xff] }
 0x2f8   : > { %15822 = vmatprep.mubr.msk.f32.mxu1 %vm363_vm1, %v19226_v54  ;;  %16080 = vmatprep.mubr.msk.f32.mxu0 %vm363_vm1, %v18910_v50  ;;  %7203 = vst.msk [vmem:[#allocation3 + $0x60] sm:$0xff] %vm363_vm1, %v7139_v22  ;;  %v15561_v58 = vpop.f32.mrb[114].mxu1  ;;  %21499 = vst [vmem:[#allocation93_spill] sm:$0xff] %v19239_v13  ;;  %vm21501_vm15 = vnez %v21500_v56  ;;  %v7970_v7 = vadd.f32 %v7906_v36, %v18747_v42  ;;  %v19244_v46 = vpop.f32.mrb[207].mxu0  ;;  %v19248_v9 = vld [vmem:[#allocation2 + $0x1e9] sm:$0xff]  ;;  %v8149_v59 = vld [vmem:[#allocation2 + $0x1f1] sm:$0xff] }
 0x2f9   : > { %v8339_v50 = vsel %vm21501_vm15, %v8147_v14, 0.0  ;;  %v7142_v29 = vadd.f32 %v15561_v58, %v7078_v0  ;;  %v6814_v32 = vpop.f32.mrb[115].mxu1  ;;  %21502 = vst [vmem:[#allocation94_spill] sm:$0xff] %v19244_v46  ;;  %8035 = vst.msk [vmem:[#allocation3 + $0x48] sm:$0xff] %vm363_vm1, %v7971_v19  ;;  %v21503_v14 = vld [vmem:[#allocation80_spill] sm:$0xff]  ;;  %v12596_v36 = vld [vmem:[%s20832_s7] sm:$0xff] }
 0x2fa   : > { %v7141_v5 = vadd.f32 %v7077_v6, %v6814_v32  ;;  %8034 = vst.msk [vmem:[#allocation3 + $0x40] sm:$0xff] %vm363_vm1, %v7970_v7  ;;  %v7909_v42 = vld [vmem:[#allocation3 + $0x58] sm:$0xff]  ;;  %v7080_v58 = vld [vmem:[#allocation3 + $0x88] sm:$0xff]  ;;  %v7079_v46 = vld [vmem:[#allocation3 + $0x80] sm:$0xff] }
 0x2fb   : > { %15823 = vmatmul.mubr.msk.f32.gmra.mrb[220].mxu1 %vm363_vm1, %v8339_v50  ;;  %16081 = vmatmul.mubr.msk.f32.gmra.mrb[56].mxu0 %vm363_vm1, %v11520_v8  ;;  %7206 = vst.msk [vmem:[#allocation3 + $0x78] sm:$0xff] %vm363_vm1, %v7142_v29  ;;  %v7973_v22 = vadd.f32 %v21503_v14, %v7909_v42  ;;  %v7908_v63 = vld [vmem:[#allocation3 + $0x50] sm:$0xff]  ;;  %v12597_v19 = vld [vmem:[%s20832_s7 + $0x8] sm:$0xff]  ;;  %v19264_v0 = vpop.f32.mrb[208].mxu0  ;;  %v21505_v50 = vld [vmem:[#allocation69_spill] sm:$0xff] }
 0x2fc   : > { %15825 = vmatprep.mubr.msk.f32.mxu1 %vm363_vm1, %v19248_v9  ;;  %16083 = vmatprep.mubr.f32.mxu0 %v21412_v37  ;;  %7205 = vst.msk [vmem:[#allocation3 + $0x70] sm:$0xff] %vm363_vm1, %v7141_v5  ;;  %v15564_v8 = vpop.f32.mrb[116].mxu1  ;;  %21504 = vst [vmem:[#allocation21_spill] sm:$0xff] %v19264_v0  ;;  %vm21506_vm2 = vnez %v21505_v50  ;;  %v21507_v29 = vld [vmem:[#allocation81_spill] sm:$0xff]  ;;  %v19269_v6 = vpack.c.bf16 %v12597_v19, %v12596_v36  ;;  %v19271_v13 = vpop.f32.mrb[209].mxu0  ;;  %v8151_v57 = vld [vmem:[#allocation2 + $0x201] sm:$0xff] }
 0x2fd   : > { %v8341_v7 = vsel %vm21506_vm2, %v8149_v59, 0.0  ;;  %v7972_v32 = vadd.f32 %v7908_v63, %v21507_v29  ;;  %v7144_v42 = vadd.f32 %v15564_v8, %v7080_v58  ;;  %v6824_v14 = vpop.f32.mrb[117].mxu1  ;;  %21508 = vst [vmem:[#allocation95_spill] sm:$0xff] %v19271_v13  ;;  %v19275_v5 = vld [vmem:[#allocation2 + $0x1f9] sm:$0xff]  ;;  %8037 = vst.msk [vmem:[#allocation3 + $0x58] sm:$0xff] %vm363_vm1, %v7973_v22  ;;  %v7082_v8 = vld [vmem:[#allocation3 + $0x98] sm:$0xff] }
 0x2fe   : > { %v7143_v0 = vadd.f32 %v7079_v46, %v6824_v14  ;;  %v7911_v59 = vld [vmem:[#allocation3 + $0x68] sm:$0xff]  ;;  %v21509_v63 = vld [vmem:[#allocation66_spill] sm:$0xff]  ;;  %16287 = vmatprep.subr.bf16.mxu1 %v19269_v6  ;;  %v11524_v46 = vsel %vm18934_vm14, %v18954_v10, 0.0 }
 0x2ff   : > { %15826 = vmatmul.mubr.msk.f32.gmra.mrb[222].mxu1 %vm363_vm1, %v8341_v7  ;;  %16084 = vmatmul.mubr.f32.gmra.mrb[58].mxu0 %v21412_v37  ;;  %8036 = vst.msk [vmem:[#allocation3 + $0x50] sm:$0xff] %vm363_vm1, %v7972_v32  ;;  %7208 = vst.msk [vmem:[#allocation3 + $0x88] sm:$0xff] %vm363_vm1, %v7144_v42  ;;  %v7975_v36 = vadd.f32 %v21509_v63, %v7911_v59  ;;  %v7910_v19 = vld [vmem:[#allocation3 + $0x60] sm:$0xff]  ;;  %v19290_v58 = vpop.f32.mrb[210].mxu0  ;;  %v21513_v29 = vld [vmem:[#allocation82_spill] sm:$0xff] }
 0x300   : > { %15828 = vmatprep.mubr.msk.f32.mxu1 %vm363_vm1, %v19275_v5  ;;  %16086 = vmatprep.mubr.msk.f32.mxu0 %vm363_vm1, %v18961_v21  ;;  %7207 = vst.msk [vmem:[#allocation3 + $0x80] sm:$0xff] %vm363_vm1, %v7143_v0  ;;  %v15567_v22 = vpop.f32.mrb[118].mxu1  ;;  %21510 = vst [vmem:[#allocation74_spill] sm:$0xff] %v19290_v58  ;;  %v21511_v21 = vld [vmem:[#allocation71_spill] sm:$0xff]  ;;  %v7974_v32 = vadd.f32 %v7910_v19, %v21513_v29  ;;  %v7081_v59 = vld [vmem:[#allocation3 + $0x90] sm:$0xff]  ;;  %v19295_v63 = vpop.f32.mrb[211].mxu0 }
 0x301   : > { %vm21512_vm4 = vnez %v21511_v21  ;;  %v7146_v42 = vadd.f32 %v15567_v22, %v7082_v8  ;;  %v6834_v14 = vpop.f32.mrb[119].mxu1  ;;  %21514 = vst [vmem:[#allocation56_spill] sm:$0xff] %v19295_v63  ;;  %v8153_v10 = vld [vmem:[#allocation2 + $0x211] sm:$0xff]  ;;  %8039 = vst.msk [vmem:[#allocation3 + $0x68] sm:$0xff] %vm363_vm1, %v7975_v36  ;;  %v21515_v19 = vld [vmem:[#allocation83_spill] sm:$0xff] }
 0x302   : > { %v8343_v7 = vsel %vm21512_vm4, %v8151_v57, 0.0  ;;  %v7145_v0 = vadd.f32 %v7081_v59, %v6834_v14  ;;  %8038 = vst.msk [vmem:[#allocation3 + $0x60] sm:$0xff] %vm363_vm1, %v7974_v32  ;;  %v7913_v57 = vld [vmem:[#allocation3 + $0x78] sm:$0xff]  ;;  %v21516_v29 = vld [vmem:[#allocation72_spill] sm:$0xff] }
 0x303   : > { %15829 = vmatmul.mubr.msk.f32.gmra.mrb[224].mxu1 %vm363_vm1, %v8343_v7  ;;  %16087 = vmatmul.mubr.msk.f32.gmra.mrb[60].mxu0 %vm363_vm1, %v11524_v46  ;;  %7210 = vst.msk [vmem:[#allocation3 + $0x98] sm:$0xff] %vm363_vm1, %v7146_v42  ;;  %v7977_v22 = vadd.f32 %v21515_v19, %v7913_v57  ;;  %v7912_v46 = vld [vmem:[#allocation3 + $0x70] sm:$0xff]  ;;  %v7084_v7 = vld [vmem:[#allocation3 + $0xa8] sm:$0xff]  ;;  %v19310_v36 = vpop.f32.mrb[212].mxu0  ;;  %vm21517_vm14 = vnez %v21516_v29  ;;  %v21518_v59 = vld [vmem:[#allocation84_spill] sm:$0xff] }
 0x304   : > { %15831 = vmatprep.mubr.msk.f32.mxu1 %vm363_vm1, %v19299_v44  ;;  %16089 = vmatprep.mubr.msk.f32.mxu0 %vm363_vm1, %v18986_v61  ;;  %7209 = vst.msk [vmem:[#allocation3 + $0x90] sm:$0xff] %vm363_vm1, %v7145_v0  ;;  %v15570_v8 = vpop.f32.mrb[120].mxu1  ;;  %v8345_v14 = vsel %vm21517_vm14, %v8153_v10, 0.0  ;;  %v7976_v63 = vadd.f32 %v7912_v46, %v21518_v59  ;;  %v7083_v32 = vld [vmem:[#allocation3 + $0xa0] sm:$0xff]  ;;  %v19315_v13 = vpop.f32.mrb[213].mxu0  ;;  %v21519_v42 = vld [vmem:[#allocation34_spill] sm:$0xff] }
 0x305   : > { %v7148_v61 = vadd.f32 %v15570_v8, %v7084_v7  ;;  %v6844_v58 = vpop.f32.mrb[121].mxu1  ;;  %v21520_v0 = vsel %vm21443_vm3, %v21519_v42, 0.0  ;;  %v10208_v57 = vld [vmem:[#allocation2 + $0x28] sm:$0xff]  ;;  %8041 = vst.msk [vmem:[#allocation3 + $0x78] sm:$0xff] %vm363_vm1, %v7977_v22  ;;  %v21521_v46 = vld [vmem:[#allocation85_spill] sm:$0xff] }
 0x306   : > { %v7147_v19 = vadd.f32 %v7083_v32, %v6844_v58  ;;  %8040 = vst.msk [vmem:[#allocation3 + $0x70] sm:$0xff] %vm363_vm1, %v7976_v63  ;;  %v7915_v10 = vld [vmem:[#allocation3 + $0x88] sm:$0xff]  ;;  %v7086_v29 = vld [vmem:[#allocation3 + $0xb8] sm:$0xff]  ;;  %v10209_v58 = vld [vmem:[#allocation2 + $0x30] sm:$0xff] }
 0x307   : > { %15832 = vmatmul.mubr.msk.f32.gmra.mrb[226].mxu1 %vm363_vm1, %v8345_v14  ;;  %16090 = vmatmul.mubr.msk.f32.gmra.mrb[62].mxu0 %vm363_vm1, %v21520_v0  ;;  %7212 = vst.msk [vmem:[#allocation3 + $0xa8] sm:$0xff] %vm363_vm1, %v7148_v61  ;;  %v7979_v40 = vadd.f32 %v21521_v46, %v7915_v10  ;;  %v7914_v8 = vld [vmem:[#allocation3 + $0x80] sm:$0xff]  ;;  %v19331_v14 = vpop.f32.mrb[214].mxu0  ;;  %v21522_v22 = vld [vmem:[#allocation73_spill] sm:$0xff] }
 0x308   : > { %15938 = vmatprep.mubr.msk.f32.mxu1 %vm363_vm1, %v10208_v57  ;;  %16092 = vmatprep.mubr.msk.f32.mxu0 %vm363_vm1, %v19010_v51  ;;  %7211 = vst.msk [vmem:[#allocation3 + $0xa0] sm:$0xff] %vm363_vm1, %v7147_v19  ;;  %v15573_v7 = vpop.f32.mrb[122].mxu1  ;;  %v7978_v59 = vadd.f32 %v7914_v8, %v21522_v22  ;;  %v7085_v51 = vld [vmem:[#allocation3 + $0xb0] sm:$0xff]  ;;  %v19334_v0 = vpop.f32.mrb[215].mxu0  ;;  %v21523_v63 = vld [vmem:[#allocation36_spill] sm:$0xff]  ;;  %v10210_v57 = vld [vmem:[#allocation2 + $0x38] sm:$0xff] }
 0x309   : > { %v7150_v32 = vadd.f32 %v15573_v7, %v7086_v29  ;;  %v6854_v42 = vpop.f32.mrb[123].mxu1  ;;  %v21524_v61 = vsel %vm21450_vm6, %v21523_v63, 0.0  ;;  %8043 = vst.msk [vmem:[#allocation3 + $0x88] sm:$0xff] %vm363_vm1, %v7979_v40  ;;  %v7088_v40 = vld [vmem:[#allocation3 + $0xc8] sm:$0xff] }
 0x30a   : > { %v7149_v19 = vadd.f32 %v7085_v51, %v6854_v42  ;;  %8042 = vst.msk [vmem:[#allocation3 + $0x80] sm:$0xff] %vm363_vm1, %v7978_v59  ;;  %v7917_v10 = vld [vmem:[#allocation3 + $0x98] sm:$0xff]  ;;  %v21526_v22 = vld [vmem:[#allocation5_spill] sm:$0xff]  ;;  %v7087_v59 = vld [vmem:[#allocation3 + $0xc0] sm:$0xff] }
 0x30b   : > { %15939 = vmatmul.mubr.msk.f32.vlgmr.msra.gmra.mrb[228].mxu1 %vm363_vm1, %v10209_v58  ;;  %16093 = vmatmul.mubr.msk.f32.gmra.mrb[64].mxu0 %vm363_vm1, %v21524_v61  ;;  %7214 = vst.msk [vmem:[#allocation3 + $0xb8] sm:$0xff] %vm363_vm1, %v7150_v32  ;;  %v7981_v46 = vadd.f32 %v21525_v34, %v7917_v10  ;;  %v7916_v8 = vld [vmem:[#allocation3 + $0x90] sm:$0xff]  ;;  %v19351_v29 = vpop.f32.mrb[216].mxu0  ;;  %v10212_v61 = vld [vmem:[#allocation2 + $0x48] sm:$0xff] }
 0x30c   : > { %15941 = vmatprep.mubr.msk.f32.mxu1 %vm363_vm1, %v10210_v57  ;;  %16095 = vmatprep.mubr.msk.f32.mxu0 %vm363_vm1, %v19034_v15  ;;  %7213 = vst.msk [vmem:[#allocation3 + $0xb0] sm:$0xff] %vm363_vm1, %v7149_v19  ;;  %v15576_v7 = vpop.f32.mrb[124].mxu1  ;;  %v10211_v58 = vld [vmem:[#allocation2 + $0x40] sm:$0xff]  ;;  %v7980_v42 = vadd.f32 %v7916_v8, %v21526_v22  ;;  %v19354_v63 = vpop.f32.mrb[217].mxu0  ;;  %v21529_v10 = vld [vmem:[#allocation87_spill] sm:$0xff] }
 0x30d   : > { %16289 = vmatpush3.bf16.msra.mxu1 %v19269_v6  ;;  %v7152_v15 = vadd.f32 %v15576_v7, %v7088_v40  ;;  %v6864_v51 = vpop.f32.mrb[125].mxu1  ;;  %v21527_v6 = vld [vmem:[#allocation40_spill] sm:$0xff]  ;;  %8045 = vst.msk [vmem:[#allocation3 + $0x98] sm:$0xff] %vm363_vm1, %v7981_v46  ;;  %v7090_v7 = vld [vmem:[#allocation3 + $0xd8] sm:$0xff] }
 0x30e   : > { %v21528_v32 = vsel %vm21455_vm9, %v21527_v6, 0.0  ;;  %v7151_v57 = vadd.f32 %v7087_v59, %v6864_v51  ;;  %8044 = vst.msk [vmem:[#allocation3 + $0x90] sm:$0xff] %vm363_vm1, %v7980_v42  ;;  %v7919_v19 = vld [vmem:[#allocation3 + $0xa8] sm:$0xff]  ;;  %v10213_v46 = vld [vmem:[#allocation2 + $0x50] sm:$0xff]  ;;  %v21531_v42 = vld [vmem:[#allocation42_spill] sm:$0xff] }
 0x30f   : > { %15942 = vmatmul.mubr.msk.f32.gmra.mrb[230].mxu1 %vm363_vm1, %v10211_v58  ;;  %16096 = vmatmul.mubr.msk.f32.gmra.mrb[66].mxu0 %vm363_vm1, %v21528_v32  ;;  %7216 = vst.msk [vmem:[#allocation3 + $0xc8] sm:$0xff] %vm363_vm1, %v7152_v15  ;;  %v7983_v60 = vadd.f32 %v21529_v10, %v7919_v19  ;;  %v7918_v34 = vld [vmem:[#allocation3 + $0xa0] sm:$0xff]  ;;  %v19370_v40 = vpop.f32.mrb[218].mxu0  ;;  %v21532_v15 = vsel %vm21459_vm8, %v21531_v42, 0.0  ;;  %v10214_v32 = vld [vmem:[#allocation2 + $0x58] sm:$0xff]  ;;  %v21533_v19 = vld [vmem:[#allocation7_spill] sm:$0xff] }
 0x310   : > { %15944 = vmatprep.mubr.msk.f32.mxu1 %vm363_vm1, %v10212_v61  ;;  %16098 = vmatprep.mubr.msk.f32.mxu0 %vm363_vm1, %v19058_v30  ;;  %7215 = vst.msk [vmem:[#allocation3 + $0xc0] sm:$0xff] %vm363_vm1, %v7151_v57  ;;  %v15579_v8 = vpop.f32.mrb[126].mxu1  ;;  %v21530_v58 = vld [vmem:[#allocation88_spill] sm:$0xff]  ;;  %v7089_v30 = vld [vmem:[#allocation3 + $0xd0] sm:$0xff]  ;;  %v19373_v6 = vpop.f32.mrb[219].mxu0 }
 0x311   : > { %v7982_v22 = vadd.f32 %v7918_v34, %v21530_v58  ;;  %v7154_v51 = vadd.f32 %v15579_v8, %v7090_v7  ;;  %v6874_v59 = vpop.f32.mrb[127].mxu1  ;;  %8047 = vst.msk [vmem:[#allocation3 + $0xa8] sm:$0xff] %vm363_vm1, %v7983_v60  ;;  %v7092_v8 = vld [vmem:[#allocation3 + $0xe8] sm:$0xff]  ;;  %v10215_v60 = vld [vmem:[#allocation2 + $0x60] sm:$0xff] }
 0x312   : > { %v7153_v61 = vadd.f32 %v7089_v30, %v6874_v59  ;;  %v7921_v57 = vld [vmem:[#allocation3 + $0xb8] sm:$0xff] }
 0x313   : > { %15945 = vmatmul.mubr.msk.f32.gmra.mrb[232].mxu1 %vm363_vm1, %v10213_v46  ;;  %16099 = vmatmul.mubr.msk.f32.gmra.mrb[68].mxu0 %vm363_vm1, %v21532_v15  ;;  %8046 = vst.msk [vmem:[#allocation3 + $0xa0] sm:$0xff] %vm363_vm1, %v7982_v22  ;;  %7218 = vst.msk [vmem:[#allocation3 + $0xd8] sm:$0xff] %vm363_vm1, %v7154_v51  ;;  %v7985_v33 = vadd.f32 %v21533_v19, %v7921_v57  ;;  %v7920_v10 = vld [vmem:[#allocation3 + $0xb0] sm:$0xff]  ;;  %v19389_v7 = vpop.f32.mrb[220].mxu0  ;;  %v21534_v46 = vld [vmem:[#allocation89_spill] sm:$0xff] }
 0x314   : > { %15947 = vmatprep.mubr.msk.f32.mxu1 %vm363_vm1, %v10214_v32  ;;  %16101 = vmatprep.mubr.msk.f32.mxu0 %vm363_vm1, %v19082_v39  ;;  %7217 = vst.msk [vmem:[#allocation3 + $0xd0] sm:$0xff] %vm363_vm1, %v7153_v61  ;;  %v15582_v34 = vpop.f32.mrb[128].mxu1  ;;  %v7984_v58 = vadd.f32 %v7920_v10, %v21534_v46  ;;  %v7091_v39 = vld [vmem:[#allocation3 + $0xe0] sm:$0xff]  ;;  %v19392_v42 = vpop.f32.mrb[221].mxu0  ;;  %v21535_v22 = vld [vmem:[#allocation45_spill] sm:$0xff]  ;;  %v10216_v15 = vld [vmem:[#allocation2 + $0x68] sm:$0xff] }
 0x315   : > { %v7156_v59 = vadd.f32 %v15582_v34, %v7092_v8  ;;  %v6884_v30 = vpop.f32.mrb[129].mxu1  ;;  %v21536_v51 = vsel %vm21465_vm5, %v21535_v22, 0.0  ;;  %8049 = vst.msk [vmem:[#allocation3 + $0xb8] sm:$0xff] %vm363_vm1, %v7985_v33  ;;  %v7094_v10 = vld [vmem:[#allocation3 + $0xf8] sm:$0xff]  ;;  %v10217_v33 = vld [vmem:[#allocation2 + $0x70] sm:$0xff]  ;;  %v21539_v22 = vld [vmem:[#allocation9_spill] sm:$0xff] }
 0x316   : > { %v7155_v32 = vadd.f32 %v7091_v39, %v6884_v30  ;;  %8048 = vst.msk [vmem:[#allocation3 + $0xb0] sm:$0xff] %vm363_vm1, %v7984_v58  ;;  %v7923_v61 = vld [vmem:[#allocation3 + $0xc8] sm:$0xff] }
 0x317   : > { %15948 = vmatmul.mubr.msk.f32.gmra.mrb[234].mxu1 %vm363_vm1, %v10215_v60  ;;  %16102 = vmatmul.mubr.msk.f32.gmra.mrb[70].mxu0 %vm363_vm1, %v21536_v51  ;;  %7220 = vst.msk [vmem:[#allocation3 + $0xe8] sm:$0xff] %vm363_vm1, %v7156_v59  ;;  %v7987_v25 = vadd.f32 %v18921_v4, %v7923_v61  ;;  %v7922_v57 = vld [vmem:[#allocation3 + $0xc0] sm:$0xff]  ;;  %v19408_v34 = vpop.f32.mrb[222].mxu0  ;;  %v21537_v4 = vld [vmem:[#allocation49_spill] sm:$0xff] }
 0x318   : > { %15950 = vmatprep.mubr.msk.f32.mxu1 %vm363_vm1, %v10216_v15  ;;  %16104 = vmatprep.mubr.msk.f32.mxu0 %vm363_vm1, %v19106_v38  ;;  %7219 = vst.msk [vmem:[#allocation3 + $0xe0] sm:$0xff] %vm363_vm1, %v7155_v32  ;;  %v15585_v19 = vpop.f32.mrb[130].mxu1  ;;  %v7986_v8 = vadd.f32 %v7922_v57, %v18926_v3  ;;  %v7093_v38 = vld [vmem:[#allocation3 + $0xf0] sm:$0xff]  ;;  %v19411_v30 = vpop.f32.mrb[223].mxu0  ;;  %v21538_v58 = vsel %vm21472_vm7, %v21537_v4, 0.0  ;;  %v10218_v59 = vld [vmem:[#allocation2 + $0x78] sm:$0xff] }
 0x319   : > { %v7158_v60 = vadd.f32 %v15585_v19, %v7094_v10  ;;  %v6894_v46 = vpop.f32.mrb[131].mxu1  ;;  %8051 = vst.msk [vmem:[#allocation3 + $0xc8] sm:$0xff] %vm363_vm1, %v7987_v25  ;;  %v7096_v32 = vld [vmem:[#allocation3 + $0x108] sm:$0xff]  ;;  %v10219_v25 = vld [vmem:[#allocation2 + $0x80] sm:$0xff]  ;;  %v21540_v57 = vld [vmem:[#allocation11_spill] sm:$0xff] }
 0x31a   : > { %v7157_v39 = vadd.f32 %v7093_v38, %v6894_v46  ;;  %8050 = vst.msk [vmem:[#allocation3 + $0xc0] sm:$0xff] %vm363_vm1, %v7986_v8  ;;  %v7925_v3 = vld [vmem:[#allocation3 + $0xd8] sm:$0xff]  ;;  %v21541_v8 = vld [vmem:[#allocation52_spill] sm:$0xff] }
 0x31b   : > { %15951 = vmatmul.mubr.msk.f32.gmra.mrb[236].mxu1 %vm363_vm1, %v10217_v33  ;;  %16105 = vmatmul.mubr.msk.f32.gmra.mrb[72].mxu0 %vm363_vm1, %v21538_v58  ;;  %7222 = vst.msk [vmem:[#allocation3 + $0xf8] sm:$0xff] %vm363_vm1, %v7158_v60  ;;  %v7989_v27 = vadd.f32 %v21539_v22, %v7925_v3  ;;  %v7924_v51 = vld [vmem:[#allocation3 + $0xd0] sm:$0xff]  ;;  %v19427_v61 = vpop.f32.mrb[224].mxu0  ;;  %v21542_v60 = vsel %vm21477_vm0, %v21541_v8, 0.0  ;;  %v10220_v38 = vld [vmem:[#allocation2 + $0x88] sm:$0xff] }
 0x31c   : > { %15953 = vmatprep.mubr.msk.f32.mxu1 %vm363_vm1, %v10218_v59  ;;  %16107 = vmatprep.mubr.msk.f32.mxu0 %vm363_vm1, %v19130_v23  ;;  %7221 = vst.msk [vmem:[#allocation3 + $0xf0] sm:$0xff] %vm363_vm1, %v7157_v39  ;;  %v15588_v15 = vpop.f32.mrb[132].mxu1  ;;  %v7988_v19 = vadd.f32 %v7924_v51, %v21540_v57  ;;  %v7095_v23 = vld [vmem:[#allocation3 + $0x100] sm:$0xff]  ;;  %v19430_v46 = vpop.f32.mrb[225].mxu0  ;;  %v21543_v59 = vld [vmem:[#allocation13_spill] sm:$0xff]  ;;  %v7098_v22 = vld [vmem:[#allocation3 + $0x118] sm:$0xff] }
 0x31d   : > { %v7160_v10 = vadd.f32 %v15588_v15, %v7096_v32  ;;  %v6904_v33 = vpop.f32.mrb[133].mxu1  ;;  %8053 = vst.msk [vmem:[#allocation3 + $0xd8] sm:$0xff] %vm363_vm1, %v7989_v27  ;;  %v10221_v27 = vld [vmem:[#allocation2 + $0x90] sm:$0xff]  ;;  %v21544_v15 = vld [vmem:[#allocation15_spill] sm:$0xff] }
 0x31e   : > { %v7159_v4 = vadd.f32 %v7095_v23, %v6904_v33  ;;  %8052 = vst.msk [vmem:[#allocation3 + $0xd0] sm:$0xff] %vm363_vm1, %v7988_v19  ;;  %v7927_v58 = vld [vmem:[#allocation3 + $0xe8] sm:$0xff]  ;;  %v21545_v19 = vld [vmem:[#allocation55_spill] sm:$0xff] }
 0x31f   : > { %15954 = vmatmul.mubr.msk.f32.gmra.mrb[238].mxu1 %vm363_vm1, %v10219_v25  ;;  %16108 = vmatmul.mubr.msk.f32.gmra.mrb[74].mxu0 %vm363_vm1, %v21542_v60  ;;  %7224 = vst.msk [vmem:[#allocation3 + $0x108] sm:$0xff] %vm363_vm1, %v7160_v10  ;;  %v7991_v11 = vadd.f32 %v21543_v59, %v7927_v58  ;;  %v7926_v39 = vld [vmem:[#allocation3 + $0xe0] sm:$0xff]  ;;  %v19446_v51 = vpop.f32.mrb[226].mxu0  ;;  %v21546_v10 = vsel %vm21481_vm11, %v21545_v19, 0.0  ;;  %v10222_v23 = vld [vmem:[#allocation2 + $0x98] sm:$0xff]  ;;  %v7102_v19 = vld [vmem:[#allocation3 + $0x138] sm:$0xff] }
 0x320   : > { %15956 = vmatprep.mubr.msk.f32.mxu1 %vm363_vm1, %v10220_v38  ;;  %16110 = vmatprep.mubr.msk.f32.mxu0 %vm363_vm1, %v19154_v55  ;;  %7223 = vst.msk [vmem:[#allocation3 + $0x100] sm:$0xff] %vm363_vm1, %v7159_v4  ;;  %v15591_v3 = vpop.f32.mrb[134].mxu1  ;;  %v7990_v32 = vadd.f32 %v7926_v39, %v21544_v15  ;;  %v7097_v55 = vld [vmem:[#allocation3 + $0x110] sm:$0xff]  ;;  %v19449_v33 = vpop.f32.mrb[227].mxu0  ;;  %v7100_v58 = vld [vmem:[#allocation3 + $0x128] sm:$0xff] }
 0x321   : > { %v7162_v25 = vadd.f32 %v15591_v3, %v7098_v22  ;;  %v6914_v57 = vpop.f32.mrb[135].mxu1  ;;  %8055 = vst.msk [vmem:[#allocation3 + $0xe8] sm:$0xff] %vm363_vm1, %v7991_v11  ;;  %v10223_v11 = vld [vmem:[#allocation2 + $0xa0] sm:$0xff] }
 0x322   : > { %v7161_v8 = vadd.f32 %v7097_v55, %v6914_v57  ;;  %8054 = vst.msk [vmem:[#allocation3 + $0xe0] sm:$0xff] %vm363_vm1, %v7990_v32  ;;  %v7929_v60 = vld [vmem:[#allocation3 + $0xf8] sm:$0xff] }
 0x323   : > { %15957 = vmatmul.mubr.msk.f32.gmra.mrb[240].mxu1 %vm363_vm1, %v10221_v27  ;;  %16111 = vmatmul.mubr.msk.f32.gmra.mrb[76].mxu0 %vm363_vm1, %v21546_v10  ;;  %7226 = vst.msk [vmem:[#allocation3 + $0x118] sm:$0xff] %vm363_vm1, %v7162_v25  ;;  %v7993_v35 = vadd.f32 %v18997_v52, %v7929_v60  ;;  %v7928_v38 = vld [vmem:[#allocation3 + $0xf0] sm:$0xff]  ;;  %v19465_v59 = vpop.f32.mrb[228].mxu0  ;;  %v21547_v52 = vld [vmem:[#allocation59_spill] sm:$0xff] }
 0x324   : > { %15959 = vmatprep.mubr.msk.f32.mxu1 %vm363_vm1, %v10222_v23  ;;  %16113 = vmatprep.mubr.msk.f32.mxu0 %vm363_vm1, %v19178_v41  ;;  %7225 = vst.msk [vmem:[#allocation3 + $0x110] sm:$0xff] %vm363_vm1, %v7161_v8  ;;  %v15594_v4 = vpop.f32.mrb[136].mxu1  ;;  %v7992_v39 = vadd.f32 %v7928_v38, %v19002_v18  ;;  %v7099_v41 = vld [vmem:[#allocation3 + $0x120] sm:$0xff]  ;;  %v19468_v27 = vpop.f32.mrb[229].mxu0  ;;  %v21548_v15 = vsel %vm21485_vm13, %v21547_v52, 0.0  ;;  %v10224_v32 = vld [vmem:[#allocation2 + $0xa8] sm:$0xff] }
 0x325   : > { %v7164_v3 = vadd.f32 %v15594_v4, %v7100_v58  ;;  %v6924_v22 = vpop.f32.mrb[137].mxu1  ;;  %8057 = vst.msk [vmem:[#allocation3 + $0xf8] sm:$0xff] %vm363_vm1, %v7993_v35  ;;  %v10225_v23 = vld [vmem:[#allocation2 + $0xb0] sm:$0xff]  ;;  %v10226_v58 = vld [vmem:[#allocation2 + $0xb8] sm:$0xff]  ;;  %v10227_v52 = vld [vmem:[#allocation2 + $0xc0] sm:$0xff] }
 0x326   : > { %v7163_v25 = vadd.f32 %v7099_v41, %v6924_v22  ;;  %8056 = vst.msk [vmem:[#allocation3 + $0xf0] sm:$0xff] %vm363_vm1, %v7992_v39  ;;  %v7931_v18 = vld [vmem:[#allocation3 + $0x108] sm:$0xff] }
 0x327   : > { %15960 = vmatmul.mubr.msk.f32.gmra.mrb[242].mxu1 %vm363_vm1, %v10223_v11  ;;  %16114 = vmatmul.mubr.msk.f32.gmra.mrb[78].mxu0 %vm363_vm1, %v21548_v15  ;;  %7228 = vst.msk [vmem:[#allocation3 + $0x128] sm:$0xff] %vm363_vm1, %v7164_v3  ;;  %v7995_v24 = vadd.f32 %v19021_v16, %v7931_v18  ;;  %v7930_v57 = vld [vmem:[#allocation3 + $0x100] sm:$0xff]  ;;  %v19484_v10 = vpop.f32.mrb[230].mxu0  ;;  %v21549_v16 = vld [vmem:[#allocation62_spill] sm:$0xff]  ;;  %v7104_v22 = vld [vmem:[#allocation3 + $0x148] sm:$0xff] }
 0x328   : > { %15962 = vmatprep.mubr.msk.f32.mxu1 %vm363_vm1, %v10224_v32  ;;  %16116 = vmatprep.mubr.msk.f32.mxu0 %vm363_vm1, %v19202_v20  ;;  %7227 = vst.msk [vmem:[#allocation3 + $0x120] sm:$0xff] %vm363_vm1, %v7163_v25  ;;  %v15597_v55 = vpop.f32.mrb[138].mxu1  ;;  %v7994_v8 = vadd.f32 %v7930_v57, %v19026_v31  ;;  %v7101_v20 = vld [vmem:[#allocation3 + $0x130] sm:$0xff]  ;;  %v19487_v38 = vpop.f32.mrb[231].mxu0  ;;  %v21550_v4 = vsel %vm21489_vm10, %v21549_v16, 0.0 }
 0x329   : > { %v7166_v60 = vadd.f32 %v15597_v55, %v7102_v19  ;;  %v6934_v35 = vpop.f32.mrb[139].mxu1  ;;  %8059 = vst.msk [vmem:[#allocation3 + $0x108] sm:$0xff] %vm363_vm1, %v7995_v24  ;;  %v21551_v15 = vld [vmem:[#allocation90_spill] sm:$0xff]  ;;  %v10228_v55 = vld [vmem:[#allocation2 + $0xc8] sm:$0xff] }
 0x32a   : > { %v7165_v11 = vadd.f32 %v7101_v20, %v6934_v35  ;;  %8058 = vst.msk [vmem:[#allocation3 + $0x100] sm:$0xff] %vm363_vm1, %v7994_v8  ;;  %v7933_v31 = vld [vmem:[#allocation3 + $0x118] sm:$0xff]  ;;  %v21554_v8 = vld [vmem:[#allocation17_spill] sm:$0xff] }
 0x32b   : > { %15963 = vmatmul.mubr.msk.f32.gmra.mrb[244].mxu1 %vm363_vm1, %v10225_v23  ;;  %16117 = vmatmul.mubr.msk.f32.gmra.mrb[80].mxu0 %vm363_vm1, %v21550_v4  ;;  %7230 = vst.msk [vmem:[#allocation3 + $0x138] sm:$0xff] %vm363_vm1, %v7166_v60  ;;  %v7997_v49 = vadd.f32 %v19045_v1, %v7933_v31  ;;  %v7932_v39 = vld [vmem:[#allocation3 + $0x110] sm:$0xff]  ;;  %v19503_v41 = vpop.f32.mrb[232].mxu0  ;;  %v21552_v1 = vld [vmem:[#allocation65_spill] sm:$0xff]  ;;  %v7106_v20 = vld [vmem:[#allocation3 + $0x158] sm:$0xff] }
 0x32c   : > { %15965 = vmatprep.mubr.msk.f32.mxu1 %vm363_vm1, %v10226_v58  ;;  %16119 = vmatprep.mubr.msk.f32.mxu0 %vm363_vm1, %v19226_v54  ;;  %7229 = vst.msk [vmem:[#allocation3 + $0x130] sm:$0xff] %vm363_vm1, %v7165_v11  ;;  %v15600_v3 = vpop.f32.mrb[140].mxu1  ;;  %v7996_v32 = vadd.f32 %v7932_v39, %v21551_v15  ;;  %v7103_v54 = vld [vmem:[#allocation3 + $0x140] sm:$0xff]  ;;  %v19506_v24 = vpop.f32.mrb[233].mxu0  ;;  %v21553_v57 = vsel %vm21494_vm12, %v21552_v1, 0.0  ;;  %v21555_v58 = vld [vmem:[#allocation91_spill] sm:$0xff] }
 0x32d   : > { %v7168_v25 = vadd.f32 %v15600_v3, %v7104_v22  ;;  %v6944_v18 = vpop.f32.mrb[141].mxu1  ;;  %8061 = vst.msk [vmem:[#allocation3 + $0x118] sm:$0xff] %vm363_vm1, %v7997_v49  ;;  %v10229_v4 = vld [vmem:[#allocation2 + $0xd0] sm:$0xff] }
 0x32e   : > { %v7167_v19 = vadd.f32 %v7103_v54, %v6944_v18  ;;  %8060 = vst.msk [vmem:[#allocation3 + $0x110] sm:$0xff] %vm363_vm1, %v7996_v32  ;;  %v7935_v23 = vld [vmem:[#allocation3 + $0x128] sm:$0xff]  ;;  %v21556_v3 = vld [vmem:[#allocation68_spill] sm:$0xff] }
 0x32f   : > { %15966 = vmatmul.mubr.msk.f32.gmra.mrb[246].mxu1 %vm363_vm1, %v10227_v52  ;;  %16120 = vmatmul.mubr.msk.f32.gmra.mrb[82].mxu0 %vm363_vm1, %v21553_v57  ;;  %7232 = vst.msk [vmem:[#allocation3 + $0x148] sm:$0xff] %vm363_vm1, %v7168_v25  ;;  %v7999_v45 = vadd.f32 %v21554_v8, %v7935_v23  ;;  %v7934_v60 = vld [vmem:[#allocation3 + $0x120] sm:$0xff]  ;;  %v19522_v16 = vpop.f32.mrb[234].mxu0  ;;  %v21557_v22 = vsel %vm21501_vm15, %v21556_v3, 0.0  ;;  %v10230_v52 = vld [vmem:[#allocation2 + $0xd8] sm:$0xff]  ;;  %v10231_v57 = vld [vmem:[#allocation2 + $0xe0] sm:$0xff] }
 0x330   : > { %15968 = vmatprep.mubr.msk.f32.mxu1 %vm363_vm1, %v10228_v55  ;;  %16122 = vmatprep.mubr.msk.f32.mxu0 %vm363_vm1, %v19248_v9  ;;  %7231 = vst.msk [vmem:[#allocation3 + $0x140] sm:$0xff] %vm363_vm1, %v7167_v19  ;;  %v15603_v35 = vpop.f32.mrb[142].mxu1  ;;  %v7998_v11 = vadd.f32 %v7934_v60, %v21555_v58  ;;  %v7105_v9 = vld [vmem:[#allocation3 + $0x150] sm:$0xff]  ;;  %v19525_v39 = vpop.f32.mrb[235].mxu0  ;;  %v7108_v54 = vld [vmem:[#allocation3 + $0x168] sm:$0xff]  ;;  %v7107_v8 = vld [vmem:[#allocation3 + $0x160] sm:$0xff] }
 0x331   : > { %v7170_v31 = vadd.f32 %v15603_v35, %v7106_v20  ;;  %v6954_v49 = vpop.f32.mrb[143].mxu1  ;;  %8063 = vst.msk [vmem:[#allocation3 + $0x128] sm:$0xff] %vm363_vm1, %v7999_v45  ;;  %v11296_v19 = vld [vmem:[#allocation2 + $0x211] sm:$0xff]  ;;  %v10232_v35 = vld [vmem:[#allocation2 + $0xe8] sm:$0xff] }
 0x332   : > { %v7169_v15 = vadd.f32 %v7105_v9, %v6954_v49  ;;  %8062 = vst.msk [vmem:[#allocation3 + $0x120] sm:$0xff] %vm363_vm1, %v7998_v11  ;;  %v7937_v32 = vld [vmem:[#allocation3 + $0x138] sm:$0xff]  ;;  %v11552_v58 = vsel %vm21512_vm4, %v11296_v19, 0.0  ;;  %v10233_v9 = vld [vmem:[#allocation2 + $0xf0] sm:$0xff] }
 0x333   : > { %15969 = vmatmul.mubr.msk.f32.gmra.mrb[248].mxu1 %vm363_vm1, %v10229_v4  ;;  %16123 = vmatmul.mubr.msk.f32.gmra.mrb[84].mxu0 %vm363_vm1, %v21557_v22  ;;  %7234 = vst.msk [vmem:[#allocation3 + $0x158] sm:$0xff] %vm363_vm1, %v7170_v31  ;;  %v8001_v56 = vadd.f32 %v19093_v28, %v7937_v32  ;;  %v7936_v25 = vld [vmem:[#allocation3 + $0x130] sm:$0xff]  ;;  %v19541_v1 = vpop.f32.mrb[236].mxu0  ;;  %v7110_v31 = vld [vmem:[#allocation3 + $0x178] sm:$0xff] }
 0x334   : > { %15971 = vmatprep.mubr.msk.f32.mxu1 %vm363_vm1, %v10230_v52  ;;  %16125 = vmatprep.mubr.msk.f32.mxu0 %vm363_vm1, %v19275_v5  ;;  %7233 = vst.msk [vmem:[#allocation3 + $0x150] sm:$0xff] %vm363_vm1, %v7169_v15  ;;  %v15606_v18 = vpop.f32.mrb[144].mxu1  ;;  %v8000_v55 = vadd.f32 %v7936_v25, %v19098_v53  ;;  %v19544_v45 = vpop.f32.mrb[237].mxu0  ;;  %v21558_v28 = vld [vmem:[#allocation70_spill] sm:$0xff] }
 0x335   : > { %v7172_v23 = vadd.f32 %v15606_v18, %v7108_v54  ;;  %v6964_v5 = vpop.f32.mrb[145].mxu1  ;;  %v21559_v60 = vsel %vm21506_vm2, %v21558_v28, 0.0  ;;  %8065 = vst.msk [vmem:[#allocation3 + $0x138] sm:$0xff] %vm363_vm1, %v8001_v56  ;;  %v7109_v52 = vld [vmem:[#allocation3 + $0x170] sm:$0xff]  ;;  %v7112_v18 = vld [vmem:[#allocation3 + $0x188] sm:$0xff]  ;;  %v10236_v28 = vld [vmem:[#allocation2 + $0x108] sm:$0xff] }
 0x336   : > { %v7171_v20 = vadd.f32 %v7107_v8, %v6964_v5  ;;  %8064 = vst.msk [vmem:[#allocation3 + $0x130] sm:$0xff] %vm363_vm1, %v8000_v55  ;;  %v7939_v53 = vld [vmem:[#allocation3 + $0x148] sm:$0xff]  ;;  %v7111_v5 = vld [vmem:[#allocation3 + $0x180] sm:$0xff] }
 0x337   : > { %15972 = vmatmul.mubr.msk.f32.gmra.mrb[250].mxu1 %vm363_vm1, %v10231_v57  ;;  %16126 = vmatmul.mubr.msk.f32.gmra.mrb[86].mxu0 %vm363_vm1, %v21559_v60  ;;  %7236 = vst.msk [vmem:[#allocation3 + $0x168] sm:$0xff] %vm363_vm1, %v7172_v23  ;;  %v8003_v50 = vadd.f32 %v19117_v12, %v7939_v53  ;;  %v7938_v4 = vld [vmem:[#allocation3 + $0x140] sm:$0xff]  ;;  %v19562_v49 = vpop.f32.mrb[238].mxu0  ;;  %v10234_v12 = vld [vmem:[#allocation2 + $0xf8] sm:$0xff]  ;;  %v10235_v57 = vld [vmem:[#allocation2 + $0x100] sm:$0xff] }
 0x338   : > { %15974 = vmatprep.mubr.msk.f32.mxu1 %vm363_vm1, %v10232_v35  ;;  %16128 = vmatprep.mubr.msk.f32.mxu0 %vm363_vm1, %v19299_v44  ;;  %7235 = vst.msk [vmem:[#allocation3 + $0x160] sm:$0xff] %vm363_vm1, %v7171_v20  ;;  %v15609_v11 = vpop.f32.mrb[146].mxu1  ;;  %v8002_v44 = vadd.f32 %v7938_v4, %v19122_v43  ;;  %v19565_v15 = vpop.f32.mrb[239].mxu0  ;;  %v7114_v53 = vld [vmem:[#allocation3 + $0x198] sm:$0xff]  ;;  %v10237_v4 = vld [vmem:[#allocation2 + $0x110] sm:$0xff] }
 0x339   : > { %v7174_v3 = vadd.f32 %v15609_v11, %v7110_v31  ;;  %v6974_v22 = vpop.f32.mrb[147].mxu1  ;;  %8067 = vst.msk [vmem:[#allocation3 + $0x148] sm:$0xff] %vm363_vm1, %v8003_v50 }
 0x33a   : > { %v7173_v21 = vadd.f32 %v7109_v52, %v6974_v22  ;;  %8066 = vst.msk [vmem:[#allocation3 + $0x140] sm:$0xff] %vm363_vm1, %v8002_v44  ;;  %v7941_v43 = vld [vmem:[#allocation3 + $0x158] sm:$0xff] }
 0x33b   : > { %15975 = vmatmul.mubr.msk.f32.gmra.mrb[252].mxu1 %vm363_vm1, %v10233_v9  ;;  %16129 = vmatmul.mubr.msk.f32.gmra.mrb[88].mxu0 %vm363_vm1, %v11552_v58  ;;  %7238 = vst.msk [vmem:[#allocation3 + $0x178] sm:$0xff] %vm363_vm1, %v7174_v3  ;;  %v8005_v32 = vadd.f32 %v19141_v48, %v7941_v43  ;;  %v7940_v56 = vld [vmem:[#allocation3 + $0x150] sm:$0xff]  ;;  %v19576_v54 = vpop.f32.mrb[240].mxu0  ;;  %v21560_v43 = vld [vmem:[#allocation92_spill] sm:$0xff] }
 0x33c   : > { %15977 = vmatprep.mubr.msk.f32.mxu1 %vm363_vm1, %v10234_v12  ;;  %16131 = vmatprep.mubr.f32.mxu0 %v21412_v37  ;;  %7237 = vst.msk [vmem:[#allocation3 + $0x170] sm:$0xff] %vm363_vm1, %v7173_v21  ;;  %v15612_v25 = vpop.f32.mrb[148].mxu1  ;;  %v8004_v55 = vadd.f32 %v7940_v56, %v19146_v26  ;;  %v19579_v8 = vpop.f32.mrb[241].mxu0  ;;  %v7113_v9 = vld [vmem:[#allocation3 + $0x190] sm:$0xff]  ;;  %v7116_v12 = vld [vmem:[#allocation3 + $0x1a8] sm:$0xff] }
 0x33d   : > { %v7176_v19 = vadd.f32 %v15612_v25, %v7112_v18  ;;  %v6984_v23 = vpop.f32.mrb[149].mxu1  ;;  %8069 = vst.msk [vmem:[#allocation3 + $0x158] sm:$0xff] %vm363_vm1, %v8005_v32  ;;  %v7115_v18 = vld [vmem:[#allocation3 + $0x1a0] sm:$0xff] }
 0x33e   : > { %v7175_v48 = vadd.f32 %v7111_v5, %v6984_v23  ;;  %8068 = vst.msk [vmem:[#allocation3 + $0x150] sm:$0xff] %vm363_vm1, %v8004_v55  ;;  %v7943_v60 = vld [vmem:[#allocation3 + $0x168] sm:$0xff]  ;;  %v10240_v55 = vld [vmem:[#allocation2 + $0x128] sm:$0xff] }
 0x33f   : > { %15978 = vmatmul.mubr.msk.f32.gmra.mrb[254].mxu1 %vm363_vm1, %v10235_v57  ;;  %16132 = vmatmul.mubr.f32.gmra.mrb[90].mxu0 %v21412_v37  ;;  %7240 = vst.msk [vmem:[#allocation3 + $0x188] sm:$0xff] %vm363_vm1, %v7176_v19  ;;  %v8007_v26 = vadd.f32 %v19165_v62, %v7943_v60  ;;  %v7942_v35 = vld [vmem:[#allocation3 + $0x160] sm:$0xff]  ;;  %v19589_v50 = vpop.f32.mrb[242].mxu0 }
 0x340   : > { %15980 = vmatprep.mubr.msk.f32.mxu1 %vm363_vm1, %v10236_v28  ;;  %7239 = vst.msk [vmem:[#allocation3 + $0x180] sm:$0xff] %vm363_vm1, %v7175_v48  ;;  %v15615_v20 = vpop.f32.mrb[150].mxu1  ;;  %v8006_v58 = vadd.f32 %v7942_v35, %v19170_v2  ;;  %v19592_v44 = vpop.f32.mrb[243].mxu0  ;;  %v7118_v48 = vld [vmem:[#allocation3 + $0x1b8] sm:$0xff] }
 0x341   : > { %v7178_v11 = vadd.f32 %v15615_v20, %v7114_v53  ;;  %v6994_v31 = vpop.f32.mrb[151].mxu1  ;;  %8071 = vst.msk [vmem:[#allocation3 + $0x168] sm:$0xff] %vm363_vm1, %v8007_v26  ;;  %v10241_v26 = vld [vmem:[#allocation2 + $0x130] sm:$0xff]  ;;  %v21561_v35 = vld [vmem:[#allocation19_spill] sm:$0xff] }
 0x342   : > { %v7177_v62 = vadd.f32 %v7113_v9, %v6994_v31  ;;  %8070 = vst.msk [vmem:[#allocation3 + $0x160] sm:$0xff] %vm363_vm1, %v8006_v58  ;;  %v7945_v3 = vld [vmem:[#allocation3 + $0x178] sm:$0xff]  ;;  %v7117_v58 = vld [vmem:[#allocation3 + $0x1b0] sm:$0xff]  ;;  %v10242_v31 = vld [vmem:[#allocation2 + $0x138] sm:$0xff] }
 0x343   : > { %15981 = vmatmul.mubr.msk.f32.gmra.mrb[0].mxu1 %vm363_vm1, %v10237_v4  ;;  %7242 = vst.msk [vmem:[#allocation3 + $0x198] sm:$0xff] %vm363_vm1, %v7178_v11  ;;  %v8009_v22 = vadd.f32 %v19189_v47, %v7945_v3  ;;  %v7944_v2 = vld [vmem:[#allocation3 + $0x170] sm:$0xff]  ;;  %v19601_v21 = vpop.f32.mrb[244].mxu0 }
 0x344   : > { %15983 = vmatprep.mubr.f32.mxu1 %v21412_v37  ;;  %7241 = vst.msk [vmem:[#allocation3 + $0x190] sm:$0xff] %vm363_vm1, %v7177_v62  ;;  %v15618_v52 = vpop.f32.mrb[152].mxu1  ;;  %v8008_v32 = vadd.f32 %v7944_v2, %v21560_v43  ;;  %v19604_v57 = vpop.f32.mrb[245].mxu0  ;;  %v21562_v62 = vld [vmem:[#allocation93_spill] sm:$0xff]  ;;  %v10243_v43 = vld [vmem:[#allocation2 + $0x140] sm:$0xff] }
 0x345   : > { %v7180_v56 = vadd.f32 %v15618_v52, %v7116_v12  ;;  %v7004_v25 = vpop.f32.mrb[153].mxu1  ;;  %8073 = vst.msk [vmem:[#allocation3 + $0x178] sm:$0xff] %vm363_vm1, %v8009_v22  ;;  %v7120_v52 = vld [vmem:[#allocation3 + $0x1c8] sm:$0xff] }
 0x346   : > { %v7179_v47 = vadd.f32 %v7115_v18, %v7004_v25  ;;  %8072 = vst.msk [vmem:[#allocation3 + $0x170] sm:$0xff] %vm363_vm1, %v8008_v32  ;;  %v7947_v19 = vld [vmem:[#allocation3 + $0x188] sm:$0xff]  ;;  %v21563_v32 = vld [vmem:[#allocation94_spill] sm:$0xff] }
 0x347   : > { %15984 = vmatmul.mubr.f32.gmra.mrb[2].mxu1 %v21412_v37  ;;  %7244 = vst.msk [vmem:[#allocation3 + $0x1a8] sm:$0xff] %vm363_vm1, %v7180_v56  ;;  %v8011_v23 = vadd.f32 %v19213_v17, %v7947_v19  ;;  %v7946_v5 = vld [vmem:[#allocation3 + $0x180] sm:$0xff]  ;;  %v19613_v60 = vpop.f32.mrb[246].mxu0  ;;  %v10244_v19 = vld [vmem:[#allocation2 + $0x148] sm:$0xff] }
 0x348   : > { %15986 = vmatprep.mubr.msk.f32.mxu1 %vm363_vm1, %v10240_v55  ;;  %7243 = vst.msk [vmem:[#allocation3 + $0x1a0] sm:$0xff] %vm363_vm1, %v7179_v47  ;;  %v15621_v28 = vpop.f32.mrb[154].mxu1  ;;  %v8010_v20 = vadd.f32 %v7946_v5, %v21561_v35  ;;  %v19616_v11 = vpop.f32.mrb[247].mxu0  ;;  %v7119_v55 = vld [vmem:[#allocation3 + $0x1c0] sm:$0xff] }
 0x349   : > { %v7182_v53 = vadd.f32 %v15621_v28, %v7118_v48  ;;  %v7014_v4 = vpop.f32.mrb[155].mxu1  ;;  %8075 = vst.msk [vmem:[#allocation3 + $0x188] sm:$0xff] %vm363_vm1, %v8011_v23  ;;  %v21564_v28 = vld [vmem:[#allocation21_spill] sm:$0xff] }
 0x34a   : > { %v7181_v17 = vadd.f32 %v7117_v58, %v7014_v4  ;;  %8074 = vst.msk [vmem:[#allocation3 + $0x180] sm:$0xff] %vm363_vm1, %v8010_v20  ;;  %v7949_v9 = vld [vmem:[#allocation3 + $0x198] sm:$0xff] }
 0x34b   : > { %15987 = vmatmul.mubr.msk.f32.gmra.mrb[4].mxu1 %vm363_vm1, %v10241_v26  ;;  %7246 = vst.msk [vmem:[#allocation3 + $0x1b8] sm:$0xff] %vm363_vm1, %v7182_v53  ;;  %v8013_v3 = vadd.f32 %v21562_v62, %v7949_v9  ;;  %v7948_v22 = vld [vmem:[#allocation3 + $0x190] sm:$0xff]  ;;  %v7122_v20 = vld [vmem:[#allocation3 + $0x1d8] sm:$0xff]  ;;  %v10245_v53 = vld [vmem:[#allocation2 + $0x150] sm:$0xff] }
 0x34c   : > { %15989 = vmatprep.mubr.msk.f32.mxu1 %vm363_vm1, %v10242_v31  ;;  %7245 = vst.msk [vmem:[#allocation3 + $0x1b0] sm:$0xff] %vm363_vm1, %v7181_v17  ;;  %v15624_v2 = vpop.f32.mrb[156].mxu1  ;;  %v19625_v12 = vpop.f32.mrb[248].mxu0  ;;  %v8012_v56 = vadd.f32 %v7948_v22, %v21563_v32  ;;  %v21565_v58 = vld [vmem:[#allocation95_spill] sm:$0xff]  ;;  %v7121_v62 = vld [vmem:[#allocation3 + $0x1d0] sm:$0xff] }
 0x34d   : > { %v7184_v25 = vadd.f32 %v15624_v2, %v7120_v52  ;;  %v7024_v18 = vpop.f32.mrb[157].mxu1  ;;  %v19628_v47 = vpop.f32.mrb[249].mxu0  ;;  %8077 = vst.msk [vmem:[#allocation3 + $0x198] sm:$0xff] %vm363_vm1, %v8013_v3  ;;  %v10246_v3 = vld [vmem:[#allocation2 + $0x158] sm:$0xff] }
 0x34e   : > { %v7183_v23 = vadd.f32 %v7119_v55, %v7024_v18  ;;  %8076 = vst.msk [vmem:[#allocation3 + $0x190] sm:$0xff] %vm363_vm1, %v8012_v56  ;;  %v7951_v5 = vld [vmem:[#allocation3 + $0x1a8] sm:$0xff] }
 0x34f   : > { %15990 = vmatmul.mubr.msk.f32.gmra.mrb[6].mxu1 %vm363_vm1, %v10243_v43  ;;  %7248 = vst.msk [vmem:[#allocation3 + $0x1c8] sm:$0xff] %vm363_vm1, %v7184_v25  ;;  %v8015_v48 = vadd.f32 %v21564_v28, %v7951_v5  ;;  %v7950_v26 = vld [vmem:[#allocation3 + $0x1a0] sm:$0xff]  ;;  %v21566_v43 = vld [vmem:[#allocation74_spill] sm:$0xff]  ;;  %v7124_v18 = vld [vmem:[#allocation3 + $0x1e8] sm:$0xff] }
 0x350   : > { %15992 = vmatprep.mubr.msk.f32.mxu1 %vm363_vm1, %v10244_v19  ;;  %7247 = vst.msk [vmem:[#allocation3 + $0x1c0] sm:$0xff] %vm363_vm1, %v7183_v23  ;;  %v15627_v35 = vpop.f32.mrb[158].mxu1  ;;  %v19637_v4 = vpop.f32.mrb[250].mxu0  ;;  %v8014_v31 = vadd.f32 %v7950_v26, %v21565_v58  ;;  %v10247_v19 = vld [vmem:[#allocation2 + $0x160] sm:$0xff]  ;;  %v21567_v23 = vld [vmem:[#allocation56_spill] sm:$0xff] }
 0x351   : > { %v7186_v17 = vadd.f32 %v15627_v35, %v7122_v20  ;;  %v7034_v9 = vpop.f32.mrb[159].mxu1  ;;  %v19641_v22 = vpop.f32.mrb[251].mxu0  ;;  %8079 = vst.msk [vmem:[#allocation3 + $0x1a8] sm:$0xff] %vm363_vm1, %v8015_v48  ;;  %v7123_v26 = vld [vmem:[#allocation3 + $0x1e0] sm:$0xff]  ;;  %v10248_v20 = vld [vmem:[#allocation2 + $0x168] sm:$0xff] }
 0x352   : > { %v7185_v2 = vadd.f32 %v7121_v62, %v7034_v9  ;;  %8078 = vst.msk [vmem:[#allocation3 + $0x1a0] sm:$0xff] %vm363_vm1, %v8014_v31  ;;  %v7953_v52 = vld [vmem:[#allocation3 + $0x1b8] sm:$0xff] }
 0x353   : > { %15993 = vmatmul.mubr.msk.f32.gmra.mrb[8].mxu1 %vm363_vm1, %v10245_v53  ;;  %7250 = vst.msk [vmem:[#allocation3 + $0x1d8] sm:$0xff] %vm363_vm1, %v7186_v17  ;;  %v8017_v32 = vadd.f32 %v21566_v43, %v7953_v52  ;;  %v7952_v56 = vld [vmem:[#allocation3 + $0x1b0] sm:$0xff]  ;;  %v7126_v62 = vld [vmem:[#allocation3 + $0x1f8] sm:$0xff] }
 0x354   : > { %15995 = vmatprep.mubr.msk.f32.mxu1 %vm363_vm1, %v10246_v3  ;;  %7249 = vst.msk [vmem:[#allocation3 + $0x1d0] sm:$0xff] %vm363_vm1, %v7185_v2  ;;  %v15630_v25 = vpop.f32.mrb[160].mxu1  ;;  %v19649_v55 = vpop.f32.mrb[252].mxu0  ;;  %v8016_v5 = vadd.f32 %v7952_v56, %v21567_v23  ;;  %v10249_v2 = vld [vmem:[#allocation2 + $0x170] sm:$0xff]  ;;  %v7125_v56 = vld [vmem:[#allocation3 + $0x1f0] sm:$0xff] }
 0x355   : > { %v7188_v28 = vadd.f32 %v15630_v25, %v7124_v18  ;;  %v7044_v48 = vpop.f32.mrb[161].mxu1  ;;  %v19652_v35 = vpop.f32.mrb[253].mxu0  ;;  %8081 = vst.msk [vmem:[#allocation3 + $0x1b8] sm:$0xff] %vm363_vm1, %v8017_v32  ;;  %v10250_v18 = vld [vmem:[#allocation2 + $0x178] sm:$0xff] }
 0x356   : > { %v7187_v53 = vadd.f32 %v7123_v26, %v7044_v48  ;;  %8080 = vst.msk [vmem:[#allocation3 + $0x1b0] sm:$0xff] %vm363_vm1, %v8016_v5  ;;  %v7955_v58 = vld [vmem:[#allocation3 + $0x1c8] sm:$0xff]  ;;  %v10251_v26 = vld [vmem:[#allocation2 + $0x180] sm:$0xff] }
 0x357   : > { %15996 = vmatmul.mubr.msk.f32.gmra.mrb[10].mxu1 %vm363_vm1, %v10247_v19  ;;  %7252 = vst.msk [vmem:[#allocation3 + $0x1e8] sm:$0xff] %vm363_vm1, %v7188_v28  ;;  %v8019_v31 = vadd.f32 %v19310_v36, %v7955_v58  ;;  %v7954_v17 = vld [vmem:[#allocation3 + $0x1c0] sm:$0xff]  ;;  %v8926_v28 = vld [vmem:[#allocation3 + $0x8] sm:$0xff] }
 0x358   : > { %15998 = vmatprep.mubr.msk.f32.mxu1 %vm363_vm1, %v10248_v20  ;;  %7251 = vst.msk [vmem:[#allocation3 + $0x1e0] sm:$0xff] %vm363_vm1, %v7187_v53  ;;  %v15633_v9 = vpop.f32.mrb[162].mxu1  ;;  %v19661_v3 = vpop.f32.mrb[254].mxu0  ;;  %v8018_v52 = vadd.f32 %v7954_v17, %v19315_v13 }
 0x359   : > { %v7190_v43 = vadd.f32 %v15633_v9, %v7126_v62  ;;  %v7054_v32 = vpop.f32.mrb[163].mxu1  ;;  %v19664_v25 = vpop.f32.mrb[255].mxu0  ;;  %8083 = vst.msk [vmem:[#allocation3 + $0x1c8] sm:$0xff] %vm363_vm1, %v8019_v31  ;;  %v8925_v31 = vld [vmem:[#allocation3] sm:$0xff]  ;;  %v10252_v9 = vld [vmem:[#allocation2 + $0x188] sm:$0xff] }
 0x35a   : > { %v7189_v36 = vadd.f32 %v7125_v56, %v7054_v32  ;;  %8082 = vst.msk [vmem:[#allocation3 + $0x1c0] sm:$0xff] %vm363_vm1, %v8018_v52  ;;  %v7957_v19 = vld [vmem:[#allocation3 + $0x1d8] sm:$0xff]  ;;  %v10253_v56 = vld [vmem:[#allocation2 + $0x190] sm:$0xff] }
 0x35b   : > { %15999 = vmatmul.mubr.msk.f32.gmra.mrb[12].mxu1 %vm363_vm1, %v10249_v2  ;;  %7254 = vst.msk [vmem:[#allocation3 + $0x1f8] sm:$0xff] %vm363_vm1, %v7190_v43  ;;  %v8021_v13 = vadd.f32 %v19331_v14, %v7957_v19  ;;  %v7956_v23 = vld [vmem:[#allocation3 + $0x1d0] sm:$0xff]  ;;  %v8928_v43 = vld [vmem:[#allocation3 + $0x18] sm:$0xff] }
 0x35c   : > { %16001 = vmatprep.mubr.msk.f32.mxu1 %vm363_vm1, %v10250_v18  ;;  %7253 = vst.msk [vmem:[#allocation3 + $0x1f0] sm:$0xff] %vm363_vm1, %v7189_v36  ;;  %v15740_v5 = vpop.f32.mrb[164].mxu1  ;;  %v19673_v48 = vpop.f32.mrb[0].mxu0  ;;  %v8020_v20 = vadd.f32 %v7956_v23, %v19334_v0 }
 0x35d   : > { %v8990_v53 = vadd.f32 %v15740_v5, %v8926_v28  ;;  %v8606_v58 = vpop.f32.mrb[165].mxu1  ;;  %v19676_v17 = vpop.f32.mrb[1].mxu0  ;;  %8085 = vst.msk [vmem:[#allocation3 + $0x1d8] sm:$0xff] %vm363_vm1, %v8021_v13  ;;  %v8927_v13 = vld [vmem:[#allocation3 + $0x10] sm:$0xff]  ;;  %v10254_v5 = vld [vmem:[#allocation2 + $0x198] sm:$0xff] }
 0x35e   : > { %v8989_v14 = vadd.f32 %v8925_v31, %v8606_v58  ;;  %8084 = vst.msk [vmem:[#allocation3 + $0x1d0] sm:$0xff] %vm363_vm1, %v8020_v20  ;;  %v7959_v62 = vld [vmem:[#allocation3 + $0x1e8] sm:$0xff]  ;;  %v10255_v31 = vld [vmem:[#allocation2 + $0x1a0] sm:$0xff] }
 0x35f   : > { %16002 = vmatmul.mubr.msk.f32.gmra.mrb[14].mxu1 %vm363_vm1, %v10251_v26  ;;  %9054 = vst.msk [vmem:[#allocation3 + $0x8] sm:$0xff] %vm363_vm1, %v8990_v53  ;;  %v8023_v0 = vadd.f32 %v19351_v29, %v7959_v62  ;;  %v7958_v2 = vld [vmem:[#allocation3 + $0x1e0] sm:$0xff]  ;;  %v8930_v53 = vld [vmem:[#allocation3 + $0x28] sm:$0xff] }
 0x360   : > { %16004 = vmatprep.mubr.msk.f32.mxu1 %vm363_vm1, %v10252_v9  ;;  %9053 = vst.msk [vmem:[#allocation3] sm:$0xff] %vm363_vm1, %v8989_v14  ;;  %v15743_v52 = vpop.f32.mrb[166].mxu1  ;;  %v19685_v32 = vpop.f32.mrb[2].mxu0  ;;  %v8022_v18 = vadd.f32 %v7958_v2, %v19354_v63 }
 0x361   : > { %v8992_v36 = vadd.f32 %v15743_v52, %v8928_v43  ;;  %v8616_v19 = vpop.f32.mrb[167].mxu1  ;;  %v19688_v23 = vpop.f32.mrb[3].mxu0  ;;  %8087 = vst.msk [vmem:[#allocation3 + $0x1e8] sm:$0xff] %vm363_vm1, %v8023_v0  ;;  %v8929_v0 = vld [vmem:[#allocation3 + $0x20] sm:$0xff]  ;;  %v10256_v52 = vld [vmem:[#allocation2 + $0x1a8] sm:$0xff] }
 0x362   : > { %v8991_v29 = vadd.f32 %v8927_v13, %v8616_v19  ;;  %8086 = vst.msk [vmem:[#allocation3 + $0x1e0] sm:$0xff] %vm363_vm1, %v8022_v18  ;;  %v7961_v28 = vld [vmem:[#allocation3 + $0x1f8] sm:$0xff]  ;;  %v10257_v13 = vld [vmem:[#allocation2 + $0x1b0] sm:$0xff] }
 0x363   : > { %16005 = vmatmul.mubr.msk.f32.gmra.mrb[16].mxu1 %vm363_vm1, %v10253_v56  ;;  %9056 = vst.msk [vmem:[#allocation3 + $0x18] sm:$0xff] %vm363_vm1, %v8992_v36  ;;  %v8025_v63 = vadd.f32 %v19370_v40, %v7961_v28  ;;  %v7960_v26 = vld [vmem:[#allocation3 + $0x1f0] sm:$0xff]  ;;  %v8932_v36 = vld [vmem:[#allocation3 + $0x38] sm:$0xff] }
 0x364   : > { %16007 = vmatprep.mubr.msk.f32.mxu1 %vm363_vm1, %v10254_v5  ;;  %9055 = vst.msk [vmem:[#allocation3 + $0x10] sm:$0xff] %vm363_vm1, %v8991_v29  ;;  %v15746_v20 = vpop.f32.mrb[168].mxu1  ;;  %v19697_v58 = vpop.f32.mrb[4].mxu0  ;;  %v8024_v9 = vadd.f32 %v7960_v26, %v19373_v6 }
 0x365   : > { %v8994_v14 = vadd.f32 %v15746_v20, %v8930_v53  ;;  %v8626_v62 = vpop.f32.mrb[169].mxu1  ;;  %v19700_v2 = vpop.f32.mrb[5].mxu0  ;;  %8089 = vst.msk [vmem:[#allocation3 + $0x1f8] sm:$0xff] %vm363_vm1, %v8025_v63  ;;  %v8931_v63 = vld [vmem:[#allocation3 + $0x30] sm:$0xff]  ;;  %v10258_v20 = vld [vmem:[#allocation2 + $0x1b8] sm:$0xff] }
 0x366   : > { %v8993_v40 = vadd.f32 %v8929_v0, %v8626_v62  ;;  %8088 = vst.msk [vmem:[#allocation3 + $0x1f0] sm:$0xff] %vm363_vm1, %v8024_v9  ;;  %v10017_v43 = vld [vmem:[#allocation3 + $0x8] sm:$0xff]  ;;  %v10259_v0 = vld [vmem:[#allocation2 + $0x1c0] sm:$0xff] }
 0x367   : > { %16008 = vmatmul.mubr.msk.f32.gmra.mrb[18].mxu1 %vm363_vm1, %v10255_v31  ;;  %9058 = vst.msk [vmem:[#allocation3 + $0x28] sm:$0xff] %vm363_vm1, %v8994_v14  ;;  %v10081_v6 = vadd.f32 %v19389_v7, %v10017_v43  ;;  %v10016_v56 = vld [vmem:[#allocation3] sm:$0xff]  ;;  %v8934_v14 = vld [vmem:[#allocation3 + $0x48] sm:$0xff] }
 0x368   : > { %16010 = vmatprep.mubr.msk.f32.mxu1 %vm363_vm1, %v10256_v52  ;;  %9057 = vst.msk [vmem:[#allocation3 + $0x20] sm:$0xff] %vm363_vm1, %v8993_v40  ;;  %v19709_v19 = vpop.f32.mrb[6].mxu0  ;;  %v10080_v5 = vadd.f32 %v10016_v56, %v19392_v42 }
 0x369   : > { %v15749_v18 = vpop.f32.mrb[170].mxu1  ;;  %v19712_v26 = vpop.f32.mrb[7].mxu0  ;;  %10145 = vst.msk [vmem:[#allocation3 + $0x8] sm:$0xff] %vm363_vm1, %v10081_v6  ;;  %v8933_v6 = vld [vmem:[#allocation3 + $0x40] sm:$0xff] }
 0x36a   : > { %v8996_v29 = vadd.f32 %v15749_v18, %v8932_v36  ;;  %v8636_v28 = vpop.f32.mrb[171].mxu1  ;;  %10144 = vst.msk [vmem:[#allocation3] sm:$0xff] %vm363_vm1, %v10080_v5  ;;  %v10019_v53 = vld [vmem:[#allocation3 + $0x18] sm:$0xff] }
 0x36b   : > { %16011 = vmatmul.mubr.msk.f32.gmra.mrb[20].mxu1 %vm363_vm1, %v10257_v13  ;;  %v8995_v7 = vadd.f32 %v8931_v63, %v8636_v28  ;;  %v10083_v42 = vadd.f32 %v19408_v34, %v10019_v53  ;;  %v10018_v31 = vld [vmem:[#allocation3 + $0x10] sm:$0xff]  ;;  %v10260_v18 = vld [vmem:[#allocation2 + $0x1c8] sm:$0xff]  ;;  %v10261_v63 = vld [vmem:[#allocation2 + $0x1d0] sm:$0xff] }
 0x36c   : > { %16013 = vmatprep.mubr.msk.f32.mxu1 %vm363_vm1, %v10258_v20  ;;  %9060 = vst.msk [vmem:[#allocation3 + $0x38] sm:$0xff] %vm363_vm1, %v8996_v29  ;;  %v19721_v62 = vpop.f32.mrb[8].mxu0  ;;  %v10082_v52 = vadd.f32 %v10018_v31, %v19411_v30  ;;  %v8936_v29 = vld [vmem:[#allocation3 + $0x58] sm:$0xff] }
 0x36d   : > { %9059 = vst.msk [vmem:[#allocation3 + $0x30] sm:$0xff] %vm363_vm1, %v8995_v7  ;;  %v15752_v9 = vpop.f32.mrb[172].mxu1  ;;  %v19724_v56 = vpop.f32.mrb[9].mxu0  ;;  %10147 = vst.msk [vmem:[#allocation3 + $0x18] sm:$0xff] %vm363_vm1, %v10083_v42  ;;  %v8935_v42 = vld [vmem:[#allocation3 + $0x50] sm:$0xff] }
 0x36e   : > { %v8998_v40 = vadd.f32 %v15752_v9, %v8934_v14  ;;  %v8646_v43 = vpop.f32.mrb[173].mxu1  ;;  %10146 = vst.msk [vmem:[#allocation3 + $0x10] sm:$0xff] %vm363_vm1, %v10082_v52  ;;  %v10021_v36 = vld [vmem:[#allocation3 + $0x28] sm:$0xff] }
 0x36f   : > { %16014 = vmatmul.mubr.msk.f32.gmra.mrb[22].mxu1 %vm363_vm1, %v10259_v0  ;;  %v8997_v34 = vadd.f32 %v8933_v6, %v8646_v43  ;;  %v10085_v30 = vadd.f32 %v19427_v61, %v10021_v36  ;;  %v10020_v13 = vld [vmem:[#allocation3 + $0x20] sm:$0xff]  ;;  %v10262_v9 = vld [vmem:[#allocation2 + $0x1d8] sm:$0xff]  ;;  %v10263_v6 = vld [vmem:[#allocation2 + $0x1e0] sm:$0xff] }
 0x370   : > { %16016 = vmatprep.mubr.msk.f32.mxu1 %vm363_vm1, %v10260_v18  ;;  %9062 = vst.msk [vmem:[#allocation3 + $0x48] sm:$0xff] %vm363_vm1, %v8998_v40  ;;  %v19733_v28 = vpop.f32.mrb[10].mxu0  ;;  %v10084_v20 = vadd.f32 %v10020_v13, %v19430_v46  ;;  %v8938_v40 = vld [vmem:[#allocation3 + $0x68] sm:$0xff] }
 0x371   : > { %9061 = vst.msk [vmem:[#allocation3 + $0x40] sm:$0xff] %vm363_vm1, %v8997_v34  ;;  %v15755_v5 = vpop.f32.mrb[174].mxu1  ;;  %v19736_v31 = vpop.f32.mrb[11].mxu0  ;;  %10149 = vst.msk [vmem:[#allocation3 + $0x28] sm:$0xff] %vm363_vm1, %v10085_v30  ;;  %v8937_v30 = vld [vmem:[#allocation3 + $0x60] sm:$0xff] }
 0x372   : > { %v9000_v7 = vadd.f32 %v15755_v5, %v8936_v29  ;;  %v8656_v53 = vpop.f32.mrb[175].mxu1  ;;  %10148 = vst.msk [vmem:[#allocation3 + $0x20] sm:$0xff] %vm363_vm1, %v10084_v20  ;;  %v10264_v5 = vld [vmem:[#allocation2 + $0x1e8] sm:$0xff] }
 0x373   : > { %16017 = vmatmul.mubr.msk.f32.gmra.mrb[24].mxu1 %vm363_vm1, %v10261_v63  ;;  %v8999_v61 = vadd.f32 %v8935_v42, %v8656_v53  ;;  %v10023_v14 = vld [vmem:[#allocation3 + $0x38] sm:$0xff]  ;;  %v10265_v42 = vld [vmem:[#allocation2 + $0x1f0] sm:$0xff] }
 0x374   : > { %16019 = vmatprep.mubr.msk.f32.mxu1 %vm363_vm1, %v10262_v9  ;;  %9064 = vst.msk [vmem:[#allocation3 + $0x58] sm:$0xff] %vm363_vm1, %v9000_v7  ;;  %v10087_v46 = vadd.f32 %v19446_v51, %v10023_v14  ;;  %v10022_v0 = vld [vmem:[#allocation3 + $0x30] sm:$0xff]  ;;  %v19745_v43 = vpop.f32.mrb[12].mxu0  ;;  %v8940_v7 = vld [vmem:[#allocation3 + $0x78] sm:$0xff] }
 0x375   : > { %9063 = vst.msk [vmem:[#allocation3 + $0x50] sm:$0xff] %vm363_vm1, %v8999_v61  ;;  %v15758_v52 = vpop.f32.mrb[176].mxu1  ;;  %v10086_v18 = vadd.f32 %v10022_v0, %v19449_v33  ;;  %v19748_v13 = vpop.f32.mrb[13].mxu0 }
 0x376   : > { %v9002_v34 = vadd.f32 %v15758_v52, %v8938_v40  ;;  %v8666_v36 = vpop.f32.mrb[177].mxu1  ;;  %10151 = vst.msk [vmem:[#allocation3 + $0x38] sm:$0xff] %vm363_vm1, %v10087_v46  ;;  %v8939_v46 = vld [vmem:[#allocation3 + $0x70] sm:$0xff]  ;;  %v10266_v52 = vld [vmem:[#allocation2 + $0x1f8] sm:$0xff] }
 0x377   : > { %16020 = vmatmul.mubr.msk.f32.gmra.mrb[26].mxu1 %vm363_vm1, %v10263_v6  ;;  %v9001_v51 = vadd.f32 %v8937_v30, %v8666_v36  ;;  %10150 = vst.msk [vmem:[#allocation3 + $0x30] sm:$0xff] %vm363_vm1, %v10086_v18  ;;  %v10025_v29 = vld [vmem:[#allocation3 + $0x48] sm:$0xff]  ;;  %v10267_v30 = vld [vmem:[#allocation2 + $0x200] sm:$0xff] }
 0x378   : > { %16022 = vmatprep.mubr.msk.f32.mxu1 %vm363_vm1, %v10264_v5  ;;  %9066 = vst.msk [vmem:[#allocation3 + $0x68] sm:$0xff] %vm363_vm1, %v9002_v34  ;;  %v10089_v33 = vadd.f32 %v19465_v59, %v10025_v29  ;;  %v10024_v63 = vld [vmem:[#allocation3 + $0x40] sm:$0xff]  ;;  %v19757_v53 = vpop.f32.mrb[14].mxu0  ;;  %v8942_v34 = vld [vmem:[#allocation3 + $0x88] sm:$0xff] }
 0x379   : > { %9065 = vst.msk [vmem:[#allocation3 + $0x60] sm:$0xff] %vm363_vm1, %v9001_v51  ;;  %v15761_v20 = vpop.f32.mrb[178].mxu1  ;;  %v10088_v9 = vadd.f32 %v10024_v63, %v19468_v27  ;;  %v19760_v0 = vpop.f32.mrb[15].mxu0 }
 0x37a   : > { %v9004_v61 = vadd.f32 %v15761_v20, %v8940_v7  ;;  %v8676_v14 = vpop.f32.mrb[179].mxu1  ;;  %10153 = vst.msk [vmem:[#allocation3 + $0x48] sm:$0xff] %vm363_vm1, %v10089_v33  ;;  %v8941_v33 = vld [vmem:[#allocation3 + $0x80] sm:$0xff]  ;;  %v10268_v20 = vld [vmem:[#allocation2 + $0x208] sm:$0xff] }
 0x37b   : > { %16023 = vmatmul.mubr.msk.f32.gmra.mrb[28].mxu1 %vm363_vm1, %v10265_v42  ;;  %v9003_v59 = vadd.f32 %v8939_v46, %v8676_v14  ;;  %10152 = vst.msk [vmem:[#allocation3 + $0x40] sm:$0xff] %vm363_vm1, %v10088_v9  ;;  %v10027_v40 = vld [vmem:[#allocation3 + $0x58] sm:$0xff]  ;;  %v10269_v46 = vld [vmem:[#allocation2 + $0x210] sm:$0xff] }
 0x37c   : > { %16025 = vmatprep.mubr.msk.f32.mxu1 %vm363_vm1, %v10266_v52  ;;  %9068 = vst.msk [vmem:[#allocation3 + $0x78] sm:$0xff] %vm363_vm1, %v9004_v61  ;;  %v10091_v27 = vadd.f32 %v19484_v10, %v10027_v40  ;;  %v10026_v6 = vld [vmem:[#allocation3 + $0x50] sm:$0xff]  ;;  %v19769_v36 = vpop.f32.mrb[16].mxu0  ;;  %v8944_v61 = vld [vmem:[#allocation3 + $0x98] sm:$0xff] }
 0x37d   : > { %9067 = vst.msk [vmem:[#allocation3 + $0x70] sm:$0xff] %vm363_vm1, %v9003_v59  ;;  %v15764_v18 = vpop.f32.mrb[180].mxu1  ;;  %v10090_v5 = vadd.f32 %v10026_v6, %v19487_v38  ;;  %v19772_v63 = vpop.f32.mrb[17].mxu0 }
 0x37e   : > { %v9006_v51 = vadd.f32 %v15764_v18, %v8942_v34  ;;  %v8686_v29 = vpop.f32.mrb[181].mxu1  ;;  %10155 = vst.msk [vmem:[#allocation3 + $0x58] sm:$0xff] %vm363_vm1, %v10091_v27  ;;  %v8943_v27 = vld [vmem:[#allocation3 + $0x90] sm:$0xff] }
 0x37f   : > { %16026 = vmatmul.mubr.msk.f32.gmra.mrb[30].mxu1 %vm363_vm1, %v10267_v30  ;;  %v9005_v10 = vadd.f32 %v8941_v33, %v8686_v29  ;;  %10154 = vst.msk [vmem:[#allocation3 + $0x50] sm:$0xff] %vm363_vm1, %v10090_v5  ;;  %v10029_v7 = vld [vmem:[#allocation3 + $0x68] sm:$0xff] }
 0x380   : > { %16028 = vmatprep.mubr.msk.f32.mxu1 %vm363_vm1, %v10268_v20  ;;  %9070 = vst.msk [vmem:[#allocation3 + $0x88] sm:$0xff] %vm363_vm1, %v9006_v51  ;;  %v10093_v38 = vadd.f32 %v19503_v41, %v10029_v7  ;;  %v10028_v42 = vld [vmem:[#allocation3 + $0x60] sm:$0xff]  ;;  %v19781_v14 = vpop.f32.mrb[18].mxu0  ;;  %v8946_v5 = vld [vmem:[#allocation3 + $0xa8] sm:$0xff] }
 0x381   : > { %9069 = vst.msk [vmem:[#allocation3 + $0x80] sm:$0xff] %vm363_vm1, %v9005_v10  ;;  %v15767_v9 = vpop.f32.mrb[182].mxu1  ;;  %v10092_v52 = vadd.f32 %v10028_v42, %v19506_v24  ;;  %v19784_v6 = vpop.f32.mrb[19].mxu0  ;;  %v8945_v10 = vld [vmem:[#allocation3 + $0xa0] sm:$0xff] }
 0x382   : > { %v9008_v59 = vadd.f32 %v15767_v9, %v8944_v61  ;;  %v8696_v40 = vpop.f32.mrb[183].mxu1  ;;  %10157 = vst.msk [vmem:[#allocation3 + $0x68] sm:$0xff] %vm363_vm1, %v10093_v38  ;;  %v8948_v61 = vld [vmem:[#allocation3 + $0xb8] sm:$0xff] }
 0x383   : > { %16029 = vmatmul.mubr.msk.f32.gmra.mrb[32].mxu1 %vm363_vm1, %v10269_v46  ;;  %v9007_v41 = vadd.f32 %v8943_v27, %v8696_v40  ;;  %10156 = vst.msk [vmem:[#allocation3 + $0x60] sm:$0xff] %vm363_vm1, %v10092_v52  ;;  %v10031_v18 = vld [vmem:[#allocation3 + $0x78] sm:$0xff]  ;;  %v8947_v40 = vld [vmem:[#allocation3 + $0xb0] sm:$0xff] }
 0x384   : > { %16031 = vmatprep.mubr.f32.mxu1 %v21412_v37  ;;  %9072 = vst.msk [vmem:[#allocation3 + $0x98] sm:$0xff] %vm363_vm1, %v9008_v59  ;;  %v10095_v34 = vadd.f32 %v19522_v16, %v10031_v18  ;;  %v10030_v24 = vld [vmem:[#allocation3 + $0x70] sm:$0xff]  ;;  %v19793_v51 = vpop.f32.mrb[20].mxu0 }
 0x385   : > { %9071 = vst.msk [vmem:[#allocation3 + $0x90] sm:$0xff] %vm363_vm1, %v9007_v41  ;;  %v15770_v30 = vpop.f32.mrb[184].mxu1  ;;  %v10094_v29 = vadd.f32 %v10030_v24, %v19525_v39  ;;  %v19796_v7 = vpop.f32.mrb[21].mxu0 }
 0x386   : > { %v9010_v33 = vadd.f32 %v15770_v30, %v8946_v5  ;;  %v8706_v20 = vpop.f32.mrb[185].mxu1  ;;  %10159 = vst.msk [vmem:[#allocation3 + $0x78] sm:$0xff] %vm363_vm1, %v10095_v34 }
 0x387   : > { %16032 = vmatmul.mubr.f32.gmra.mrb[34].mxu1 %v21412_v37  ;;  %v9009_v38 = vadd.f32 %v8945_v10, %v8706_v20  ;;  %10158 = vst.msk [vmem:[#allocation3 + $0x70] sm:$0xff] %vm363_vm1, %v10094_v29  ;;  %v10033_v16 = vld [vmem:[#allocation3 + $0x88] sm:$0xff]  ;;  %v8949_v20 = vld [vmem:[#allocation3 + $0xc0] sm:$0xff] }
 0x388   : > { %9074 = vst.msk [vmem:[#allocation3 + $0xa8] sm:$0xff] %vm363_vm1, %v9010_v33  ;;  %v10097_v42 = vadd.f32 %v19541_v1, %v10033_v16  ;;  %v10032_v9 = vld [vmem:[#allocation3 + $0x80] sm:$0xff]  ;;  %v19804_v46 = vpop.f32.mrb[22].mxu0 }
 0x389   : > { %9073 = vst.msk [vmem:[#allocation3 + $0xa0] sm:$0xff] %vm363_vm1, %v9009_v38  ;;  %v15773_v39 = vpop.f32.mrb[186].mxu1  ;;  %v10096_v52 = vadd.f32 %v10032_v9, %v19544_v45  ;;  %v19807_v27 = vpop.f32.mrb[23].mxu0  ;;  %v8950_v45 = vld [vmem:[#allocation3 + $0xc8] sm:$0xff] }
 0x38a   : > { %v9012_v37 = vadd.f32 %v15773_v39, %v8948_v61  ;;  %v8716_v59 = vpop.f32.mrb[187].mxu1  ;;  %10161 = vst.msk [vmem:[#allocation3 + $0x88] sm:$0xff] %vm363_vm1, %v10097_v42 }
 0x38b   : > { %v9011_v41 = vadd.f32 %v8947_v40, %v8716_v59  ;;  %10160 = vst.msk [vmem:[#allocation3 + $0x80] sm:$0xff] %vm363_vm1, %v10096_v52  ;;  %v10035_v1 = vld [vmem:[#allocation3 + $0x98] sm:$0xff]  ;;  %v8951_v59 = vld [vmem:[#allocation3 + $0xd0] sm:$0xff] }
 0x38c   : > { %9076 = vst.msk [vmem:[#allocation3 + $0xb8] sm:$0xff] %vm363_vm1, %v9012_v37  ;;  %v10099_v18 = vadd.f32 %v19562_v49, %v10035_v1  ;;  %v10034_v34 = vld [vmem:[#allocation3 + $0x90] sm:$0xff]  ;;  %v19814_v30 = vpop.f32.mrb[24].mxu0 }
 0x38d   : > { %9075 = vst.msk [vmem:[#allocation3 + $0xb0] sm:$0xff] %vm363_vm1, %v9011_v41  ;;  %v15776_v24 = vpop.f32.mrb[188].mxu1  ;;  %v10098_v5 = vadd.f32 %v10034_v34, %v19565_v15  ;;  %v19817_v10 = vpop.f32.mrb[25].mxu0  ;;  %v8952_v15 = vld [vmem:[#allocation3 + $0xd8] sm:$0xff] }
 0x38e   : > { %v9014_v29 = vadd.f32 %v15776_v24, %v8950_v45  ;;  %v8726_v33 = vpop.f32.mrb[189].mxu1  ;;  %10163 = vst.msk [vmem:[#allocation3 + $0x98] sm:$0xff] %vm363_vm1, %v10099_v18 }
 0x38f   : > { %v9013_v38 = vadd.f32 %v8949_v20, %v8726_v33  ;;  %10162 = vst.msk [vmem:[#allocation3 + $0x90] sm:$0xff] %vm363_vm1, %v10098_v5  ;;  %v10037_v49 = vld [vmem:[#allocation3 + $0xa8] sm:$0xff]  ;;  %v8953_v33 = vld [vmem:[#allocation3 + $0xe0] sm:$0xff] }
 0x390   : > { %9078 = vst.msk [vmem:[#allocation3 + $0xc8] sm:$0xff] %vm363_vm1, %v9014_v29  ;;  %v10101_v16 = vadd.f32 %v19576_v54, %v10037_v49  ;;  %v10036_v42 = vld [vmem:[#allocation3 + $0xa0] sm:$0xff]  ;;  %v19824_v39 = vpop.f32.mrb[26].mxu0 }
 0x391   : > { %9077 = vst.msk [vmem:[#allocation3 + $0xc0] sm:$0xff] %vm363_vm1, %v9013_v38  ;;  %v10100_v61 = vadd.f32 %v10036_v42, %v19579_v8  ;;  %v19827_v40 = vpop.f32.mrb[27].mxu0  ;;  %v8954_v8 = vld [vmem:[#allocation3 + $0xe8] sm:$0xff] }
 0x392   : > { %v15779_v9 = vpop.f32.mrb[190].mxu1  ;;  %10165 = vst.msk [vmem:[#allocation3 + $0xa8] sm:$0xff] %vm363_vm1, %v10101_v16 }
 0x393   : > { %v9016_v52 = vadd.f32 %v15779_v9, %v8952_v15  ;;  %v8736_v37 = vpop.f32.mrb[191].mxu1  ;;  %10164 = vst.msk [vmem:[#allocation3 + $0xa0] sm:$0xff] %vm363_vm1, %v10100_v61  ;;  %v10039_v54 = vld [vmem:[#allocation3 + $0xb8] sm:$0xff] }
 0x394   : > { %v9015_v41 = vadd.f32 %v8951_v59, %v8736_v37  ;;  %v10103_v1 = vadd.f32 %v19589_v50, %v10039_v54  ;;  %v10038_v18 = vld [vmem:[#allocation3 + $0xb0] sm:$0xff]  ;;  %v19834_v24 = vpop.f32.mrb[28].mxu0 }
 0x395   : > { %9080 = vst.msk [vmem:[#allocation3 + $0xd8] sm:$0xff] %vm363_vm1, %v9016_v52  ;;  %v10102_v45 = vadd.f32 %v10038_v18, %v19592_v44  ;;  %v19837_v20 = vpop.f32.mrb[29].mxu0  ;;  %v8956_v44 = vld [vmem:[#allocation3 + $0xf8] sm:$0xff]  ;;  %v8955_v37 = vld [vmem:[#allocation3 + $0xf0] sm:$0xff] }
 0x396   : > { %9079 = vst.msk [vmem:[#allocation3 + $0xd0] sm:$0xff] %vm363_vm1, %v9015_v41  ;;  %v15782_v34 = vpop.f32.mrb[192].mxu1  ;;  %10167 = vst.msk [vmem:[#allocation3 + $0xb8] sm:$0xff] %vm363_vm1, %v10103_v1 }
 0x397   : > { %v9018_v5 = vadd.f32 %v15782_v34, %v8954_v8  ;;  %v8746_v29 = vpop.f32.mrb[193].mxu1  ;;  %10166 = vst.msk [vmem:[#allocation3 + $0xb0] sm:$0xff] %vm363_vm1, %v10102_v45  ;;  %v10041_v50 = vld [vmem:[#allocation3 + $0xc8] sm:$0xff] }
 0x398   : > { %v9017_v38 = vadd.f32 %v8953_v33, %v8746_v29  ;;  %v10105_v49 = vadd.f32 %v19601_v21, %v10041_v50  ;;  %v10040_v16 = vld [vmem:[#allocation3 + $0xc0] sm:$0xff] }
 0x399   : > { %9082 = vst.msk [vmem:[#allocation3 + $0xe8] sm:$0xff] %vm363_vm1, %v9018_v5  ;;  %v19844_v9 = vpop.f32.mrb[30].mxu0  ;;  %v10104_v15 = vadd.f32 %v10040_v16, %v19604_v57  ;;  %v8958_v57 = vld [vmem:[#allocation3 + $0x108] sm:$0xff]  ;;  %v8957_v29 = vld [vmem:[#allocation3 + $0x100] sm:$0xff] }
 0x39a   : > { %9081 = vst.msk [vmem:[#allocation3 + $0xe0] sm:$0xff] %vm363_vm1, %v9017_v38  ;;  %v15785_v42 = vpop.f32.mrb[194].mxu1  ;;  %v19847_v59 = vpop.f32.mrb[31].mxu0  ;;  %10169 = vst.msk [vmem:[#allocation3 + $0xc8] sm:$0xff] %vm363_vm1, %v10105_v49 }
 0x39b   : > { %v9020_v61 = vadd.f32 %v15785_v42, %v8956_v44  ;;  %v8756_v52 = vpop.f32.mrb[195].mxu1  ;;  %10168 = vst.msk [vmem:[#allocation3 + $0xc0] sm:$0xff] %vm363_vm1, %v10104_v15 }
 0x39c   : > { %v9019_v41 = vadd.f32 %v8955_v37, %v8756_v52  ;;  %v10043_v21 = vld [vmem:[#allocation3 + $0xd8] sm:$0xff]  ;;  %v8959_v52 = vld [vmem:[#allocation3 + $0x110] sm:$0xff] }
 0x39d   : > { %9084 = vst.msk [vmem:[#allocation3 + $0xf8] sm:$0xff] %vm363_vm1, %v9020_v61  ;;  %v10107_v54 = vadd.f32 %v19613_v60, %v10043_v21  ;;  %v10042_v1 = vld [vmem:[#allocation3 + $0xd0] sm:$0xff] }
 0x39e   : > { %9083 = vst.msk [vmem:[#allocation3 + $0xf0] sm:$0xff] %vm363_vm1, %v9019_v41  ;;  %v15788_v18 = vpop.f32.mrb[196].mxu1  ;;  %v19854_v34 = vpop.f32.mrb[32].mxu0  ;;  %v10106_v8 = vadd.f32 %v10042_v1, %v19616_v11  ;;  %v8960_v11 = vld [vmem:[#allocation3 + $0x118] sm:$0xff] }
 0x39f   : > { %v9022_v45 = vadd.f32 %v15788_v18, %v8958_v57  ;;  %v8766_v5 = vpop.f32.mrb[197].mxu1  ;;  %v19857_v33 = vpop.f32.mrb[33].mxu0  ;;  %10171 = vst.msk [vmem:[#allocation3 + $0xd8] sm:$0xff] %vm363_vm1, %v10107_v54 }
 0x3a0   : > { %v9021_v38 = vadd.f32 %v8957_v29, %v8766_v5  ;;  %10170 = vst.msk [vmem:[#allocation3 + $0xd0] sm:$0xff] %vm363_vm1, %v10106_v8  ;;  %v10045_v60 = vld [vmem:[#allocation3 + $0xe8] sm:$0xff]  ;;  %v8961_v5 = vld [vmem:[#allocation3 + $0x120] sm:$0xff] }
 0x3a1   : > { %9086 = vst.msk [vmem:[#allocation3 + $0x108] sm:$0xff] %vm363_vm1, %v9022_v45  ;;  %v10109_v50 = vadd.f32 %v19625_v12, %v10045_v60  ;;  %v10044_v49 = vld [vmem:[#allocation3 + $0xe0] sm:$0xff] }
 0x3a2   : > { %9085 = vst.msk [vmem:[#allocation3 + $0x100] sm:$0xff] %vm363_vm1, %v9021_v38  ;;  %v15791_v16 = vpop.f32.mrb[198].mxu1  ;;  %v19864_v42 = vpop.f32.mrb[34].mxu0  ;;  %v10108_v44 = vadd.f32 %v10044_v49, %v19628_v47  ;;  %v8962_v47 = vld [vmem:[#allocation3 + $0x128] sm:$0xff] }
 0x3a3   : > { %v9024_v15 = vadd.f32 %v15791_v16, %v8960_v11  ;;  %v8776_v61 = vpop.f32.mrb[199].mxu1  ;;  %v19867_v37 = vpop.f32.mrb[35].mxu0  ;;  %10173 = vst.msk [vmem:[#allocation3 + $0xe8] sm:$0xff] %vm363_vm1, %v10109_v50 }
 0x3a4   : > { %v9023_v41 = vadd.f32 %v8959_v52, %v8776_v61  ;;  %10172 = vst.msk [vmem:[#allocation3 + $0xe0] sm:$0xff] %vm363_vm1, %v10108_v44  ;;  %v10047_v12 = vld [vmem:[#allocation3 + $0xf8] sm:$0xff]  ;;  %v8963_v61 = vld [vmem:[#allocation3 + $0x130] sm:$0xff] }
 0x3a5   : > { %9088 = vst.msk [vmem:[#allocation3 + $0x118] sm:$0xff] %vm363_vm1, %v9024_v15  ;;  %v10111_v21 = vadd.f32 %v19637_v4, %v10047_v12  ;;  %v10046_v54 = vld [vmem:[#allocation3 + $0xf0] sm:$0xff] }
 0x3a6   : > { %9087 = vst.msk [vmem:[#allocation3 + $0x110] sm:$0xff] %vm363_vm1, %v9023_v41  ;;  %v15794_v1 = vpop.f32.mrb[200].mxu1  ;;  %v19874_v18 = vpop.f32.mrb[36].mxu0  ;;  %v10110_v57 = vadd.f32 %v10046_v54, %v19641_v22  ;;  %v8964_v22 = vld [vmem:[#allocation3 + $0x138] sm:$0xff] }
 0x3a7   : > { %v9026_v8 = vadd.f32 %v15794_v1, %v8962_v47  ;;  %v8786_v45 = vpop.f32.mrb[201].mxu1  ;;  %v19877_v29 = vpop.f32.mrb[37].mxu0  ;;  %10175 = vst.msk [vmem:[#allocation3 + $0xf8] sm:$0xff] %vm363_vm1, %v10111_v21 }
 0x3a8   : > { %v9025_v38 = vadd.f32 %v8961_v5, %v8786_v45  ;;  %10174 = vst.msk [vmem:[#allocation3 + $0xf0] sm:$0xff] %vm363_vm1, %v10110_v57  ;;  %v10049_v4 = vld [vmem:[#allocation3 + $0x108] sm:$0xff]  ;;  %v8965_v45 = vld [vmem:[#allocation3 + $0x140] sm:$0xff] }
 0x3a9   : > { %9090 = vst.msk [vmem:[#allocation3 + $0x128] sm:$0xff] %vm363_vm1, %v9026_v8  ;;  %v10113_v60 = vadd.f32 %v19649_v55, %v10049_v4  ;;  %v10048_v50 = vld [vmem:[#allocation3 + $0x100] sm:$0xff] }
 0x3aa   : > { %9089 = vst.msk [vmem:[#allocation3 + $0x120] sm:$0xff] %vm363_vm1, %v9025_v38  ;;  %v15797_v49 = vpop.f32.mrb[202].mxu1  ;;  %v19884_v16 = vpop.f32.mrb[38].mxu0  ;;  %v10112_v11 = vadd.f32 %v10048_v50, %v19652_v35  ;;  %v8966_v35 = vld [vmem:[#allocation3 + $0x148] sm:$0xff] }
 0x3ab   : > { %v9028_v44 = vadd.f32 %v15797_v49, %v8964_v22  ;;  %v8796_v15 = vpop.f32.mrb[203].mxu1  ;;  %v19887_v52 = vpop.f32.mrb[39].mxu0  ;;  %10177 = vst.msk [vmem:[#allocation3 + $0x108] sm:$0xff] %vm363_vm1, %v10113_v60 }
 0x3ac   : > { %v9027_v41 = vadd.f32 %v8963_v61, %v8796_v15  ;;  %10176 = vst.msk [vmem:[#allocation3 + $0x100] sm:$0xff] %vm363_vm1, %v10112_v11  ;;  %v10051_v55 = vld [vmem:[#allocation3 + $0x118] sm:$0xff]  ;;  %v8967_v15 = vld [vmem:[#allocation3 + $0x150] sm:$0xff] }
 0x3ad   : > { %9092 = vst.msk [vmem:[#allocation3 + $0x138] sm:$0xff] %vm363_vm1, %v9028_v44  ;;  %v10115_v12 = vadd.f32 %v19661_v3, %v10051_v55  ;;  %v10050_v21 = vld [vmem:[#allocation3 + $0x110] sm:$0xff] }
 0x3ae   : > { %9091 = vst.msk [vmem:[#allocation3 + $0x130] sm:$0xff] %vm363_vm1, %v9027_v41  ;;  %v15800_v54 = vpop.f32.mrb[204].mxu1  ;;  %v19894_v1 = vpop.f32.mrb[40].mxu0  ;;  %v10114_v47 = vadd.f32 %v10050_v21, %v19664_v25  ;;  %v8968_v25 = vld [vmem:[#allocation3 + $0x158] sm:$0xff] }
 0x3af   : > { %v9030_v57 = vadd.f32 %v15800_v54, %v8966_v35  ;;  %v8806_v8 = vpop.f32.mrb[205].mxu1  ;;  %v19897_v5 = vpop.f32.mrb[41].mxu0  ;;  %10179 = vst.msk [vmem:[#allocation3 + $0x118] sm:$0xff] %vm363_vm1, %v10115_v12 }
 0x3b0   : > { %v9029_v38 = vadd.f32 %v8965_v45, %v8806_v8  ;;  %10178 = vst.msk [vmem:[#allocation3 + $0x110] sm:$0xff] %vm363_vm1, %v10114_v47  ;;  %v10053_v3 = vld [vmem:[#allocation3 + $0x128] sm:$0xff]  ;;  %v8969_v8 = vld [vmem:[#allocation3 + $0x160] sm:$0xff] }
 0x3b1   : > { %9094 = vst.msk [vmem:[#allocation3 + $0x148] sm:$0xff] %vm363_vm1, %v9030_v57  ;;  %v10117_v4 = vadd.f32 %v19673_v48, %v10053_v3  ;;  %v10052_v60 = vld [vmem:[#allocation3 + $0x120] sm:$0xff] }
 0x3b2   : > { %9093 = vst.msk [vmem:[#allocation3 + $0x140] sm:$0xff] %vm363_vm1, %v9029_v38  ;;  %v15803_v50 = vpop.f32.mrb[206].mxu1  ;;  %v19904_v49 = vpop.f32.mrb[42].mxu0  ;;  %v10116_v22 = vadd.f32 %v10052_v60, %v19676_v17  ;;  %v8970_v17 = vld [vmem:[#allocation3 + $0x168] sm:$0xff] }
 0x3b3   : > { %v9032_v11 = vadd.f32 %v15803_v50, %v8968_v25  ;;  %v8816_v44 = vpop.f32.mrb[207].mxu1  ;;  %v19907_v61 = vpop.f32.mrb[43].mxu0  ;;  %10181 = vst.msk [vmem:[#allocation3 + $0x128] sm:$0xff] %vm363_vm1, %v10117_v4 }
 0x3b4   : > { %v9031_v41 = vadd.f32 %v8967_v15, %v8816_v44  ;;  %10180 = vst.msk [vmem:[#allocation3 + $0x120] sm:$0xff] %vm363_vm1, %v10116_v22  ;;  %v10055_v48 = vld [vmem:[#allocation3 + $0x138] sm:$0xff]  ;;  %v8971_v44 = vld [vmem:[#allocation3 + $0x170] sm:$0xff] }
 0x3b5   : > { %9096 = vst.msk [vmem:[#allocation3 + $0x158] sm:$0xff] %vm363_vm1, %v9032_v11  ;;  %v10119_v55 = vadd.f32 %v19685_v32, %v10055_v48  ;;  %v10054_v12 = vld [vmem:[#allocation3 + $0x130] sm:$0xff] }
 0x3b6   : > { %9095 = vst.msk [vmem:[#allocation3 + $0x150] sm:$0xff] %vm363_vm1, %v9031_v41  ;;  %v15806_v21 = vpop.f32.mrb[208].mxu1  ;;  %v19914_v54 = vpop.f32.mrb[44].mxu0  ;;  %v10118_v35 = vadd.f32 %v10054_v12, %v19688_v23  ;;  %v8972_v23 = vld [vmem:[#allocation3 + $0x178] sm:$0xff] }
 0x3b7   : > { %v9034_v47 = vadd.f32 %v15806_v21, %v8970_v17  ;;  %v8826_v57 = vpop.f32.mrb[209].mxu1  ;;  %v19917_v45 = vpop.f32.mrb[45].mxu0  ;;  %10183 = vst.msk [vmem:[#allocation3 + $0x138] sm:$0xff] %vm363_vm1, %v10119_v55 }
 0x3b8   : > { %v9033_v38 = vadd.f32 %v8969_v8, %v8826_v57  ;;  %10182 = vst.msk [vmem:[#allocation3 + $0x130] sm:$0xff] %vm363_vm1, %v10118_v35  ;;  %v10057_v32 = vld [vmem:[#allocation3 + $0x148] sm:$0xff]  ;;  %v8973_v57 = vld [vmem:[#allocation3 + $0x180] sm:$0xff] }
 0x3b9   : > { %9098 = vst.msk [vmem:[#allocation3 + $0x168] sm:$0xff] %vm363_vm1, %v9034_v47  ;;  %v10121_v3 = vadd.f32 %v19697_v58, %v10057_v32  ;;  %v10056_v4 = vld [vmem:[#allocation3 + $0x140] sm:$0xff] }
 0x3ba   : > { %9097 = vst.msk [vmem:[#allocation3 + $0x160] sm:$0xff] %vm363_vm1, %v9033_v38  ;;  %v15809_v60 = vpop.f32.mrb[210].mxu1  ;;  %v19924_v50 = vpop.f32.mrb[46].mxu0  ;;  %v10120_v25 = vadd.f32 %v10056_v4, %v19700_v2  ;;  %v8974_v2 = vld [vmem:[#allocation3 + $0x188] sm:$0xff] }
 0x3bb   : > { %v9036_v22 = vadd.f32 %v15809_v60, %v8972_v23  ;;  %v8836_v11 = vpop.f32.mrb[211].mxu1  ;;  %v19927_v15 = vpop.f32.mrb[47].mxu0  ;;  %10185 = vst.msk [vmem:[#allocation3 + $0x148] sm:$0xff] %vm363_vm1, %v10121_v3 }
 0x3bc   : > { %v9035_v41 = vadd.f32 %v8971_v44, %v8836_v11  ;;  %10184 = vst.msk [vmem:[#allocation3 + $0x140] sm:$0xff] %vm363_vm1, %v10120_v25  ;;  %v10059_v58 = vld [vmem:[#allocation3 + $0x158] sm:$0xff]  ;;  %v8975_v11 = vld [vmem:[#allocation3 + $0x190] sm:$0xff] }
 0x3bd   : > { %9100 = vst.msk [vmem:[#allocation3 + $0x178] sm:$0xff] %vm363_vm1, %v9036_v22  ;;  %v10123_v48 = vadd.f32 %v19709_v19, %v10059_v58  ;;  %v10058_v55 = vld [vmem:[#allocation3 + $0x150] sm:$0xff] }
 0x3be   : > { %9099 = vst.msk [vmem:[#allocation3 + $0x170] sm:$0xff] %vm363_vm1, %v9035_v41  ;;  %v15812_v12 = vpop.f32.mrb[212].mxu1  ;;  %v19934_v21 = vpop.f32.mrb[48].mxu0  ;;  %v10122_v17 = vadd.f32 %v10058_v55, %v19712_v26  ;;  %v8976_v26 = vld [vmem:[#allocation3 + $0x198] sm:$0xff] }
 0x3bf   : > { %v9038_v35 = vadd.f32 %v15812_v12, %v8974_v2  ;;  %v8846_v47 = vpop.f32.mrb[213].mxu1  ;;  %v19937_v8 = vpop.f32.mrb[49].mxu0  ;;  %10187 = vst.msk [vmem:[#allocation3 + $0x158] sm:$0xff] %vm363_vm1, %v10123_v48 }
 0x3c0   : > { %v9037_v38 = vadd.f32 %v8973_v57, %v8846_v47  ;;  %10186 = vst.msk [vmem:[#allocation3 + $0x150] sm:$0xff] %vm363_vm1, %v10122_v17  ;;  %v10061_v19 = vld [vmem:[#allocation3 + $0x168] sm:$0xff]  ;;  %v8977_v47 = vld [vmem:[#allocation3 + $0x1a0] sm:$0xff] }
 0x3c1   : > { %9102 = vst.msk [vmem:[#allocation3 + $0x188] sm:$0xff] %vm363_vm1, %v9038_v35  ;;  %v10125_v32 = vadd.f32 %v19721_v62, %v10061_v19  ;;  %v10060_v3 = vld [vmem:[#allocation3 + $0x160] sm:$0xff] }
 0x3c2   : > { %9101 = vst.msk [vmem:[#allocation3 + $0x180] sm:$0xff] %vm363_vm1, %v9037_v38  ;;  %v15815_v4 = vpop.f32.mrb[214].mxu1  ;;  %v19944_v60 = vpop.f32.mrb[50].mxu0  ;;  %v10124_v23 = vadd.f32 %v10060_v3, %v19724_v56  ;;  %v8978_v56 = vld [vmem:[#allocation3 + $0x1a8] sm:$0xff] }
 0x3c3   : > { %v9040_v25 = vadd.f32 %v15815_v4, %v8976_v26  ;;  %v8856_v22 = vpop.f32.mrb[215].mxu1  ;;  %v19947_v44 = vpop.f32.mrb[51].mxu0  ;;  %10189 = vst.msk [vmem:[#allocation3 + $0x168] sm:$0xff] %vm363_vm1, %v10125_v32 }
 0x3c4   : > { %v9039_v41 = vadd.f32 %v8975_v11, %v8856_v22  ;;  %10188 = vst.msk [vmem:[#allocation3 + $0x160] sm:$0xff] %vm363_vm1, %v10124_v23  ;;  %v10063_v62 = vld [vmem:[#allocation3 + $0x178] sm:$0xff]  ;;  %v8979_v22 = vld [vmem:[#allocation3 + $0x1b0] sm:$0xff] }
 0x3c5   : > { %9104 = vst.msk [vmem:[#allocation3 + $0x198] sm:$0xff] %vm363_vm1, %v9040_v25  ;;  %v10127_v58 = vadd.f32 %v19733_v28, %v10063_v62  ;;  %v10062_v48 = vld [vmem:[#allocation3 + $0x170] sm:$0xff] }
 0x3c6   : > { %9103 = vst.msk [vmem:[#allocation3 + $0x190] sm:$0xff] %vm363_vm1, %v9039_v41  ;;  %v15818_v55 = vpop.f32.mrb[216].mxu1  ;;  %v19954_v12 = vpop.f32.mrb[52].mxu0  ;;  %v10126_v2 = vadd.f32 %v10062_v48, %v19736_v31  ;;  %v8980_v31 = vld [vmem:[#allocation3 + $0x1b8] sm:$0xff] }
 0x3c7   : > { %v9042_v17 = vadd.f32 %v15818_v55, %v8978_v56  ;;  %v8866_v35 = vpop.f32.mrb[217].mxu1  ;;  %v19957_v57 = vpop.f32.mrb[53].mxu0  ;;  %10191 = vst.msk [vmem:[#allocation3 + $0x178] sm:$0xff] %vm363_vm1, %v10127_v58 }
 0x3c8   : > { %v9041_v38 = vadd.f32 %v8977_v47, %v8866_v35  ;;  %10190 = vst.msk [vmem:[#allocation3 + $0x170] sm:$0xff] %vm363_vm1, %v10126_v2  ;;  %v10065_v28 = vld [vmem:[#allocation3 + $0x188] sm:$0xff]  ;;  %v8981_v35 = vld [vmem:[#allocation3 + $0x1c0] sm:$0xff] }
 0x3c9   : > { %9106 = vst.msk [vmem:[#allocation3 + $0x1a8] sm:$0xff] %vm363_vm1, %v9042_v17  ;;  %v10129_v19 = vadd.f32 %v19745_v43, %v10065_v28  ;;  %v10064_v32 = vld [vmem:[#allocation3 + $0x180] sm:$0xff] }
 0x3ca   : > { %9105 = vst.msk [vmem:[#allocation3 + $0x1a0] sm:$0xff] %vm363_vm1, %v9041_v38  ;;  %v15821_v3 = vpop.f32.mrb[218].mxu1  ;;  %v19964_v4 = vpop.f32.mrb[54].mxu0  ;;  %v10128_v26 = vadd.f32 %v10064_v32, %v19748_v13  ;;  %v8982_v13 = vld [vmem:[#allocation3 + $0x1c8] sm:$0xff] }
 0x3cb   : > { %v9044_v23 = vadd.f32 %v15821_v3, %v8980_v31  ;;  %v8876_v25 = vpop.f32.mrb[219].mxu1  ;;  %v19967_v11 = vpop.f32.mrb[55].mxu0  ;;  %10193 = vst.msk [vmem:[#allocation3 + $0x188] sm:$0xff] %vm363_vm1, %v10129_v19 }
 0x3cc   : > { %v9043_v41 = vadd.f32 %v8979_v22, %v8876_v25  ;;  %10192 = vst.msk [vmem:[#allocation3 + $0x180] sm:$0xff] %vm363_vm1, %v10128_v26  ;;  %v10067_v43 = vld [vmem:[#allocation3 + $0x198] sm:$0xff]  ;;  %v8983_v25 = vld [vmem:[#allocation3 + $0x1d0] sm:$0xff] }
 0x3cd   : > { %9108 = vst.msk [vmem:[#allocation3 + $0x1b8] sm:$0xff] %vm363_vm1, %v9044_v23  ;;  %v10131_v62 = vadd.f32 %v19757_v53, %v10067_v43  ;;  %v10066_v58 = vld [vmem:[#allocation3 + $0x190] sm:$0xff] }
 0x3ce   : > { %9107 = vst.msk [vmem:[#allocation3 + $0x1b0] sm:$0xff] %vm363_vm1, %v9043_v41  ;;  %v15824_v48 = vpop.f32.mrb[220].mxu1  ;;  %v19974_v55 = vpop.f32.mrb[56].mxu0  ;;  %v10130_v56 = vadd.f32 %v10066_v58, %v19760_v0  ;;  %v8984_v0 = vld [vmem:[#allocation3 + $0x1d8] sm:$0xff] }
 0x3cf   : > { %v9046_v2 = vadd.f32 %v15824_v48, %v8982_v13  ;;  %v8886_v17 = vpop.f32.mrb[221].mxu1  ;;  %v19977_v47 = vpop.f32.mrb[57].mxu0  ;;  %10195 = vst.msk [vmem:[#allocation3 + $0x198] sm:$0xff] %vm363_vm1, %v10131_v62 }
 0x3d0   : > { %v9045_v38 = vadd.f32 %v8981_v35, %v8886_v17  ;;  %10194 = vst.msk [vmem:[#allocation3 + $0x190] sm:$0xff] %vm363_vm1, %v10130_v56  ;;  %v10069_v53 = vld [vmem:[#allocation3 + $0x1a8] sm:$0xff]  ;;  %v8985_v17 = vld [vmem:[#allocation3 + $0x1e0] sm:$0xff] }
 0x3d1   : > { %9110 = vst.msk [vmem:[#allocation3 + $0x1c8] sm:$0xff] %vm363_vm1, %v9046_v2  ;;  %v10133_v28 = vadd.f32 %v19769_v36, %v10069_v53  ;;  %v10068_v19 = vld [vmem:[#allocation3 + $0x1a0] sm:$0xff] }
 0x3d2   : > { %9109 = vst.msk [vmem:[#allocation3 + $0x1c0] sm:$0xff] %vm363_vm1, %v9045_v38  ;;  %v15827_v32 = vpop.f32.mrb[222].mxu1  ;;  %v19984_v3 = vpop.f32.mrb[58].mxu0  ;;  %v10132_v31 = vadd.f32 %v10068_v19, %v19772_v63  ;;  %v8986_v63 = vld [vmem:[#allocation3 + $0x1e8] sm:$0xff] }
 0x3d3   : > { %v9048_v26 = vadd.f32 %v15827_v32, %v8984_v0  ;;  %v8896_v23 = vpop.f32.mrb[223].mxu1  ;;  %v19987_v22 = vpop.f32.mrb[59].mxu0  ;;  %10197 = vst.msk [vmem:[#allocation3 + $0x1a8] sm:$0xff] %vm363_vm1, %v10133_v28 }
 0x3d4   : > { %v9047_v41 = vadd.f32 %v8983_v25, %v8896_v23  ;;  %10196 = vst.msk [vmem:[#allocation3 + $0x1a0] sm:$0xff] %vm363_vm1, %v10132_v31  ;;  %v10071_v36 = vld [vmem:[#allocation3 + $0x1b8] sm:$0xff]  ;;  %v8987_v23 = vld [vmem:[#allocation3 + $0x1f0] sm:$0xff] }
 0x3d5   : > { %9112 = vst.msk [vmem:[#allocation3 + $0x1d8] sm:$0xff] %vm363_vm1, %v9048_v26  ;;  %v10135_v43 = vadd.f32 %v19781_v14, %v10071_v36  ;;  %v10070_v62 = vld [vmem:[#allocation3 + $0x1b0] sm:$0xff] }
 0x3d6   : > { %9111 = vst.msk [vmem:[#allocation3 + $0x1d0] sm:$0xff] %vm363_vm1, %v9047_v41  ;;  %v15830_v58 = vpop.f32.mrb[224].mxu1  ;;  %v19994_v48 = vpop.f32.mrb[60].mxu0  ;;  %v10134_v13 = vadd.f32 %v10070_v62, %v19784_v6  ;;  %v8988_v6 = vld [vmem:[#allocation3 + $0x1f8] sm:$0xff] }
 0x3d7   : > { %v9050_v56 = vadd.f32 %v15830_v58, %v8986_v63  ;;  %v8906_v2 = vpop.f32.mrb[225].mxu1  ;;  %v19997_v35 = vpop.f32.mrb[61].mxu0  ;;  %10199 = vst.msk [vmem:[#allocation3 + $0x1b8] sm:$0xff] %vm363_vm1, %v10135_v43 }
 0x3d8   : > { %v9049_v38 = vadd.f32 %v8985_v17, %v8906_v2  ;;  %10198 = vst.msk [vmem:[#allocation3 + $0x1b0] sm:$0xff] %vm363_vm1, %v10134_v13  ;;  %v10073_v14 = vld [vmem:[#allocation3 + $0x1c8] sm:$0xff]  ;;  %v11043_v2 = vld [vmem:[#allocation3] sm:$0xff] }
 0x3d9   : > { %9114 = vst.msk [vmem:[#allocation3 + $0x1e8] sm:$0xff] %vm363_vm1, %v9050_v56  ;;  %v10137_v53 = vadd.f32 %v19793_v51, %v10073_v14  ;;  %v10072_v28 = vld [vmem:[#allocation3 + $0x1c0] sm:$0xff] }
 0x3da   : > { %9113 = vst.msk [vmem:[#allocation3 + $0x1e0] sm:$0xff] %vm363_vm1, %v9049_v38  ;;  %v15833_v19 = vpop.f32.mrb[226].mxu1  ;;  %v20004_v32 = vpop.f32.mrb[62].mxu0  ;;  %v10136_v0 = vadd.f32 %v10072_v28, %v19796_v7  ;;  %v11044_v7 = vld [vmem:[#allocation3 + $0x8] sm:$0xff] }
 0x3db   : > { %v9052_v31 = vadd.f32 %v15833_v19, %v8988_v6  ;;  %v8916_v26 = vpop.f32.mrb[227].mxu1  ;;  %v20007_v25 = vpop.f32.mrb[63].mxu0  ;;  %10201 = vst.msk [vmem:[#allocation3 + $0x1c8] sm:$0xff] %vm363_vm1, %v10137_v53 }
 0x3dc   : > { %v9051_v41 = vadd.f32 %v8987_v23, %v8916_v26  ;;  %10200 = vst.msk [vmem:[#allocation3 + $0x1c0] sm:$0xff] %vm363_vm1, %v10136_v0  ;;  %v10075_v51 = vld [vmem:[#allocation3 + $0x1d8] sm:$0xff]  ;;  %v11045_v26 = vld [vmem:[#allocation3 + $0x10] sm:$0xff] }
 0x3dd   : > { %9116 = vst.msk [vmem:[#allocation3 + $0x1f8] sm:$0xff] %vm363_vm1, %v9052_v31  ;;  %v10139_v36 = vadd.f32 %v19804_v46, %v10075_v51  ;;  %v10074_v43 = vld [vmem:[#allocation3 + $0x1d0] sm:$0xff] }
 0x3de   : > { %9115 = vst.msk [vmem:[#allocation3 + $0x1f0] sm:$0xff] %vm363_vm1, %v9051_v41  ;;  %v15940_v62 = vpop.f32.mrb[228].mxu1  ;;  %v20014_v58 = vpop.f32.mrb[64].mxu0  ;;  %v10138_v63 = vadd.f32 %v10074_v43, %v19807_v27  ;;  %v11046_v27 = vld [vmem:[#allocation3 + $0x18] sm:$0xff] }
 0x3df   : > { %v11108_v13 = vadd.f32 %v15940_v62, %v11044_v7  ;;  %v10724_v56 = vpop.f32.mrb[229].mxu1  ;;  %v20017_v17 = vpop.f32.mrb[65].mxu0  ;;  %10203 = vst.msk [vmem:[#allocation3 + $0x1d8] sm:$0xff] %vm363_vm1, %v10139_v36 }
 0x3e0   : > { %v11107_v38 = vadd.f32 %v11043_v2, %v10724_v56  ;;  %10202 = vst.msk [vmem:[#allocation3 + $0x1d0] sm:$0xff] %vm363_vm1, %v10138_v63  ;;  %v10077_v46 = vld [vmem:[#allocation3 + $0x1e8] sm:$0xff]  ;;  %v11047_v56 = vld [vmem:[#allocation3 + $0x20] sm:$0xff] }
 0x3e1   : > { %11172 = vst.msk [vmem:[#allocation3 + $0x8] sm:$0xff] %vm363_vm1, %v11108_v13  ;;  %v10141_v14 = vadd.f32 %v19814_v30, %v10077_v46  ;;  %v10076_v53 = vld [vmem:[#allocation3 + $0x1e0] sm:$0xff] }
 0x3e2   : > { %11171 = vst.msk [vmem:[#allocation3] sm:$0xff] %vm363_vm1, %v11107_v38  ;;  %v15943_v28 = vpop.f32.mrb[230].mxu1  ;;  %v20024_v19 = vpop.f32.mrb[66].mxu0  ;;  %v10140_v6 = vadd.f32 %v10076_v53, %v19817_v10  ;;  %v11048_v10 = vld [vmem:[#allocation3 + $0x28] sm:$0xff] }
 0x3e3   : > { %v11110_v0 = vadd.f32 %v15943_v28, %v11046_v27  ;;  %v10734_v31 = vpop.f32.mrb[231].mxu1  ;;  %v20027_v23 = vpop.f32.mrb[67].mxu0  ;;  %10205 = vst.msk [vmem:[#allocation3 + $0x1e8] sm:$0xff] %vm363_vm1, %v10141_v14  ;;  %v11050_v28 = vld [vmem:[#allocation3 + $0x38] sm:$0xff] }
 0x3e4   : > { %v11109_v41 = vadd.f32 %v11045_v26, %v10734_v31  ;;  %10204 = vst.msk [vmem:[#allocation3 + $0x1e0] sm:$0xff] %vm363_vm1, %v10140_v6  ;;  %v10079_v30 = vld [vmem:[#allocation3 + $0x1f8] sm:$0xff]  ;;  %v11049_v31 = vld [vmem:[#allocation3 + $0x30] sm:$0xff] }
 0x3e5   : > { %11174 = vst.msk [vmem:[#allocation3 + $0x18] sm:$0xff] %vm363_vm1, %v11110_v0  ;;  %v10143_v51 = vadd.f32 %v19824_v39, %v10079_v30  ;;  %v10078_v36 = vld [vmem:[#allocation3 + $0x1f0] sm:$0xff] }
 0x3e6   : > { %11173 = vst.msk [vmem:[#allocation3 + $0x10] sm:$0xff] %vm363_vm1, %v11109_v41  ;;  %v15946_v43 = vpop.f32.mrb[232].mxu1  ;;  %v20034_v62 = vpop.f32.mrb[68].mxu0  ;;  %v10142_v7 = vadd.f32 %v10078_v36, %v19827_v40 }
 0x3e7   : > { %v11112_v63 = vadd.f32 %v15946_v43, %v11048_v10  ;;  %v10744_v13 = vpop.f32.mrb[233].mxu1  ;;  %v20037_v2 = vpop.f32.mrb[69].mxu0  ;;  %10207 = vst.msk [vmem:[#allocation3 + $0x1f8] sm:$0xff] %vm363_vm1, %v10143_v51  ;;  %v11052_v43 = vld [vmem:[#allocation3 + $0x48] sm:$0xff] }
 0x3e8   : > { %v12135_v38 = vld [vmem:[#allocation3 + $0x8] sm:$0xff]  ;;  %v11111_v46 = vadd.f32 %v11047_v56, %v10744_v13  ;;  %10206 = vst.msk [vmem:[#allocation3 + $0x1f0] sm:$0xff] %vm363_vm1, %v10142_v7  ;;  %v11051_v13 = vld [vmem:[#allocation3 + $0x40] sm:$0xff] }
 0x3e9   : > { %v12199_v39 = vadd.f32 %v19834_v24, %v12135_v38  ;;  %v12134_v14 = vld [vmem:[#allocation3] sm:$0xff]  ;;  %11176 = vst.msk [vmem:[#allocation3 + $0x28] sm:$0xff] %vm363_vm1, %v11112_v63 }
 0x3ea   : > { %v12198_v53 = vadd.f32 %v12134_v14, %v19837_v20  ;;  %11175 = vst.msk [vmem:[#allocation3 + $0x20] sm:$0xff] %vm363_vm1, %v11111_v46  ;;  %v15949_v40 = vpop.f32.mrb[234].mxu1  ;;  %v20045_v27 = vpop.f32.mrb[70].mxu0 }
 0x3eb   : > { %12263 = vst.msk [vmem:[#allocation3 + $0x8] sm:$0xff] %vm363_vm1, %v12199_v39  ;;  %v11114_v6 = vadd.f32 %v15949_v40, %v11050_v28  ;;  %v10754_v0 = vpop.f32.mrb[235].mxu1  ;;  %v20048_v26 = vpop.f32.mrb[71].mxu0  ;;  %v11054_v40 = vld [vmem:[#allocation3 + $0x58] sm:$0xff] }
 0x3ec   : > { %12262 = vst.msk [vmem:[#allocation3] sm:$0xff] %vm363_vm1, %v12198_v53  ;;  %v12137_v24 = vld [vmem:[#allocation3 + $0x18] sm:$0xff]  ;;  %v11113_v41 = vadd.f32 %v11049_v31, %v10754_v0 }
 0x3ed   : > { %v12201_v30 = vadd.f32 %v19844_v9, %v12137_v24  ;;  %v12136_v20 = vld [vmem:[#allocation3 + $0x10] sm:$0xff]  ;;  %11178 = vst.msk [vmem:[#allocation3 + $0x38] sm:$0xff] %vm363_vm1, %v11114_v6 }
 0x3ee   : > { %v12200_v51 = vadd.f32 %v12136_v20, %v19847_v59  ;;  %11177 = vst.msk [vmem:[#allocation3 + $0x30] sm:$0xff] %vm363_vm1, %v11113_v41  ;;  %v15952_v36 = vpop.f32.mrb[236].mxu1  ;;  %v20055_v10 = vpop.f32.mrb[72].mxu0  ;;  %v20064_v59 = vld [vmem:[%s20830_s5] ss:$0 sm:$0xff] }
 0x3ef   : > { %12265 = vst.msk [vmem:[#allocation3 + $0x18] sm:$0xff] %vm363_vm1, %v12201_v30  ;;  %v11116_v7 = vadd.f32 %v15952_v36, %v11052_v43  ;;  %v10764_v63 = vpop.f32.mrb[237].mxu1  ;;  %v20058_v56 = vpop.f32.mrb[73].mxu0  ;;  %v20075_v6 = vld [vmem:[%s20831_s6] ss:$0 sm:$0xff] }
 0x3f0   : > { %12264 = vst.msk [vmem:[#allocation3 + $0x10] sm:$0xff] %vm363_vm1, %v12200_v51  ;;  %v12139_v9 = vld [vmem:[#allocation3 + $0x28] sm:$0xff]  ;;  %v11115_v38 = vadd.f32 %v11051_v13, %v10764_v63  ;;  %v11053_v24 = vld [vmem:[#allocation3 + $0x50] sm:$0xff] }
 0x3f1   : > { %v12203_v46 = vadd.f32 %v19854_v34, %v12139_v9  ;;  %v12138_v39 = vld [vmem:[#allocation3 + $0x20] sm:$0xff]  ;;  %11180 = vst.msk [vmem:[#allocation3 + $0x48] sm:$0xff] %vm363_vm1, %v11116_v7 }
 0x3f2   : > { %v12202_v14 = vadd.f32 %v12138_v39, %v19857_v33  ;;  %11179 = vst.msk [vmem:[#allocation3 + $0x40] sm:$0xff] %vm363_vm1, %v11115_v38  ;;  %v15955_v53 = vpop.f32.mrb[238].mxu1  ;;  %v20070_v28 = vpop.f32.mrb[74].mxu0  ;;  %v12327_v0 = vld [vmem:[#allocation3 + $0x8] sm:$0xff] }
 0x3f3   : > { %12267 = vst.msk [vmem:[#allocation3 + $0x28] sm:$0xff] %vm363_vm1, %v12203_v46  ;;  %v11118_v34 = vadd.f32 %v15955_v53, %v11054_v40  ;;  %v10774_v31 = vpop.f32.mrb[239].mxu1  ;;  %v20078_v41 = vpop.f32.mrb[75].mxu0  ;;  %v12326_v33 = vld [vmem:[#allocation3] sm:$0xff]  ;;  %v12398_v30 = vmul.f32 %v20064_v59, %v12327_v0  ;;  %v11056_v38 = vld [vmem:[#allocation3 + $0x68] sm:$0xff] }
 0x3f4   : > { %12266 = vst.msk [vmem:[#allocation3 + $0x20] sm:$0xff] %vm363_vm1, %v12202_v14  ;;  %v12141_v20 = vld [vmem:[#allocation3 + $0x38] sm:$0xff]  ;;  %v11117_v51 = vadd.f32 %v11053_v24, %v10774_v31  ;;  %v12397_v36 = vmul.f32 %v20064_v59, %v12326_v33  ;;  %v11055_v40 = vld [vmem:[#allocation3 + $0x60] sm:$0xff] }
 0x3f5   : > { %v12205_v43 = vadd.f32 %v19864_v42, %v12141_v20  ;;  %v12140_v7 = vld [vmem:[#allocation3 + $0x30] sm:$0xff]  ;;  %11182 = vst.msk [vmem:[#allocation3 + $0x58] sm:$0xff] %vm363_vm1, %v11118_v34  ;;  %v12469_v63 = vadd.f32 %v20075_v6, %v12398_v30 }
 0x3f6   : > { %v12204_v13 = vadd.f32 %v12140_v7, %v19867_v37  ;;  %11181 = vst.msk [vmem:[#allocation3 + $0x50] sm:$0xff] %vm363_vm1, %v11117_v51  ;;  %v15958_v9 = vpop.f32.mrb[240].mxu1  ;;  %v20088_v46 = vpop.f32.mrb[76].mxu0  ;;  %v12468_v39 = vadd.f32 %v20075_v6, %v12397_v36  ;;  %v12329_v14 = vld [vmem:[#allocation3 + $0x18] sm:$0xff] }
 0x3f7   : > { %12269 = vst.msk [vmem:[#allocation3 + $0x38] sm:$0xff] %vm363_vm1, %v12205_v43  ;;  %v11120_v53 = vadd.f32 %v15958_v9, %v11056_v38  ;;  %v10784_v42 = vpop.f32.mrb[241].mxu1  ;;  %v20092_v0 = vpop.f32.mrb[77].mxu0  ;;  %v12328_v34 = vld [vmem:[#allocation3 + $0x10] sm:$0xff]  ;;  %v12400_v31 = vmul.f32 %v20064_v59, %v12329_v14  ;;  %v12533_v36 = vmax.f32 %v12469_v63, 0.0  ;;  %v11058_v38 = vld [vmem:[#allocation3 + $0x78] sm:$0xff] }
 0x3f8   : > { %12268 = vst.msk [vmem:[#allocation3 + $0x30] sm:$0xff] %vm363_vm1, %v12204_v13  ;;  %v12143_v37 = vld [vmem:[#allocation3 + $0x48] sm:$0xff]  ;;  %v11119_v24 = vadd.f32 %v11055_v40, %v10784_v42  ;;  %v12532_v33 = vmax.f32 %v12468_v39, 0.0  ;;  %v12399_v30 = vmul.f32 %v20064_v59, %v12328_v34  ;;  %v11057_v63 = vld [vmem:[#allocation3 + $0x70] sm:$0xff] }
 0x3f9   : > { %v12207_v20 = vadd.f32 %v19874_v18, %v12143_v37  ;;  %v12142_v51 = vld [vmem:[#allocation3 + $0x40] sm:$0xff]  ;;  %11184 = vst.msk [vmem:[#allocation3 + $0x68] sm:$0xff] %vm363_vm1, %v11120_v53  ;;  %v12471_v43 = vadd.f32 %v20075_v6, %v12400_v31 }
 0x3fa   : > { %v12206_v7 = vadd.f32 %v12142_v51, %v19877_v29  ;;  %11183 = vst.msk [vmem:[#allocation3 + $0x60] sm:$0xff] %vm363_vm1, %v11119_v24  ;;  %v15961_v9 = vpop.f32.mrb[242].mxu1  ;;  %v20102_v13 = vpop.f32.mrb[78].mxu0  ;;  %16138 = vmatprep.mubr.msk.f32.mxu1 %vm363_vm1, %v12532_v33  ;;  %v12470_v39 = vadd.f32 %v20075_v6, %v12399_v30  ;;  %v12331_v14 = vld [vmem:[#allocation3 + $0x28] sm:$0xff] }
 0x3fb   : > { %12271 = vst.msk [vmem:[#allocation3 + $0x48] sm:$0xff] %vm363_vm1, %v12207_v20  ;;  %v11122_v18 = vadd.f32 %v15961_v9, %v11058_v38  ;;  %v10794_v53 = vpop.f32.mrb[243].mxu1  ;;  %v20107_v42 = vpop.f32.mrb[79].mxu0  ;;  %16139 = vmatmul.mubr.msk.f32.vlgmr.msra.gmra.mrb[36].mxu1 %vm363_vm1, %v12533_v36  ;;  %v12330_v29 = vld [vmem:[#allocation3 + $0x20] sm:$0xff]  ;;  %v12402_v40 = vmul.f32 %v20064_v59, %v12331_v14  ;;  %v12535_v20 = vmax.f32 %v12471_v43, 0.0  ;;  %v11060_v38 = vld [vmem:[#allocation3 + $0x88] sm:$0xff] }
 0x3fc   : > { %12270 = vst.msk [vmem:[#allocation3 + $0x40] sm:$0xff] %vm363_vm1, %v12206_v7  ;;  %v12145_v34 = vld [vmem:[#allocation3 + $0x58] sm:$0xff]  ;;  %v11121_v31 = vadd.f32 %v11057_v63, %v10794_v53  ;;  %v12534_v37 = vmax.f32 %v12470_v39, 0.0  ;;  %v12401_v24 = vmul.f32 %v20064_v59, %v12330_v29  ;;  %v11059_v43 = vld [vmem:[#allocation3 + $0x80] sm:$0xff] }
 0x3fd   : > { %v12209_v33 = vadd.f32 %v19884_v16, %v12145_v34  ;;  %v12144_v30 = vld [vmem:[#allocation3 + $0x50] sm:$0xff]  ;;  %11186 = vst.msk [vmem:[#allocation3 + $0x78] sm:$0xff] %vm363_vm1, %v11122_v18  ;;  %v12473_v51 = vadd.f32 %v20075_v6, %v12402_v40 }
 0x3fe   : > { %v12208_v36 = vadd.f32 %v12144_v30, %v19887_v52  ;;  %11185 = vst.msk [vmem:[#allocation3 + $0x70] sm:$0xff] %vm363_vm1, %v11121_v31  ;;  %v15964_v9 = vpop.f32.mrb[244].mxu1  ;;  %v20118_v7 = vpop.f32.mrb[80].mxu0  ;;  %16141 = vmatprep.mubr.msk.f32.mxu1 %vm363_vm1, %v12534_v37  ;;  %v12472_v39 = vadd.f32 %v20075_v6, %v12401_v24  ;;  %v12333_v14 = vld [vmem:[#allocation3 + $0x38] sm:$0xff] }
 0x3ff   : > { %12273 = vst.msk [vmem:[#allocation3 + $0x58] sm:$0xff] %vm363_vm1, %v12209_v33  ;;  %v11124_v16 = vadd.f32 %v15964_v9, %v11060_v38  ;;  %v10804_v18 = vpop.f32.mrb[245].mxu1  ;;  %v20123_v53 = vpop.f32.mrb[81].mxu0  ;;  %16142 = vmatmul.mubr.msk.f32.gmra.mrb[38].mxu1 %vm363_vm1, %v12535_v20  ;;  %v12332_v52 = vld [vmem:[#allocation3 + $0x30] sm:$0xff]  ;;  %v12404_v63 = vmul.f32 %v20064_v59, %v12333_v14  ;;  %v12537_v33 = vmax.f32 %v12473_v51, 0.0  ;;  %v11062_v38 = vld [vmem:[#allocation3 + $0x98] sm:$0xff] }
 0x400   : > { %12272 = vst.msk [vmem:[#allocation3 + $0x50] sm:$0xff] %vm363_vm1, %v12208_v36  ;;  %v12147_v29 = vld [vmem:[#allocation3 + $0x68] sm:$0xff]  ;;  %v11123_v40 = vadd.f32 %v11059_v43, %v10804_v18  ;;  %v12536_v34 = vmax.f32 %v12472_v39, 0.0  ;;  %v12403_v31 = vmul.f32 %v20064_v59, %v12332_v52  ;;  %v11061_v51 = vld [vmem:[#allocation3 + $0x90] sm:$0xff] }
 0x401   : > { %v12211_v37 = vadd.f32 %v19894_v1, %v12147_v29  ;;  %v12146_v24 = vld [vmem:[#allocation3 + $0x60] sm:$0xff]  ;;  %11188 = vst.msk [vmem:[#allocation3 + $0x88] sm:$0xff] %vm363_vm1, %v11124_v16  ;;  %v12475_v30 = vadd.f32 %v20075_v6, %v12404_v63 }
 0x402   : > { %v12210_v20 = vadd.f32 %v12146_v24, %v19897_v5  ;;  %11187 = vst.msk [vmem:[#allocation3 + $0x80] sm:$0xff] %vm363_vm1, %v11123_v40  ;;  %v15967_v9 = vpop.f32.mrb[246].mxu1  ;;  %v20134_v36 = vpop.f32.mrb[82].mxu0  ;;  %16144 = vmatprep.mubr.msk.f32.mxu1 %vm363_vm1, %v12536_v34  ;;  %v12474_v39 = vadd.f32 %v20075_v6, %v12403_v31  ;;  %v12335_v14 = vld [vmem:[#allocation3 + $0x48] sm:$0xff] }
 0x403   : > { %12275 = vst.msk [vmem:[#allocation3 + $0x68] sm:$0xff] %vm363_vm1, %v12211_v37  ;;  %v11126_v1 = vadd.f32 %v15967_v9, %v11062_v38  ;;  %v10814_v16 = vpop.f32.mrb[247].mxu1  ;;  %v20139_v18 = vpop.f32.mrb[83].mxu0  ;;  %16145 = vmatmul.mubr.msk.f32.gmra.mrb[40].mxu1 %vm363_vm1, %v12537_v33  ;;  %v12334_v5 = vld [vmem:[#allocation3 + $0x40] sm:$0xff]  ;;  %v12406_v43 = vmul.f32 %v20064_v59, %v12335_v14  ;;  %v12539_v37 = vmax.f32 %v12475_v30, 0.0  ;;  %v11064_v38 = vld [vmem:[#allocation3 + $0xa8] sm:$0xff] }
 0x404   : > { %12274 = vst.msk [vmem:[#allocation3 + $0x60] sm:$0xff] %vm363_vm1, %v12210_v20  ;;  %v12149_v52 = vld [vmem:[#allocation3 + $0x78] sm:$0xff]  ;;  %v11125_v63 = vadd.f32 %v11061_v51, %v10814_v16  ;;  %v12538_v29 = vmax.f32 %v12474_v39, 0.0  ;;  %v12405_v40 = vmul.f32 %v20064_v59, %v12334_v5  ;;  %v11063_v30 = vld [vmem:[#allocation3 + $0xa0] sm:$0xff] }
 0x405   : > { %v12213_v34 = vadd.f32 %v19904_v49, %v12149_v52  ;;  %v12148_v31 = vld [vmem:[#allocation3 + $0x70] sm:$0xff]  ;;  %11190 = vst.msk [vmem:[#allocation3 + $0x98] sm:$0xff] %vm363_vm1, %v11126_v1  ;;  %v12477_v24 = vadd.f32 %v20075_v6, %v12406_v43 }
 0x406   : > { %v12212_v33 = vadd.f32 %v12148_v31, %v19907_v61  ;;  %11189 = vst.msk [vmem:[#allocation3 + $0x90] sm:$0xff] %vm363_vm1, %v11125_v63  ;;  %v15970_v9 = vpop.f32.mrb[248].mxu1  ;;  %v20150_v20 = vpop.f32.mrb[84].mxu0  ;;  %16147 = vmatprep.mubr.msk.f32.mxu1 %vm363_vm1, %v12538_v29  ;;  %v12476_v39 = vadd.f32 %v20075_v6, %v12405_v40  ;;  %v12337_v14 = vld [vmem:[#allocation3 + $0x58] sm:$0xff] }
 0x407   : > { %12277 = vst.msk [vmem:[#allocation3 + $0x78] sm:$0xff] %vm363_vm1, %v12213_v34  ;;  %v11128_v49 = vadd.f32 %v15970_v9, %v11064_v38  ;;  %v10824_v1 = vpop.f32.mrb[249].mxu1  ;;  %v20155_v16 = vpop.f32.mrb[85].mxu0  ;;  %16148 = vmatmul.mubr.msk.f32.gmra.mrb[42].mxu1 %vm363_vm1, %v12539_v37  ;;  %v12336_v61 = vld [vmem:[#allocation3 + $0x50] sm:$0xff]  ;;  %v12408_v51 = vmul.f32 %v20064_v59, %v12337_v14  ;;  %v12541_v34 = vmax.f32 %v12477_v24, 0.0  ;;  %v11066_v38 = vld [vmem:[#allocation3 + $0xb8] sm:$0xff] }
 0x408   : > { %12276 = vst.msk [vmem:[#allocation3 + $0x70] sm:$0xff] %vm363_vm1, %v12212_v33  ;;  %v12151_v5 = vld [vmem:[#allocation3 + $0x88] sm:$0xff]  ;;  %v11127_v43 = vadd.f32 %v11063_v30, %v10824_v1  ;;  %v12540_v52 = vmax.f32 %v12476_v39, 0.0  ;;  %v12407_v63 = vmul.f32 %v20064_v59, %v12336_v61  ;;  %v11065_v24 = vld [vmem:[#allocation3 + $0xb0] sm:$0xff] }
 0x409   : > { %v12215_v29 = vadd.f32 %v19914_v54, %v12151_v5  ;;  %v12150_v40 = vld [vmem:[#allocation3 + $0x80] sm:$0xff]  ;;  %11192 = vst.msk [vmem:[#allocation3 + $0xa8] sm:$0xff] %vm363_vm1, %v11128_v49  ;;  %v12479_v31 = vadd.f32 %v20075_v6, %v12408_v51 }
 0x40a   : > { %v12214_v37 = vadd.f32 %v12150_v40, %v19917_v45  ;;  %11191 = vst.msk [vmem:[#allocation3 + $0xa0] sm:$0xff] %vm363_vm1, %v11127_v43  ;;  %v15973_v9 = vpop.f32.mrb[250].mxu1  ;;  %v20166_v33 = vpop.f32.mrb[86].mxu0  ;;  %16150 = vmatprep.mubr.msk.f32.mxu1 %vm363_vm1, %v12540_v52  ;;  %v12478_v39 = vadd.f32 %v20075_v6, %v12407_v63  ;;  %v12339_v14 = vld [vmem:[#allocation3 + $0x68] sm:$0xff] }
 0x40b   : > { %12279 = vst.msk [vmem:[#allocation3 + $0x88] sm:$0xff] %vm363_vm1, %v12215_v29  ;;  %v11130_v54 = vadd.f32 %v15973_v9, %v11066_v38  ;;  %v10834_v49 = vpop.f32.mrb[251].mxu1  ;;  %v20171_v1 = vpop.f32.mrb[87].mxu0  ;;  %16151 = vmatmul.mubr.msk.f32.gmra.mrb[44].mxu1 %vm363_vm1, %v12541_v34  ;;  %v12338_v45 = vld [vmem:[#allocation3 + $0x60] sm:$0xff]  ;;  %v12410_v30 = vmul.f32 %v20064_v59, %v12339_v14  ;;  %v12543_v29 = vmax.f32 %v12479_v31, 0.0  ;;  %v11068_v38 = vld [vmem:[#allocation3 + $0xc8] sm:$0xff] }
 0x40c   : > { %12278 = vst.msk [vmem:[#allocation3 + $0x80] sm:$0xff] %vm363_vm1, %v12214_v37  ;;  %v12153_v61 = vld [vmem:[#allocation3 + $0x98] sm:$0xff]  ;;  %v11129_v51 = vadd.f32 %v11065_v24, %v10834_v49  ;;  %v12542_v5 = vmax.f32 %v12478_v39, 0.0  ;;  %v12409_v43 = vmul.f32 %v20064_v59, %v12338_v45  ;;  %v11067_v31 = vld [vmem:[#allocation3 + $0xc0] sm:$0xff] }
 0x40d   : > { %v12217_v52 = vadd.f32 %v19924_v50, %v12153_v61  ;;  %v12152_v63 = vld [vmem:[#allocation3 + $0x90] sm:$0xff]  ;;  %11194 = vst.msk [vmem:[#allocation3 + $0xb8] sm:$0xff] %vm363_vm1, %v11130_v54  ;;  %v12481_v40 = vadd.f32 %v20075_v6, %v12410_v30 }
 0x40e   : > { %v12216_v34 = vadd.f32 %v12152_v63, %v19927_v15  ;;  %11193 = vst.msk [vmem:[#allocation3 + $0xb0] sm:$0xff] %vm363_vm1, %v11129_v51  ;;  %v15976_v9 = vpop.f32.mrb[252].mxu1  ;;  %v20182_v37 = vpop.f32.mrb[88].mxu0  ;;  %16153 = vmatprep.mubr.msk.f32.mxu1 %vm363_vm1, %v12542_v5  ;;  %v12480_v39 = vadd.f32 %v20075_v6, %v12409_v43  ;;  %v12341_v14 = vld [vmem:[#allocation3 + $0x78] sm:$0xff] }
 0x40f   : > { %12281 = vst.msk [vmem:[#allocation3 + $0x98] sm:$0xff] %vm363_vm1, %v12217_v52  ;;  %v11132_v50 = vadd.f32 %v15976_v9, %v11068_v38  ;;  %v10844_v54 = vpop.f32.mrb[253].mxu1  ;;  %v20187_v49 = vpop.f32.mrb[89].mxu0  ;;  %16154 = vmatmul.mubr.msk.f32.gmra.mrb[46].mxu1 %vm363_vm1, %v12543_v29  ;;  %v12340_v15 = vld [vmem:[#allocation3 + $0x70] sm:$0xff]  ;;  %v12412_v24 = vmul.f32 %v20064_v59, %v12341_v14  ;;  %v12545_v52 = vmax.f32 %v12481_v40, 0.0  ;;  %v11070_v38 = vld [vmem:[#allocation3 + $0xd8] sm:$0xff] }
 0x410   : > { %12280 = vst.msk [vmem:[#allocation3 + $0x90] sm:$0xff] %vm363_vm1, %v12216_v34  ;;  %v12155_v45 = vld [vmem:[#allocation3 + $0xa8] sm:$0xff]  ;;  %v11131_v30 = vadd.f32 %v11067_v31, %v10844_v54  ;;  %v12544_v61 = vmax.f32 %v12480_v39, 0.0  ;;  %v12411_v51 = vmul.f32 %v20064_v59, %v12340_v15  ;;  %v11069_v40 = vld [vmem:[#allocation3 + $0xd0] sm:$0xff] }
 0x411   : > { %v12219_v5 = vadd.f32 %v19934_v21, %v12155_v45  ;;  %v12154_v43 = vld [vmem:[#allocation3 + $0xa0] sm:$0xff]  ;;  %11196 = vst.msk [vmem:[#allocation3 + $0xc8] sm:$0xff] %vm363_vm1, %v11132_v50  ;;  %v12483_v63 = vadd.f32 %v20075_v6, %v12412_v24 }
 0x412   : > { %v12218_v29 = vadd.f32 %v12154_v43, %v19937_v8  ;;  %11195 = vst.msk [vmem:[#allocation3 + $0xc0] sm:$0xff] %vm363_vm1, %v11131_v30  ;;  %v15979_v9 = vpop.f32.mrb[254].mxu1  ;;  %16156 = vmatprep.mubr.msk.f32.mxu1 %vm363_vm1, %v12544_v61  ;;  %v12482_v34 = vadd.f32 %v20075_v6, %v12411_v51  ;;  %v12343_v39 = vld [vmem:[#allocation3 + $0x88] sm:$0xff]  ;;  %v20200_v14 = vpop.f32.mrb[90].mxu0 }
 0x413   : > { %12283 = vst.msk [vmem:[#allocation3 + $0xa8] sm:$0xff] %vm363_vm1, %v12219_v5  ;;  %v11134_v21 = vadd.f32 %v15979_v9, %v11070_v38  ;;  %v10854_v50 = vpop.f32.mrb[255].mxu1  ;;  %16157 = vmatmul.mubr.msk.f32.gmra.mrb[48].mxu1 %vm363_vm1, %v12545_v52  ;;  %v12342_v54 = vld [vmem:[#allocation3 + $0x80] sm:$0xff]  ;;  %v12414_v8 = vmul.f32 %v20064_v59, %v12343_v39  ;;  %v20205_v31 = vpop.f32.mrb[91].mxu0  ;;  %v12547_v5 = vmax.f32 %v12483_v63, 0.0  ;;  %v11072_v38 = vld [vmem:[#allocation3 + $0xe8] sm:$0xff] }
 0x414   : > { %12282 = vst.msk [vmem:[#allocation3 + $0xa0] sm:$0xff] %vm363_vm1, %v12218_v29  ;;  %v12157_v15 = vld [vmem:[#allocation3 + $0xb8] sm:$0xff]  ;;  %v11133_v24 = vadd.f32 %v11069_v40, %v10854_v50  ;;  %v12546_v45 = vmax.f32 %v12482_v34, 0.0  ;;  %v12413_v30 = vmul.f32 %v20064_v59, %v12342_v54  ;;  %v11071_v50 = vld [vmem:[#allocation3 + $0xe0] sm:$0xff] }
 0x415   : > { %v12221_v61 = vadd.f32 %v19944_v60, %v12157_v15  ;;  %v12156_v51 = vld [vmem:[#allocation3 + $0xb0] sm:$0xff]  ;;  %11198 = vst.msk [vmem:[#allocation3 + $0xd8] sm:$0xff] %vm363_vm1, %v11134_v21  ;;  %v12485_v43 = vadd.f32 %v20075_v6, %v12414_v8 }
 0x416   : > { %v12220_v52 = vadd.f32 %v12156_v51, %v19947_v44  ;;  %11197 = vst.msk [vmem:[#allocation3 + $0xd0] sm:$0xff] %vm363_vm1, %v11133_v24  ;;  %v15982_v9 = vpop.f32.mrb[0].mxu1  ;;  %16159 = vmatprep.mubr.msk.f32.mxu1 %vm363_vm1, %v12546_v45  ;;  %v12484_v29 = vadd.f32 %v20075_v6, %v12413_v30  ;;  %v12345_v34 = vld [vmem:[#allocation3 + $0x98] sm:$0xff] }
 0x417   : > { %12285 = vst.msk [vmem:[#allocation3 + $0xb8] sm:$0xff] %vm363_vm1, %v12221_v61  ;;  %v11136_v60 = vadd.f32 %v15982_v9, %v11072_v38  ;;  %v10864_v39 = vpop.f32.mrb[1].mxu1  ;;  %16160 = vmatmul.mubr.msk.f32.gmra.mrb[50].mxu1 %vm363_vm1, %v12547_v5  ;;  %v12344_v63 = vld [vmem:[#allocation3 + $0x90] sm:$0xff]  ;;  %v12416_v21 = vmul.f32 %v20064_v59, %v12345_v34  ;;  %v12549_v45 = vmax.f32 %v12485_v43, 0.0  ;;  %v11074_v5 = vld [vmem:[#allocation3 + $0xf8] sm:$0xff] }
 0x418   : > { %12284 = vst.msk [vmem:[#allocation3 + $0xb0] sm:$0xff] %vm363_vm1, %v12220_v52  ;;  %v12159_v44 = vld [vmem:[#allocation3 + $0xc8] sm:$0xff]  ;;  %v11135_v40 = vadd.f32 %v11071_v50, %v10864_v39  ;;  %v12548_v54 = vmax.f32 %v12484_v29, 0.0  ;;  %v12415_v8 = vmul.f32 %v20064_v59, %v12344_v63  ;;  %v11073_v29 = vld [vmem:[#allocation3 + $0xf0] sm:$0xff] }
 0x419   : > { %v12223_v15 = vadd.f32 %v19954_v12, %v12159_v44  ;;  %v12158_v24 = vld [vmem:[#allocation3 + $0xc0] sm:$0xff]  ;;  %11200 = vst.msk [vmem:[#allocation3 + $0xe8] sm:$0xff] %vm363_vm1, %v11136_v60  ;;  %v12487_v30 = vadd.f32 %v20075_v6, %v12416_v21 }
 0x41a   : > { %v12222_v61 = vadd.f32 %v12158_v24, %v19957_v57  ;;  %11199 = vst.msk [vmem:[#allocation3 + $0xe0] sm:$0xff] %vm363_vm1, %v11135_v40  ;;  %v15985_v51 = vpop.f32.mrb[2].mxu1  ;;  %16162 = vmatprep.mubr.msk.f32.mxu1 %vm363_vm1, %v12548_v54  ;;  %v12486_v52 = vadd.f32 %v20075_v6, %v12415_v8  ;;  %v12347_v9 = vld [vmem:[#allocation3 + $0xa8] sm:$0xff] }
 0x41b   : > { %12287 = vst.msk [vmem:[#allocation3 + $0xc8] sm:$0xff] %vm363_vm1, %v12223_v15  ;;  %v11138_v12 = vadd.f32 %v15985_v51, %v11074_v5  ;;  %v10874_v38 = vpop.f32.mrb[3].mxu1  ;;  %16163 = vmatmul.mubr.msk.f32.gmra.mrb[52].mxu1 %vm363_vm1, %v12549_v45  ;;  %v12346_v43 = vld [vmem:[#allocation3 + $0xa0] sm:$0xff]  ;;  %v12418_v34 = vmul.f32 %v20064_v59, %v12347_v9  ;;  %v12551_v44 = vmax.f32 %v12487_v30, 0.0  ;;  %v11076_v15 = vld [vmem:[#allocation3 + $0x108] sm:$0xff] }
 0x41c   : > { %12286 = vst.msk [vmem:[#allocation3 + $0xc0] sm:$0xff] %vm363_vm1, %v12222_v61  ;;  %v12161_v57 = vld [vmem:[#allocation3 + $0xd8] sm:$0xff]  ;;  %v11137_v60 = vadd.f32 %v11073_v29, %v10874_v38  ;;  %v12550_v39 = vmax.f32 %v12486_v52, 0.0  ;;  %v12417_v50 = vmul.f32 %v20064_v59, %v12346_v43  ;;  %v11075_v51 = vld [vmem:[#allocation3 + $0x100] sm:$0xff] }
 0x41d   : > { %v12225_v63 = vadd.f32 %v19964_v4, %v12161_v57  ;;  %v12160_v21 = vld [vmem:[#allocation3 + $0xd0] sm:$0xff]  ;;  %11202 = vst.msk [vmem:[#allocation3 + $0xf8] sm:$0xff] %vm363_vm1, %v11138_v12  ;;  %v12489_v40 = vadd.f32 %v20075_v6, %v12418_v34 }
 0x41e   : > { %v12224_v54 = vadd.f32 %v12160_v21, %v19967_v11  ;;  %11201 = vst.msk [vmem:[#allocation3 + $0xf0] sm:$0xff] %vm363_vm1, %v11137_v60  ;;  %v15988_v8 = vpop.f32.mrb[4].mxu1  ;;  %16165 = vmatprep.mubr.msk.f32.mxu1 %vm363_vm1, %v12550_v39  ;;  %v12488_v24 = vadd.f32 %v20075_v6, %v12417_v50  ;;  %v12349_v45 = vld [vmem:[#allocation3 + $0xb8] sm:$0xff] }
 0x41f   : > { %12289 = vst.msk [vmem:[#allocation3 + $0xd8] sm:$0xff] %vm363_vm1, %v12225_v63  ;;  %v11140_v4 = vadd.f32 %v15988_v8, %v11076_v15  ;;  %v10884_v61 = vpop.f32.mrb[5].mxu1  ;;  %16166 = vmatmul.mubr.msk.f32.gmra.mrb[54].mxu1 %vm363_vm1, %v12551_v44  ;;  %v12348_v30 = vld [vmem:[#allocation3 + $0xb0] sm:$0xff]  ;;  %v12420_v5 = vmul.f32 %v20064_v59, %v12349_v45  ;;  %v12553_v43 = vmax.f32 %v12489_v40, 0.0  ;;  %v11078_v39 = vld [vmem:[#allocation3 + $0x118] sm:$0xff] }
 0x420   : > { %12288 = vst.msk [vmem:[#allocation3 + $0xd0] sm:$0xff] %vm363_vm1, %v12224_v54  ;;  %v12163_v11 = vld [vmem:[#allocation3 + $0xe8] sm:$0xff]  ;;  %v11139_v52 = vadd.f32 %v11075_v51, %v10884_v61  ;;  %v12552_v9 = vmax.f32 %v12488_v24, 0.0  ;;  %v12419_v12 = vmul.f32 %v20064_v59, %v12348_v30  ;;  %v11077_v44 = vld [vmem:[#allocation3 + $0x110] sm:$0xff] }
 0x421   : > { %v12227_v38 = vadd.f32 %v19974_v55, %v12163_v11  ;;  %v12162_v29 = vld [vmem:[#allocation3 + $0xe0] sm:$0xff]  ;;  %11204 = vst.msk [vmem:[#allocation3 + $0x108] sm:$0xff] %vm363_vm1, %v11140_v4  ;;  %v12491_v34 = vadd.f32 %v20075_v6, %v12420_v5  ;;  %v11080_v11 = vld [vmem:[#allocation3 + $0x128] sm:$0xff] }
 0x422   : > { %v12226_v57 = vadd.f32 %v12162_v29, %v19977_v47  ;;  %11203 = vst.msk [vmem:[#allocation3 + $0x100] sm:$0xff] %vm363_vm1, %v11139_v52  ;;  %v15991_v60 = vpop.f32.mrb[6].mxu1  ;;  %16168 = vmatprep.mubr.msk.f32.mxu1 %vm363_vm1, %v12552_v9  ;;  %v12490_v50 = vadd.f32 %v20075_v6, %v12419_v12  ;;  %v12351_v63 = vld [vmem:[#allocation3 + $0xc8] sm:$0xff] }
 0x423   : > { %12291 = vst.msk [vmem:[#allocation3 + $0xe8] sm:$0xff] %vm363_vm1, %v12227_v38  ;;  %v11142_v55 = vadd.f32 %v15991_v60, %v11078_v39  ;;  %v10894_v21 = vpop.f32.mrb[7].mxu1  ;;  %16169 = vmatmul.mubr.msk.f32.gmra.mrb[56].mxu1 %vm363_vm1, %v12553_v43  ;;  %v12350_v40 = vld [vmem:[#allocation3 + $0xc0] sm:$0xff]  ;;  %v12422_v54 = vmul.f32 %v20064_v59, %v12351_v63  ;;  %v12555_v61 = vmax.f32 %v12491_v34, 0.0 }
 0x424   : > { %12290 = vst.msk [vmem:[#allocation3 + $0xe0] sm:$0xff] %vm363_vm1, %v12226_v57  ;;  %v12165_v47 = vld [vmem:[#allocation3 + $0xf8] sm:$0xff]  ;;  %v11141_v8 = vadd.f32 %v11077_v44, %v10894_v21  ;;  %v12554_v15 = vmax.f32 %v12490_v50, 0.0  ;;  %v12421_v24 = vmul.f32 %v20064_v59, %v12350_v40  ;;  %v11079_v38 = vld [vmem:[#allocation3 + $0x120] sm:$0xff] }
 0x425   : > { %v12229_v45 = vadd.f32 %v19984_v3, %v12165_v47  ;;  %v12164_v4 = vld [vmem:[#allocation3 + $0xf0] sm:$0xff]  ;;  %11206 = vst.msk [vmem:[#allocation3 + $0x118] sm:$0xff] %vm363_vm1, %v11142_v55  ;;  %v12493_v51 = vadd.f32 %v20075_v6, %v12422_v54  ;;  %v11082_v40 = vld [vmem:[#allocation3 + $0x138] sm:$0xff] }
 0x426   : > { %v12228_v30 = vadd.f32 %v12164_v4, %v19987_v22  ;;  %11205 = vst.msk [vmem:[#allocation3 + $0x110] sm:$0xff] %vm363_vm1, %v11141_v8  ;;  %v15994_v5 = vpop.f32.mrb[8].mxu1  ;;  %16171 = vmatprep.mubr.msk.f32.mxu1 %vm363_vm1, %v12554_v15  ;;  %v12492_v52 = vadd.f32 %v20075_v6, %v12421_v24  ;;  %v12353_v9 = vld [vmem:[#allocation3 + $0xd8] sm:$0xff]  ;;  %v11081_v15 = vld [vmem:[#allocation3 + $0x130] sm:$0xff] }
 0x427   : > { %12293 = vst.msk [vmem:[#allocation3 + $0xf8] sm:$0xff] %vm363_vm1, %v12229_v45  ;;  %v11144_v3 = vadd.f32 %v15994_v5, %v11080_v11  ;;  %v10904_v12 = vpop.f32.mrb[9].mxu1  ;;  %16172 = vmatmul.mubr.msk.f32.gmra.mrb[58].mxu1 %vm363_vm1, %v12555_v61  ;;  %v12352_v29 = vld [vmem:[#allocation3 + $0xd0] sm:$0xff]  ;;  %v12424_v43 = vmul.f32 %v20064_v59, %v12353_v9  ;;  %v12557_v63 = vmax.f32 %v12493_v51, 0.0 }
 0x428   : > { %12292 = vst.msk [vmem:[#allocation3 + $0xf0] sm:$0xff] %vm363_vm1, %v12228_v30  ;;  %v12167_v22 = vld [vmem:[#allocation3 + $0x108] sm:$0xff]  ;;  %v11143_v34 = vadd.f32 %v11079_v38, %v10904_v12  ;;  %v12556_v57 = vmax.f32 %v12492_v52, 0.0  ;;  %v12423_v60 = vmul.f32 %v20064_v59, %v12352_v29 }
 0x429   : > { %v12231_v39 = vadd.f32 %v19994_v48, %v12167_v22  ;;  %v12166_v50 = vld [vmem:[#allocation3 + $0x100] sm:$0xff]  ;;  %11208 = vst.msk [vmem:[#allocation3 + $0x128] sm:$0xff] %vm363_vm1, %v11144_v3  ;;  %v12495_v55 = vadd.f32 %v20075_v6, %v12424_v43  ;;  %v11084_v12 = vld [vmem:[#allocation3 + $0x148] sm:$0xff] }
 0x42a   : > { %v12230_v21 = vadd.f32 %v12166_v50, %v19997_v35  ;;  %11207 = vst.msk [vmem:[#allocation3 + $0x120] sm:$0xff] %vm363_vm1, %v11143_v34  ;;  %v15997_v44 = vpop.f32.mrb[10].mxu1  ;;  %16174 = vmatprep.mubr.msk.f32.mxu1 %vm363_vm1, %v12556_v57  ;;  %v12494_v54 = vadd.f32 %v20075_v6, %v12423_v60  ;;  %v12355_v47 = vld [vmem:[#allocation3 + $0xe8] sm:$0xff]  ;;  %v11083_v22 = vld [vmem:[#allocation3 + $0x140] sm:$0xff] }
 0x42b   : > { %12295 = vst.msk [vmem:[#allocation3 + $0x108] sm:$0xff] %vm363_vm1, %v12231_v39  ;;  %v11146_v48 = vadd.f32 %v15997_v44, %v11082_v40  ;;  %v10914_v8 = vpop.f32.mrb[11].mxu1  ;;  %16175 = vmatmul.mubr.msk.f32.gmra.mrb[60].mxu1 %vm363_vm1, %v12557_v63  ;;  %v12354_v24 = vld [vmem:[#allocation3 + $0xe0] sm:$0xff]  ;;  %v12426_v45 = vmul.f32 %v20064_v59, %v12355_v47  ;;  %v12559_v11 = vmax.f32 %v12495_v55, 0.0  ;;  %v11086_v47 = vld [vmem:[#allocation3 + $0x158] sm:$0xff] }
 0x42c   : > { %12294 = vst.msk [vmem:[#allocation3 + $0x100] sm:$0xff] %vm363_vm1, %v12230_v21  ;;  %v12169_v35 = vld [vmem:[#allocation3 + $0x118] sm:$0xff]  ;;  %v11145_v4 = vadd.f32 %v11081_v15, %v10914_v8  ;;  %v12558_v61 = vmax.f32 %v12494_v54, 0.0  ;;  %v12425_v51 = vmul.f32 %v20064_v59, %v12354_v24  ;;  %v11085_v24 = vld [vmem:[#allocation3 + $0x150] sm:$0xff] }
 0x42d   : > { %v12233_v30 = vadd.f32 %v20004_v32, %v12169_v35  ;;  %v12168_v5 = vld [vmem:[#allocation3 + $0x110] sm:$0xff]  ;;  %11210 = vst.msk [vmem:[#allocation3 + $0x138] sm:$0xff] %vm363_vm1, %v11146_v48  ;;  %v12497_v52 = vadd.f32 %v20075_v6, %v12426_v45 }
 0x42e   : > { %v12232_v9 = vadd.f32 %v12168_v5, %v20007_v25  ;;  %11209 = vst.msk [vmem:[#allocation3 + $0x130] sm:$0xff] %vm363_vm1, %v11145_v4  ;;  %v16000_v3 = vpop.f32.mrb[12].mxu1  ;;  %16177 = vmatprep.mubr.msk.f32.mxu1 %vm363_vm1, %v12558_v61  ;;  %v12496_v38 = vadd.f32 %v20075_v6, %v12425_v51  ;;  %v12357_v29 = vld [vmem:[#allocation3 + $0xf8] sm:$0xff] }
 0x42f   : > { %12297 = vst.msk [vmem:[#allocation3 + $0x118] sm:$0xff] %vm363_vm1, %v12233_v30  ;;  %v11148_v32 = vadd.f32 %v16000_v3, %v11084_v12  ;;  %v10924_v43 = vpop.f32.mrb[13].mxu1  ;;  %16178 = vmatmul.mubr.msk.f32.gmra.mrb[62].mxu1 %vm363_vm1, %v12559_v11  ;;  %v12356_v34 = vld [vmem:[#allocation3 + $0xf0] sm:$0xff]  ;;  %v12428_v57 = vmul.f32 %v20064_v59, %v12357_v29  ;;  %v12561_v21 = vmax.f32 %v12497_v52, 0.0  ;;  %v11088_v12 = vld [vmem:[#allocation3 + $0x168] sm:$0xff] }
 0x430   : > { %12296 = vst.msk [vmem:[#allocation3 + $0x110] sm:$0xff] %vm363_vm1, %v12232_v9  ;;  %v12171_v25 = vld [vmem:[#allocation3 + $0x128] sm:$0xff]  ;;  %v11147_v60 = vadd.f32 %v11083_v22, %v10924_v43  ;;  %v12560_v39 = vmax.f32 %v12496_v38, 0.0  ;;  %v12427_v50 = vmul.f32 %v20064_v59, %v12356_v34  ;;  %v11087_v43 = vld [vmem:[#allocation3 + $0x160] sm:$0xff] }
 0x431   : > { %v12235_v63 = vadd.f32 %v20014_v58, %v12171_v25  ;;  %v12170_v55 = vld [vmem:[#allocation3 + $0x120] sm:$0xff]  ;;  %11212 = vst.msk [vmem:[#allocation3 + $0x148] sm:$0xff] %vm363_vm1, %v11148_v32  ;;  %v12499_v44 = vadd.f32 %v20075_v6, %v12428_v57 }
 0x432   : > { %v12234_v40 = vadd.f32 %v12170_v55, %v20017_v17  ;;  %11211 = vst.msk [vmem:[#allocation3 + $0x140] sm:$0xff] %vm363_vm1, %v11147_v60  ;;  %v16003_v54 = vpop.f32.mrb[14].mxu1  ;;  %16180 = vmatprep.mubr.msk.f32.mxu1 %vm363_vm1, %v12560_v39  ;;  %v12498_v48 = vadd.f32 %v20075_v6, %v12427_v50  ;;  %v12359_v8 = vld [vmem:[#allocation3 + $0x108] sm:$0xff] }
 0x433   : > { %12299 = vst.msk [vmem:[#allocation3 + $0x128] sm:$0xff] %vm363_vm1, %v12235_v63  ;;  %v11150_v58 = vadd.f32 %v16003_v54, %v11086_v47  ;;  %v10934_v15 = vpop.f32.mrb[15].mxu1  ;;  %16181 = vmatmul.mubr.msk.f32.gmra.mrb[64].mxu1 %vm363_vm1, %v12561_v21  ;;  %v12358_v45 = vld [vmem:[#allocation3 + $0x100] sm:$0xff]  ;;  %v12430_v35 = vmul.f32 %v20064_v59, %v12359_v8  ;;  %v12563_v11 = vmax.f32 %v12499_v44, 0.0  ;;  %v11089_v8 = vld [vmem:[#allocation3 + $0x170] sm:$0xff] }
 0x434   : > { %12298 = vst.msk [vmem:[#allocation3 + $0x120] sm:$0xff] %vm363_vm1, %v12234_v40  ;;  %v12173_v17 = vld [vmem:[#allocation3 + $0x138] sm:$0xff]  ;;  %v11149_v4 = vadd.f32 %v11085_v24, %v10934_v15  ;;  %v12562_v61 = vmax.f32 %v12498_v48, 0.0  ;;  %v12429_v51 = vmul.f32 %v20064_v59, %v12358_v45 }
 0x435   : > { %v12237_v30 = vadd.f32 %v20024_v19, %v12173_v17  ;;  %v12172_v5 = vld [vmem:[#allocation3 + $0x130] sm:$0xff]  ;;  %11214 = vst.msk [vmem:[#allocation3 + $0x158] sm:$0xff] %vm363_vm1, %v11150_v58  ;;  %v12501_v52 = vadd.f32 %v20075_v6, %v12430_v35  ;;  %v11090_v40 = vld [vmem:[#allocation3 + $0x178] sm:$0xff] }
 0x436   : > { %v12236_v9 = vadd.f32 %v12172_v5, %v20027_v23  ;;  %11213 = vst.msk [vmem:[#allocation3 + $0x150] sm:$0xff] %vm363_vm1, %v11149_v4  ;;  %v16006_v3 = vpop.f32.mrb[16].mxu1  ;;  %16183 = vmatprep.mubr.msk.f32.mxu1 %vm363_vm1, %v12562_v61  ;;  %v12500_v38 = vadd.f32 %v20075_v6, %v12429_v51  ;;  %v12361_v29 = vld [vmem:[#allocation3 + $0x118] sm:$0xff] }
 0x437   : > { %12301 = vst.msk [vmem:[#allocation3 + $0x138] sm:$0xff] %vm363_vm1, %v12237_v30  ;;  %v11152_v19 = vadd.f32 %v16006_v3, %v11088_v12  ;;  %v10944_v32 = vpop.f32.mrb[17].mxu1  ;;  %16184 = vmatmul.mubr.msk.f32.gmra.mrb[66].mxu1 %vm363_vm1, %v12563_v11  ;;  %v12360_v22 = vld [vmem:[#allocation3 + $0x110] sm:$0xff]  ;;  %v12432_v34 = vmul.f32 %v20064_v59, %v12361_v29  ;;  %v12565_v63 = vmax.f32 %v12501_v52, 0.0  ;;  %v11092_v11 = vld [vmem:[#allocation3 + $0x188] sm:$0xff]  ;;  %v11091_v12 = vld [vmem:[#allocation3 + $0x180] sm:$0xff] }
 0x438   : > { %12300 = vst.msk [vmem:[#allocation3 + $0x130] sm:$0xff] %vm363_vm1, %v12236_v9  ;;  %v12175_v23 = vld [vmem:[#allocation3 + $0x148] sm:$0xff]  ;;  %v11151_v57 = vadd.f32 %v11087_v43, %v10944_v32  ;;  %v12564_v25 = vmax.f32 %v12500_v38, 0.0  ;;  %v12431_v60 = vmul.f32 %v20064_v59, %v12360_v22 }
 0x439   : > { %v12239_v39 = vadd.f32 %v20034_v62, %v12175_v23  ;;  %v12174_v50 = vld [vmem:[#allocation3 + $0x140] sm:$0xff]  ;;  %11216 = vst.msk [vmem:[#allocation3 + $0x168] sm:$0xff] %vm363_vm1, %v11152_v19  ;;  %v12503_v55 = vadd.f32 %v20075_v6, %v12432_v34 }
 0x43a   : > { %v12238_v21 = vadd.f32 %v12174_v50, %v20037_v2  ;;  %11215 = vst.msk [vmem:[#allocation3 + $0x160] sm:$0xff] %vm363_vm1, %v11151_v57  ;;  %v16009_v44 = vpop.f32.mrb[18].mxu1  ;;  %16186 = vmatprep.mubr.msk.f32.mxu1 %vm363_vm1, %v12564_v25  ;;  %v12502_v54 = vadd.f32 %v20075_v6, %v12431_v60  ;;  %v12363_v47 = vld [vmem:[#allocation3 + $0x128] sm:$0xff] }
 0x43b   : > { %12303 = vst.msk [vmem:[#allocation3 + $0x148] sm:$0xff] %vm363_vm1, %v12239_v39  ;;  %v11154_v62 = vadd.f32 %v16009_v44, %v11090_v40  ;;  %v10954_v48 = vpop.f32.mrb[19].mxu1  ;;  %16187 = vmatmul.mubr.msk.f32.gmra.mrb[68].mxu1 %vm363_vm1, %v12565_v63  ;;  %v12362_v58 = vld [vmem:[#allocation3 + $0x120] sm:$0xff]  ;;  %v12434_v15 = vmul.f32 %v20064_v59, %v12363_v47  ;;  %v12567_v61 = vmax.f32 %v12503_v55, 0.0  ;;  %v11094_v39 = vld [vmem:[#allocation3 + $0x198] sm:$0xff] }
 0x43c   : > { %12302 = vst.msk [vmem:[#allocation3 + $0x140] sm:$0xff] %vm363_vm1, %v12238_v21  ;;  %v12177_v2 = vld [vmem:[#allocation3 + $0x158] sm:$0xff]  ;;  %v11153_v24 = vadd.f32 %v11089_v8, %v10954_v48  ;;  %v12566_v45 = vmax.f32 %v12502_v54, 0.0  ;;  %v12433_v35 = vmul.f32 %v20064_v59, %v12362_v58  ;;  %v11093_v21 = vld [vmem:[#allocation3 + $0x190] sm:$0xff] }
 0x43d   : > { %v12241_v17 = vadd.f32 %v20045_v27, %v12177_v2  ;;  %v12176_v4 = vld [vmem:[#allocation3 + $0x150] sm:$0xff]  ;;  %11218 = vst.msk [vmem:[#allocation3 + $0x178] sm:$0xff] %vm363_vm1, %v11154_v62  ;;  %v12505_v51 = vadd.f32 %v20075_v6, %v12434_v15 }
 0x43e   : > { %v12240_v30 = vadd.f32 %v12176_v4, %v20048_v26  ;;  %11217 = vst.msk [vmem:[#allocation3 + $0x170] sm:$0xff] %vm363_vm1, %v11153_v24  ;;  %v16012_v5 = vpop.f32.mrb[20].mxu1  ;;  %16189 = vmatprep.mubr.msk.f32.mxu1 %vm363_vm1, %v12566_v45  ;;  %v12504_v52 = vadd.f32 %v20075_v6, %v12433_v35  ;;  %v12365_v9 = vld [vmem:[#allocation3 + $0x138] sm:$0xff]  ;;  %v20355_v62 = vld [vmem:[%s20830_s5] ss:$0 sm:$0xff]  ;;  %v11096_v45 = vld [vmem:[#allocation3 + $0x1a8] sm:$0xff] }
 0x43f   : > { %12305 = vst.msk [vmem:[#allocation3 + $0x158] sm:$0xff] %vm363_vm1, %v12241_v17  ;;  %v11156_v27 = vadd.f32 %v16012_v5, %v11092_v11  ;;  %v10964_v3 = vpop.f32.mrb[21].mxu1  ;;  %16190 = vmatmul.mubr.msk.f32.gmra.mrb[70].mxu1 %vm363_vm1, %v12567_v61  ;;  %v12364_v38 = vld [vmem:[#allocation3 + $0x130] sm:$0xff]  ;;  %v12436_v29 = vmul.f32 %v20064_v59, %v12365_v9  ;;  %v12569_v23 = vmax.f32 %v12505_v51, 0.0  ;;  %v11095_v61 = vld [vmem:[#allocation3 + $0x1a0] sm:$0xff] }
 0x440   : > { %12304 = vst.msk [vmem:[#allocation3 + $0x150] sm:$0xff] %vm363_vm1, %v12240_v30  ;;  %v12179_v26 = vld [vmem:[#allocation3 + $0x168] sm:$0xff]  ;;  %v11155_v19 = vadd.f32 %v11091_v12, %v10964_v3  ;;  %v12568_v32 = vmax.f32 %v12504_v52, 0.0  ;;  %v12435_v43 = vmul.f32 %v20064_v59, %v12364_v38  ;;  %v20367_v35 = vld [vmem:[%s20831_s6] ss:$0 sm:$0xff] }
 0x441   : > { %v12243_v22 = vadd.f32 %v20055_v10, %v12179_v26  ;;  %v12178_v34 = vld [vmem:[#allocation3 + $0x160] sm:$0xff]  ;;  %11220 = vst.msk [vmem:[#allocation3 + $0x188] sm:$0xff] %vm363_vm1, %v11156_v27  ;;  %v12507_v57 = vadd.f32 %v20075_v6, %v12436_v29  ;;  %v11098_v26 = vld [vmem:[#allocation3 + $0x1b8] sm:$0xff] }
 0x442   : > { %v12242_v25 = vadd.f32 %v12178_v34, %v20058_v56  ;;  %11219 = vst.msk [vmem:[#allocation3 + $0x180] sm:$0xff] %vm363_vm1, %v11155_v19  ;;  %v16015_v60 = vpop.f32.mrb[22].mxu1  ;;  %16192 = vmatprep.mubr.msk.f32.mxu1 %vm363_vm1, %v12568_v32  ;;  %v12506_v50 = vadd.f32 %v20075_v6, %v12435_v43  ;;  %v12367_v63 = vld [vmem:[#allocation3 + $0x148] sm:$0xff] }
 0x443   : > { %12307 = vst.msk [vmem:[#allocation3 + $0x168] sm:$0xff] %vm363_vm1, %v12243_v22  ;;  %v11158_v10 = vadd.f32 %v16015_v60, %v11094_v39  ;;  %v10974_v55 = vpop.f32.mrb[23].mxu1  ;;  %16193 = vmatmul.mubr.msk.f32.gmra.mrb[72].mxu1 %vm363_vm1, %v12569_v23  ;;  %v12366_v44 = vld [vmem:[#allocation3 + $0x140] sm:$0xff]  ;;  %v12438_v40 = vmul.f32 %v20064_v59, %v12367_v63  ;;  %v12571_v15 = vmax.f32 %v12507_v57, 0.0  ;;  %v11097_v22 = vld [vmem:[#allocation3 + $0x1b0] sm:$0xff] }
 0x444   : > { %12306 = vst.msk [vmem:[#allocation3 + $0x160] sm:$0xff] %vm363_vm1, %v12242_v25  ;;  %v12181_v56 = vld [vmem:[#allocation3 + $0x178] sm:$0xff]  ;;  %v11157_v54 = vadd.f32 %v11093_v21, %v10974_v55  ;;  %v12570_v47 = vmax.f32 %v12506_v50, 0.0  ;;  %v12437_v48 = vmul.f32 %v20355_v62, %v12366_v44  ;;  %v11100_v44 = vld [vmem:[#allocation3 + $0x1c8] sm:$0xff] }
 0x445   : > { %v12245_v8 = vadd.f32 %v20070_v28, %v12181_v56  ;;  %v12180_v58 = vld [vmem:[#allocation3 + $0x170] sm:$0xff]  ;;  %11222 = vst.msk [vmem:[#allocation3 + $0x198] sm:$0xff] %vm363_vm1, %v11158_v10  ;;  %v12509_v59 = vadd.f32 %v20075_v6, %v12438_v40 }
 0x446   : > { %v12244_v2 = vadd.f32 %v12180_v58, %v20078_v41  ;;  %11221 = vst.msk [vmem:[#allocation3 + $0x190] sm:$0xff] %vm363_vm1, %v11157_v54  ;;  %v16018_v24 = vpop.f32.mrb[24].mxu1  ;;  %16195 = vmatprep.mubr.msk.f32.mxu1 %vm363_vm1, %v12570_v47  ;;  %v12508_v28 = vadd.f32 %v20367_v35, %v12437_v48  ;;  %v12369_v17 = vld [vmem:[#allocation3 + $0x158] sm:$0xff]  ;;  %v11099_v47 = vld [vmem:[#allocation3 + $0x1c0] sm:$0xff] }
 0x447   : > { %12309 = vst.msk [vmem:[#allocation3 + $0x178] sm:$0xff] %vm363_vm1, %v12245_v8  ;;  %v11160_v4 = vadd.f32 %v16018_v24, %v11096_v45  ;;  %v10984_v6 = vpop.f32.mrb[25].mxu1  ;;  %16196 = vmatmul.mubr.msk.f32.gmra.mrb[74].mxu1 %vm363_vm1, %v12571_v15  ;;  %v12368_v41 = vld [vmem:[#allocation3 + $0x150] sm:$0xff]  ;;  %v12440_v51 = vmul.f32 %v20355_v62, %v12369_v17  ;;  %v12573_v3 = vmax.f32 %v12509_v59, 0.0 }
 0x448   : > { %12308 = vst.msk [vmem:[#allocation3 + $0x170] sm:$0xff] %vm363_vm1, %v12244_v2  ;;  %v12183_v30 = vld [vmem:[#allocation3 + $0x188] sm:$0xff]  ;;  %v11159_v5 = vadd.f32 %v11095_v61, %v10984_v6  ;;  %v12572_v11 = vmax.f32 %v12508_v28, 0.0  ;;  %v12439_v52 = vmul.f32 %v20355_v62, %v12368_v41  ;;  %v11102_v6 = vld [vmem:[#allocation3 + $0x1d8] sm:$0xff] }
 0x449   : > { %v12247_v9 = vadd.f32 %v20088_v46, %v12183_v30  ;;  %v12182_v27 = vld [vmem:[#allocation3 + $0x180] sm:$0xff]  ;;  %11224 = vst.msk [vmem:[#allocation3 + $0x1a8] sm:$0xff] %vm363_vm1, %v11160_v4  ;;  %v12511_v12 = vadd.f32 %v20367_v35, %v12440_v51  ;;  %v11101_v30 = vld [vmem:[#allocation3 + $0x1d0] sm:$0xff] }
 0x44a   : > { %v12246_v38 = vadd.f32 %v12182_v27, %v20092_v0  ;;  %11223 = vst.msk [vmem:[#allocation3 + $0x1a0] sm:$0xff] %vm363_vm1, %v11159_v5  ;;  %v16021_v29 = vpop.f32.mrb[26].mxu1  ;;  %16198 = vmatprep.mubr.msk.f32.mxu1 %vm363_vm1, %v12572_v11  ;;  %v12510_v19 = vadd.f32 %v20367_v35, %v12439_v52  ;;  %v12371_v32 = vld [vmem:[#allocation3 + $0x168] sm:$0xff] }
 0x44b   : > { %12311 = vst.msk [vmem:[#allocation3 + $0x188] sm:$0xff] %vm363_vm1, %v12247_v9  ;;  %v11162_v46 = vadd.f32 %v16021_v29, %v11098_v26  ;;  %v10994_v43 = vpop.f32.mrb[27].mxu1  ;;  %16199 = vmatmul.mubr.msk.f32.gmra.mrb[76].mxu1 %vm363_vm1, %v12573_v3  ;;  %v12370_v34 = vld [vmem:[#allocation3 + $0x160] sm:$0xff]  ;;  %v12442_v23 = vmul.f32 %v20355_v62, %v12371_v32  ;;  %v12575_v63 = vmax.f32 %v12511_v12, 0.0  ;;  %v11104_v32 = vld [vmem:[#allocation3 + $0x1e8] sm:$0xff] }
 0x44c   : > { %12310 = vst.msk [vmem:[#allocation3 + $0x180] sm:$0xff] %vm363_vm1, %v12246_v38  ;;  %v12185_v0 = vld [vmem:[#allocation3 + $0x198] sm:$0xff]  ;;  %v11161_v57 = vadd.f32 %v11097_v22, %v10994_v43  ;;  %v12574_v25 = vmax.f32 %v12510_v19, 0.0  ;;  %v12441_v60 = vmul.f32 %v20355_v62, %v12370_v34  ;;  %v11103_v34 = vld [vmem:[#allocation3 + $0x1e0] sm:$0xff] }
 0x44d   : > { %v12249_v39 = vadd.f32 %v20102_v13, %v12185_v0  ;;  %v12184_v50 = vld [vmem:[#allocation3 + $0x190] sm:$0xff]  ;;  %11226 = vst.msk [vmem:[#allocation3 + $0x1b8] sm:$0xff] %vm363_vm1, %v11162_v46  ;;  %v12513_v10 = vadd.f32 %v20367_v35, %v12442_v23 }
 0x44e   : > { %v12248_v55 = vadd.f32 %v12184_v50, %v20107_v42  ;;  %11225 = vst.msk [vmem:[#allocation3 + $0x1b0] sm:$0xff] %vm363_vm1, %v11161_v57  ;;  %v16024_v21 = vpop.f32.mrb[28].mxu1  ;;  %16201 = vmatprep.mubr.msk.f32.mxu1 %vm363_vm1, %v12574_v25  ;;  %v12512_v40 = vadd.f32 %v20367_v35, %v12441_v60  ;;  %v12373_v56 = vld [vmem:[#allocation3 + $0x178] sm:$0xff] }
 0x44f   : > { %12313 = vst.msk [vmem:[#allocation3 + $0x198] sm:$0xff] %vm363_vm1, %v12249_v39  ;;  %v11164_v13 = vadd.f32 %v16024_v21, %v11100_v44  ;;  %v11004_v54 = vpop.f32.mrb[29].mxu1  ;;  %16202 = vmatmul.mubr.msk.f32.gmra.mrb[78].mxu1 %vm363_vm1, %v12575_v63  ;;  %v12372_v48 = vld [vmem:[#allocation3 + $0x170] sm:$0xff]  ;;  %v12444_v8 = vmul.f32 %v20355_v62, %v12373_v56  ;;  %v12577_v45 = vmax.f32 %v12513_v10, 0.0  ;;  %v11106_v44 = vld [vmem:[#allocation3 + $0x1f8] sm:$0xff] }
 0x450   : > { %12312 = vst.msk [vmem:[#allocation3 + $0x190] sm:$0xff] %vm363_vm1, %v12248_v55  ;;  %v12187_v42 = vld [vmem:[#allocation3 + $0x1a8] sm:$0xff]  ;;  %v11163_v58 = vadd.f32 %v11099_v47, %v11004_v54  ;;  %v12576_v15 = vmax.f32 %v12512_v40, 0.0  ;;  %v12443_v59 = vmul.f32 %v20355_v62, %v12372_v48  ;;  %v11105_v54 = vld [vmem:[#allocation3 + $0x1f0] sm:$0xff] }
 0x451   : > { %v12251_v2 = vadd.f32 %v20118_v7, %v12187_v42  ;;  %v12186_v24 = vld [vmem:[#allocation3 + $0x1a0] sm:$0xff]  ;;  %11228 = vst.msk [vmem:[#allocation3 + $0x1c8] sm:$0xff] %vm363_vm1, %v11164_v13  ;;  %v12515_v28 = vadd.f32 %v20367_v35, %v12444_v8 }
 0x452   : > { %v12250_v17 = vadd.f32 %v12186_v24, %v20123_v53  ;;  %11227 = vst.msk [vmem:[#allocation3 + $0x1c0] sm:$0xff] %vm363_vm1, %v11163_v58  ;;  %v16027_v4 = vpop.f32.mrb[30].mxu1  ;;  %16204 = vmatprep.mubr.msk.f32.mxu1 %vm363_vm1, %v12576_v15  ;;  %v12514_v61 = vadd.f32 %v20367_v35, %v12443_v59  ;;  %v12375_v41 = vld [vmem:[#allocation3 + $0x188] sm:$0xff] }
 0x453   : > { %12315 = vst.msk [vmem:[#allocation3 + $0x1a8] sm:$0xff] %vm363_vm1, %v12251_v2  ;;  %v11166_v7 = vadd.f32 %v16027_v4, %v11102_v6  ;;  %v11014_v51 = vpop.f32.mrb[31].mxu1  ;;  %16205 = vmatmul.mubr.msk.f32.gmra.mrb[80].mxu1 %vm363_vm1, %v12577_v45  ;;  %v12374_v5 = vld [vmem:[#allocation3 + $0x180] sm:$0xff]  ;;  %v12446_v11 = vmul.f32 %v20355_v62, %v12375_v41  ;;  %v12579_v38 = vmax.f32 %v12515_v28, 0.0 }
 0x454   : > { %12314 = vst.msk [vmem:[#allocation3 + $0x1a0] sm:$0xff] %vm363_vm1, %v12250_v17  ;;  %v12189_v53 = vld [vmem:[#allocation3 + $0x1b8] sm:$0xff]  ;;  %v11165_v52 = vadd.f32 %v11101_v30, %v11014_v51  ;;  %v12578_v9 = vmax.f32 %v12514_v61, 0.0  ;;  %v12445_v27 = vmul.f32 %v20355_v62, %v12374_v5 }
 0x455   : > { %v12253_v3 = vadd.f32 %v20134_v36, %v12189_v53  ;;  %v12188_v12 = vld [vmem:[#allocation3 + $0x1b0] sm:$0xff]  ;;  %11230 = vst.msk [vmem:[#allocation3 + $0x1d8] sm:$0xff] %vm363_vm1, %v11166_v7  ;;  %v12517_v29 = vadd.f32 %v20367_v35, %v12446_v11 }
 0x456   : > { %v12252_v26 = vadd.f32 %v12188_v12, %v20139_v18  ;;  %11229 = vst.msk [vmem:[#allocation3 + $0x1d0] sm:$0xff] %vm363_vm1, %v11165_v52  ;;  %v16030_v19 = vpop.f32.mrb[32].mxu1  ;;  %16207 = vmatprep.mubr.msk.f32.mxu1 %vm363_vm1, %v12578_v9  ;;  %v12516_v46 = vadd.f32 %v20367_v35, %v12445_v27  ;;  %v12377_v43 = vld [vmem:[#allocation3 + $0x198] sm:$0xff] }
 0x457   : > { %12317 = vst.msk [vmem:[#allocation3 + $0x1b8] sm:$0xff] %vm363_vm1, %v12253_v3  ;;  %v11168_v36 = vadd.f32 %v16030_v19, %v11104_v32  ;;  %v11024_v22 = vpop.f32.mrb[33].mxu1  ;;  %16208 = vmatmul.mubr.msk.f32.gmra.mrb[82].mxu1 %vm363_vm1, %v12579_v38  ;;  %v12376_v23 = vld [vmem:[#allocation3 + $0x190] sm:$0xff]  ;;  %v12448_v0 = vmul.f32 %v20355_v62, %v12377_v43  ;;  %v12581_v63 = vmax.f32 %v12517_v29, 0.0 }
 0x458   : > { %12316 = vst.msk [vmem:[#allocation3 + $0x1b0] sm:$0xff] %vm363_vm1, %v12252_v26  ;;  %v12191_v18 = vld [vmem:[#allocation3 + $0x1c8] sm:$0xff]  ;;  %v11167_v57 = vadd.f32 %v11103_v34, %v11024_v22  ;;  %v12580_v25 = vmax.f32 %v12516_v46, 0.0  ;;  %v12447_v60 = vmul.f32 %v20355_v62, %v12376_v23 }
 0x459   : > { %v12255_v39 = vadd.f32 %v20150_v20, %v12191_v18  ;;  %v12190_v50 = vld [vmem:[#allocation3 + $0x1c0] sm:$0xff]  ;;  %11232 = vst.msk [vmem:[#allocation3 + $0x1e8] sm:$0xff] %vm363_vm1, %v11168_v36  ;;  %v12519_v10 = vadd.f32 %v20367_v35, %v12448_v0 }
 0x45a   : > { %v12254_v55 = vadd.f32 %v12190_v50, %v20155_v16  ;;  %11231 = vst.msk [vmem:[#allocation3 + $0x1e0] sm:$0xff] %vm363_vm1, %v11167_v57  ;;  %v16033_v21 = vpop.f32.mrb[34].mxu1  ;;  %16210 = vmatprep.mubr.msk.f32.mxu1 %vm363_vm1, %v12580_v25  ;;  %v12518_v40 = vadd.f32 %v20367_v35, %v12447_v60  ;;  %v12379_v56 = vld [vmem:[#allocation3 + $0x1a8] sm:$0xff] }
 0x45b   : > { %12319 = vst.msk [vmem:[#allocation3 + $0x1c8] sm:$0xff] %vm363_vm1, %v12255_v39  ;;  %v11170_v20 = vadd.f32 %v16033_v21, %v11106_v44  ;;  %v11034_v13 = vpop.f32.mrb[35].mxu1  ;;  %16211 = vmatmul.mubr.msk.f32.gmra.mrb[84].mxu1 %vm363_vm1, %v12581_v63  ;;  %v12378_v47 = vld [vmem:[#allocation3 + $0x1a0] sm:$0xff]  ;;  %v12450_v48 = vmul.f32 %v20355_v62, %v12379_v56  ;;  %v12583_v2 = vmax.f32 %v12519_v10, 0.0 }
 0x45c   : > { %12318 = vst.msk [vmem:[#allocation3 + $0x1c0] sm:$0xff] %vm363_vm1, %v12254_v55  ;;  %v12193_v16 = vld [vmem:[#allocation3 + $0x1d8] sm:$0xff]  ;;  %v11169_v8 = vadd.f32 %v11105_v54, %v11034_v13  ;;  %v12582_v42 = vmax.f32 %v12518_v40, 0.0  ;;  %v12449_v58 = vmul.f32 %v20355_v62, %v12378_v47 }
 0x45d   : > { %v12257_v15 = vadd.f32 %v20166_v33, %v12193_v16  ;;  %v12192_v59 = vld [vmem:[#allocation3 + $0x1d0] sm:$0xff]  ;;  %11234 = vst.msk [vmem:[#allocation3 + $0x1f8] sm:$0xff] %vm363_vm1, %v11170_v20  ;;  %v12521_v24 = vadd.f32 %v20367_v35, %v12450_v48 }
 0x45e   : > { %v12256_v45 = vadd.f32 %v12192_v59, %v20171_v1  ;;  %11233 = vst.msk [vmem:[#allocation3 + $0x1f0] sm:$0xff] %vm363_vm1, %v11169_v8  ;;  %16213 = vmatprep.mubr.msk.f32.mxu1 %vm363_vm1, %v12582_v42  ;;  %v12520_v28 = vadd.f32 %v20367_v35, %v12449_v58  ;;  %v12381_v17 = vld [vmem:[#allocation3 + $0x1b8] sm:$0xff]  ;;  %v20493_v48 = vld [vmem:[%s20834_s9] ss:$0 sm:$0xff] }
 0x45f   : > { %12321 = vst.msk [vmem:[#allocation3 + $0x1d8] sm:$0xff] %vm363_vm1, %v12257_v15  ;;  %16214 = vmatmul.mubr.msk.f32.gmra.mrb[86].mxu1 %vm363_vm1, %v12583_v2  ;;  %v12380_v33 = vld [vmem:[#allocation3 + $0x1b0] sm:$0xff]  ;;  %v12452_v4 = vmul.f32 %v20355_v62, %v12381_v17  ;;  %v12585_v51 = vmax.f32 %v12521_v24, 0.0  ;;  %v13382_v58 = vld [vmem:[%s16409_s16 + $0x8] sm:$0xff] }
 0x460   : > { %12320 = vst.msk [vmem:[#allocation3 + $0x1d0] sm:$0xff] %vm363_vm1, %v12256_v45  ;;  %v12195_v6 = vld [vmem:[#allocation3 + $0x1e8] sm:$0xff]  ;;  %v12584_v61 = vmax.f32 %v12520_v28, 0.0  ;;  %v12451_v1 = vmul.f32 %v20355_v62, %v12380_v33  ;;  %v13381_v24 = vld [vmem:[%s16409_s16] sm:$0xff] }
 0x461   : > { %v12259_v41 = vadd.f32 %v20182_v37, %v12195_v6  ;;  %v12194_v7 = vld [vmem:[#allocation3 + $0x1e0] sm:$0xff]  ;;  %v12523_v30 = vadd.f32 %v20367_v35, %v12452_v4 }
 0x462   : > { %v12258_v5 = vadd.f32 %v12194_v7, %v20187_v49  ;;  %16216 = vmatprep.mubr.msk.f32.mxu1 %vm363_vm1, %v12584_v61  ;;  %v12522_v11 = vadd.f32 %v20367_v35, %v12451_v1  ;;  %v12383_v53 = vld [vmem:[#allocation3 + $0x1c8] sm:$0xff] }
 0x463   : > { %12323 = vst.msk [vmem:[#allocation3 + $0x1e8] sm:$0xff] %vm363_vm1, %v12259_v41  ;;  %16217 = vmatmul.mubr.msk.f32.gmra.mrb[88].mxu1 %vm363_vm1, %v12585_v51  ;;  %v12382_v52 = vld [vmem:[#allocation3 + $0x1c0] sm:$0xff]  ;;  %v12454_v9 = vmul.f32 %v20355_v62, %v12383_v53  ;;  %v12587_v38 = vmax.f32 %v12523_v30, 0.0  ;;  %v13384_v1 = vld [vmem:[%s16409_s16 + $0x18] sm:$0xff] }
 0x464   : > { %12322 = vst.msk [vmem:[#allocation3 + $0x1e0] sm:$0xff] %vm363_vm1, %v12258_v5  ;;  %v12197_v37 = vld [vmem:[#allocation3 + $0x1f8] sm:$0xff]  ;;  %v12586_v27 = vmax.f32 %v12522_v11, 0.0  ;;  %v12453_v3 = vmul.f32 %v20355_v62, %v12382_v52  ;;  %v13383_v5 = vld [vmem:[%s16409_s16 + $0x10] sm:$0xff] }
 0x465   : > { %v12261_v49 = vadd.f32 %v20200_v14, %v12197_v37  ;;  %v12196_v12 = vld [vmem:[#allocation3 + $0x1f0] sm:$0xff]  ;;  %v12525_v29 = vadd.f32 %v20367_v35, %v12454_v9 }
 0x466   : > { %v12260_v26 = vadd.f32 %v12196_v12, %v20205_v31  ;;  %16219 = vmatprep.mubr.msk.f32.mxu1 %vm363_vm1, %v12586_v27  ;;  %v12524_v19 = vadd.f32 %v20367_v35, %v12453_v3  ;;  %v12385_v32 = vld [vmem:[#allocation3 + $0x1d8] sm:$0xff] }
 0x467   : > { %12325 = vst.msk [vmem:[#allocation3 + $0x1f8] sm:$0xff] %vm363_vm1, %v12261_v49  ;;  %16220 = vmatmul.mubr.msk.f32.gmra.mrb[90].mxu1 %vm363_vm1, %v12587_v38  ;;  %v12384_v46 = vld [vmem:[#allocation3 + $0x1d0] sm:$0xff]  ;;  %v12456_v43 = vmul.f32 %v20355_v62, %v12385_v32  ;;  %v12589_v22 = vmax.f32 %v12525_v29, 0.0  ;;  %v13386_v12 = vld [vmem:[%s16409_s16 + $0x28] sm:$0xff] }
 0x468   : > { %12324 = vst.msk [vmem:[#allocation3 + $0x1f0] sm:$0xff] %vm363_vm1, %v12260_v26  ;;  %v12588_v14 = vmax.f32 %v12524_v19, 0.0  ;;  %v12455_v36 = vmul.f32 %v20355_v62, %v12384_v46  ;;  %v13385_v32 = vld [vmem:[%s16409_s16 + $0x20] sm:$0xff] }
 0x469   : > { %v12527_v31 = vadd.f32 %v20367_v35, %v12456_v43 }
 0x46a   : > { %16222 = vmatprep.mubr.msk.f32.mxu1 %vm363_vm1, %v12588_v14  ;;  %v12526_v34 = vadd.f32 %v20367_v35, %v12455_v36  ;;  %v12387_v23 = vld [vmem:[#allocation3 + $0x1e8] sm:$0xff] }
 0x46b   : > { %16223 = vmatmul.mubr.msk.f32.gmra.mrb[92].mxu1 %vm363_vm1, %v12589_v22  ;;  %v12386_v0 = vld [vmem:[#allocation3 + $0x1e0] sm:$0xff]  ;;  %v12458_v18 = vmul.f32 %v20355_v62, %v12387_v23  ;;  %v12591_v60 = vmax.f32 %v12527_v31, 0.0 }
 0x46c   : > { %v12590_v57 = vmax.f32 %v12526_v34, 0.0  ;;  %v12457_v25 = vmul.f32 %v20355_v62, %v12386_v0  ;;  %v13388_v0 = vld [vmem:[%s16409_s16 + $0x38] sm:$0xff] }
 0x46d   : > { %v12529_v39 = vadd.f32 %v20367_v35, %v12458_v18 }
 0x46e   : > { %16225 = vmatprep.mubr.msk.f32.mxu1 %vm363_vm1, %v12590_v57  ;;  %v12528_v50 = vadd.f32 %v20367_v35, %v12457_v25  ;;  %v12389_v63 = vld [vmem:[#allocation3 + $0x1f8] sm:$0xff] }
 0x46f   : > { %16226 = vmatmul.mubr.msk.f32.gmra.mrb[94].mxu1 %vm363_vm1, %v12591_v60  ;;  %v12388_v10 = vld [vmem:[#allocation3 + $0x1f0] sm:$0xff]  ;;  %v12460_v55 = vmul.f32 %v20355_v62, %v12389_v63  ;;  %v12593_v40 = vmax.f32 %v12529_v39, 0.0  ;;  %v13387_v39 = vld [vmem:[%s16409_s16 + $0x30] sm:$0xff] }
 0x470   : > { %v12592_v21 = vmax.f32 %v12528_v50, 0.0  ;;  %v12459_v44 = vmul.f32 %v20355_v62, %v12388_v10  ;;  %v20488_v62 = vld [vmem:[%s20833_s8] ss:$0 sm:$0xff] }
 0x471   : > { %v12531_v56 = vadd.f32 %v20367_v35, %v12460_v55 }
 0x472   : > { %16228 = vmatprep.mubr.msk.f32.mxu1 %vm363_vm1, %v12592_v21  ;;  %v12530_v20 = vadd.f32 %v20367_v35, %v12459_v44 }
 0x473   : > { %16229 = vmatmul.mubr.msk.f32.gmra.mrb[96].mxu1 %vm363_vm1, %v12593_v40  ;;  %v12595_v54 = vmax.f32 %v12531_v56, 0.0 }
 0x474   : > { %v12594_v13 = vmax.f32 %v12530_v20, 0.0  ;;  %v13390_v20 = vld [vmem:[%s16409_s16 + $0x48] sm:$0xff] }
 0x476   : > { %16231 = vmatprep.mubr.msk.f32.mxu1 %vm363_vm1, %v12594_v13 }
 0x477   : > { %16232 = vmatmul.mubr.msk.f32.gmra.mrb[98].mxu1 %vm363_vm1, %v12595_v54  ;;  %vm21568_vm1 = vcmask 523264  }
 0x478   : > { %vm21569_vm3 = vmmov %vm21568_vm1 }
 0x479   : > { %vm21570_vm6 = vmmov %vm21568_vm1 }
 0x47a   : > { %vm21571_vm9 = vmmov %vm21568_vm1 }
 0x47b   : > { %vm21572_vm8 = vmmov %vm21568_vm1 }
 0x47c   : > { %vm21573_vm5 = vmmov %vm21568_vm1 }
 0x47d   : > { %vm21574_vm7 = vmmov %vm21568_vm1 }
 0x47e   : > { %vm21575_vm0 = vmmov %vm21568_vm1 }
 0x47f   : > { %vm21576_vm11 = vmmov %vm21575_vm0 }
 0x480   : > { %vm21577_vm13 = vmmov %vm21575_vm0 }
 0x481   : > { %vm21578_vm10 = vmmov %vm21575_vm0 }
 0x482   : > { %vm21579_vm12 = vmmov %vm21575_vm0 }
 0x483   : > { %vm21580_vm15 = vmmov %vm21575_vm0 }
 0x484   : > { %vm21581_vm2 = vmmov %vm21575_vm0 }
 0x485   : > { %vm21582_vm4 = vmmov %vm21575_vm0 }
 0x486   : > { %vm21583_vm14 = vmmov %vm21575_vm0 }
 0x4ce   : > { %v16140_v47 = vpop.f32.mrb[36].mxu1 }
 0x4cf   : > { %v13183_v35 = vmul.f32 %v16140_v47, %v20488_v62  ;;  %v12856_v16 = vpop.f32.mrb[37].mxu1 }
 0x4d0   : > { %v13182_v8 = vmul.f32 %v20488_v62, %v12856_v16  ;;  %v13389_v16 = vld [vmem:[%s16409_s16 + $0x40] sm:$0xff] }
 0x4d1   : > { %v13254_v42 = vadd.f32 %v20493_v48, %v13183_v35 }
 0x4d2   : > { %v13253_v15 = vadd.f32 %v20493_v48, %v13182_v8  ;;  %v16143_v59 = vpop.f32.mrb[38].mxu1 }
 0x4d3   : > { %v13318_v2 = vmax.f32 %v13254_v42, 0.0  ;;  %v13185_v45 = vmul.f32 %v16143_v59, %v20488_v62  ;;  %v12866_v28 = vpop.f32.mrb[39].mxu1 }
 0x4d4   : > { %v13317_v17 = vmax.f32 %v13253_v15, 0.0  ;;  %v13184_v33 = vmul.f32 %v20488_v62, %v12866_v28  ;;  %v13392_v28 = vld [vmem:[%s16409_s16 + $0x58] sm:$0xff] }
 0x4d5   : > { %v13446_v4 = vadd.f32 %v13382_v58, %v13318_v2  ;;  %v13256_v6 = vadd.f32 %v20493_v48, %v13185_v45 }
 0x4d6   : > { %v13445_v61 = vadd.f32 %v13381_v24, %v13317_v17  ;;  %v13255_v41 = vadd.f32 %v20493_v48, %v13184_v33  ;;  %v16146_v7 = vpop.f32.mrb[40].mxu1 }
 0x4d7   : > { %v13510_v51 = vmax.f32 %v13446_v4, 0.0  ;;  %v13320_v30 = vmax.f32 %v13256_v6, 0.0  ;;  %v13187_v11 = vmul.f32 %v16146_v7, %v20488_v62  ;;  %v12876_v53 = vpop.f32.mrb[41].mxu1 }
 0x4d8   : > { %v13509_v52 = vmax.f32 %v13445_v61, 0.0  ;;  %v13319_v9 = vmax.f32 %v13255_v41, 0.0  ;;  %v13186_v37 = vmul.f32 %v20488_v62, %v12876_v53  ;;  %v13391_v61 = vld [vmem:[%s16409_s16 + $0x50] sm:$0xff] }
 0x4d9   : > { %13574 = vst.msk [vmem:[%s20509_s14 + $0x8] sm:$0xff] %vm21568_vm1, %v13510_v51  ;;  %v13448_v27 = vadd.f32 %v13384_v1, %v13320_v30  ;;  %v13258_v3 = vadd.f32 %v20493_v48, %v13187_v11  ;;  %vm21584_vm1 = vmmov %vm21575_vm0 }
 0x4da   : > { %13573 = vst.msk [vmem:[%s20509_s14] sm:$0xff] %vm21569_vm3, %v13509_v52  ;;  %v13447_v49 = vadd.f32 %v13383_v5, %v13319_v9  ;;  %v13257_v38 = vadd.f32 %v20493_v48, %v13186_v37  ;;  %v16149_v29 = vpop.f32.mrb[42].mxu1  ;;  %v13394_v52 = vld [vmem:[%s16409_s16 + $0x68] sm:$0xff]  ;;  %vm21585_vm3 = vmmov %vm21575_vm0 }
 0x4db   : > { %v13512_v26 = vmax.f32 %v13448_v27, 0.0  ;;  %v13322_v19 = vmax.f32 %v13258_v3, 0.0  ;;  %v13189_v46 = vmul.f32 %v16149_v29, %v20488_v62  ;;  %v12886_v43 = vpop.f32.mrb[43].mxu1 }
 0x4dc   : > { %v13511_v14 = vmax.f32 %v13447_v49, 0.0  ;;  %v13321_v36 = vmax.f32 %v13257_v38, 0.0  ;;  %v13188_v22 = vmul.f32 %v20488_v62, %v12886_v43  ;;  %v13393_v49 = vld [vmem:[%s16409_s16 + $0x60] sm:$0xff] }
 0x4dd   : > { %13576 = vst.msk [vmem:[%s20509_s14 + $0x18] sm:$0xff] %vm21570_vm6, %v13512_v26  ;;  %v13450_v31 = vadd.f32 %v13386_v12, %v13322_v19  ;;  %v13260_v34 = vadd.f32 %v20493_v48, %v13189_v46  ;;  %vm21586_vm6 = vmmov %vm21575_vm0 }
 0x4de   : > { %13575 = vst.msk [vmem:[%s20509_s14 + $0x10] sm:$0xff] %vm21571_vm9, %v13511_v14  ;;  %v13449_v23 = vadd.f32 %v13385_v32, %v13321_v36  ;;  %v13259_v18 = vadd.f32 %v20493_v48, %v13188_v22  ;;  %v16152_v57 = vpop.f32.mrb[44].mxu1  ;;  %v13396_v14 = vld [vmem:[%s16409_s16 + $0x78] sm:$0xff]  ;;  %vm21587_vm9 = vmmov %vm21575_vm0 }
 0x4df   : > { %v13514_v25 = vmax.f32 %v13450_v31, 0.0  ;;  %v13324_v60 = vmax.f32 %v13260_v34, 0.0  ;;  %v13191_v50 = vmul.f32 %v16152_v57, %v20488_v62  ;;  %v12896_v63 = vpop.f32.mrb[45].mxu1 }
 0x4e0   : > { %v13513_v10 = vmax.f32 %v13449_v23, 0.0  ;;  %v13323_v55 = vmax.f32 %v13259_v18, 0.0  ;;  %v13190_v21 = vmul.f32 %v20488_v62, %v12896_v63  ;;  %v13395_v23 = vld [vmem:[%s16409_s16 + $0x70] sm:$0xff] }
 0x4e1   : > { %13578 = vst.msk [vmem:[%s20509_s14 + $0x28] sm:$0xff] %vm21572_vm8, %v13514_v25  ;;  %v13452_v44 = vadd.f32 %v13388_v0, %v13324_v60  ;;  %v13262_v40 = vadd.f32 %v20493_v48, %v13191_v50  ;;  %vm21588_vm8 = vmmov %vm21575_vm0 }
 0x4e2   : > { %13577 = vst.msk [vmem:[%s20509_s14 + $0x20] sm:$0xff] %vm21573_vm5, %v13513_v10  ;;  %v13451_v56 = vadd.f32 %v13387_v39, %v13323_v55  ;;  %v13261_v13 = vadd.f32 %v20493_v48, %v13190_v21  ;;  %v16155_v54 = vpop.f32.mrb[46].mxu1  ;;  %v13398_v10 = vld [vmem:[%s16409_s16 + $0x88] sm:$0xff]  ;;  %vm21589_vm5 = vmmov %vm21575_vm0 }
 0x4e3   : > { %v13516_v47 = vmax.f32 %v13452_v44, 0.0  ;;  %v13326_v35 = vmax.f32 %v13262_v40, 0.0  ;;  %v13193_v8 = vmul.f32 %v16155_v54, %v20488_v62  ;;  %v12906_v42 = vpop.f32.mrb[47].mxu1 }
 0x4e4   : > { %v13515_v58 = vmax.f32 %v13451_v56, 0.0  ;;  %v13325_v15 = vmax.f32 %v13261_v13, 0.0  ;;  %v13192_v59 = vmul.f32 %v20488_v62, %v12906_v42  ;;  %v13397_v56 = vld [vmem:[%s16409_s16 + $0x80] sm:$0xff] }
 0x4e5   : > { %13580 = vst.msk [vmem:[%s20509_s14 + $0x38] sm:$0xff] %vm21574_vm7, %v13516_v47  ;;  %v13454_v2 = vadd.f32 %v13390_v20, %v13326_v35  ;;  %v13264_v24 = vadd.f32 %v20493_v48, %v13193_v8  ;;  %vm21590_vm7 = vmmov %vm21575_vm0 }
 0x4e6   : > { %13579 = vst.msk [vmem:[%s20509_s14 + $0x30] sm:$0xff] %vm21575_vm0, %v13515_v58  ;;  %v13453_v45 = vadd.f32 %v13389_v16, %v13325_v15  ;;  %v13263_v17 = vadd.f32 %v20493_v48, %v13192_v59  ;;  %v16158_v33 = vpop.f32.mrb[48].mxu1  ;;  %v13400_v58 = vld [vmem:[%s16409_s16 + $0x98] sm:$0xff] }
 0x4e7   : > { %v13518_v4 = vmax.f32 %v13454_v2, 0.0  ;;  %v13328_v6 = vmax.f32 %v13264_v24, 0.0  ;;  %v13195_v1 = vmul.f32 %v16158_v33, %v20488_v62  ;;  %v12916_v41 = vpop.f32.mrb[49].mxu1 }
 0x4e8   : > { %v13517_v7 = vmax.f32 %v13453_v45, 0.0  ;;  %v13327_v51 = vmax.f32 %v13263_v17, 0.0  ;;  %v13194_v30 = vmul.f32 %v20488_v62, %v12916_v41  ;;  %v13399_v45 = vld [vmem:[%s16409_s16 + $0x90] sm:$0xff] }
 0x4e9   : > { %13582 = vst.msk [vmem:[%s20509_s14 + $0x48] sm:$0xff] %vm21576_vm11, %v13518_v4  ;;  %v13456_v5 = vadd.f32 %v13392_v28, %v13328_v6  ;;  %v13266_v11 = vadd.f32 %v20493_v48, %v13195_v1  ;;  %vm21591_vm11 = vmmov %vm21575_vm0 }
 0x4ea   : > { %13581 = vst.msk [vmem:[%s20509_s14 + $0x40] sm:$0xff] %vm21577_vm13, %v13517_v7  ;;  %v13455_v53 = vadd.f32 %v13391_v61, %v13327_v51  ;;  %v13265_v9 = vadd.f32 %v20493_v48, %v13194_v30  ;;  %v16161_v37 = vpop.f32.mrb[50].mxu1  ;;  %v13402_v7 = vld [vmem:[%s16409_s16 + $0xa8] sm:$0xff]  ;;  %vm21592_vm13 = vmmov %vm21575_vm0 }
 0x4eb   : > { %v13520_v27 = vmax.f32 %v13456_v5, 0.0  ;;  %v13330_v3 = vmax.f32 %v13266_v11, 0.0  ;;  %v13197_v12 = vmul.f32 %v16161_v37, %v20488_v62  ;;  %v12926_v38 = vpop.f32.mrb[51].mxu1 }
 0x4ec   : > { %v13519_v29 = vmax.f32 %v13455_v53, 0.0  ;;  %v13329_v26 = vmax.f32 %v13265_v9, 0.0  ;;  %v13196_v19 = vmul.f32 %v20488_v62, %v12926_v38  ;;  %v13401_v53 = vld [vmem:[%s16409_s16 + $0xa0] sm:$0xff] }
 0x4ed   : > { %13584 = vst.msk [vmem:[%s20509_s14 + $0x58] sm:$0xff] %vm21578_vm10, %v13520_v27  ;;  %v13458_v32 = vadd.f32 %v13394_v52, %v13330_v3  ;;  %v13268_v46 = vadd.f32 %v20493_v48, %v13197_v12  ;;  %vm21593_vm10 = vmmov %vm21575_vm0 }
 0x4ee   : > { %13583 = vst.msk [vmem:[%s20509_s14 + $0x50] sm:$0xff] %vm21579_vm12, %v13519_v29  ;;  %v13457_v43 = vadd.f32 %v13393_v49, %v13329_v26  ;;  %v13267_v36 = vadd.f32 %v20493_v48, %v13196_v19  ;;  %v16164_v22 = vpop.f32.mrb[52].mxu1  ;;  %v13404_v29 = vld [vmem:[%s16409_s16 + $0xb8] sm:$0xff]  ;;  %vm21594_vm12 = vmmov %vm21575_vm0 }
 0x4ef   : > { %v13522_v31 = vmax.f32 %v13458_v32, 0.0  ;;  %v13332_v34 = vmax.f32 %v13268_v46, 0.0  ;;  %v13199_v0 = vmul.f32 %v16164_v22, %v20488_v62  ;;  %v12936_v18 = vpop.f32.mrb[53].mxu1 }
 0x4f0   : > { %v13521_v57 = vmax.f32 %v13457_v43, 0.0  ;;  %v13331_v25 = vmax.f32 %v13267_v36, 0.0  ;;  %v13198_v60 = vmul.f32 %v20488_v62, %v12936_v18  ;;  %v13403_v43 = vld [vmem:[%s16409_s16 + $0xb0] sm:$0xff] }
 0x4f1   : > { %13586 = vst.msk [vmem:[%s20509_s14 + $0x68] sm:$0xff] %vm21580_vm15, %v13522_v31  ;;  %v13460_v39 = vadd.f32 %v13396_v14, %v13332_v34  ;;  %v13270_v50 = vadd.f32 %v20493_v48, %v13199_v0  ;;  %vm21595_vm15 = vmmov %vm21575_vm0 }
 0x4f2   : > { %13585 = vst.msk [vmem:[%s20509_s14 + $0x60] sm:$0xff] %vm21581_vm2, %v13521_v57  ;;  %v13459_v63 = vadd.f32 %v13395_v23, %v13331_v25  ;;  %v13269_v55 = vadd.f32 %v20493_v48, %v13198_v60  ;;  %v16167_v21 = vpop.f32.mrb[54].mxu1  ;;  %v13406_v57 = vld [vmem:[%s16409_s16 + $0xc8] sm:$0xff]  ;;  %vm21596_vm2 = vmmov %vm21575_vm0 }
 0x4f3   : > { %v13524_v44 = vmax.f32 %v13460_v39, 0.0  ;;  %v13334_v40 = vmax.f32 %v13270_v50, 0.0  ;;  %v13201_v20 = vmul.f32 %v16167_v21, %v20488_v62  ;;  %v12946_v13 = vpop.f32.mrb[55].mxu1 }
 0x4f4   : > { %v13523_v54 = vmax.f32 %v13459_v63, 0.0  ;;  %v13333_v47 = vmax.f32 %v13269_v55, 0.0  ;;  %v13200_v35 = vmul.f32 %v20488_v62, %v12946_v13  ;;  %v13405_v63 = vld [vmem:[%s16409_s16 + $0xc0] sm:$0xff] }
 0x4f5   : > { %13588 = vst.msk [vmem:[%s20509_s14 + $0x78] sm:$0xff] %vm21582_vm4, %v13524_v44  ;;  %v13462_v16 = vadd.f32 %v13398_v10, %v13334_v40  ;;  %v13272_v8 = vadd.f32 %v20493_v48, %v13201_v20  ;;  %vm21597_vm4 = vmmov %vm21575_vm0 }
 0x4f6   : > { %13587 = vst.msk [vmem:[%s20509_s14 + $0x70] sm:$0xff] %vm21583_vm14, %v13523_v54  ;;  %v13461_v42 = vadd.f32 %v13397_v56, %v13333_v47  ;;  %v13271_v15 = vadd.f32 %v20493_v48, %v13200_v35  ;;  %v16170_v59 = vpop.f32.mrb[56].mxu1  ;;  %v13408_v54 = vld [vmem:[%s16409_s16 + $0xd8] sm:$0xff]  ;;  %vm21598_vm14 = vmmov %vm21575_vm0 }
 0x4f7   : > { %v13526_v2 = vmax.f32 %v13462_v16, 0.0  ;;  %v13336_v24 = vmax.f32 %v13272_v8, 0.0  ;;  %v13203_v28 = vmul.f32 %v16170_v59, %v20488_v62  ;;  %v12956_v17 = vpop.f32.mrb[57].mxu1 }
 0x4f8   : > { %v13525_v33 = vmax.f32 %v13461_v42, 0.0  ;;  %v13335_v4 = vmax.f32 %v13271_v15, 0.0  ;;  %v13202_v6 = vmul.f32 %v20488_v62, %v12956_v17  ;;  %v13407_v42 = vld [vmem:[%s16409_s16 + $0xd0] sm:$0xff] }
 0x4f9   : > { %13590 = vst.msk [vmem:[%s20509_s14 + $0x88] sm:$0xff] %vm21584_vm1, %v13526_v2  ;;  %v13464_v61 = vadd.f32 %v13400_v58, %v13336_v24  ;;  %v13274_v1 = vadd.f32 %v20493_v48, %v13203_v28  ;;  %vm21599_vm1 = vmmov %vm21575_vm0 }
 0x4fa   : > { %13589 = vst.msk [vmem:[%s20509_s14 + $0x80] sm:$0xff] %vm21585_vm3, %v13525_v33  ;;  %v13463_v41 = vadd.f32 %v13399_v45, %v13335_v4  ;;  %v13273_v51 = vadd.f32 %v20493_v48, %v13202_v6  ;;  %v16173_v30 = vpop.f32.mrb[58].mxu1  ;;  %v13410_v33 = vld [vmem:[%s16409_s16 + $0xe8] sm:$0xff]  ;;  %vm21600_vm3 = vmmov %vm21575_vm0 }
 0x4fb   : > { %v13528_v5 = vmax.f32 %v13464_v61, 0.0  ;;  %v13338_v11 = vmax.f32 %v13274_v1, 0.0  ;;  %v13205_v52 = vmul.f32 %v16173_v30, %v20488_v62  ;;  %v12966_v9 = vpop.f32.mrb[59].mxu1 }
 0x4fc   : > { %v13527_v37 = vmax.f32 %v13463_v41, 0.0  ;;  %v13337_v27 = vmax.f32 %v13273_v51, 0.0  ;;  %v13204_v3 = vmul.f32 %v20488_v62, %v12966_v9  ;;  %v13409_v41 = vld [vmem:[%s16409_s16 + $0xe0] sm:$0xff] }
 0x4fd   : > { %13592 = vst.msk [vmem:[%s20509_s14 + $0x98] sm:$0xff] %vm21586_vm6, %v13528_v5  ;;  %v13466_v49 = vadd.f32 %v13402_v7, %v13338_v11  ;;  %v13276_v12 = vadd.f32 %v20493_v48, %v13205_v52  ;;  %vm21601_vm6 = vmmov %vm21575_vm0 }
 0x4fe   : > { %13591 = vst.msk [vmem:[%s20509_s14 + $0x90] sm:$0xff] %vm21587_vm9, %v13527_v37  ;;  %v13465_v38 = vadd.f32 %v13401_v53, %v13337_v27  ;;  %v13275_v26 = vadd.f32 %v20493_v48, %v13204_v3  ;;  %v16176_v19 = vpop.f32.mrb[60].mxu1  ;;  %v13412_v37 = vld [vmem:[%s16409_s16 + $0xf8] sm:$0xff]  ;;  %vm21602_vm9 = vmmov %vm21575_vm0 }
 0x4ff   : > { %v13530_v32 = vmax.f32 %v13466_v49, 0.0  ;;  %v13340_v46 = vmax.f32 %v13276_v12, 0.0  ;;  %v13207_v14 = vmul.f32 %v16176_v19, %v20488_v62  ;;  %v12976_v36 = vpop.f32.mrb[61].mxu1 }
 0x500   : > { %v13529_v22 = vmax.f32 %v13465_v38, 0.0  ;;  %v13339_v31 = vmax.f32 %v13275_v26, 0.0  ;;  %v13206_v34 = vmul.f32 %v20488_v62, %v12976_v36  ;;  %v13411_v38 = vld [vmem:[%s16409_s16 + $0xf0] sm:$0xff] }
 0x501   : > { %13594 = vst.msk [vmem:[%s20509_s14 + $0xa8] sm:$0xff] %vm21588_vm8, %v13530_v32  ;;  %v13468_v23 = vadd.f32 %v13404_v29, %v13340_v46  ;;  %v13278_v0 = vadd.f32 %v20493_v48, %v13207_v14  ;;  %vm21603_vm8 = vmmov %vm21575_vm0 }
 0x502   : > { %13593 = vst.msk [vmem:[%s20509_s14 + $0xa0] sm:$0xff] %vm21589_vm5, %v13529_v22  ;;  %v13467_v18 = vadd.f32 %v13403_v43, %v13339_v31  ;;  %v13277_v25 = vadd.f32 %v20493_v48, %v13206_v34  ;;  %v16179_v60 = vpop.f32.mrb[62].mxu1  ;;  %v13414_v22 = vld [vmem:[%s16409_s16 + $0x108] sm:$0xff]  ;;  %vm21604_vm5 = vmmov %vm21575_vm0 }
 0x503   : > { %v13532_v39 = vmax.f32 %v13468_v23, 0.0  ;;  %v13342_v50 = vmax.f32 %v13278_v0, 0.0  ;;  %v13209_v10 = vmul.f32 %v16179_v60, %v20488_v62  ;;  %v12986_v55 = vpop.f32.mrb[63].mxu1 }
 0x504   : > { %v13531_v21 = vmax.f32 %v13467_v18, 0.0  ;;  %v13341_v44 = vmax.f32 %v13277_v25, 0.0  ;;  %v13208_v40 = vmul.f32 %v20488_v62, %v12986_v55  ;;  %v13413_v18 = vld [vmem:[%s16409_s16 + $0x100] sm:$0xff] }
 0x505   : > { %13596 = vst.msk [vmem:[%s20509_s14 + $0xb8] sm:$0xff] %vm21590_vm7, %v13532_v39  ;;  %v13470_v56 = vadd.f32 %v13406_v57, %v13342_v50  ;;  %v13280_v20 = vadd.f32 %v20493_v48, %v13209_v10  ;;  %vm21605_vm7 = vmmov %vm21575_vm0 }
 0x506   : > { %13595 = vst.msk [vmem:[%s20509_s14 + $0xb0] sm:$0xff] %vm21575_vm0, %v13531_v21  ;;  %v13469_v13 = vadd.f32 %v13405_v63, %v13341_v44  ;;  %v13279_v47 = vadd.f32 %v20493_v48, %v13208_v40  ;;  %v16182_v35 = vpop.f32.mrb[64].mxu1  ;;  %v13416_v21 = vld [vmem:[%s16409_s16 + $0x118] sm:$0xff] }
 0x507   : > { %v13534_v16 = vmax.f32 %v13470_v56, 0.0  ;;  %v13344_v8 = vmax.f32 %v13280_v20, 0.0  ;;  %v13211_v58 = vmul.f32 %v16182_v35, %v20488_v62  ;;  %v12996_v15 = vpop.f32.mrb[65].mxu1 }
 0x508   : > { %v13533_v59 = vmax.f32 %v13469_v13, 0.0  ;;  %v13343_v2 = vmax.f32 %v13279_v47, 0.0  ;;  %v13210_v24 = vmul.f32 %v20488_v62, %v12996_v15  ;;  %v13415_v13 = vld [vmem:[%s16409_s16 + $0x110] sm:$0xff] }
 0x509   : > { %13598 = vst.msk [vmem:[%s20509_s14 + $0xc8] sm:$0xff] %vm21591_vm11, %v13534_v16  ;;  %v13472_v45 = vadd.f32 %v13408_v54, %v13344_v8  ;;  %v13282_v28 = vadd.f32 %v20493_v48, %v13211_v58  ;;  %vm21606_vm11 = vmmov %vm21575_vm0 }
 0x50a   : > { %13597 = vst.msk [vmem:[%s20509_s14 + $0xc0] sm:$0xff] %vm21592_vm13, %v13533_v59  ;;  %v13471_v17 = vadd.f32 %v13407_v42, %v13343_v2  ;;  %v13281_v4 = vadd.f32 %v20493_v48, %v13210_v24  ;;  %v16185_v6 = vpop.f32.mrb[66].mxu1  ;;  %v13418_v59 = vld [vmem:[%s16409_s16 + $0x128] sm:$0xff]  ;;  %vm21607_vm13 = vmmov %vm21575_vm0 }
 0x50b   : > { %v13536_v61 = vmax.f32 %v13472_v45, 0.0  ;;  %v13346_v1 = vmax.f32 %v13282_v28, 0.0  ;;  %v13213_v7 = vmul.f32 %v16185_v6, %v20488_v62  ;;  %v13006_v51 = vpop.f32.mrb[67].mxu1 }
 0x50c   : > { %v13535_v30 = vmax.f32 %v13471_v17, 0.0  ;;  %v13345_v5 = vmax.f32 %v13281_v4, 0.0  ;;  %v13212_v11 = vmul.f32 %v20488_v62, %v13006_v51  ;;  %v13417_v17 = vld [vmem:[%s16409_s16 + $0x120] sm:$0xff] }
 0x50d   : > { %13600 = vst.msk [vmem:[%s20509_s14 + $0xd8] sm:$0xff] %vm21593_vm10, %v13536_v61  ;;  %v13474_v53 = vadd.f32 %v13410_v33, %v13346_v1  ;;  %v13284_v52 = vadd.f32 %v20493_v48, %v13213_v7  ;;  %vm21608_vm10 = vmmov %vm21575_vm0 }
 0x50e   : > { %13599 = vst.msk [vmem:[%s20509_s14 + $0xd0] sm:$0xff] %vm21594_vm12, %v13535_v30  ;;  %v13473_v9 = vadd.f32 %v13409_v41, %v13345_v5  ;;  %v13283_v27 = vadd.f32 %v20493_v48, %v13212_v11  ;;  %v16188_v3 = vpop.f32.mrb[68].mxu1  ;;  %v13420_v30 = vld [vmem:[%s16409_s16 + $0x138] sm:$0xff]  ;;  %vm21609_vm12 = vmmov %vm21575_vm0 }
 0x50f   : > { %v13538_v49 = vmax.f32 %v13474_v53, 0.0  ;;  %v13348_v12 = vmax.f32 %v13284_v52, 0.0  ;;  %v13215_v29 = vmul.f32 %v16188_v3, %v20488_v62  ;;  %v13016_v26 = vpop.f32.mrb[69].mxu1 }
 0x510   : > { %v13537_v19 = vmax.f32 %v13473_v9, 0.0  ;;  %v13347_v32 = vmax.f32 %v13283_v27, 0.0  ;;  %v13214_v46 = vmul.f32 %v20488_v62, %v13016_v26  ;;  %v13419_v9 = vld [vmem:[%s16409_s16 + $0x130] sm:$0xff] }
 0x511   : > { %13602 = vst.msk [vmem:[%s20509_s14 + $0xe8] sm:$0xff] %vm21595_vm15, %v13538_v49  ;;  %v13476_v43 = vadd.f32 %v13412_v37, %v13348_v12  ;;  %v13286_v14 = vadd.f32 %v20493_v48, %v13215_v29  ;;  %vm21610_vm15 = vmmov %vm21575_vm0 }
 0x512   : > { %13601 = vst.msk [vmem:[%s20509_s14 + $0xe0] sm:$0xff] %vm21596_vm2, %v13537_v19  ;;  %v13475_v36 = vadd.f32 %v13411_v38, %v13347_v32  ;;  %v13285_v31 = vadd.f32 %v20493_v48, %v13214_v46  ;;  %v16191_v34 = vpop.f32.mrb[70].mxu1  ;;  %v13422_v19 = vld [vmem:[%s16409_s16 + $0x148] sm:$0xff]  ;;  %vm21611_vm2 = vmmov %vm21575_vm0 }
 0x513   : > { %v13540_v23 = vmax.f32 %v13476_v43, 0.0  ;;  %v13350_v0 = vmax.f32 %v13286_v14, 0.0  ;;  %v13217_v57 = vmul.f32 %v16191_v34, %v20488_v62  ;;  %v13026_v25 = vpop.f32.mrb[71].mxu1 }
 0x514   : > { %v13539_v60 = vmax.f32 %v13475_v36, 0.0  ;;  %v13349_v39 = vmax.f32 %v13285_v31, 0.0  ;;  %v13216_v50 = vmul.f32 %v20488_v62, %v13026_v25  ;;  %v13421_v36 = vld [vmem:[%s16409_s16 + $0x140] sm:$0xff] }
 0x515   : > { %13604 = vst.msk [vmem:[%s20509_s14 + $0xf8] sm:$0xff] %vm21597_vm4, %v13540_v23  ;;  %v13478_v63 = vadd.f32 %v13414_v22, %v13350_v0  ;;  %v13288_v10 = vadd.f32 %v20493_v48, %v13217_v57  ;;  %vm21612_vm4 = vmmov %vm21575_vm0 }
 0x516   : > { %13603 = vst.msk [vmem:[%s20509_s14 + $0xf0] sm:$0xff] %vm21598_vm14, %v13539_v60  ;;  %v13477_v55 = vadd.f32 %v13413_v18, %v13349_v39  ;;  %v13287_v44 = vadd.f32 %v20493_v48, %v13216_v50  ;;  %v16194_v40 = vpop.f32.mrb[72].mxu1  ;;  %v13424_v60 = vld [vmem:[%s16409_s16 + $0x158] sm:$0xff]  ;;  %vm21613_vm14 = vmmov %vm21575_vm0 }
 0x517   : > { %v13542_v56 = vmax.f32 %v13478_v63, 0.0  ;;  %v13352_v20 = vmax.f32 %v13288_v10, 0.0  ;;  %v13219_v54 = vmul.f32 %v16194_v40, %v20488_v62  ;;  %v13036_v47 = vpop.f32.mrb[73].mxu1 }
 0x518   : > { %v13541_v35 = vmax.f32 %v13477_v55, 0.0  ;;  %v13351_v16 = vmax.f32 %v13287_v44, 0.0  ;;  %v13218_v8 = vmul.f32 %v20488_v62, %v13036_v47  ;;  %v13423_v55 = vld [vmem:[%s16409_s16 + $0x150] sm:$0xff] }
 0x519   : > { %13606 = vst.msk [vmem:[%s20509_s14 + $0x108] sm:$0xff] %vm21599_vm1, %v13542_v56  ;;  %v13480_v42 = vadd.f32 %v13416_v21, %v13352_v20  ;;  %v13290_v58 = vadd.f32 %v20493_v48, %v13219_v54  ;;  %vm21614_vm1 = vmmov %vm21575_vm0 }
 0x51a   : > { %13605 = vst.msk [vmem:[%s20509_s14 + $0x100] sm:$0xff] %vm21600_vm3, %v13541_v35  ;;  %v13479_v15 = vadd.f32 %v13415_v13, %v13351_v16  ;;  %v13289_v2 = vadd.f32 %v20493_v48, %v13218_v8  ;;  %v16197_v24 = vpop.f32.mrb[74].mxu1  ;;  %v13426_v35 = vld [vmem:[%s16409_s16 + $0x168] sm:$0xff]  ;;  %vm21615_vm3 = vmmov %vm21575_vm0 }
 0x51b   : > { %v13544_v45 = vmax.f32 %v13480_v42, 0.0  ;;  %v13354_v28 = vmax.f32 %v13290_v58, 0.0  ;;  %v13221_v33 = vmul.f32 %v16197_v24, %v20488_v62  ;;  %v13046_v4 = vpop.f32.mrb[75].mxu1 }
 0x51c   : > { %v13543_v6 = vmax.f32 %v13479_v15, 0.0  ;;  %v13353_v61 = vmax.f32 %v13289_v2, 0.0  ;;  %v13220_v1 = vmul.f32 %v20488_v62, %v13046_v4  ;;  %v13425_v15 = vld [vmem:[%s16409_s16 + $0x160] sm:$0xff] }
 0x51d   : > { %13608 = vst.msk [vmem:[%s20509_s14 + $0x118] sm:$0xff] %vm21601_vm6, %v13544_v45  ;;  %v13482_v41 = vadd.f32 %v13418_v59, %v13354_v28  ;;  %v13292_v7 = vadd.f32 %v20493_v48, %v13221_v33  ;;  %vm21616_vm6 = vmmov %vm21575_vm0 }
 0x51e   : > { %13607 = vst.msk [vmem:[%s20509_s14 + $0x110] sm:$0xff] %vm21602_vm9, %v13543_v6  ;;  %v13481_v51 = vadd.f32 %v13417_v17, %v13353_v61  ;;  %v13291_v5 = vadd.f32 %v20493_v48, %v13220_v1  ;;  %v16200_v11 = vpop.f32.mrb[76].mxu1  ;;  %v13428_v6 = vld [vmem:[%s16409_s16 + $0x178] sm:$0xff]  ;;  %vm21617_vm9 = vmmov %vm21575_vm0 }
 0x51f   : > { %v13546_v53 = vmax.f32 %v13482_v41, 0.0  ;;  %v13356_v52 = vmax.f32 %v13292_v7, 0.0  ;;  %v13223_v37 = vmul.f32 %v16200_v11, %v20488_v62  ;;  %v13056_v27 = vpop.f32.mrb[77].mxu1 }
 0x520   : > { %v13545_v3 = vmax.f32 %v13481_v51, 0.0  ;;  %v13355_v49 = vmax.f32 %v13291_v5, 0.0  ;;  %v13222_v12 = vmul.f32 %v20488_v62, %v13056_v27  ;;  %v13427_v51 = vld [vmem:[%s16409_s16 + $0x170] sm:$0xff] }
 0x521   : > { %13610 = vst.msk [vmem:[%s20509_s14 + $0x128] sm:$0xff] %vm21603_vm8, %v13546_v53  ;;  %v13484_v38 = vadd.f32 %v13420_v30, %v13356_v52  ;;  %v13294_v29 = vadd.f32 %v20493_v48, %v13223_v37  ;;  %vm21618_vm8 = vmmov %vm21575_vm0 }
 0x522   : > { %13609 = vst.msk [vmem:[%s20509_s14 + $0x120] sm:$0xff] %vm21604_vm5, %v13545_v3  ;;  %v13483_v26 = vadd.f32 %v13419_v9, %v13355_v49  ;;  %v13293_v32 = vadd.f32 %v20493_v48, %v13222_v12  ;;  %v16203_v46 = vpop.f32.mrb[78].mxu1  ;;  %v13430_v3 = vld [vmem:[%s16409_s16 + $0x188] sm:$0xff]  ;;  %vm21619_vm5 = vmmov %vm21575_vm0 }
 0x523   : > { %v13548_v43 = vmax.f32 %v13484_v38, 0.0  ;;  %v13358_v14 = vmax.f32 %v13294_v29, 0.0  ;;  %v13225_v22 = vmul.f32 %v16203_v46, %v20488_v62  ;;  %v13066_v31 = vpop.f32.mrb[79].mxu1 }
 0x524   : > { %v13547_v34 = vmax.f32 %v13483_v26, 0.0  ;;  %v13357_v23 = vmax.f32 %v13293_v32, 0.0  ;;  %v13224_v0 = vmul.f32 %v20488_v62, %v13066_v31  ;;  %v13429_v26 = vld [vmem:[%s16409_s16 + $0x180] sm:$0xff] }
 0x525   : > { %13612 = vst.msk [vmem:[%s20509_s14 + $0x138] sm:$0xff] %vm21605_vm7, %v13548_v43  ;;  %v13486_v18 = vadd.f32 %v13422_v19, %v13358_v14  ;;  %v13296_v57 = vadd.f32 %v20493_v48, %v13225_v22  ;;  %vm21620_vm7 = vmmov %vm21575_vm0 }
 0x526   : > { %13611 = vst.msk [vmem:[%s20509_s14 + $0x130] sm:$0xff] %vm21575_vm0, %v13547_v34  ;;  %v13485_v25 = vadd.f32 %v13421_v36, %v13357_v23  ;;  %v13295_v39 = vadd.f32 %v20493_v48, %v13224_v0  ;;  %v16206_v50 = vpop.f32.mrb[80].mxu1  ;;  %v13432_v34 = vld [vmem:[%s16409_s16 + $0x198] sm:$0xff] }
 0x527   : > { %v13550_v63 = vmax.f32 %v13486_v18, 0.0  ;;  %v13360_v10 = vmax.f32 %v13296_v57, 0.0  ;;  %v13227_v21 = vmul.f32 %v16206_v50, %v20488_v62  ;;  %v13076_v44 = vpop.f32.mrb[81].mxu1 }
 0x528   : > { %v13549_v40 = vmax.f32 %v13485_v25, 0.0  ;;  %v13359_v56 = vmax.f32 %v13295_v39, 0.0  ;;  %v13226_v20 = vmul.f32 %v20488_v62, %v13076_v44  ;;  %v13431_v25 = vld [vmem:[%s16409_s16 + $0x190] sm:$0xff] }
 0x529   : > { %13614 = vst.msk [vmem:[%s20509_s14 + $0x148] sm:$0xff] %vm21606_vm11, %v13550_v63  ;;  %v13488_v13 = vadd.f32 %v13424_v60, %v13360_v10  ;;  %v13298_v54 = vadd.f32 %v20493_v48, %v13227_v21  ;;  %vm21621_vm11 = vmmov %vm21575_vm0 }
 0x52a   : > { %13613 = vst.msk [vmem:[%s20509_s14 + $0x140] sm:$0xff] %vm21607_vm13, %v13549_v40  ;;  %v13487_v47 = vadd.f32 %v13423_v55, %v13359_v56  ;;  %v13297_v16 = vadd.f32 %v20493_v48, %v13226_v20  ;;  %v16209_v8 = vpop.f32.mrb[82].mxu1  ;;  %v13434_v40 = vld [vmem:[%s16409_s16 + $0x1a8] sm:$0xff]  ;;  %vm21622_vm13 = vmmov %vm21575_vm0 }
 0x52b   : > { %v13552_v42 = vmax.f32 %v13488_v13, 0.0  ;;  %v13362_v58 = vmax.f32 %v13298_v54, 0.0  ;;  %v13229_v59 = vmul.f32 %v16209_v8, %v20488_v62  ;;  %v13086_v2 = vpop.f32.mrb[83].mxu1 }
 0x52c   : > { %v13551_v24 = vmax.f32 %v13487_v47, 0.0  ;;  %v13361_v45 = vmax.f32 %v13297_v16, 0.0  ;;  %v13228_v28 = vmul.f32 %v20488_v62, %v13086_v2  ;;  %v13433_v47 = vld [vmem:[%s16409_s16 + $0x1a0] sm:$0xff] }
 0x52d   : > { %13616 = vst.msk [vmem:[%s20509_s14 + $0x158] sm:$0xff] %vm21608_vm10, %v13552_v42  ;;  %v13490_v17 = vadd.f32 %v13426_v35, %v13362_v58  ;;  %v13300_v33 = vadd.f32 %v20493_v48, %v13229_v59  ;;  %vm21623_vm10 = vmmov %vm21575_vm0 }
 0x52e   : > { %13615 = vst.msk [vmem:[%s20509_s14 + $0x150] sm:$0xff] %vm21609_vm12, %v13551_v24  ;;  %v13489_v4 = vadd.f32 %v13425_v15, %v13361_v45  ;;  %v13299_v61 = vadd.f32 %v20493_v48, %v13228_v28  ;;  %v16212_v1 = vpop.f32.mrb[84].mxu1  ;;  %v13436_v24 = vld [vmem:[%s16409_s16 + $0x1b8] sm:$0xff]  ;;  %vm21624_vm12 = vmmov %vm21575_vm0 }
 0x52f   : > { %v13554_v41 = vmax.f32 %v13490_v17, 0.0  ;;  %v13364_v7 = vmax.f32 %v13300_v33, 0.0  ;;  %v13231_v30 = vmul.f32 %v16212_v1, %v20488_v62  ;;  %v13096_v5 = vpop.f32.mrb[85].mxu1 }
 0x530   : > { %v13553_v11 = vmax.f32 %v13489_v4, 0.0  ;;  %v13363_v53 = vmax.f32 %v13299_v61, 0.0  ;;  %v13230_v52 = vmul.f32 %v20488_v62, %v13096_v5  ;;  %v13435_v4 = vld [vmem:[%s16409_s16 + $0x1b0] sm:$0xff] }
 0x531   : > { %13618 = vst.msk [vmem:[%s20509_s14 + $0x168] sm:$0xff] %vm21610_vm15, %v13554_v41  ;;  %v13492_v9 = vadd.f32 %v13428_v6, %v13364_v7  ;;  %v13302_v37 = vadd.f32 %v20493_v48, %v13231_v30  ;;  %vm21625_vm15 = vmmov %vm21575_vm0 }
 0x532   : > { %13617 = vst.msk [vmem:[%s20509_s14 + $0x160] sm:$0xff] %vm21611_vm2, %v13553_v11  ;;  %v13491_v27 = vadd.f32 %v13427_v51, %v13363_v53  ;;  %v13301_v49 = vadd.f32 %v20493_v48, %v13230_v52  ;;  %v16215_v12 = vpop.f32.mrb[86].mxu1  ;;  %v13438_v11 = vld [vmem:[%s16409_s16 + $0x1c8] sm:$0xff]  ;;  %vm21626_vm2 = vmmov %vm21575_vm0 }
 0x533   : > { %v13556_v38 = vmax.f32 %v13492_v9, 0.0  ;;  %v13366_v29 = vmax.f32 %v13302_v37, 0.0  ;;  %v13233_v19 = vmul.f32 %v16215_v12, %v20488_v62  ;;  %v13106_v32 = vpop.f32.mrb[87].mxu1 }
 0x534   : > { %v13555_v46 = vmax.f32 %v13491_v27, 0.0  ;;  %v13365_v43 = vmax.f32 %v13301_v49, 0.0  ;;  %v13232_v14 = vmul.f32 %v20488_v62, %v13106_v32  ;;  %v13437_v27 = vld [vmem:[%s16409_s16 + $0x1c0] sm:$0xff] }
 0x535   : > { %13620 = vst.msk [vmem:[%s20509_s14 + $0x178] sm:$0xff] %vm21612_vm4, %v13556_v38  ;;  %v13494_v36 = vadd.f32 %v13430_v3, %v13366_v29  ;;  %v13304_v22 = vadd.f32 %v20493_v48, %v13233_v19  ;;  %vm21627_vm4 = vmmov %vm21575_vm0 }
 0x536   : > { %13619 = vst.msk [vmem:[%s20509_s14 + $0x170] sm:$0xff] %vm21613_vm14, %v13555_v46  ;;  %v13493_v31 = vadd.f32 %v13429_v26, %v13365_v43  ;;  %v13303_v23 = vadd.f32 %v20493_v48, %v13232_v14  ;;  %v16218_v0 = vpop.f32.mrb[88].mxu1  ;;  %v13440_v46 = vld [vmem:[%s16409_s16 + $0x1d8] sm:$0xff]  ;;  %vm21628_vm14 = vmmov %vm21575_vm0 }
 0x537   : > { %v13558_v18 = vmax.f32 %v13494_v36, 0.0  ;;  %v13368_v57 = vmax.f32 %v13304_v22, 0.0  ;;  %v13235_v60 = vmul.f32 %v16218_v0, %v20488_v62  ;;  %v13116_v39 = vpop.f32.mrb[89].mxu1 }
 0x538   : > { %v13557_v50 = vmax.f32 %v13493_v31, 0.0  ;;  %v13367_v63 = vmax.f32 %v13303_v23, 0.0  ;;  %v13234_v10 = vmul.f32 %v20488_v62, %v13116_v39  ;;  %v13439_v31 = vld [vmem:[%s16409_s16 + $0x1d0] sm:$0xff] }
 0x539   : > { %13622 = vst.msk [vmem:[%s20509_s14 + $0x188] sm:$0xff] %vm21614_vm1, %v13558_v18  ;;  %v13496_v55 = vadd.f32 %v13432_v34, %v13368_v57  ;;  %v13306_v21 = vadd.f32 %v20493_v48, %v13235_v60 }
 0x53a   : > { %13621 = vst.msk [vmem:[%s20509_s14 + $0x180] sm:$0xff] %vm21615_vm3, %v13557_v50  ;;  %v13495_v44 = vadd.f32 %v13431_v25, %v13367_v63  ;;  %v13305_v56 = vadd.f32 %v20493_v48, %v13234_v10  ;;  %v16221_v20 = vpop.f32.mrb[90].mxu1  ;;  %v13442_v50 = vld [vmem:[%s16409_s16 + $0x1e8] sm:$0xff] }
 0x53b   : > { %v13560_v13 = vmax.f32 %v13496_v55, 0.0  ;;  %v13370_v54 = vmax.f32 %v13306_v21, 0.0  ;;  %v13237_v35 = vmul.f32 %v16221_v20, %v20488_v62  ;;  %v13126_v16 = vpop.f32.mrb[91].mxu1 }
 0x53c   : > { %v13559_v8 = vmax.f32 %v13495_v44, 0.0  ;;  %v13369_v42 = vmax.f32 %v13305_v56, 0.0  ;;  %v13236_v58 = vmul.f32 %v20488_v62, %v13126_v16  ;;  %v13441_v44 = vld [vmem:[%s16409_s16 + $0x1e0] sm:$0xff] }
 0x53d   : > { %13624 = vst.msk [vmem:[%s20509_s14 + $0x198] sm:$0xff] %vm21616_vm6, %v13560_v13  ;;  %v13498_v15 = vadd.f32 %v13434_v40, %v13370_v54  ;;  %v13308_v59 = vadd.f32 %v20493_v48, %v13237_v35 }
 0x53e   : > { %13623 = vst.msk [vmem:[%s20509_s14 + $0x190] sm:$0xff] %vm21617_vm9, %v13559_v8  ;;  %v13497_v2 = vadd.f32 %v13433_v47, %v13369_v42  ;;  %v13307_v45 = vadd.f32 %v20493_v48, %v13236_v58  ;;  %v16224_v28 = vpop.f32.mrb[92].mxu1  ;;  %v13444_v8 = vld [vmem:[%s16409_s16 + $0x1f8] sm:$0xff] }
 0x53f   : > { %v13562_v17 = vmax.f32 %v13498_v15, 0.0  ;;  %v13372_v33 = vmax.f32 %v13308_v59, 0.0  ;;  %v13239_v6 = vmul.f32 %v16224_v28, %v20488_v62  ;;  %v13136_v61 = vpop.f32.mrb[93].mxu1  ;;  %v13443_v59 = vld [vmem:[%s16409_s16 + $0x1f0] sm:$0xff] }
 0x540   : > { %v13561_v1 = vmax.f32 %v13497_v2, 0.0  ;;  %v13371_v41 = vmax.f32 %v13307_v45, 0.0  ;;  %v13238_v7 = vmul.f32 %v20488_v62, %v13136_v61 }
 0x541   : > { %13626 = vst.msk [vmem:[%s20509_s14 + $0x1a8] sm:$0xff] %vm21618_vm8, %v13562_v17  ;;  %v13500_v51 = vadd.f32 %v13436_v24, %v13372_v33  ;;  %v13310_v30 = vadd.f32 %v20493_v48, %v13239_v6 }
 0x542   : > { %13625 = vst.msk [vmem:[%s20509_s14 + $0x1a0] sm:$0xff] %vm21619_vm5, %v13561_v1  ;;  %v13499_v5 = vadd.f32 %v13435_v4, %v13371_v41  ;;  %v13309_v53 = vadd.f32 %v20493_v48, %v13238_v7  ;;  %v16227_v52 = vpop.f32.mrb[94].mxu1 }
 0x543   : > { %v13564_v9 = vmax.f32 %v13500_v51, 0.0  ;;  %v13374_v37 = vmax.f32 %v13310_v30, 0.0  ;;  %v13241_v3 = vmul.f32 %v16227_v52, %v20488_v62  ;;  %v13146_v49 = vpop.f32.mrb[95].mxu1 }
 0x544   : > { %v13563_v12 = vmax.f32 %v13499_v5, 0.0  ;;  %v13373_v38 = vmax.f32 %v13309_v53, 0.0  ;;  %v13240_v29 = vmul.f32 %v20488_v62, %v13146_v49 }
 0x545   : > { %13628 = vst.msk [vmem:[%s20509_s14 + $0x1b8] sm:$0xff] %vm21620_vm7, %v13564_v9  ;;  %v13502_v26 = vadd.f32 %v13438_v11, %v13374_v37  ;;  %v13312_v19 = vadd.f32 %v20493_v48, %v13241_v3 }
 0x546   : > { %13627 = vst.msk [vmem:[%s20509_s14 + $0x1b0] sm:$0xff] %vm21575_vm0, %v13563_v12  ;;  %v13501_v32 = vadd.f32 %v13437_v27, %v13373_v38  ;;  %v13311_v43 = vadd.f32 %v20493_v48, %v13240_v29  ;;  %v16230_v14 = vpop.f32.mrb[96].mxu1 }
 0x547   : > { %v13566_v36 = vmax.f32 %v13502_v26, 0.0  ;;  %v13376_v22 = vmax.f32 %v13312_v19, 0.0  ;;  %v13243_v34 = vmul.f32 %v16230_v14, %v20488_v62  ;;  %v13156_v23 = vpop.f32.mrb[97].mxu1 }
 0x548   : > { %v13565_v0 = vmax.f32 %v13501_v32, 0.0  ;;  %v13375_v18 = vmax.f32 %v13311_v43, 0.0  ;;  %v13242_v57 = vmul.f32 %v20488_v62, %v13156_v23 }
 0x549   : > { %13630 = vst.msk [vmem:[%s20509_s14 + $0x1c8] sm:$0xff] %vm21621_vm11, %v13566_v36  ;;  %v13504_v25 = vadd.f32 %v13440_v46, %v13376_v22  ;;  %v13314_v60 = vadd.f32 %v20493_v48, %v13243_v34 }
 0x54a   : > { %13629 = vst.msk [vmem:[%s20509_s14 + $0x1c0] sm:$0xff] %vm21622_vm13, %v13565_v0  ;;  %v13503_v39 = vadd.f32 %v13439_v31, %v13375_v18  ;;  %v13313_v63 = vadd.f32 %v20493_v48, %v13242_v57  ;;  %v16233_v10 = vpop.f32.mrb[98].mxu1 }
 0x54b   : > { %v13568_v55 = vmax.f32 %v13504_v25, 0.0  ;;  %v13378_v21 = vmax.f32 %v13314_v60, 0.0  ;;  %v13245_v40 = vmul.f32 %v16233_v10, %v20488_v62  ;;  %v13166_v56 = vpop.f32.mrb[99].mxu1 }
 0x54c   : > { %v13567_v20 = vmax.f32 %v13503_v39, 0.0  ;;  %v13377_v13 = vmax.f32 %v13313_v63, 0.0  ;;  %v13244_v54 = vmul.f32 %v20488_v62, %v13166_v56 }
 0x54d   : > { %13632 = vst.msk [vmem:[%s20509_s14 + $0x1d8] sm:$0xff] %vm21623_vm10, %v13568_v55  ;;  %v13506_v47 = vadd.f32 %v13442_v50, %v13378_v21  ;;  %v13316_v35 = vadd.f32 %v20493_v48, %v13245_v40 }
 0x54e   : > { %13631 = vst.msk [vmem:[%s20509_s14 + $0x1d0] sm:$0xff] %vm21624_vm12, %v13567_v20  ;;  %v13505_v16 = vadd.f32 %v13441_v44, %v13377_v13  ;;  %v13315_v42 = vadd.f32 %v20493_v48, %v13244_v54 }
 0x54f   : > { %v13570_v58 = vmax.f32 %v13506_v47, 0.0  ;;  %v13380_v15 = vmax.f32 %v13316_v35, 0.0 }
 0x550   : > { %v13569_v2 = vmax.f32 %v13505_v16, 0.0  ;;  %v13379_v24 = vmax.f32 %v13315_v42, 0.0 }
 0x551   : > { %13634 = vst.msk [vmem:[%s20509_s14 + $0x1e8] sm:$0xff] %vm21625_vm15, %v13570_v58  ;;  %v13508_v62 = vadd.f32 %v13444_v8, %v13380_v15 }
 0x552   : > { %13633 = vst.msk [vmem:[%s20509_s14 + $0x1e0] sm:$0xff] %vm21626_vm2, %v13569_v2  ;;  %v13507_v45 = vadd.f32 %v13443_v59, %v13379_v24 }
 0x553   : > { %v13572_v28 = vmax.f32 %v13508_v62, 0.0 }
 0x554   : > { %v13571_v17 = vmax.f32 %v13507_v45, 0.0 }
 0x555   : > { %13636 = vst.msk [vmem:[%s20509_s14 + $0x1f8] sm:$0xff] %vm21627_vm4, %v13572_v28 }
 0x556   : > { %13635 = vst.msk [vmem:[%s20509_s14 + $0x1f0] sm:$0xff] %vm21628_vm14, %v13571_v17 }
 0x557 PF: > { %s20_s13 = sadd.s32 1, %s16311_s13  }
 0x558   : > { %p17_p4 = scmp.ge.s32.totalorder %s20_s13, 4  }
 0x55a   :  { %19 = sbr.rel (!%p17_p4) target bundleno = 1 (0x1), region = 90 }

</bundles_post_ra>
